<compile_context>
chip_gen: v7x
topology: tpu7x:2x2x1
jax: 0.10.0
libtpu: 0.0.40
codegen_flags: <defaults>
</compile_context>

<pallas_src>
import numpy as np
import jax
import jax.numpy as jnp
from jax import lax
from jax.experimental import pallas as pl
from jax.experimental.pallas import tpu as pltpu


# ----------------------------------------------------------------------------
# Static network description (matches ConvAutoencoder.__init__ / forward)
# ----------------------------------------------------------------------------
# (kind, k, cin, cout, mode)
_LAYERS = (
    [("conv", 5, 2, 32, "bn_relu"), ("conv", 5, 32, 64, "bn_relu"),
     ("conv", 5, 64, 64, "bn_relu")]
    + [("conv", 3, 64, 64, "bn_relu")] * 7
    + [("conv", 2, 64, 2, "none")]                      # conv11 -> latent z
    + [("convT", 2, 2, 64, "bn_relu")]
    + [("convT", 3, 64, 64, "bn_relu")] * 7
    + [("convT", 5, 64, 64, "bn_relu"), ("convT", 5, 64, 32, "bn_relu"),
       ("convT", 5, 32, 2, "tanh")]                     # convt11 -> tanh output
)
N_LAYERS = len(_LAYERS)        # 22
KMAX = 5
CMAX = 128                     # lane-dense channel dim (real channels <= 64, zero padded)
HP = WP = 32                   # padded spatial grid (pow2 -> bit-mask coords)
IMG = HP * WP                  # 1024 flat rows per image
GUARD = 136                    # zero guard rows (>= max tap overshoot 4*33=132), 8-aligned
TM = 256                       # row tile for the conv / epilogue loops (divides IMG)
BN_EPS = 1e-5


def _layer_geometry():
    geo, h = [], 28
    for (kind, k, cin, cout, mode) in _LAYERS:
        if kind == "conv":
            s, oh = 0, h - k + 1
        else:                                  # ConvTranspose2d(stride=1) == full conv
            s, oh = k - 1, h + k - 1
        geo.append(dict(kind=kind, k=k, s=s, oh=oh, cin=cin, cout=cout, mode=mode))
        h = oh
    return geo


_GEO = _layer_geometry()


# ----------------------------------------------------------------------------
# Parameters: raw PyTorch-layout init + one-time packing into kernel format
# ----------------------------------------------------------------------------
def init_params(key):
    params = []
    keys = jax.random.split(key, N_LAYERS)
    for kk, (kind, k, cin, cout, mode) in zip(keys, _LAYERS):
        kw, kb = jax.random.split(kk)
        bound = 1.0 / float(np.sqrt(cin * k * k))
        if kind == "conv":
            w = jax.random.uniform(kw, (cout, cin, k, k), jnp.float32, -bound, bound)
        else:  # ConvTranspose2d weight layout: (Cin, Cout, k, k)
            w = jax.random.uniform(kw, (cin, cout, k, k), jnp.float32, -bound, bound)
        b = jax.random.uniform(kb, (cout,), jnp.float32, -bound, bound)
        params.append(dict(w=w, b=b,
                           gamma=jnp.ones((cout,), jnp.float32),
                           beta=jnp.zeros((cout,), jnp.float32)))
    return params


def pack_params(params):
    """Hoisted weight prep (done once): flip/transpose/zero-pad, cast to bf16.

    wpack  : (N_LAYERS*25, 128, 128) bf16  -- per-tap (Cin, Cout) matrices
    affpack: (N_LAYERS*8, 128) f32         -- row0=gamma, row1=beta, row2=conv bias
    """
    wpack = np.zeros((N_LAYERS * KMAX * KMAX, CMAX, CMAX), np.float32)
    affpack = np.zeros((N_LAYERS * 8, CMAX), np.float32)
    for L, (geo, p) in enumerate(zip(_GEO, params)):
        k, cin, cout = geo["k"], geo["cin"], geo["cout"]
        w = np.asarray(p["w"], np.float32)
        for i in range(k):
            for j in range(k):
                if geo["kind"] == "conv":
                    tap = w[:, :, i, j].T                     # (cin, cout)
                else:
                    tap = w[:, :, k - 1 - i, k - 1 - j]       # flipped, (cin, cout)
                wpack[L * KMAX * KMAX + i * KMAX + j, :cin, :cout] = tap
        affpack[L * 8 + 0, :cout] = np.asarray(p["gamma"], np.float32)
        affpack[L * 8 + 1, :cout] = np.asarray(p["beta"], np.float32)
        affpack[L * 8 + 2, :cout] = np.asarray(p["b"], np.float32)
    return jnp.asarray(wpack, jnp.bfloat16), jnp.asarray(affpack, jnp.float32)


def _build_cfg(n):
    """Per-layer scalar config (SMEM prefetch): [k, s*(WP+1), oh, is_bn, count, 0,0,0]."""
    rows = []
    for geo in _GEO:
        rows.append([geo["k"], geo["s"] * (WP + 1), geo["oh"],
                     1 if geo["mode"] == "bn_relu" else 0,
                     n * geo["oh"] * geo["oh"], 0, 0, 0])
    return jnp.asarray(rows, jnp.int32)                  # (22, 8)


# ----------------------------------------------------------------------------
# The fused kernel: grid=(22,), one layer per grid step, activations in VMEM
# ----------------------------------------------------------------------------
def _make_forward(n):
    mg = n * IMG                   # rows of one activation slab (the 32x32 grid region)
    tot = mg + 2 * GUARD           # + zero guards; multiple of 8
    n_tiles = mg // TM             # IMG % TM == 0 -> always exact

    def kernel(cfg_ref, x_ref, w_ref, aff_ref, o_ref, act_ref, stat_ref):
        lid = pl.program_id(0)

        # Layer 0: zero the four guard bands once; input goes into slot 0 interior.
        @pl.when(lid == 0)
        def _():
            zg = jnp.zeros((GUARD, CMAX), jnp.float32)
            act_ref[0:GUARD, :] = zg
            act_ref[GUARD + mg:tot, :] = zg
            act_ref[tot:tot + GUARD, :] = zg
            act_ref[tot + GUARD + mg:2 * tot, :] = zg
            act_ref[GUARD:GUARD + mg, :] = x_ref[...]

        # Per-layer scalar configuration (SMEM).
        kval = cfg_ref[lid, 0]
        base_shift = cfg_ref[lid, 1]      # 0 for conv, (k-1)*33 for conv-transpose
        oh = cfg_ref[lid, 2]              # square output extent
        is_bn = cfg_ref[lid, 3]
        cnt = cfg_ref[lid, 4]             # N * oh * oh  (BatchNorm sample count)

        parity = lid % 2
        src_base = parity * tot           # slot this layer reads
        dst_base = (1 - parity) * tot     # slot this layer writes
        in_base = src_base + GUARD - base_shift
        out_base = dst_base + GUARD

        def valid_mask(row0):
            ridx = lax.broadcasted_iota(jnp.int32, (TM, CMAX), 0) + row0
            gx = jnp.bitwise_and(ridx, WP - 1)
            gy = jnp.bitwise_and(ridx >> 5, HP - 1)
            return jnp.maximum(gx, gy) < oh        # oh == ow for every layer here

        # ---- pass 1: conv / convT = k*k shifted matmuls, row-tiled, acc in vregs
        def conv_pass(kk):
            def tile_body(t, carry):
                ssum, ssq = carry
                row0 = t * TM
                acc = jnp.zeros((TM, CMAX), jnp.float32)
                for i in range(kk):                       # statically unrolled taps
                    for j in range(kk):
                        off = in_base + row0 + (i * WP + j)
                        patch = act_ref[pl.ds(off, TM), :].astype(jnp.bfloat16)
                        acc = acc + jnp.dot(patch, w_ref[i * KMAX + j],
                                            preferred_element_type=jnp.float32)
                yv = jnp.where(valid_mask(row0), acc, 0.0)
                dst = pl.multiple_of(out_base + row0, 8)
                act_ref[pl.ds(dst, TM), :] = yv           # single store per tile
                return (ssum + jnp.sum(yv, axis=0, keepdims=True),
                        ssq + jnp.sum(yv * yv, axis=0, keepdims=True))

            zero = jnp.zeros((1, CMAX), jnp.float32)
            ssum, ssq = lax.fori_loop(0, n_tiles, tile_body, (zero, zero))
            stat_ref[0:1, :] = ssum
            stat_ref[1:2, :] = ssq

        @pl.when(kval == 5)
        def _(): conv_pass(5)

        @pl.when(kval == 3)
        def _(): conv_pass(3)

        @pl.when(kval == 2)
        def _(): conv_pass(2)

        # ---- per-layer affine params: training-mode BatchNorm stats, or conv bias
        aff = aff_ref[pl.ds(pl.multiple_of(lid * 8, 8), 8), :]
        gamma, beta, cbias = aff[0:1, :], aff[1:2, :], aff[2:3, :]
        inv_cnt = 1.0 / cnt.astype(jnp.float32)
        mean = stat_ref[0:1, :] * inv_cnt
        var = jnp.maximum(stat_ref[1:2, :] * inv_cnt - mean * mean, 0.0)
        bn_scale = gamma * lax.rsqrt(var + BN_EPS)
        bn_shift = beta - mean * bn_scale       # conv bias cancelled by mean subtraction
        use_bn = is_bn > 0
        scale = jnp.where(use_bn, bn_scale, jnp.ones_like(bn_scale))
        shift = jnp.where(use_bn, bn_shift, cbias)
        relu_floor = jnp.where(use_bn, jnp.float32(0.0), jnp.float32(-jnp.inf))

        # ---- pass 2: fused affine + (scalar-floored) ReLU + re-mask, one tiled pass
        def affine_tile(t, _):
            row0 = t * TM
            dst = pl.multiple_of(out_base + row0, 8)
            y = act_ref[pl.ds(dst, TM), :] * scale + shift
            y = jnp.maximum(y, relu_floor)
            y = jnp.where(valid_mask(row0), y, 0.0)   # keep invalid grid region exactly 0
            act_ref[pl.ds(dst, TM), :] = y
            return 0

        lax.fori_loop(0, n_tiles, affine_tile, 0)

        # ---- final layer: tanh -> output block
        @pl.when(lid == N_LAYERS - 1)
        def _():
            def out_tile(t, _):
                row0 = pl.multiple_of(t * TM, 8)
                dst = pl.multiple_of(out_base + row0, 8)
                o_ref[pl.ds(row0, TM), :] = jnp.tanh(act_ref[pl.ds(dst, TM), :])
                return 0
            lax.fori_loop(0, n_tiles, out_tile, 0)

    grid_spec = pltpu.PrefetchScalarGridSpec(
        num_scalar_prefetch=1,
        grid=(N_LAYERS,),
        in_specs=[
            pl.BlockSpec((mg, CMAX), lambda L, cfg: (0, 0)),                    # input (loaded once)
            pl.BlockSpec((KMAX * KMAX, CMAX, CMAX), lambda L, cfg: (L, 0, 0)),  # per-layer taps
            pl.BlockSpec((N_LAYERS * 8, CMAX), lambda L, cfg: (0, 0)),          # gamma/beta/bias (once)
        ],
        out_specs=pl.BlockSpec((mg, CMAX), lambda L, cfg: (0, 0)),
        scratch_shapes=[
            pltpu.VMEM((2 * tot, CMAX), jnp.float32),   # ping-pong activation slabs + guards
            pltpu.VMEM((8, CMAX), jnp.float32),         # BN partial sums (sum, sumsq)
        ],
    )
    return pl.pallas_call(
        kernel,
        out_shape=jax.ShapeDtypeStruct((mg, CMAX), jnp.float32),
        grid_spec=grid_spec,
        compiler_params=pltpu.CompilerParams(
            dimension_semantics=("arbitrary",),        # strict layer-to-layer dependence
            vmem_limit_bytes=32 * 1024 * 1024,         # ~9 MB used; headroom, fits v7x 64 MiB
        ),
    )


# ----------------------------------------------------------------------------
# Full forward pass (encode -> decode), jitted
# ----------------------------------------------------------------------------
@jax.jit
def conv_autoencoder_forward(x, wpack, affpack):
    x = x.reshape(-1, 2, 28, 28).astype(jnp.float32)
    n = x.shape[0]
    xh = jnp.transpose(x, (0, 2, 3, 1))                                  # NHWC
    xh = jnp.pad(xh, ((0, 0), (0, HP - 28), (0, WP - 28), (0, CMAX - 2)))
    x2d = xh.reshape(n * IMG, CMAX)
    cfg = _build_cfg(n)
    out = _make_forward(n)(cfg, x2d, wpack, affpack)
    out = out.reshape(n, HP, WP, CMAX)[:, :28, :28, :2]
    out = jnp.transpose(out, (0, 3, 1, 2)).reshape(n, 2 * 28 * 28)
    return out


if __name__ == "__main__":
    key = jax.random.PRNGKey(0)
    pkey, xkey = jax.random.split(key)
    params = init_params(pkey)
    wpack, affpack = pack_params(params)     # one-time hoisted weight packing

    # batch=2, channels=2, spatial=28x28 (fixed by the module's internal view)
    x = jax.random.normal(xkey, (2, 2, 28, 28), dtype=jnp.float32)

    y = conv_autoencoder_forward(x, wpack, affpack)
    y = jax.block_until_ready(y)

    assert y.shape == (2, 2 * 28 * 28), y.shape
    assert bool(jnp.all(jnp.isfinite(y)))
    assert bool(jnp.all(jnp.abs(y) <= 1.0))          # tanh output range
    assert float(jnp.std(y)) > 0.0                   # not degenerate
    print("KERNEL_OK")
</pallas_src>

<mosaic_0001>
module attributes {stable_mosaic.version = 11 : i64} {
  func.func @kernel(%arg0: i32, %arg1: memref<22x8xi32, #tpu.memory_space<smem>>, %arg2: memref<2048x128xf32, #tpu.memory_space<vmem>>, %arg3: memref<25x128x128xbf16, #tpu.memory_space<vmem>>, %arg4: memref<176x128xf32, #tpu.memory_space<vmem>>, %arg5: memref<2048x128xf32, #tpu.memory_space<vmem>>, %arg6: memref<4640x128xf32, #tpu.memory_space<vmem>>, %arg7: memref<8x128xf32, #tpu.memory_space<vmem>>) attributes {dimension_semantics = [#tpu.dimension_semantics<arbitrary>], iteration_bounds = array<i64: 22>, scalar_prefetch = 1 : i64, scratch_operands = 2 : i64, tpu.core_type = #tpu.core_type<tc>, window_params = [{pipeline_mode = #tpu.pipeline_mode<synchronous>, transform_indices = @transform_0, window_bounds = array<i64: 2048, 128>}, {transform_indices = @transform_1, window_bounds = array<i64: 25, 128, 128>}, {pipeline_mode = #tpu.pipeline_mode<synchronous>, transform_indices = @transform_2, window_bounds = array<i64: 176, 128>}, {pipeline_mode = #tpu.pipeline_mode<synchronous>, transform_indices = @transform_3, window_bounds = array<i64: 2048, 128>}]} {
    %c0_i32 = arith.constant 0 : i32
    %0 = arith.cmpi eq, %arg0, %c0_i32 : i32
    %1 = arith.extui %0 : i1 to i32
    %c0_i32_0 = arith.constant 0 : i32
    %2 = arith.cmpi ne, %1, %c0_i32_0 : i32
    scf.if %2 {
      %cst_28 = arith.constant 0.000000e+00 : f32
      %72 = vector.broadcast %cst_28 : f32 to vector<136x128xf32>
      %c0_29 = arith.constant 0 : index
      %c0_30 = arith.constant 0 : index
      %73 = vector.load %arg6[%c0_29, %c0_30] : memref<4640x128xf32, #tpu.memory_space<vmem>>, vector<136x128xf32>
      tpu.vector_store %arg6[%c0_29, %c0_30], %72 {strides = array<i32>} : memref<4640x128xf32, #tpu.memory_space<vmem>>, vector<136x128xf32>,
      %c2184 = arith.constant 2184 : index
      %c0_31 = arith.constant 0 : index
      %74 = vector.load %arg6[%c2184, %c0_31] : memref<4640x128xf32, #tpu.memory_space<vmem>>, vector<136x128xf32>
      tpu.vector_store %arg6[%c2184, %c0_31], %72 {strides = array<i32>} : memref<4640x128xf32, #tpu.memory_space<vmem>>, vector<136x128xf32>,
      %c2320 = arith.constant 2320 : index
      %c0_32 = arith.constant 0 : index
      %75 = vector.load %arg6[%c2320, %c0_32] : memref<4640x128xf32, #tpu.memory_space<vmem>>, vector<136x128xf32>
      tpu.vector_store %arg6[%c2320, %c0_32], %72 {strides = array<i32>} : memref<4640x128xf32, #tpu.memory_space<vmem>>, vector<136x128xf32>,
      %c4504 = arith.constant 4504 : index
      %c0_33 = arith.constant 0 : index
      %76 = vector.load %arg6[%c4504, %c0_33] : memref<4640x128xf32, #tpu.memory_space<vmem>>, vector<136x128xf32>
      tpu.vector_store %arg6[%c4504, %c0_33], %72 {strides = array<i32>} : memref<4640x128xf32, #tpu.memory_space<vmem>>, vector<136x128xf32>,
      %c0_34 = arith.constant 0 : index
      %c0_35 = arith.constant 0 : index
      %77 = vector.load %arg2[%c0_34, %c0_35] : memref<2048x128xf32, #tpu.memory_space<vmem>>, vector<2048x128xf32>
      %c136 = arith.constant 136 : index
      %c0_36 = arith.constant 0 : index
      %78 = vector.load %arg6[%c136, %c0_36] : memref<4640x128xf32, #tpu.memory_space<vmem>>, vector<2048x128xf32>
      tpu.vector_store %arg6[%c136, %c0_36], %77 {strides = array<i32>} : memref<4640x128xf32, #tpu.memory_space<vmem>>, vector<2048x128xf32>,
    } else {
    }
    %3 = arith.index_cast %arg0 : i32 to index
    %c0 = arith.constant 0 : index
    %4 = memref.load %arg1[%3, %c0] : memref<22x8xi32, #tpu.memory_space<smem>>
    %5 = arith.index_cast %arg0 : i32 to index
    %c1 = arith.constant 1 : index
    %6 = memref.load %arg1[%5, %c1] : memref<22x8xi32, #tpu.memory_space<smem>>
    %7 = arith.index_cast %arg0 : i32 to index
    %c2 = arith.constant 2 : index
    %8 = memref.load %arg1[%7, %c2] : memref<22x8xi32, #tpu.memory_space<smem>>
    %9 = arith.index_cast %arg0 : i32 to index
    %c3 = arith.constant 3 : index
    %10 = memref.load %arg1[%9, %c3] : memref<22x8xi32, #tpu.memory_space<smem>>
    %11 = arith.index_cast %arg0 : i32 to index
    %c4 = arith.constant 4 : index
    %12 = memref.load %arg1[%11, %c4] : memref<22x8xi32, #tpu.memory_space<smem>>
    %c2_i32 = arith.constant 2 : i32
    %c0_i32_1 = arith.constant 0 : i32
    %13 = arith.cmpi eq, %c2_i32, %c0_i32_1 : i32
    %c1_i32 = arith.constant 1 : i32
    %14 = arith.select %13, %c1_i32, %c2_i32 : i32
    %15 = arith.remsi %arg0, %14 : i32
    %c0_i32_2 = arith.constant 0 : i32
    %16 = arith.cmpi ne, %15, %c0_i32_2 : i32
    %c0_i32_3 = arith.constant 0 : i32
    %17 = arith.cmpi slt, %15, %c0_i32_3 : i32
    %c0_i32_4 = arith.constant 0 : i32
    %18 = arith.cmpi slt, %14, %c0_i32_4 : i32
    %19 = arith.xori %17, %18 : i1
    %20 = arith.andi %19, %16 : i1
    %21 = arith.addi %15, %14 : i32
    %22 = arith.select %20, %21, %15 : i32
    %c2320_i32 = arith.constant 2320 : i32
    %23 = arith.muli %22, %c2320_i32 : i32
    %c1_i32_5 = arith.constant 1 : i32
    %24 = arith.subi %c1_i32_5, %22 : i32
    %c2320_i32_6 = arith.constant 2320 : i32
    %25 = arith.muli %24, %c2320_i32_6 : i32
    %c136_i32 = arith.constant 136 : i32
    %26 = arith.addi %23, %c136_i32 : i32
    %27 = arith.subi %26, %6 : i32
    %c136_i32_7 = arith.constant 136 : i32
    %28 = arith.addi %25, %c136_i32_7 : i32
    %c5_i32 = arith.constant 5 : i32
    %29 = arith.cmpi eq, %4, %c5_i32 : i32
    %30 = arith.extui %29 : i1 to i32
    %c0_i32_8 = arith.constant 0 : i32
    %31 = arith.cmpi ne, %30, %c0_i32_8 : i32
    scf.if %31 {
      %cst_28 = arith.constant 0.000000e+00 : f32
      %72 = vector.broadcast %cst_28 : f32 to vector<1x128xf32>
      %c0_i32_29 = arith.constant 0 : i32
      %c8_i32_30 = arith.constant 8 : i32
      %73 = arith.addi %c0_i32_29, %c8_i32_30 : i32
      %c1_i32_31 = arith.constant 1 : i32
      %74:2 = scf.for %arg8 = %c0_i32_29 to %73 step %c1_i32_31 iter_args(%arg9 = %72, %arg10 = %72) -> (vector<1x128xf32>, vector<1x128xf32>)  : i32 {
        %c256_i32 = arith.constant 256 : i32
        %77 = arith.muli %arg8, %c256_i32 : i32
        %cst_37 = arith.constant 0.000000e+00 : f32
        %78 = vector.broadcast %cst_37 : f32 to vector<256x128xf32>
        %79 = arith.addi %27, %77 : i32
        %c0_i32_38 = arith.constant 0 : i32
        %80 = arith.addi %79, %c0_i32_38 : i32
        %81 = arith.index_cast %80 : i32 to index
        %c0_39 = arith.constant 0 : index
        %82 = vector.load %arg6[%81, %c0_39] : memref<4640x128xf32, #tpu.memory_space<vmem>>, vector<256x128xf32>
        %83 = arith.truncf %82 : vector<256x128xf32> to vector<256x128xbf16>
        %c0_40 = arith.constant 0 : index
        %c0_41 = arith.constant 0 : index
        %c0_42 = arith.constant 0 : index
        %84 = vector.load %arg3[%c0_40, %c0_41, %c0_42] : memref<25x128x128xbf16, #tpu.memory_space<vmem>>, vector<1x128x128xbf16>
        %85 = vector.shape_cast %84 : vector<1x128x128xbf16> to vector<128x128xbf16>
        %cst_43 = arith.constant dense<0.000000e+00> : vector<256x128xf32>
        %86 = tpu.matmul %83, %85, %cst_43 {dimension_numbers = #tpu.dot_dimension_numbers<[1], [0], [0], [1], [0, 0, 1, 1], [], []>} : vector<256x128xbf16>, vector<128x128xbf16>, vector<256x128xf32> -> vector<256x128xf32>
        %87 = arith.addf %78, %86 : vector<256x128xf32>
        %88 = arith.addi %27, %77 : i32
        %c1_i32_44 = arith.constant 1 : i32
        %89 = arith.addi %88, %c1_i32_44 : i32
        %90 = arith.index_cast %89 : i32 to index
        %c0_45 = arith.constant 0 : index
        %91 = vector.load %arg6[%90, %c0_45] : memref<4640x128xf32, #tpu.memory_space<vmem>>, vector<256x128xf32>
        %92 = arith.truncf %91 : vector<256x128xf32> to vector<256x128xbf16>
        %c1_46 = arith.constant 1 : index
        %c0_47 = arith.constant 0 : index
        %c0_48 = arith.constant 0 : index
        %93 = vector.load %arg3[%c1_46, %c0_47, %c0_48] : memref<25x128x128xbf16, #tpu.memory_space<vmem>>, vector<1x128x128xbf16>
        %94 = vector.shape_cast %93 : vector<1x128x128xbf16> to vector<128x128xbf16>
        %cst_49 = arith.constant dense<0.000000e+00> : vector<256x128xf32>
        %95 = tpu.matmul %92, %94, %cst_49 {dimension_numbers = #tpu.dot_dimension_numbers<[1], [0], [0], [1], [0, 0, 1, 1], [], []>} : vector<256x128xbf16>, vector<128x128xbf16>, vector<256x128xf32> -> vector<256x128xf32>
        %96 = arith.addf %87, %95 : vector<256x128xf32>
        %97 = arith.addi %27, %77 : i32
        %c2_i32_50 = arith.constant 2 : i32
        %98 = arith.addi %97, %c2_i32_50 : i32
        %99 = arith.index_cast %98 : i32 to index
        %c0_51 = arith.constant 0 : index
        %100 = vector.load %arg6[%99, %c0_51] : memref<4640x128xf32, #tpu.memory_space<vmem>>, vector<256x128xf32>
        %101 = arith.truncf %100 : vector<256x128xf32> to vector<256x128xbf16>
        %c2_52 = arith.constant 2 : index
        %c0_53 = arith.constant 0 : index
        %c0_54 = arith.constant 0 : index
        %102 = vector.load %arg3[%c2_52, %c0_53, %c0_54] : memref<25x128x128xbf16, #tpu.memory_space<vmem>>, vector<1x128x128xbf16>
        %103 = vector.shape_cast %102 : vector<1x128x128xbf16> to vector<128x128xbf16>
        %cst_55 = arith.constant dense<0.000000e+00> : vector<256x128xf32>
        %104 = tpu.matmul %101, %103, %cst_55 {dimension_numbers = #tpu.dot_dimension_numbers<[1], [0], [0], [1], [0, 0, 1, 1], [], []>} : vector<256x128xbf16>, vector<128x128xbf16>, vector<256x128xf32> -> vector<256x128xf32>
        %105 = arith.addf %96, %104 : vector<256x128xf32>
        %106 = arith.addi %27, %77 : i32
        %c3_i32_56 = arith.constant 3 : i32
        %107 = arith.addi %106, %c3_i32_56 : i32
        %108 = arith.index_cast %107 : i32 to index
        %c0_57 = arith.constant 0 : index
        %109 = vector.load %arg6[%108, %c0_57] : memref<4640x128xf32, #tpu.memory_space<vmem>>, vector<256x128xf32>
        %110 = arith.truncf %109 : vector<256x128xf32> to vector<256x128xbf16>
        %c3_58 = arith.constant 3 : index
        %c0_59 = arith.constant 0 : index
        %c0_60 = arith.constant 0 : index
        %111 = vector.load %arg3[%c3_58, %c0_59, %c0_60] : memref<25x128x128xbf16, #tpu.memory_space<vmem>>, vector<1x128x128xbf16>
        %112 = vector.shape_cast %111 : vector<1x128x128xbf16> to vector<128x128xbf16>
        %cst_61 = arith.constant dense<0.000000e+00> : vector<256x128xf32>
        %113 = tpu.matmul %110, %112, %cst_61 {dimension_numbers = #tpu.dot_dimension_numbers<[1], [0], [0], [1], [0, 0, 1, 1], [], []>} : vector<256x128xbf16>, vector<128x128xbf16>, vector<256x128xf32> -> vector<256x128xf32>
        %114 = arith.addf %105, %113 : vector<256x128xf32>
        %115 = arith.addi %27, %77 : i32
        %c4_i32 = arith.constant 4 : i32
        %116 = arith.addi %115, %c4_i32 : i32
        %117 = arith.index_cast %116 : i32 to index
        %c0_62 = arith.constant 0 : index
        %118 = vector.load %arg6[%117, %c0_62] : memref<4640x128xf32, #tpu.memory_space<vmem>>, vector<256x128xf32>
        %119 = arith.truncf %118 : vector<256x128xf32> to vector<256x128xbf16>
        %c4_63 = arith.constant 4 : index
        %c0_64 = arith.constant 0 : index
        %c0_65 = arith.constant 0 : index
        %120 = vector.load %arg3[%c4_63, %c0_64, %c0_65] : memref<25x128x128xbf16, #tpu.memory_space<vmem>>, vector<1x128x128xbf16>
        %121 = vector.shape_cast %120 : vector<1x128x128xbf16> to vector<128x128xbf16>
        %cst_66 = arith.constant dense<0.000000e+00> : vector<256x128xf32>
        %122 = tpu.matmul %119, %121, %cst_66 {dimension_numbers = #tpu.dot_dimension_numbers<[1], [0], [0], [1], [0, 0, 1, 1], [], []>} : vector<256x128xbf16>, vector<128x128xbf16>, vector<256x128xf32> -> vector<256x128xf32>
        %123 = arith.addf %114, %122 : vector<256x128xf32>
        %124 = arith.addi %27, %77 : i32
        %c32_i32 = arith.constant 32 : i32
        %125 = arith.addi %124, %c32_i32 : i32
        %126 = arith.index_cast %125 : i32 to index
        %c0_67 = arith.constant 0 : index
        %127 = vector.load %arg6[%126, %c0_67] : memref<4640x128xf32, #tpu.memory_space<vmem>>, vector<256x128xf32>
        %128 = arith.truncf %127 : vector<256x128xf32> to vector<256x128xbf16>
        %c5 = arith.constant 5 : index
        %c0_68 = arith.constant 0 : index
        %c0_69 = arith.constant 0 : index
        %129 = vector.load %arg3[%c5, %c0_68, %c0_69] : memref<25x128x128xbf16, #tpu.memory_space<vmem>>, vector<1x128x128xbf16>
        %130 = vector.shape_cast %129 : vector<1x128x128xbf16> to vector<128x128xbf16>
        %cst_70 = arith.constant dense<0.000000e+00> : vector<256x128xf32>
        %131 = tpu.matmul %128, %130, %cst_70 {dimension_numbers = #tpu.dot_dimension_numbers<[1], [0], [0], [1], [0, 0, 1, 1], [], []>} : vector<256x128xbf16>, vector<128x128xbf16>, vector<256x128xf32> -> vector<256x128xf32>
        %132 = arith.addf %123, %131 : vector<256x128xf32>
        %133 = arith.addi %27, %77 : i32
        %c33_i32 = arith.constant 33 : i32
        %134 = arith.addi %133, %c33_i32 : i32
        %135 = arith.index_cast %134 : i32 to index
        %c0_71 = arith.constant 0 : index
        %136 = vector.load %arg6[%135, %c0_71] : memref<4640x128xf32, #tpu.memory_space<vmem>>, vector<256x128xf32>
        %137 = arith.truncf %136 : vector<256x128xf32> to vector<256x128xbf16>
        %c6 = arith.constant 6 : index
        %c0_72 = arith.constant 0 : index
        %c0_73 = arith.constant 0 : index
        %138 = vector.load %arg3[%c6, %c0_72, %c0_73] : memref<25x128x128xbf16, #tpu.memory_space<vmem>>, vector<1x128x128xbf16>
        %139 = vector.shape_cast %138 : vector<1x128x128xbf16> to vector<128x128xbf16>
        %cst_74 = arith.constant dense<0.000000e+00> : vector<256x128xf32>
        %140 = tpu.matmul %137, %139, %cst_74 {dimension_numbers = #tpu.dot_dimension_numbers<[1], [0], [0], [1], [0, 0, 1, 1], [], []>} : vector<256x128xbf16>, vector<128x128xbf16>, vector<256x128xf32> -> vector<256x128xf32>
        %141 = arith.addf %132, %140 : vector<256x128xf32>
        %142 = arith.addi %27, %77 : i32
        %c34_i32 = arith.constant 34 : i32
        %143 = arith.addi %142, %c34_i32 : i32
        %144 = arith.index_cast %143 : i32 to index
        %c0_75 = arith.constant 0 : index
        %145 = vector.load %arg6[%144, %c0_75] : memref<4640x128xf32, #tpu.memory_space<vmem>>, vector<256x128xf32>
        %146 = arith.truncf %145 : vector<256x128xf32> to vector<256x128xbf16>
        %c7 = arith.constant 7 : index
        %c0_76 = arith.constant 0 : index
        %c0_77 = arith.constant 0 : index
        %147 = vector.load %arg3[%c7, %c0_76, %c0_77] : memref<25x128x128xbf16, #tpu.memory_space<vmem>>, vector<1x128x128xbf16>
        %148 = vector.shape_cast %147 : vector<1x128x128xbf16> to vector<128x128xbf16>
        %cst_78 = arith.constant dense<0.000000e+00> : vector<256x128xf32>
        %149 = tpu.matmul %146, %148, %cst_78 {dimension_numbers = #tpu.dot_dimension_numbers<[1], [0], [0], [1], [0, 0, 1, 1], [], []>} : vector<256x128xbf16>, vector<128x128xbf16>, vector<256x128xf32> -> vector<256x128xf32>
        %150 = arith.addf %141, %149 : vector<256x128xf32>
        %151 = arith.addi %27, %77 : i32
        %c35_i32 = arith.constant 35 : i32
        %152 = arith.addi %151, %c35_i32 : i32
        %153 = arith.index_cast %152 : i32 to index
        %c0_79 = arith.constant 0 : index
        %154 = vector.load %arg6[%153, %c0_79] : memref<4640x128xf32, #tpu.memory_space<vmem>>, vector<256x128xf32>
        %155 = arith.truncf %154 : vector<256x128xf32> to vector<256x128xbf16>
        %c8 = arith.constant 8 : index
        %c0_80 = arith.constant 0 : index
        %c0_81 = arith.constant 0 : index
        %156 = vector.load %arg3[%c8, %c0_80, %c0_81] : memref<25x128x128xbf16, #tpu.memory_space<vmem>>, vector<1x128x128xbf16>
        %157 = vector.shape_cast %156 : vector<1x128x128xbf16> to vector<128x128xbf16>
        %cst_82 = arith.constant dense<0.000000e+00> : vector<256x128xf32>
        %158 = tpu.matmul %155, %157, %cst_82 {dimension_numbers = #tpu.dot_dimension_numbers<[1], [0], [0], [1], [0, 0, 1, 1], [], []>} : vector<256x128xbf16>, vector<128x128xbf16>, vector<256x128xf32> -> vector<256x128xf32>
        %159 = arith.addf %150, %158 : vector<256x128xf32>
        %160 = arith.addi %27, %77 : i32
        %c36_i32 = arith.constant 36 : i32
        %161 = arith.addi %160, %c36_i32 : i32
        %162 = arith.index_cast %161 : i32 to index
        %c0_83 = arith.constant 0 : index
        %163 = vector.load %arg6[%162, %c0_83] : memref<4640x128xf32, #tpu.memory_space<vmem>>, vector<256x128xf32>
        %164 = arith.truncf %163 : vector<256x128xf32> to vector<256x128xbf16>
        %c9 = arith.constant 9 : index
        %c0_84 = arith.constant 0 : index
        %c0_85 = arith.constant 0 : index
        %165 = vector.load %arg3[%c9, %c0_84, %c0_85] : memref<25x128x128xbf16, #tpu.memory_space<vmem>>, vector<1x128x128xbf16>
        %166 = vector.shape_cast %165 : vector<1x128x128xbf16> to vector<128x128xbf16>
        %cst_86 = arith.constant dense<0.000000e+00> : vector<256x128xf32>
        %167 = tpu.matmul %164, %166, %cst_86 {dimension_numbers = #tpu.dot_dimension_numbers<[1], [0], [0], [1], [0, 0, 1, 1], [], []>} : vector<256x128xbf16>, vector<128x128xbf16>, vector<256x128xf32> -> vector<256x128xf32>
        %168 = arith.addf %159, %167 : vector<256x128xf32>
        %169 = arith.addi %27, %77 : i32
        %c64_i32 = arith.constant 64 : i32
        %170 = arith.addi %169, %c64_i32 : i32
        %171 = arith.index_cast %170 : i32 to index
        %c0_87 = arith.constant 0 : index
        %172 = vector.load %arg6[%171, %c0_87] : memref<4640x128xf32, #tpu.memory_space<vmem>>, vector<256x128xf32>
        %173 = arith.truncf %172 : vector<256x128xf32> to vector<256x128xbf16>
        %c10 = arith.constant 10 : index
        %c0_88 = arith.constant 0 : index
        %c0_89 = arith.constant 0 : index
        %174 = vector.load %arg3[%c10, %c0_88, %c0_89] : memref<25x128x128xbf16, #tpu.memory_space<vmem>>, vector<1x128x128xbf16>
        %175 = vector.shape_cast %174 : vector<1x128x128xbf16> to vector<128x128xbf16>
        %cst_90 = arith.constant dense<0.000000e+00> : vector<256x128xf32>
        %176 = tpu.matmul %173, %175, %cst_90 {dimension_numbers = #tpu.dot_dimension_numbers<[1], [0], [0], [1], [0, 0, 1, 1], [], []>} : vector<256x128xbf16>, vector<128x128xbf16>, vector<256x128xf32> -> vector<256x128xf32>
        %177 = arith.addf %168, %176 : vector<256x128xf32>
        %178 = arith.addi %27, %77 : i32
        %c65_i32 = arith.constant 65 : i32
        %179 = arith.addi %178, %c65_i32 : i32
        %180 = arith.index_cast %179 : i32 to index
        %c0_91 = arith.constant 0 : index
        %181 = vector.load %arg6[%180, %c0_91] : memref<4640x128xf32, #tpu.memory_space<vmem>>, vector<256x128xf32>
        %182 = arith.truncf %181 : vector<256x128xf32> to vector<256x128xbf16>
        %c11 = arith.constant 11 : index
        %c0_92 = arith.constant 0 : index
        %c0_93 = arith.constant 0 : index
        %183 = vector.load %arg3[%c11, %c0_92, %c0_93] : memref<25x128x128xbf16, #tpu.memory_space<vmem>>, vector<1x128x128xbf16>
        %184 = vector.shape_cast %183 : vector<1x128x128xbf16> to vector<128x128xbf16>
        %cst_94 = arith.constant dense<0.000000e+00> : vector<256x128xf32>
        %185 = tpu.matmul %182, %184, %cst_94 {dimension_numbers = #tpu.dot_dimension_numbers<[1], [0], [0], [1], [0, 0, 1, 1], [], []>} : vector<256x128xbf16>, vector<128x128xbf16>, vector<256x128xf32> -> vector<256x128xf32>
        %186 = arith.addf %177, %185 : vector<256x128xf32>
        %187 = arith.addi %27, %77 : i32
        %c66_i32 = arith.constant 66 : i32
        %188 = arith.addi %187, %c66_i32 : i32
        %189 = arith.index_cast %188 : i32 to index
        %c0_95 = arith.constant 0 : index
        %190 = vector.load %arg6[%189, %c0_95] : memref<4640x128xf32, #tpu.memory_space<vmem>>, vector<256x128xf32>
        %191 = arith.truncf %190 : vector<256x128xf32> to vector<256x128xbf16>
        %c12 = arith.constant 12 : index
        %c0_96 = arith.constant 0 : index
        %c0_97 = arith.constant 0 : index
        %192 = vector.load %arg3[%c12, %c0_96, %c0_97] : memref<25x128x128xbf16, #tpu.memory_space<vmem>>, vector<1x128x128xbf16>
        %193 = vector.shape_cast %192 : vector<1x128x128xbf16> to vector<128x128xbf16>
        %cst_98 = arith.constant dense<0.000000e+00> : vector<256x128xf32>
        %194 = tpu.matmul %191, %193, %cst_98 {dimension_numbers = #tpu.dot_dimension_numbers<[1], [0], [0], [1], [0, 0, 1, 1], [], []>} : vector<256x128xbf16>, vector<128x128xbf16>, vector<256x128xf32> -> vector<256x128xf32>
        %195 = arith.addf %186, %194 : vector<256x128xf32>
        %196 = arith.addi %27, %77 : i32
        %c67_i32 = arith.constant 67 : i32
        %197 = arith.addi %196, %c67_i32 : i32
        %198 = arith.index_cast %197 : i32 to index
        %c0_99 = arith.constant 0 : index
        %199 = vector.load %arg6[%198, %c0_99] : memref<4640x128xf32, #tpu.memory_space<vmem>>, vector<256x128xf32>
        %200 = arith.truncf %199 : vector<256x128xf32> to vector<256x128xbf16>
        %c13 = arith.constant 13 : index
        %c0_100 = arith.constant 0 : index
        %c0_101 = arith.constant 0 : index
        %201 = vector.load %arg3[%c13, %c0_100, %c0_101] : memref<25x128x128xbf16, #tpu.memory_space<vmem>>, vector<1x128x128xbf16>
        %202 = vector.shape_cast %201 : vector<1x128x128xbf16> to vector<128x128xbf16>
        %cst_102 = arith.constant dense<0.000000e+00> : vector<256x128xf32>
        %203 = tpu.matmul %200, %202, %cst_102 {dimension_numbers = #tpu.dot_dimension_numbers<[1], [0], [0], [1], [0, 0, 1, 1], [], []>} : vector<256x128xbf16>, vector<128x128xbf16>, vector<256x128xf32> -> vector<256x128xf32>
        %204 = arith.addf %195, %203 : vector<256x128xf32>
        %205 = arith.addi %27, %77 : i32
        %c68_i32 = arith.constant 68 : i32
        %206 = arith.addi %205, %c68_i32 : i32
        %207 = arith.index_cast %206 : i32 to index
        %c0_103 = arith.constant 0 : index
        %208 = vector.load %arg6[%207, %c0_103] : memref<4640x128xf32, #tpu.memory_space<vmem>>, vector<256x128xf32>
        %209 = arith.truncf %208 : vector<256x128xf32> to vector<256x128xbf16>
        %c14 = arith.constant 14 : index
        %c0_104 = arith.constant 0 : index
        %c0_105 = arith.constant 0 : index
        %210 = vector.load %arg3[%c14, %c0_104, %c0_105] : memref<25x128x128xbf16, #tpu.memory_space<vmem>>, vector<1x128x128xbf16>
        %211 = vector.shape_cast %210 : vector<1x128x128xbf16> to vector<128x128xbf16>
        %cst_106 = arith.constant dense<0.000000e+00> : vector<256x128xf32>
        %212 = tpu.matmul %209, %211, %cst_106 {dimension_numbers = #tpu.dot_dimension_numbers<[1], [0], [0], [1], [0, 0, 1, 1], [], []>} : vector<256x128xbf16>, vector<128x128xbf16>, vector<256x128xf32> -> vector<256x128xf32>
        %213 = arith.addf %204, %212 : vector<256x128xf32>
        %214 = arith.addi %27, %77 : i32
        %c96_i32 = arith.constant 96 : i32
        %215 = arith.addi %214, %c96_i32 : i32
        %216 = arith.index_cast %215 : i32 to index
        %c0_107 = arith.constant 0 : index
        %217 = vector.load %arg6[%216, %c0_107] : memref<4640x128xf32, #tpu.memory_space<vmem>>, vector<256x128xf32>
        %218 = arith.truncf %217 : vector<256x128xf32> to vector<256x128xbf16>
        %c15 = arith.constant 15 : index
        %c0_108 = arith.constant 0 : index
        %c0_109 = arith.constant 0 : index
        %219 = vector.load %arg3[%c15, %c0_108, %c0_109] : memref<25x128x128xbf16, #tpu.memory_space<vmem>>, vector<1x128x128xbf16>
        %220 = vector.shape_cast %219 : vector<1x128x128xbf16> to vector<128x128xbf16>
        %cst_110 = arith.constant dense<0.000000e+00> : vector<256x128xf32>
        %221 = tpu.matmul %218, %220, %cst_110 {dimension_numbers = #tpu.dot_dimension_numbers<[1], [0], [0], [1], [0, 0, 1, 1], [], []>} : vector<256x128xbf16>, vector<128x128xbf16>, vector<256x128xf32> -> vector<256x128xf32>
        %222 = arith.addf %213, %221 : vector<256x128xf32>
        %223 = arith.addi %27, %77 : i32
        %c97_i32 = arith.constant 97 : i32
        %224 = arith.addi %223, %c97_i32 : i32
        %225 = arith.index_cast %224 : i32 to index
        %c0_111 = arith.constant 0 : index
        %226 = vector.load %arg6[%225, %c0_111] : memref<4640x128xf32, #tpu.memory_space<vmem>>, vector<256x128xf32>
        %227 = arith.truncf %226 : vector<256x128xf32> to vector<256x128xbf16>
        %c16 = arith.constant 16 : index
        %c0_112 = arith.constant 0 : index
        %c0_113 = arith.constant 0 : index
        %228 = vector.load %arg3[%c16, %c0_112, %c0_113] : memref<25x128x128xbf16, #tpu.memory_space<vmem>>, vector<1x128x128xbf16>
        %229 = vector.shape_cast %228 : vector<1x128x128xbf16> to vector<128x128xbf16>
        %cst_114 = arith.constant dense<0.000000e+00> : vector<256x128xf32>
        %230 = tpu.matmul %227, %229, %cst_114 {dimension_numbers = #tpu.dot_dimension_numbers<[1], [0], [0], [1], [0, 0, 1, 1], [], []>} : vector<256x128xbf16>, vector<128x128xbf16>, vector<256x128xf32> -> vector<256x128xf32>
        %231 = arith.addf %222, %230 : vector<256x128xf32>
        %232 = arith.addi %27, %77 : i32
        %c98_i32 = arith.constant 98 : i32
        %233 = arith.addi %232, %c98_i32 : i32
        %234 = arith.index_cast %233 : i32 to index
        %c0_115 = arith.constant 0 : index
        %235 = vector.load %arg6[%234, %c0_115] : memref<4640x128xf32, #tpu.memory_space<vmem>>, vector<256x128xf32>
        %236 = arith.truncf %235 : vector<256x128xf32> to vector<256x128xbf16>
        %c17 = arith.constant 17 : index
        %c0_116 = arith.constant 0 : index
        %c0_117 = arith.constant 0 : index
        %237 = vector.load %arg3[%c17, %c0_116, %c0_117] : memref<25x128x128xbf16, #tpu.memory_space<vmem>>, vector<1x128x128xbf16>
        %238 = vector.shape_cast %237 : vector<1x128x128xbf16> to vector<128x128xbf16>
        %cst_118 = arith.constant dense<0.000000e+00> : vector<256x128xf32>
        %239 = tpu.matmul %236, %238, %cst_118 {dimension_numbers = #tpu.dot_dimension_numbers<[1], [0], [0], [1], [0, 0, 1, 1], [], []>} : vector<256x128xbf16>, vector<128x128xbf16>, vector<256x128xf32> -> vector<256x128xf32>
        %240 = arith.addf %231, %239 : vector<256x128xf32>
        %241 = arith.addi %27, %77 : i32
        %c99_i32 = arith.constant 99 : i32
        %242 = arith.addi %241, %c99_i32 : i32
        %243 = arith.index_cast %242 : i32 to index
        %c0_119 = arith.constant 0 : index
        %244 = vector.load %arg6[%243, %c0_119] : memref<4640x128xf32, #tpu.memory_space<vmem>>, vector<256x128xf32>
        %245 = arith.truncf %244 : vector<256x128xf32> to vector<256x128xbf16>
        %c18 = arith.constant 18 : index
        %c0_120 = arith.constant 0 : index
        %c0_121 = arith.constant 0 : index
        %246 = vector.load %arg3[%c18, %c0_120, %c0_121] : memref<25x128x128xbf16, #tpu.memory_space<vmem>>, vector<1x128x128xbf16>
        %247 = vector.shape_cast %246 : vector<1x128x128xbf16> to vector<128x128xbf16>
        %cst_122 = arith.constant dense<0.000000e+00> : vector<256x128xf32>
        %248 = tpu.matmul %245, %247, %cst_122 {dimension_numbers = #tpu.dot_dimension_numbers<[1], [0], [0], [1], [0, 0, 1, 1], [], []>} : vector<256x128xbf16>, vector<128x128xbf16>, vector<256x128xf32> -> vector<256x128xf32>
        %249 = arith.addf %240, %248 : vector<256x128xf32>
        %250 = arith.addi %27, %77 : i32
        %c100_i32 = arith.constant 100 : i32
        %251 = arith.addi %250, %c100_i32 : i32
        %252 = arith.index_cast %251 : i32 to index
        %c0_123 = arith.constant 0 : index
        %253 = vector.load %arg6[%252, %c0_123] : memref<4640x128xf32, #tpu.memory_space<vmem>>, vector<256x128xf32>
        %254 = arith.truncf %253 : vector<256x128xf32> to vector<256x128xbf16>
        %c19 = arith.constant 19 : index
        %c0_124 = arith.constant 0 : index
        %c0_125 = arith.constant 0 : index
        %255 = vector.load %arg3[%c19, %c0_124, %c0_125] : memref<25x128x128xbf16, #tpu.memory_space<vmem>>, vector<1x128x128xbf16>
        %256 = vector.shape_cast %255 : vector<1x128x128xbf16> to vector<128x128xbf16>
        %cst_126 = arith.constant dense<0.000000e+00> : vector<256x128xf32>
        %257 = tpu.matmul %254, %256, %cst_126 {dimension_numbers = #tpu.dot_dimension_numbers<[1], [0], [0], [1], [0, 0, 1, 1], [], []>} : vector<256x128xbf16>, vector<128x128xbf16>, vector<256x128xf32> -> vector<256x128xf32>
        %258 = arith.addf %249, %257 : vector<256x128xf32>
        %259 = arith.addi %27, %77 : i32
        %c128_i32 = arith.constant 128 : i32
        %260 = arith.addi %259, %c128_i32 : i32
        %261 = arith.index_cast %260 : i32 to index
        %c0_127 = arith.constant 0 : index
        %262 = vector.load %arg6[%261, %c0_127] : memref<4640x128xf32, #tpu.memory_space<vmem>>, vector<256x128xf32>
        %263 = arith.truncf %262 : vector<256x128xf32> to vector<256x128xbf16>
        %c20 = arith.constant 20 : index
        %c0_128 = arith.constant 0 : index
        %c0_129 = arith.constant 0 : index
        %264 = vector.load %arg3[%c20, %c0_128, %c0_129] : memref<25x128x128xbf16, #tpu.memory_space<vmem>>, vector<1x128x128xbf16>
        %265 = vector.shape_cast %264 : vector<1x128x128xbf16> to vector<128x128xbf16>
        %cst_130 = arith.constant dense<0.000000e+00> : vector<256x128xf32>
        %266 = tpu.matmul %263, %265, %cst_130 {dimension_numbers = #tpu.dot_dimension_numbers<[1], [0], [0], [1], [0, 0, 1, 1], [], []>} : vector<256x128xbf16>, vector<128x128xbf16>, vector<256x128xf32> -> vector<256x128xf32>
        %267 = arith.addf %258, %266 : vector<256x128xf32>
        %268 = arith.addi %27, %77 : i32
        %c129_i32 = arith.constant 129 : i32
        %269 = arith.addi %268, %c129_i32 : i32
        %270 = arith.index_cast %269 : i32 to index
        %c0_131 = arith.constant 0 : index
        %271 = vector.load %arg6[%270, %c0_131] : memref<4640x128xf32, #tpu.memory_space<vmem>>, vector<256x128xf32>
        %272 = arith.truncf %271 : vector<256x128xf32> to vector<256x128xbf16>
        %c21 = arith.constant 21 : index
        %c0_132 = arith.constant 0 : index
        %c0_133 = arith.constant 0 : index
        %273 = vector.load %arg3[%c21, %c0_132, %c0_133] : memref<25x128x128xbf16, #tpu.memory_space<vmem>>, vector<1x128x128xbf16>
        %274 = vector.shape_cast %273 : vector<1x128x128xbf16> to vector<128x128xbf16>
        %cst_134 = arith.constant dense<0.000000e+00> : vector<256x128xf32>
        %275 = tpu.matmul %272, %274, %cst_134 {dimension_numbers = #tpu.dot_dimension_numbers<[1], [0], [0], [1], [0, 0, 1, 1], [], []>} : vector<256x128xbf16>, vector<128x128xbf16>, vector<256x128xf32> -> vector<256x128xf32>
        %276 = arith.addf %267, %275 : vector<256x128xf32>
        %277 = arith.addi %27, %77 : i32
        %c130_i32 = arith.constant 130 : i32
        %278 = arith.addi %277, %c130_i32 : i32
        %279 = arith.index_cast %278 : i32 to index
        %c0_135 = arith.constant 0 : index
        %280 = vector.load %arg6[%279, %c0_135] : memref<4640x128xf32, #tpu.memory_space<vmem>>, vector<256x128xf32>
        %281 = arith.truncf %280 : vector<256x128xf32> to vector<256x128xbf16>
        %c22 = arith.constant 22 : index
        %c0_136 = arith.constant 0 : index
        %c0_137 = arith.constant 0 : index
        %282 = vector.load %arg3[%c22, %c0_136, %c0_137] : memref<25x128x128xbf16, #tpu.memory_space<vmem>>, vector<1x128x128xbf16>
        %283 = vector.shape_cast %282 : vector<1x128x128xbf16> to vector<128x128xbf16>
        %cst_138 = arith.constant dense<0.000000e+00> : vector<256x128xf32>
        %284 = tpu.matmul %281, %283, %cst_138 {dimension_numbers = #tpu.dot_dimension_numbers<[1], [0], [0], [1], [0, 0, 1, 1], [], []>} : vector<256x128xbf16>, vector<128x128xbf16>, vector<256x128xf32> -> vector<256x128xf32>
        %285 = arith.addf %276, %284 : vector<256x128xf32>
        %286 = arith.addi %27, %77 : i32
        %c131_i32 = arith.constant 131 : i32
        %287 = arith.addi %286, %c131_i32 : i32
        %288 = arith.index_cast %287 : i32 to index
        %c0_139 = arith.constant 0 : index
        %289 = vector.load %arg6[%288, %c0_139] : memref<4640x128xf32, #tpu.memory_space<vmem>>, vector<256x128xf32>
        %290 = arith.truncf %289 : vector<256x128xf32> to vector<256x128xbf16>
        %c23 = arith.constant 23 : index
        %c0_140 = arith.constant 0 : index
        %c0_141 = arith.constant 0 : index
        %291 = vector.load %arg3[%c23, %c0_140, %c0_141] : memref<25x128x128xbf16, #tpu.memory_space<vmem>>, vector<1x128x128xbf16>
        %292 = vector.shape_cast %291 : vector<1x128x128xbf16> to vector<128x128xbf16>
        %cst_142 = arith.constant dense<0.000000e+00> : vector<256x128xf32>
        %293 = tpu.matmul %290, %292, %cst_142 {dimension_numbers = #tpu.dot_dimension_numbers<[1], [0], [0], [1], [0, 0, 1, 1], [], []>} : vector<256x128xbf16>, vector<128x128xbf16>, vector<256x128xf32> -> vector<256x128xf32>
        %294 = arith.addf %285, %293 : vector<256x128xf32>
        %295 = arith.addi %27, %77 : i32
        %c132_i32 = arith.constant 132 : i32
        %296 = arith.addi %295, %c132_i32 : i32
        %297 = arith.index_cast %296 : i32 to index
        %c0_143 = arith.constant 0 : index
        %298 = vector.load %arg6[%297, %c0_143] : memref<4640x128xf32, #tpu.memory_space<vmem>>, vector<256x128xf32>
        %299 = arith.truncf %298 : vector<256x128xf32> to vector<256x128xbf16>
        %c24 = arith.constant 24 : index
        %c0_144 = arith.constant 0 : index
        %c0_145 = arith.constant 0 : index
        %300 = vector.load %arg3[%c24, %c0_144, %c0_145] : memref<25x128x128xbf16, #tpu.memory_space<vmem>>, vector<1x128x128xbf16>
        %301 = vector.shape_cast %300 : vector<1x128x128xbf16> to vector<128x128xbf16>
        %cst_146 = arith.constant dense<0.000000e+00> : vector<256x128xf32>
        %302 = tpu.matmul %299, %301, %cst_146 {dimension_numbers = #tpu.dot_dimension_numbers<[1], [0], [0], [1], [0, 0, 1, 1], [], []>} : vector<256x128xbf16>, vector<128x128xbf16>, vector<256x128xf32> -> vector<256x128xf32>
        %303 = arith.addf %294, %302 : vector<256x128xf32>
        %304 = tpu.iota {dimensions = array<i32: 0>} : vector<256x128xi32>
        %305 = vector.broadcast %77 : i32 to vector<256x128xi32>
        %306 = arith.addi %304, %305 : vector<256x128xi32>
        %c31_i32 = arith.constant 31 : i32
        %307 = vector.broadcast %c31_i32 : i32 to vector<256x128xi32>
        %308 = arith.andi %306, %307 : vector<256x128xi32>
        %c5_i32_147 = arith.constant 5 : i32
        %309 = vector.broadcast %c5_i32_147 : i32 to vector<256x128xi32>
        %310 = arith.shrsi %306, %309 : vector<256x128xi32>
        %c31_i32_148 = arith.constant 31 : i32
        %311 = vector.broadcast %c31_i32_148 : i32 to vector<256x128xi32>
        %312 = arith.andi %310, %311 : vector<256x128xi32>
        %313 = arith.maxsi %308, %312 : vector<256x128xi32>
        %314 = vector.broadcast %8 : i32 to vector<256x128xi32>
        %315 = arith.cmpi slt, %313, %314 : vector<256x128xi32>
        %cst_149 = arith.constant 0.000000e+00 : f32
        %316 = vector.broadcast %cst_149 : f32 to vector<256x128xf32>
        %317 = arith.select %315, %303, %316 : vector<256x128xi1>, vector<256x128xf32>
        %318 = arith.addi %28, %77 : i32
        %319 = tpu.assume_multiple %318, 8 : i32
        %320 = arith.index_cast %319 : i32 to index
        %c0_150 = arith.constant 0 : index
        %321 = vector.load %arg6[%320, %c0_150] : memref<4640x128xf32, #tpu.memory_space<vmem>>, vector<256x128xf32>
        tpu.vector_store %arg6[%320, %c0_150], %317 {strides = array<i32>} : memref<4640x128xf32, #tpu.memory_space<vmem>>, vector<256x128xf32>,
        %cst_151 = arith.constant dense<0.000000e+00> : vector<128xf32>
        %322 = vector.multi_reduction <add>, %317, %cst_151 [0] : vector<256x128xf32> to vector<128xf32>
        %323 = vector.shape_cast %322 : vector<128xf32> to vector<1x128xf32>
        %324 = arith.addf %arg9, %323 : vector<1x128xf32>
        %325 = arith.mulf %317, %317 : vector<256x128xf32>
        %cst_152 = arith.constant dense<0.000000e+00> : vector<128xf32>
        %326 = vector.multi_reduction <add>, %325, %cst_152 [0] : vector<256x128xf32> to vector<128xf32>
        %327 = vector.shape_cast %326 : vector<128xf32> to vector<1x128xf32>
        %328 = arith.addf %arg10, %327 : vector<1x128xf32>
        scf.yield %324, %328 : vector<1x128xf32>, vector<1x128xf32>
      }
      %c8_i32_32 = arith.constant 8 : i32
      %c0_33 = arith.constant 0 : index
      %c0_34 = arith.constant 0 : index
      %75 = vector.load %arg7[%c0_33, %c0_34] : memref<8x128xf32, #tpu.memory_space<vmem>>, vector<1x128xf32>
      tpu.vector_store %arg7[%c0_33, %c0_34], %74#0 {strides = array<i32>} : memref<8x128xf32, #tpu.memory_space<vmem>>, vector<1x128xf32>,
      %c1_35 = arith.constant 1 : index
      %c0_36 = arith.constant 0 : index
      %76 = vector.load %arg7[%c1_35, %c0_36] : memref<8x128xf32, #tpu.memory_space<vmem>>, vector<1x128xf32>
      tpu.vector_store %arg7[%c1_35, %c0_36], %74#1 {strides = array<i32>} : memref<8x128xf32, #tpu.memory_space<vmem>>, vector<1x128xf32>,
    } else {
    }
    %c3_i32 = arith.constant 3 : i32
    %32 = arith.cmpi eq, %4, %c3_i32 : i32
    %33 = arith.extui %32 : i1 to i32
    %c0_i32_9 = arith.constant 0 : i32
    %34 = arith.cmpi ne, %33, %c0_i32_9 : i32
    scf.if %34 {
      %cst_28 = arith.constant 0.000000e+00 : f32
      %72 = vector.broadcast %cst_28 : f32 to vector<1x128xf32>
      %c0_i32_29 = arith.constant 0 : i32
      %c8_i32_30 = arith.constant 8 : i32
      %73 = arith.addi %c0_i32_29, %c8_i32_30 : i32
      %c1_i32_31 = arith.constant 1 : i32
      %74:2 = scf.for %arg8 = %c0_i32_29 to %73 step %c1_i32_31 iter_args(%arg9 = %72, %arg10 = %72) -> (vector<1x128xf32>, vector<1x128xf32>)  : i32 {
        %c256_i32 = arith.constant 256 : i32
        %77 = arith.muli %arg8, %c256_i32 : i32
        %cst_37 = arith.constant 0.000000e+00 : f32
        %78 = vector.broadcast %cst_37 : f32 to vector<256x128xf32>
        %79 = arith.addi %27, %77 : i32
        %c0_i32_38 = arith.constant 0 : i32
        %80 = arith.addi %79, %c0_i32_38 : i32
        %81 = arith.index_cast %80 : i32 to index
        %c0_39 = arith.constant 0 : index
        %82 = vector.load %arg6[%81, %c0_39] : memref<4640x128xf32, #tpu.memory_space<vmem>>, vector<256x128xf32>
        %83 = arith.truncf %82 : vector<256x128xf32> to vector<256x128xbf16>
        %c0_40 = arith.constant 0 : index
        %c0_41 = arith.constant 0 : index
        %c0_42 = arith.constant 0 : index
        %84 = vector.load %arg3[%c0_40, %c0_41, %c0_42] : memref<25x128x128xbf16, #tpu.memory_space<vmem>>, vector<1x128x128xbf16>
        %85 = vector.shape_cast %84 : vector<1x128x128xbf16> to vector<128x128xbf16>
        %cst_43 = arith.constant dense<0.000000e+00> : vector<256x128xf32>
        %86 = tpu.matmul %83, %85, %cst_43 {dimension_numbers = #tpu.dot_dimension_numbers<[1], [0], [0], [1], [0, 0, 1, 1], [], []>} : vector<256x128xbf16>, vector<128x128xbf16>, vector<256x128xf32> -> vector<256x128xf32>
        %87 = arith.addf %78, %86 : vector<256x128xf32>
        %88 = arith.addi %27, %77 : i32
        %c1_i32_44 = arith.constant 1 : i32
        %89 = arith.addi %88, %c1_i32_44 : i32
        %90 = arith.index_cast %89 : i32 to index
        %c0_45 = arith.constant 0 : index
        %91 = vector.load %arg6[%90, %c0_45] : memref<4640x128xf32, #tpu.memory_space<vmem>>, vector<256x128xf32>
        %92 = arith.truncf %91 : vector<256x128xf32> to vector<256x128xbf16>
        %c1_46 = arith.constant 1 : index
        %c0_47 = arith.constant 0 : index
        %c0_48 = arith.constant 0 : index
        %93 = vector.load %arg3[%c1_46, %c0_47, %c0_48] : memref<25x128x128xbf16, #tpu.memory_space<vmem>>, vector<1x128x128xbf16>
        %94 = vector.shape_cast %93 : vector<1x128x128xbf16> to vector<128x128xbf16>
        %cst_49 = arith.constant dense<0.000000e+00> : vector<256x128xf32>
        %95 = tpu.matmul %92, %94, %cst_49 {dimension_numbers = #tpu.dot_dimension_numbers<[1], [0], [0], [1], [0, 0, 1, 1], [], []>} : vector<256x128xbf16>, vector<128x128xbf16>, vector<256x128xf32> -> vector<256x128xf32>
        %96 = arith.addf %87, %95 : vector<256x128xf32>
        %97 = arith.addi %27, %77 : i32
        %c2_i32_50 = arith.constant 2 : i32
        %98 = arith.addi %97, %c2_i32_50 : i32
        %99 = arith.index_cast %98 : i32 to index
        %c0_51 = arith.constant 0 : index
        %100 = vector.load %arg6[%99, %c0_51] : memref<4640x128xf32, #tpu.memory_space<vmem>>, vector<256x128xf32>
        %101 = arith.truncf %100 : vector<256x128xf32> to vector<256x128xbf16>
        %c2_52 = arith.constant 2 : index
        %c0_53 = arith.constant 0 : index
        %c0_54 = arith.constant 0 : index
        %102 = vector.load %arg3[%c2_52, %c0_53, %c0_54] : memref<25x128x128xbf16, #tpu.memory_space<vmem>>, vector<1x128x128xbf16>
        %103 = vector.shape_cast %102 : vector<1x128x128xbf16> to vector<128x128xbf16>
        %cst_55 = arith.constant dense<0.000000e+00> : vector<256x128xf32>
        %104 = tpu.matmul %101, %103, %cst_55 {dimension_numbers = #tpu.dot_dimension_numbers<[1], [0], [0], [1], [0, 0, 1, 1], [], []>} : vector<256x128xbf16>, vector<128x128xbf16>, vector<256x128xf32> -> vector<256x128xf32>
        %105 = arith.addf %96, %104 : vector<256x128xf32>
        %106 = arith.addi %27, %77 : i32
        %c32_i32 = arith.constant 32 : i32
        %107 = arith.addi %106, %c32_i32 : i32
        %108 = arith.index_cast %107 : i32 to index
        %c0_56 = arith.constant 0 : index
        %109 = vector.load %arg6[%108, %c0_56] : memref<4640x128xf32, #tpu.memory_space<vmem>>, vector<256x128xf32>
        %110 = arith.truncf %109 : vector<256x128xf32> to vector<256x128xbf16>
        %c5 = arith.constant 5 : index
        %c0_57 = arith.constant 0 : index
        %c0_58 = arith.constant 0 : index
        %111 = vector.load %arg3[%c5, %c0_57, %c0_58] : memref<25x128x128xbf16, #tpu.memory_space<vmem>>, vector<1x128x128xbf16>
        %112 = vector.shape_cast %111 : vector<1x128x128xbf16> to vector<128x128xbf16>
        %cst_59 = arith.constant dense<0.000000e+00> : vector<256x128xf32>
        %113 = tpu.matmul %110, %112, %cst_59 {dimension_numbers = #tpu.dot_dimension_numbers<[1], [0], [0], [1], [0, 0, 1, 1], [], []>} : vector<256x128xbf16>, vector<128x128xbf16>, vector<256x128xf32> -> vector<256x128xf32>
        %114 = arith.addf %105, %113 : vector<256x128xf32>
        %115 = arith.addi %27, %77 : i32
        %c33_i32 = arith.constant 33 : i32
        %116 = arith.addi %115, %c33_i32 : i32
        %117 = arith.index_cast %116 : i32 to index
        %c0_60 = arith.constant 0 : index
        %118 = vector.load %arg6[%117, %c0_60] : memref<4640x128xf32, #tpu.memory_space<vmem>>, vector<256x128xf32>
        %119 = arith.truncf %118 : vector<256x128xf32> to vector<256x128xbf16>
        %c6 = arith.constant 6 : index
        %c0_61 = arith.constant 0 : index
        %c0_62 = arith.constant 0 : index
        %120 = vector.load %arg3[%c6, %c0_61, %c0_62] : memref<25x128x128xbf16, #tpu.memory_space<vmem>>, vector<1x128x128xbf16>
        %121 = vector.shape_cast %120 : vector<1x128x128xbf16> to vector<128x128xbf16>
        %cst_63 = arith.constant dense<0.000000e+00> : vector<256x128xf32>
        %122 = tpu.matmul %119, %121, %cst_63 {dimension_numbers = #tpu.dot_dimension_numbers<[1], [0], [0], [1], [0, 0, 1, 1], [], []>} : vector<256x128xbf16>, vector<128x128xbf16>, vector<256x128xf32> -> vector<256x128xf32>
        %123 = arith.addf %114, %122 : vector<256x128xf32>
        %124 = arith.addi %27, %77 : i32
        %c34_i32 = arith.constant 34 : i32
        %125 = arith.addi %124, %c34_i32 : i32
        %126 = arith.index_cast %125 : i32 to index
        %c0_64 = arith.constant 0 : index
        %127 = vector.load %arg6[%126, %c0_64] : memref<4640x128xf32, #tpu.memory_space<vmem>>, vector<256x128xf32>
        %128 = arith.truncf %127 : vector<256x128xf32> to vector<256x128xbf16>
        %c7 = arith.constant 7 : index
        %c0_65 = arith.constant 0 : index
        %c0_66 = arith.constant 0 : index
        %129 = vector.load %arg3[%c7, %c0_65, %c0_66] : memref<25x128x128xbf16, #tpu.memory_space<vmem>>, vector<1x128x128xbf16>
        %130 = vector.shape_cast %129 : vector<1x128x128xbf16> to vector<128x128xbf16>
        %cst_67 = arith.constant dense<0.000000e+00> : vector<256x128xf32>
        %131 = tpu.matmul %128, %130, %cst_67 {dimension_numbers = #tpu.dot_dimension_numbers<[1], [0], [0], [1], [0, 0, 1, 1], [], []>} : vector<256x128xbf16>, vector<128x128xbf16>, vector<256x128xf32> -> vector<256x128xf32>
        %132 = arith.addf %123, %131 : vector<256x128xf32>
        %133 = arith.addi %27, %77 : i32
        %c64_i32 = arith.constant 64 : i32
        %134 = arith.addi %133, %c64_i32 : i32
        %135 = arith.index_cast %134 : i32 to index
        %c0_68 = arith.constant 0 : index
        %136 = vector.load %arg6[%135, %c0_68] : memref<4640x128xf32, #tpu.memory_space<vmem>>, vector<256x128xf32>
        %137 = arith.truncf %136 : vector<256x128xf32> to vector<256x128xbf16>
        %c10 = arith.constant 10 : index
        %c0_69 = arith.constant 0 : index
        %c0_70 = arith.constant 0 : index
        %138 = vector.load %arg3[%c10, %c0_69, %c0_70] : memref<25x128x128xbf16, #tpu.memory_space<vmem>>, vector<1x128x128xbf16>
        %139 = vector.shape_cast %138 : vector<1x128x128xbf16> to vector<128x128xbf16>
        %cst_71 = arith.constant dense<0.000000e+00> : vector<256x128xf32>
        %140 = tpu.matmul %137, %139, %cst_71 {dimension_numbers = #tpu.dot_dimension_numbers<[1], [0], [0], [1], [0, 0, 1, 1], [], []>} : vector<256x128xbf16>, vector<128x128xbf16>, vector<256x128xf32> -> vector<256x128xf32>
        %141 = arith.addf %132, %140 : vector<256x128xf32>
        %142 = arith.addi %27, %77 : i32
        %c65_i32 = arith.constant 65 : i32
        %143 = arith.addi %142, %c65_i32 : i32
        %144 = arith.index_cast %143 : i32 to index
        %c0_72 = arith.constant 0 : index
        %145 = vector.load %arg6[%144, %c0_72] : memref<4640x128xf32, #tpu.memory_space<vmem>>, vector<256x128xf32>
        %146 = arith.truncf %145 : vector<256x128xf32> to vector<256x128xbf16>
        %c11 = arith.constant 11 : index
        %c0_73 = arith.constant 0 : index
        %c0_74 = arith.constant 0 : index
        %147 = vector.load %arg3[%c11, %c0_73, %c0_74] : memref<25x128x128xbf16, #tpu.memory_space<vmem>>, vector<1x128x128xbf16>
        %148 = vector.shape_cast %147 : vector<1x128x128xbf16> to vector<128x128xbf16>
        %cst_75 = arith.constant dense<0.000000e+00> : vector<256x128xf32>
        %149 = tpu.matmul %146, %148, %cst_75 {dimension_numbers = #tpu.dot_dimension_numbers<[1], [0], [0], [1], [0, 0, 1, 1], [], []>} : vector<256x128xbf16>, vector<128x128xbf16>, vector<256x128xf32> -> vector<256x128xf32>
        %150 = arith.addf %141, %149 : vector<256x128xf32>
        %151 = arith.addi %27, %77 : i32
        %c66_i32 = arith.constant 66 : i32
        %152 = arith.addi %151, %c66_i32 : i32
        %153 = arith.index_cast %152 : i32 to index
        %c0_76 = arith.constant 0 : index
        %154 = vector.load %arg6[%153, %c0_76] : memref<4640x128xf32, #tpu.memory_space<vmem>>, vector<256x128xf32>
        %155 = arith.truncf %154 : vector<256x128xf32> to vector<256x128xbf16>
        %c12 = arith.constant 12 : index
        %c0_77 = arith.constant 0 : index
        %c0_78 = arith.constant 0 : index
        %156 = vector.load %arg3[%c12, %c0_77, %c0_78] : memref<25x128x128xbf16, #tpu.memory_space<vmem>>, vector<1x128x128xbf16>
        %157 = vector.shape_cast %156 : vector<1x128x128xbf16> to vector<128x128xbf16>
        %cst_79 = arith.constant dense<0.000000e+00> : vector<256x128xf32>
        %158 = tpu.matmul %155, %157, %cst_79 {dimension_numbers = #tpu.dot_dimension_numbers<[1], [0], [0], [1], [0, 0, 1, 1], [], []>} : vector<256x128xbf16>, vector<128x128xbf16>, vector<256x128xf32> -> vector<256x128xf32>
        %159 = arith.addf %150, %158 : vector<256x128xf32>
        %160 = tpu.iota {dimensions = array<i32: 0>} : vector<256x128xi32>
        %161 = vector.broadcast %77 : i32 to vector<256x128xi32>
        %162 = arith.addi %160, %161 : vector<256x128xi32>
        %c31_i32 = arith.constant 31 : i32
        %163 = vector.broadcast %c31_i32 : i32 to vector<256x128xi32>
        %164 = arith.andi %162, %163 : vector<256x128xi32>
        %c5_i32_80 = arith.constant 5 : i32
        %165 = vector.broadcast %c5_i32_80 : i32 to vector<256x128xi32>
        %166 = arith.shrsi %162, %165 : vector<256x128xi32>
        %c31_i32_81 = arith.constant 31 : i32
        %167 = vector.broadcast %c31_i32_81 : i32 to vector<256x128xi32>
        %168 = arith.andi %166, %167 : vector<256x128xi32>
        %169 = arith.maxsi %164, %168 : vector<256x128xi32>
        %170 = vector.broadcast %8 : i32 to vector<256x128xi32>
        %171 = arith.cmpi slt, %169, %170 : vector<256x128xi32>
        %cst_82 = arith.constant 0.000000e+00 : f32
        %172 = vector.broadcast %cst_82 : f32 to vector<256x128xf32>
        %173 = arith.select %171, %159, %172 : vector<256x128xi1>, vector<256x128xf32>
        %174 = arith.addi %28, %77 : i32
        %175 = tpu.assume_multiple %174, 8 : i32
        %176 = arith.index_cast %175 : i32 to index
        %c0_83 = arith.constant 0 : index
        %177 = vector.load %arg6[%176, %c0_83] : memref<4640x128xf32, #tpu.memory_space<vmem>>, vector<256x128xf32>
        tpu.vector_store %arg6[%176, %c0_83], %173 {strides = array<i32>} : memref<4640x128xf32, #tpu.memory_space<vmem>>, vector<256x128xf32>,
        %cst_84 = arith.constant dense<0.000000e+00> : vector<128xf32>
        %178 = vector.multi_reduction <add>, %173, %cst_84 [0] : vector<256x128xf32> to vector<128xf32>
        %179 = vector.shape_cast %178 : vector<128xf32> to vector<1x128xf32>
        %180 = arith.addf %arg9, %179 : vector<1x128xf32>
        %181 = arith.mulf %173, %173 : vector<256x128xf32>
        %cst_85 = arith.constant dense<0.000000e+00> : vector<128xf32>
        %182 = vector.multi_reduction <add>, %181, %cst_85 [0] : vector<256x128xf32> to vector<128xf32>
        %183 = vector.shape_cast %182 : vector<128xf32> to vector<1x128xf32>
        %184 = arith.addf %arg10, %183 : vector<1x128xf32>
        scf.yield %180, %184 : vector<1x128xf32>, vector<1x128xf32>
      }
      %c8_i32_32 = arith.constant 8 : i32
      %c0_33 = arith.constant 0 : index
      %c0_34 = arith.constant 0 : index
      %75 = vector.load %arg7[%c0_33, %c0_34] : memref<8x128xf32, #tpu.memory_space<vmem>>, vector<1x128xf32>
      tpu.vector_store %arg7[%c0_33, %c0_34], %74#0 {strides = array<i32>} : memref<8x128xf32, #tpu.memory_space<vmem>>, vector<1x128xf32>,
      %c1_35 = arith.constant 1 : index
      %c0_36 = arith.constant 0 : index
      %76 = vector.load %arg7[%c1_35, %c0_36] : memref<8x128xf32, #tpu.memory_space<vmem>>, vector<1x128xf32>
      tpu.vector_store %arg7[%c1_35, %c0_36], %74#1 {strides = array<i32>} : memref<8x128xf32, #tpu.memory_space<vmem>>, vector<1x128xf32>,
    } else {
    }
    %c2_i32_10 = arith.constant 2 : i32
    %35 = arith.cmpi eq, %4, %c2_i32_10 : i32
    %36 = arith.extui %35 : i1 to i32
    %c0_i32_11 = arith.constant 0 : i32
    %37 = arith.cmpi ne, %36, %c0_i32_11 : i32
    scf.if %37 {
      %cst_28 = arith.constant 0.000000e+00 : f32
      %72 = vector.broadcast %cst_28 : f32 to vector<1x128xf32>
      %c0_i32_29 = arith.constant 0 : i32
      %c8_i32_30 = arith.constant 8 : i32
      %73 = arith.addi %c0_i32_29, %c8_i32_30 : i32
      %c1_i32_31 = arith.constant 1 : i32
      %74:2 = scf.for %arg8 = %c0_i32_29 to %73 step %c1_i32_31 iter_args(%arg9 = %72, %arg10 = %72) -> (vector<1x128xf32>, vector<1x128xf32>)  : i32 {
        %c256_i32 = arith.constant 256 : i32
        %77 = arith.muli %arg8, %c256_i32 : i32
        %cst_37 = arith.constant 0.000000e+00 : f32
        %78 = vector.broadcast %cst_37 : f32 to vector<256x128xf32>
        %79 = arith.addi %27, %77 : i32
        %c0_i32_38 = arith.constant 0 : i32
        %80 = arith.addi %79, %c0_i32_38 : i32
        %81 = arith.index_cast %80 : i32 to index
        %c0_39 = arith.constant 0 : index
        %82 = vector.load %arg6[%81, %c0_39] : memref<4640x128xf32, #tpu.memory_space<vmem>>, vector<256x128xf32>
        %83 = arith.truncf %82 : vector<256x128xf32> to vector<256x128xbf16>
        %c0_40 = arith.constant 0 : index
        %c0_41 = arith.constant 0 : index
        %c0_42 = arith.constant 0 : index
        %84 = vector.load %arg3[%c0_40, %c0_41, %c0_42] : memref<25x128x128xbf16, #tpu.memory_space<vmem>>, vector<1x128x128xbf16>
        %85 = vector.shape_cast %84 : vector<1x128x128xbf16> to vector<128x128xbf16>
        %cst_43 = arith.constant dense<0.000000e+00> : vector<256x128xf32>
        %86 = tpu.matmul %83, %85, %cst_43 {dimension_numbers = #tpu.dot_dimension_numbers<[1], [0], [0], [1], [0, 0, 1, 1], [], []>} : vector<256x128xbf16>, vector<128x128xbf16>, vector<256x128xf32> -> vector<256x128xf32>
        %87 = arith.addf %78, %86 : vector<256x128xf32>
        %88 = arith.addi %27, %77 : i32
        %c1_i32_44 = arith.constant 1 : i32
        %89 = arith.addi %88, %c1_i32_44 : i32
        %90 = arith.index_cast %89 : i32 to index
        %c0_45 = arith.constant 0 : index
        %91 = vector.load %arg6[%90, %c0_45] : memref<4640x128xf32, #tpu.memory_space<vmem>>, vector<256x128xf32>
        %92 = arith.truncf %91 : vector<256x128xf32> to vector<256x128xbf16>
        %c1_46 = arith.constant 1 : index
        %c0_47 = arith.constant 0 : index
        %c0_48 = arith.constant 0 : index
        %93 = vector.load %arg3[%c1_46, %c0_47, %c0_48] : memref<25x128x128xbf16, #tpu.memory_space<vmem>>, vector<1x128x128xbf16>
        %94 = vector.shape_cast %93 : vector<1x128x128xbf16> to vector<128x128xbf16>
        %cst_49 = arith.constant dense<0.000000e+00> : vector<256x128xf32>
        %95 = tpu.matmul %92, %94, %cst_49 {dimension_numbers = #tpu.dot_dimension_numbers<[1], [0], [0], [1], [0, 0, 1, 1], [], []>} : vector<256x128xbf16>, vector<128x128xbf16>, vector<256x128xf32> -> vector<256x128xf32>
        %96 = arith.addf %87, %95 : vector<256x128xf32>
        %97 = arith.addi %27, %77 : i32
        %c32_i32 = arith.constant 32 : i32
        %98 = arith.addi %97, %c32_i32 : i32
        %99 = arith.index_cast %98 : i32 to index
        %c0_50 = arith.constant 0 : index
        %100 = vector.load %arg6[%99, %c0_50] : memref<4640x128xf32, #tpu.memory_space<vmem>>, vector<256x128xf32>
        %101 = arith.truncf %100 : vector<256x128xf32> to vector<256x128xbf16>
        %c5 = arith.constant 5 : index
        %c0_51 = arith.constant 0 : index
        %c0_52 = arith.constant 0 : index
        %102 = vector.load %arg3[%c5, %c0_51, %c0_52] : memref<25x128x128xbf16, #tpu.memory_space<vmem>>, vector<1x128x128xbf16>
        %103 = vector.shape_cast %102 : vector<1x128x128xbf16> to vector<128x128xbf16>
        %cst_53 = arith.constant dense<0.000000e+00> : vector<256x128xf32>
        %104 = tpu.matmul %101, %103, %cst_53 {dimension_numbers = #tpu.dot_dimension_numbers<[1], [0], [0], [1], [0, 0, 1, 1], [], []>} : vector<256x128xbf16>, vector<128x128xbf16>, vector<256x128xf32> -> vector<256x128xf32>
        %105 = arith.addf %96, %104 : vector<256x128xf32>
        %106 = arith.addi %27, %77 : i32
        %c33_i32 = arith.constant 33 : i32
        %107 = arith.addi %106, %c33_i32 : i32
        %108 = arith.index_cast %107 : i32 to index
        %c0_54 = arith.constant 0 : index
        %109 = vector.load %arg6[%108, %c0_54] : memref<4640x128xf32, #tpu.memory_space<vmem>>, vector<256x128xf32>
        %110 = arith.truncf %109 : vector<256x128xf32> to vector<256x128xbf16>
        %c6 = arith.constant 6 : index
        %c0_55 = arith.constant 0 : index
        %c0_56 = arith.constant 0 : index
        %111 = vector.load %arg3[%c6, %c0_55, %c0_56] : memref<25x128x128xbf16, #tpu.memory_space<vmem>>, vector<1x128x128xbf16>
        %112 = vector.shape_cast %111 : vector<1x128x128xbf16> to vector<128x128xbf16>
        %cst_57 = arith.constant dense<0.000000e+00> : vector<256x128xf32>
        %113 = tpu.matmul %110, %112, %cst_57 {dimension_numbers = #tpu.dot_dimension_numbers<[1], [0], [0], [1], [0, 0, 1, 1], [], []>} : vector<256x128xbf16>, vector<128x128xbf16>, vector<256x128xf32> -> vector<256x128xf32>
        %114 = arith.addf %105, %113 : vector<256x128xf32>
        %115 = tpu.iota {dimensions = array<i32: 0>} : vector<256x128xi32>
        %116 = vector.broadcast %77 : i32 to vector<256x128xi32>
        %117 = arith.addi %115, %116 : vector<256x128xi32>
        %c31_i32 = arith.constant 31 : i32
        %118 = vector.broadcast %c31_i32 : i32 to vector<256x128xi32>
        %119 = arith.andi %117, %118 : vector<256x128xi32>
        %c5_i32_58 = arith.constant 5 : i32
        %120 = vector.broadcast %c5_i32_58 : i32 to vector<256x128xi32>
        %121 = arith.shrsi %117, %120 : vector<256x128xi32>
        %c31_i32_59 = arith.constant 31 : i32
        %122 = vector.broadcast %c31_i32_59 : i32 to vector<256x128xi32>
        %123 = arith.andi %121, %122 : vector<256x128xi32>
        %124 = arith.maxsi %119, %123 : vector<256x128xi32>
        %125 = vector.broadcast %8 : i32 to vector<256x128xi32>
        %126 = arith.cmpi slt, %124, %125 : vector<256x128xi32>
        %cst_60 = arith.constant 0.000000e+00 : f32
        %127 = vector.broadcast %cst_60 : f32 to vector<256x128xf32>
        %128 = arith.select %126, %114, %127 : vector<256x128xi1>, vector<256x128xf32>
        %129 = arith.addi %28, %77 : i32
        %130 = tpu.assume_multiple %129, 8 : i32
        %131 = arith.index_cast %130 : i32 to index
        %c0_61 = arith.constant 0 : index
        %132 = vector.load %arg6[%131, %c0_61] : memref<4640x128xf32, #tpu.memory_space<vmem>>, vector<256x128xf32>
        tpu.vector_store %arg6[%131, %c0_61], %128 {strides = array<i32>} : memref<4640x128xf32, #tpu.memory_space<vmem>>, vector<256x128xf32>,
        %cst_62 = arith.constant dense<0.000000e+00> : vector<128xf32>
        %133 = vector.multi_reduction <add>, %128, %cst_62 [0] : vector<256x128xf32> to vector<128xf32>
        %134 = vector.shape_cast %133 : vector<128xf32> to vector<1x128xf32>
        %135 = arith.addf %arg9, %134 : vector<1x128xf32>
        %136 = arith.mulf %128, %128 : vector<256x128xf32>
        %cst_63 = arith.constant dense<0.000000e+00> : vector<128xf32>
        %137 = vector.multi_reduction <add>, %136, %cst_63 [0] : vector<256x128xf32> to vector<128xf32>
        %138 = vector.shape_cast %137 : vector<128xf32> to vector<1x128xf32>
        %139 = arith.addf %arg10, %138 : vector<1x128xf32>
        scf.yield %135, %139 : vector<1x128xf32>, vector<1x128xf32>
      }
      %c8_i32_32 = arith.constant 8 : i32
      %c0_33 = arith.constant 0 : index
      %c0_34 = arith.constant 0 : index
      %75 = vector.load %arg7[%c0_33, %c0_34] : memref<8x128xf32, #tpu.memory_space<vmem>>, vector<1x128xf32>
      tpu.vector_store %arg7[%c0_33, %c0_34], %74#0 {strides = array<i32>} : memref<8x128xf32, #tpu.memory_space<vmem>>, vector<1x128xf32>,
      %c1_35 = arith.constant 1 : index
      %c0_36 = arith.constant 0 : index
      %76 = vector.load %arg7[%c1_35, %c0_36] : memref<8x128xf32, #tpu.memory_space<vmem>>, vector<1x128xf32>
      tpu.vector_store %arg7[%c1_35, %c0_36], %74#1 {strides = array<i32>} : memref<8x128xf32, #tpu.memory_space<vmem>>, vector<1x128xf32>,
    } else {
    }
    %c8_i32 = arith.constant 8 : i32
    %38 = arith.muli %arg0, %c8_i32 : i32
    %39 = tpu.assume_multiple %38, 8 : i32
    %40 = arith.index_cast %39 : i32 to index
    %c0_12 = arith.constant 0 : index
    %41 = vector.load %arg4[%40, %c0_12] : memref<176x128xf32, #tpu.memory_space<vmem>>, vector<8x128xf32>
    %42 = vector.extract_strided_slice %41 {offsets = [0, 0], sizes = [1, 128], strides = [1, 1]} : vector<8x128xf32> to vector<1x128xf32>
    %43 = vector.extract_strided_slice %41 {offsets = [1, 0], sizes = [1, 128], strides = [1, 1]} : vector<8x128xf32> to vector<1x128xf32>
    %44 = vector.extract_strided_slice %41 {offsets = [2, 0], sizes = [1, 128], strides = [1, 1]} : vector<8x128xf32> to vector<1x128xf32>
    %45 = arith.sitofp %12 : i32 to f32
    %cst = arith.constant 1.000000e+00 : f32
    %46 = arith.divf %cst, %45 : f32
    %c0_13 = arith.constant 0 : index
    %c0_14 = arith.constant 0 : index
    %47 = vector.load %arg7[%c0_13, %c0_14] : memref<8x128xf32, #tpu.memory_space<vmem>>, vector<1x128xf32>
    %48 = vector.broadcast %46 : f32 to vector<1x128xf32>
    %49 = arith.mulf %47, %48 : vector<1x128xf32>
    %c1_15 = arith.constant 1 : index
    %c0_16 = arith.constant 0 : index
    %50 = vector.load %arg7[%c1_15, %c0_16] : memref<8x128xf32, #tpu.memory_space<vmem>>, vector<1x128xf32>
    %51 = vector.broadcast %46 : f32 to vector<1x128xf32>
    %52 = arith.mulf %50, %51 : vector<1x128xf32>
    %53 = arith.mulf %49, %49 : vector<1x128xf32>
    %54 = arith.subf %52, %53 : vector<1x128xf32>
    %cst_17 = arith.constant 0.000000e+00 : f32
    %55 = vector.broadcast %cst_17 : f32 to vector<1x128xf32>
    %56 = arith.maximumf %54, %55 : vector<1x128xf32>
    %cst_18 = arith.constant 9.99999974E-6 : f32
    %57 = vector.broadcast %cst_18 : f32 to vector<1x128xf32>
    %58 = arith.addf %56, %57 : vector<1x128xf32>
    %59 = math.rsqrt %58 : vector<1x128xf32>
    %60 = arith.mulf %42, %59 : vector<1x128xf32>
    %61 = arith.mulf %49, %60 : vector<1x128xf32>
    %62 = arith.subf %43, %61 : vector<1x128xf32>
    %c0_i32_19 = arith.constant 0 : i32
    %63 = arith.cmpi sgt, %10, %c0_i32_19 : i32
    %cst_20 = arith.constant 1.000000e+00 : f32
    %64 = vector.broadcast %cst_20 : f32 to vector<1x128xf32>
    %65 = arith.select %63, %60, %64 : vector<1x128xf32>
    %66 = arith.select %63, %62, %44 : vector<1x128xf32>
    %cst_21 = arith.constant 0.000000e+00 : f32
    %cst_22 = arith.constant 0xFF800000 : f32
    %67 = arith.select %63, %cst_21, %cst_22 : f32
    %c0_i32_23 = arith.constant 0 : i32
    %c8_i32_24 = arith.constant 8 : i32
    %68 = arith.addi %c0_i32_23, %c8_i32_24 : i32
    %c1_i32_25 = arith.constant 1 : i32
    scf.for %arg8 = %c0_i32_23 to %68 step %c1_i32_25  : i32 {
      %c256_i32 = arith.constant 256 : i32
      %72 = arith.muli %arg8, %c256_i32 : i32
      %73 = arith.addi %28, %72 : i32
      %74 = tpu.assume_multiple %73, 8 : i32
      %75 = arith.index_cast %74 : i32 to index
      %c0_28 = arith.constant 0 : index
      %76 = vector.load %arg6[%75, %c0_28] : memref<4640x128xf32, #tpu.memory_space<vmem>>, vector<256x128xf32>
      %77 = vector.broadcast %65 : vector<1x128xf32> to vector<256x128xf32>
      %78 = arith.mulf %76, %77 : vector<256x128xf32>
      %79 = vector.broadcast %66 : vector<1x128xf32> to vector<256x128xf32>
      %80 = arith.addf %78, %79 : vector<256x128xf32>
      %81 = vector.broadcast %67 : f32 to vector<256x128xf32>
      %82 = arith.maximumf %80, %81 : vector<256x128xf32>
      %83 = tpu.iota {dimensions = array<i32: 0>} : vector<256x128xi32>
      %84 = vector.broadcast %72 : i32 to vector<256x128xi32>
      %85 = arith.addi %83, %84 : vector<256x128xi32>
      %c31_i32 = arith.constant 31 : i32
      %86 = vector.broadcast %c31_i32 : i32 to vector<256x128xi32>
      %87 = arith.andi %85, %86 : vector<256x128xi32>
      %c5_i32_29 = arith.constant 5 : i32
      %88 = vector.broadcast %c5_i32_29 : i32 to vector<256x128xi32>
      %89 = arith.shrsi %85, %88 : vector<256x128xi32>
      %c31_i32_30 = arith.constant 31 : i32
      %90 = vector.broadcast %c31_i32_30 : i32 to vector<256x128xi32>
      %91 = arith.andi %89, %90 : vector<256x128xi32>
      %92 = arith.maxsi %87, %91 : vector<256x128xi32>
      %93 = vector.broadcast %8 : i32 to vector<256x128xi32>
      %94 = arith.cmpi slt, %92, %93 : vector<256x128xi32>
      %cst_31 = arith.constant 0.000000e+00 : f32
      %95 = vector.broadcast %cst_31 : f32 to vector<256x128xf32>
      %96 = arith.select %94, %82, %95 : vector<256x128xi1>, vector<256x128xf32>
      %97 = arith.index_cast %74 : i32 to index
      %c0_32 = arith.constant 0 : index
      %98 = vector.load %arg6[%97, %c0_32] : memref<4640x128xf32, #tpu.memory_space<vmem>>, vector<256x128xf32>
      tpu.vector_store %arg6[%97, %c0_32], %96 {strides = array<i32>} : memref<4640x128xf32, #tpu.memory_space<vmem>>, vector<256x128xf32>,
    }
    %c8_i32_26 = arith.constant 8 : i32
    %c21_i32 = arith.constant 21 : i32
    %69 = arith.cmpi eq, %arg0, %c21_i32 : i32
    %70 = arith.extui %69 : i1 to i32
    %c0_i32_27 = arith.constant 0 : i32
    %71 = arith.cmpi ne, %70, %c0_i32_27 : i32
    scf.if %71 {
      %c0_i32_28 = arith.constant 0 : i32
      %c8_i32_29 = arith.constant 8 : i32
      %72 = arith.addi %c0_i32_28, %c8_i32_29 : i32
      %c1_i32_30 = arith.constant 1 : i32
      scf.for %arg8 = %c0_i32_28 to %72 step %c1_i32_30  : i32 {
        %c256_i32 = arith.constant 256 : i32
        %73 = arith.muli %arg8, %c256_i32 : i32
        %74 = tpu.assume_multiple %73, 8 : i32
        %75 = arith.addi %28, %74 : i32
        %76 = tpu.assume_multiple %75, 8 : i32
        %77 = arith.index_cast %76 : i32 to index
        %c0_32 = arith.constant 0 : index
        %78 = vector.load %arg6[%77, %c0_32] : memref<4640x128xf32, #tpu.memory_space<vmem>>, vector<256x128xf32>
        %79 = math.tanh %78 : vector<256x128xf32>
        %80 = arith.index_cast %74 : i32 to index
        %c0_33 = arith.constant 0 : index
        %81 = vector.load %arg5[%80, %c0_33] : memref<2048x128xf32, #tpu.memory_space<vmem>>, vector<256x128xf32>
        tpu.vector_store %arg5[%80, %c0_33], %79 {strides = array<i32>} : memref<2048x128xf32, #tpu.memory_space<vmem>>, vector<256x128xf32>,
      }
      %c8_i32_31 = arith.constant 8 : i32
    } else {
    }
    return
  }
  func.func @transform_0(%arg0: i32, %arg1: memref<22x8xi32, #tpu.memory_space<smem>>) -> (i32, i32) {
    %c0_i32 = arith.constant 0 : i32
    %c0_i32_0 = arith.constant 0 : i32
    %c0_i32_1 = arith.constant 0 : i32
    return %c0_i32, %c0_i32_0 : i32, i32
  }
  func.func @transform_1(%arg0: i32, %arg1: memref<22x8xi32, #tpu.memory_space<smem>>) -> (i32, i32, i32) {
    %c0_i32 = arith.constant 0 : i32
    %c0_i32_0 = arith.constant 0 : i32
    %c0_i32_1 = arith.constant 0 : i32
    return %arg0, %c0_i32, %c0_i32_0 : i32, i32, i32
  }
  func.func @transform_2(%arg0: i32, %arg1: memref<22x8xi32, #tpu.memory_space<smem>>) -> (i32, i32) {
    %c0_i32 = arith.constant 0 : i32
    %c0_i32_0 = arith.constant 0 : i32
    %c0_i32_1 = arith.constant 0 : i32
    return %c0_i32, %c0_i32_0 : i32, i32
  }
  func.func @transform_3(%arg0: i32, %arg1: memref<22x8xi32, #tpu.memory_space<smem>>) -> (i32, i32) {
    %c0_i32 = arith.constant 0 : i32
    %c0_i32_0 = arith.constant 0 : i32
    %c0_i32_1 = arith.constant 0 : i32
    return %c0_i32, %c0_i32_0 : i32, i32
  }
}

</mosaic_0001>

<bundles_post_ra>
// kernel: conv_autoencoder_forward.1
= control target key start
LH: loop header
LB: loop body
LE: loop exit
PB: predicated region body
PF: predicated region fallthrough
CT: control target
= control target key end

     0   :  { %s26807_s0 = inlined_call_operand.hbm [shape: s32[22,8], index: 0, kind: input, shape index: {}]   ;;  %s26808_s1 = inlined_call_operand.vmem [shape: f32[2048,128], index: 1, kind: input, shape index: {}]   ;;  %s26809_s2 = inlined_call_operand.hbm [shape: bf16[550,128,128], index: 2, kind: input, shape index: {}]   ;;  %s26810_s3 = inlined_call_operand.hbm [shape: f32[176,128], index: 3, kind: input, shape index: {}]   ;;  %s26811_s4 = inlined_call_operand.vmem [shape: f32[2048,128], index: 4, kind: output, shape index: {}]  }
   0x1   :  { %s21214_s17 = scalar_lea.hbm %s26807_s0, 384 }
   0x2   :  { %p21215_p0 = scmp.ne.s32.totalorder %s26807_s0, %s21214_s17  ;;  %p21218_p1 = scmp.lt.u32.totalorder %s21214_s17, %s26807_s0 }
   0x4   :  { %p21220_p2 = pnand %p21218_p1, %p21215_p0 }
   0x6   :  { %21223 = shalt.err (!%p21220_p2)  }
   0x7   :  { %s21412_s22 = smov [#allocation5]  }
   0x8   :  { %10 = dma.hbm_to_smem %s26807_s0, 384, %s21412_s22, [#allocation4] }
   0x9   :  { %21342 = dma.done.wait [#allocation4], 384 }
   0xa   :  { %21343 = vsyncadd [#allocation4], 4294966912 }
   0xb   :  { %12 = sfence }
   0xc   :  { %13 = vsyncpa [#allocation7], 0 }
   0xd   :  { %15 = vsyncpa [#allocation7 + $0x1], 0 }
   0xe   :  { %16 = vsyncpa [#allocation9], 0  ;;  %s21457_s25 = smov 0   ;;  %s21459_s26 = smov 0  }
   0xf   :  { %s21461_s27 = smov 0   ;;  %s21463_s28 = smov 0  }
  0x10 LB: > { %s21476_s0 = sadd.s32 4294967295, %s21366_s28   ;;  %p63_p3 = scmp.ne.s32.totalorder %s21358_s26, %s21354_s25  ;;  %s21366_s28 = sphi %s21463_s28, %s27023_s28   ;;  %s21362_s27 = sphi %s21461_s27, %s27022_s27   ;;  %s21358_s26 = sphi %s21459_s26, %s27021_s26   ;;  %s21354_s25 = sphi %s21457_s25, %s27020_s25  }
  0x11   : > { %p26812_p4 = scmp.eq.s32.totalorder %s21476_s0, 0  ;;  %p14547_p5 = scmp.ge.s32.totalorder %s21366_s28, 1 }
  0x12   : > { %p116_p6 = scmp.lt.s32.totalorder %s21366_s28, 23  ;;  %s21413_s5 = smov [#allocation8]  }
  0x13   : > { %p21485_p8 = por %p26812_p4, %p63_p3  ;;  %s131_s6 = sshll.u32 %s21413_s5, 4  ;;  %s132_s6 = int_to_ptr.vmem [resolvable:$true] %s131_s6 }
  0x14   : > { %p21489_p9 = pnand %p14547_p5, %p116_p6  ;;  %s21502_s8 = sadd.s32 1, %s21366_s28  }
  0x15   : > { %s26815_s29 = scalar_select %p21485_p8, 1, 0 }
  0x16   : > { %s26816_s30 = scalar_select %p21489_p9, 1, 0 }
  0x17   : > { %p20688_p10 = pneg %p21489_p9  ;;  %s50_s9 = sadd.s32 1, %s21362_s27 }
  0x18   : > { %s47_s10 = ssub.s32 %s21366_s28, %s21502_s8  ;;  %s21224_s13 = scalar_lea.hbm %s26810_s3, 2816 }
  0x19   : > { %p21497_p11 = pnand %p20688_p10, %p26812_p4  ;;  %p21225_p12 = scmp.ne.s32.totalorder %s26810_s3, %s21224_s13 }
  0x1a   : > { %p21231_p2 = scmp.lt.u32.totalorder %s21224_s13, %s26810_s3 }
  0x1b   : > { %p21226_p13 = pneg %p21497_p11 }
  0x1d   : > { %p21227_p0 = pnand %p21226_p13, %p21225_p12 }
  0x1f   : > { %p21228_p1 = pneg %p21227_p0 }
  0x21   : > { %p21233_p3 = pnand %p21231_p2, %p21228_p1 }
  0x23   : > { %21236 = shalt.err (!%p21233_p3)
}
  0x24   : > { %s21237_s18 = scalar_lea.vmem %s132_s6, 2816  ;;  %p21245_p7 = scmp.lt.s32.totalorder %s132_s6, %s132_s6 }
  0x25   : > { %p21238_p5 = scmp.ne.s32.totalorder %s132_s6, %s21237_s18  ;;  %p21246_p4 = scmp.lt.s32.totalorder %s21237_s18, %s21237_s18 }
  0x27   : > { %p21240_p6 = pnand %p21238_p5, %p21226_p13  ;;  %p21247_p8 = por %p21246_p4, %p21245_p7 }
  0x29   : > { %p21241_p10 = pneg %p21240_p6 }
  0x2b   : > { %p21248_p9 = pnand %p21247_p8, %p21241_p10 }
  0x2d   : > { %21251 = shalt.err (!%p21248_p9)
}
  0x2e   : > { %s21414_s19 = smov 128   ;;  %s21415_s20 = smov 8  }
  0x2f   : > { %20691 = dma.hbm_to_vmem [thread:$0]  (!%p21497_p11), %s26810_s3, 2816, %s132_s6, [#allocation9], %s21414_s19, %s21414_s19, %s21415_s20  }
  0x30   : > { %p48_p12 = scmp.eq.s32.totalorder %s47_s10, 0  ;;  %p57_p13 = scmp.ne.s32.totalorder %s21362_s27, %s21358_s26 }
  0x31   : > { %p58_p4 = scmp.eq.s32.totalorder %s21366_s28, 0  ;;  %p20697_p7 = scmp.lt.s32.totalorder %s21366_s28, 22 }
  0x32   : > { %s21528_s23 = scalar_select %p48_p12, %s21362_s27, %s50_s9  }
  0x33   : > { %p59_p8 = por %p58_p4, %p57_p13  ;;  %s145_s24 = sand.u32 1, %s21362_s27  }
  0x34   : > { %s20678_s25 = smul.u32 1600, %s145_s24  ;;  %s21257_s16 = scalar_lea.hbm %s26809_s2, 563200 }
  0x35   : > { %s16789_s5 = smul.u32 25600, %s21366_s28  ;;  %p21532_p9 = pnand %p20697_p7, %p59_p8 }
  0x36   : > { %s149_s9 = scalar_lea.vmem [#allocation6], %s20678_s25  ;;  %s21543_s28 = scalar_lea.sflag [#allocation7], %s145_s24 }
  0x37   : > { %s21539_s6 = scalar_lea.hbm %s26809_s2, %s16789_s5  ;;  %s157_s10 = sshll.u32 %s149_s9, 4  ;;  %s21541_s10 = int_to_ptr.vmem [resolvable:$true] %s157_s10 }
  0x38   : > { %s21252_s13 = scalar_lea.hbm %s21539_s6, 25600  ;;  %p21254_p0 = pneg %p21532_p9 }
  0x39   : > { %p21253_p11 = scmp.ne.s32.totalorder %s21539_s6, %s21252_s13  ;;  %p21258_p3 = scmp.lt.u32.totalorder %s21539_s6, %s26809_s2 }
  0x3a   : > { %p21259_p5 = scmp.lt.u32.totalorder %s21257_s16, %s21252_s13  ;;  %p21261_p10 = scmp.lt.u32.totalorder %s21252_s13, %s21539_s6 }
  0x3b   : > { %p21255_p1 = pnand %p21254_p0, %p21253_p11 }
  0x3c   : > { %p21260_p6 = por %p21259_p5, %p21258_p3 }
  0x3d   : > { %p21256_p2 = pneg %p21255_p1 }
  0x3e   : > { %p21262_p12 = por %p21261_p10, %p21260_p6 }
  0x40   : > { %p21263_p13 = pnand %p21262_p12, %p21256_p2 }
  0x42   : > { %21266 = shalt.err (!%p21263_p13)
}
  0x43   : > { %s21267_s19 = scalar_lea.vmem %s21541_s10, 25600  ;;  %s21416_s20 = smov [#allocation6]  }
  0x44   : > { %p21268_p4 = scmp.ne.s32.totalorder %s21541_s10, %s21267_s19  ;;  %s21272_s21 = sshll.u32 %s21416_s20, 4  ;;  %s21273_s21 = int_to_ptr.vmem [resolvable:$false] %s21272_s21 }
  0x45   : > { %s21274_s22 = scalar_lea.vmem %s21273_s21, 51200  ;;  %p21275_p11 = scmp.lt.s32.totalorder %s21541_s10, %s21273_s21 }
  0x46   : > { %p21270_p7 = pnand %p21268_p4, %p21254_p0  ;;  %p21276_p1 = scmp.lt.s32.totalorder %s21274_s22, %s21267_s19 }
  0x48   : > { %p21271_p8 = pneg %p21270_p7  ;;  %p21277_p3 = por %p21276_p1, %p21275_p11 }
  0x4a   : > { %p21278_p5 = pnand %p21277_p3, %p21271_p8 }
  0x4c   : > { %21281 = shalt.err (!%p21278_p5)
}
  0x4d   : > { %s21417_s24 = smov 64   ;;  %s21418_s25 = smov 4  }
  0x4e   : > { %20695 = dma.hbm_to_vmem [thread:$0]  (!%p21532_p9), %s21539_s6, 25600, %s21541_s10, %s21543_s28, %s21417_s24, %s21417_s24, %s21418_s25  }
  0x4f   : > { %p26819_p0 = scmp.ne.s32.totalorder %s26816_s30, 0 }
  0x50   : > { %s171_s5 = sand.u32 (!%p26819_p0), 1, %s21358_s26   ;;  %p26820_p2 = scmp.ne.s32.totalorder (!%p26819_p0), %s26815_s29, 0 }
  0x51   : > { %169 = sbr.rel (%p26819_p0) target bundleno = 2563 (0xa03), region = 32  ;;  %s172_s7 = scalar_lea.sflag (!%p26819_p0), [#allocation7], %s171_s5 }
  0x52   : > { %s20679_s12 = smul.u32 (!%p26819_p0), 1600, %s171_s5 }
  0x54   : > { %s21574_s9 = scalar_lea.vmem (!%p26819_p0), [#allocation6], %s20679_s12 }
  0x58   : > { %21345 = dma.done.wait (%p26820_p2), %s172_s7, 25600  }
  0x59   : > { %21347 = vsyncadd (%p26820_p2), %s172_s7, 4294941696  ;;  %p26821_p6 = scmp.eq.s32.totalorder %s21476_s0, 0 }
  0x5b   : > { %21349 = dma.done.wait (%p26821_p6), [#allocation9], 2816   ;;  %p26822_p9 = pmov %p26821_p6 }
  0x5c   : > { %p26823_p10 = scmp.ne.s32.totalorder %s21476_s0, 0 }
  0x5d   : > { %21351 = vsyncadd (%p26822_p9), [#allocation9], 4294964480  ;;  %v21589_v0 = vld [vmem:[%s26808_s1] sm:$0xff] (!%p26823_p10)  ;;  %v21594_v1 = vld [vmem:[%s26808_s1 + $0x8] sm:$0xff] (!%p26823_p10)  ;;  %v21419_v3 = vmov (!%p26823_p10), 0.0  }
  0x5e   : > { %202 = sbr.rel (%p26823_p10) target bundleno = 256 (0x100), region = 44  ;;  %v21599_v2 = vld [vmem:[%s26808_s1 + $0x10] sm:$0xff] (!%p26823_p10)  ;;  %203 = vst [vmem:[#allocation2] sm:$0xff] (!%p26823_p10), %v21419_v3  ;;  %204 = vst [vmem:[#allocation2 + $0x8] sm:$0xff] (!%p26823_p10), %v21419_v3  ;;  %v274_v4 = vld [vmem:[%s26808_s1 + $0x18] sm:$0xff] (!%p26823_p10) }
  0x5f   : > { %205 = vst [vmem:[#allocation2 + $0x10] sm:$0xff] (!%p26823_p10), %v21419_v3  ;;  %206 = vst [vmem:[#allocation2 + $0x18] sm:$0xff] (!%p26823_p10), %v21419_v3  ;;  %v275_v5 = vld [vmem:[%s26808_s1 + $0x20] sm:$0xff] (!%p26823_p10)  ;;  %v276_v6 = vld [vmem:[%s26808_s1 + $0x28] sm:$0xff] (!%p26823_p10) }
  0x60   : > { %207 = vst [vmem:[#allocation2 + $0x20] sm:$0xff] (!%p26823_p10), %v21419_v3  ;;  %208 = vst [vmem:[#allocation2 + $0x28] sm:$0xff] (!%p26823_p10), %v21419_v3  ;;  %v277_v7 = vld [vmem:[%s26808_s1 + $0x30] sm:$0xff] (!%p26823_p10)  ;;  %v278_v8 = vld [vmem:[%s26808_s1 + $0x38] sm:$0xff] (!%p26823_p10) }
  0x61   : > { %209 = vst [vmem:[#allocation2 + $0x30] sm:$0xff] (!%p26823_p10), %v21419_v3  ;;  %210 = vst [vmem:[#allocation2 + $0x38] sm:$0xff] (!%p26823_p10), %v21419_v3  ;;  %v279_v9 = vld [vmem:[%s26808_s1 + $0x40] sm:$0xff] (!%p26823_p10)  ;;  %v280_v10 = vld [vmem:[%s26808_s1 + $0x48] sm:$0xff] (!%p26823_p10) }
  0x62   : > { %211 = vst [vmem:[#allocation2 + $0x40] sm:$0xff] (!%p26823_p10), %v21419_v3  ;;  %212 = vst [vmem:[#allocation2 + $0x48] sm:$0xff] (!%p26823_p10), %v21419_v3  ;;  %v281_v11 = vld [vmem:[%s26808_s1 + $0x50] sm:$0xff] (!%p26823_p10)  ;;  %v282_v12 = vld [vmem:[%s26808_s1 + $0x58] sm:$0xff] (!%p26823_p10) }
  0x63   : > { %213 = vst [vmem:[#allocation2 + $0x50] sm:$0xff] (!%p26823_p10), %v21419_v3  ;;  %214 = vst [vmem:[#allocation2 + $0x58] sm:$0xff] (!%p26823_p10), %v21419_v3  ;;  %v283_v13 = vld [vmem:[%s26808_s1 + $0x60] sm:$0xff] (!%p26823_p10)  ;;  %v284_v14 = vld [vmem:[%s26808_s1 + $0x68] sm:$0xff] (!%p26823_p10) }
  0x64   : > { %215 = vst [vmem:[#allocation2 + $0x60] sm:$0xff] (!%p26823_p10), %v21419_v3  ;;  %216 = vst [vmem:[#allocation2 + $0x68] sm:$0xff] (!%p26823_p10), %v21419_v3  ;;  %v285_v15 = vld [vmem:[%s26808_s1 + $0x70] sm:$0xff] (!%p26823_p10)  ;;  %v286_v16 = vld [vmem:[%s26808_s1 + $0x78] sm:$0xff] (!%p26823_p10) }
  0x65   : > { %217 = vst [vmem:[#allocation2 + $0x70] sm:$0xff] %v21419_v3  ;;  %218 = vst [vmem:[#allocation2 + $0x78] sm:$0xff] %v21419_v3  ;;  %v287_v17 = vld [vmem:[%s26808_s1 + $0x80] sm:$0xff]  ;;  %v288_v18 = vld [vmem:[%s26808_s1 + $0x88] sm:$0xff] }
  0x66   : > { %219 = vst [vmem:[#allocation2 + $0x80] sm:$0xff] %v21419_v3  ;;  %220 = vst [vmem:[#allocation2 + $0x888] sm:$0xff] %v21419_v3  ;;  %v289_v19 = vld [vmem:[%s26808_s1 + $0x90] sm:$0xff]  ;;  %v290_v20 = vld [vmem:[%s26808_s1 + $0x98] sm:$0xff] }
  0x67   : > { %221 = vst [vmem:[#allocation2 + $0x890] sm:$0xff] %v21419_v3  ;;  %222 = vst [vmem:[#allocation2 + $0x898] sm:$0xff] %v21419_v3  ;;  %v291_v21 = vld [vmem:[%s26808_s1 + $0xa0] sm:$0xff]  ;;  %v292_v22 = vld [vmem:[%s26808_s1 + $0xa8] sm:$0xff] }
  0x68   : > { %223 = vst [vmem:[#allocation2 + $0x8a0] sm:$0xff] %v21419_v3  ;;  %224 = vst [vmem:[#allocation2 + $0x8a8] sm:$0xff] %v21419_v3  ;;  %v293_v23 = vld [vmem:[%s26808_s1 + $0xb0] sm:$0xff]  ;;  %v294_v24 = vld [vmem:[%s26808_s1 + $0xb8] sm:$0xff] }
  0x69   : > { %225 = vst [vmem:[#allocation2 + $0x8b0] sm:$0xff] %v21419_v3  ;;  %226 = vst [vmem:[#allocation2 + $0x8b8] sm:$0xff] %v21419_v3  ;;  %v295_v25 = vld [vmem:[%s26808_s1 + $0xc0] sm:$0xff]  ;;  %v296_v26 = vld [vmem:[%s26808_s1 + $0xc8] sm:$0xff] }
  0x6a   : > { %227 = vst [vmem:[#allocation2 + $0x8c0] sm:$0xff] %v21419_v3  ;;  %228 = vst [vmem:[#allocation2 + $0x8c8] sm:$0xff] %v21419_v3  ;;  %v297_v27 = vld [vmem:[%s26808_s1 + $0xd0] sm:$0xff]  ;;  %v298_v28 = vld [vmem:[%s26808_s1 + $0xd8] sm:$0xff] }
  0x6b   : > { %229 = vst [vmem:[#allocation2 + $0x8d0] sm:$0xff] %v21419_v3  ;;  %230 = vst [vmem:[#allocation2 + $0x8d8] sm:$0xff] %v21419_v3  ;;  %v299_v29 = vld [vmem:[%s26808_s1 + $0xe0] sm:$0xff]  ;;  %v300_v30 = vld [vmem:[%s26808_s1 + $0xe8] sm:$0xff] }
  0x6c   : > { %231 = vst [vmem:[#allocation2 + $0x8e0] sm:$0xff] %v21419_v3  ;;  %232 = vst [vmem:[#allocation2 + $0x8e8] sm:$0xff] %v21419_v3  ;;  %v301_v31 = vld [vmem:[%s26808_s1 + $0xf0] sm:$0xff]  ;;  %v302_v32 = vld [vmem:[%s26808_s1 + $0xf8] sm:$0xff] }
  0x6d   : > { %233 = vst [vmem:[#allocation2 + $0x8f0] sm:$0xff] %v21419_v3  ;;  %234 = vst [vmem:[#allocation2 + $0x8f8] sm:$0xff] %v21419_v3  ;;  %v303_v33 = vld [vmem:[%s26808_s1 + $0x100] sm:$0xff]  ;;  %v304_v34 = vld [vmem:[%s26808_s1 + $0x108] sm:$0xff] }
  0x6e   : > { %235 = vst [vmem:[#allocation2 + $0x900] sm:$0xff] %v21419_v3  ;;  %236 = vst [vmem:[#allocation2 + $0x908] sm:$0xff] %v21419_v3  ;;  %v305_v35 = vld [vmem:[%s26808_s1 + $0x110] sm:$0xff]  ;;  %v306_v36 = vld [vmem:[%s26808_s1 + $0x118] sm:$0xff] }
  0x6f   : > { %237 = vst [vmem:[#allocation2 + $0x910] sm:$0xff] %v21419_v3  ;;  %238 = vst [vmem:[#allocation2 + $0x918] sm:$0xff] %v21419_v3  ;;  %v307_v37 = vld [vmem:[%s26808_s1 + $0x120] sm:$0xff]  ;;  %v308_v38 = vld [vmem:[%s26808_s1 + $0x128] sm:$0xff] }
  0x70   : > { %239 = vst [vmem:[#allocation2 + $0x920] sm:$0xff] %v21419_v3  ;;  %240 = vst [vmem:[#allocation2 + $0x928] sm:$0xff] %v21419_v3  ;;  %v309_v39 = vld [vmem:[%s26808_s1 + $0x130] sm:$0xff]  ;;  %v310_v40 = vld [vmem:[%s26808_s1 + $0x138] sm:$0xff] }
  0x71   : > { %241 = vst [vmem:[#allocation2 + $0x930] sm:$0xff] %v21419_v3  ;;  %242 = vst [vmem:[#allocation2 + $0x938] sm:$0xff] %v21419_v3  ;;  %v311_v41 = vld [vmem:[%s26808_s1 + $0x140] sm:$0xff]  ;;  %v312_v42 = vld [vmem:[%s26808_s1 + $0x148] sm:$0xff] }
  0x72   : > { %243 = vst [vmem:[#allocation2 + $0x940] sm:$0xff] %v21419_v3  ;;  %244 = vst [vmem:[#allocation2 + $0x948] sm:$0xff] %v21419_v3  ;;  %v313_v43 = vld [vmem:[%s26808_s1 + $0x150] sm:$0xff]  ;;  %v314_v44 = vld [vmem:[%s26808_s1 + $0x158] sm:$0xff] }
  0x73   : > { %245 = vst [vmem:[#allocation2 + $0x950] sm:$0xff] %v21419_v3  ;;  %246 = vst [vmem:[#allocation2 + $0x958] sm:$0xff] %v21419_v3  ;;  %v315_v45 = vld [vmem:[%s26808_s1 + $0x160] sm:$0xff]  ;;  %v316_v46 = vld [vmem:[%s26808_s1 + $0x168] sm:$0xff] }
  0x74   : > { %247 = vst [vmem:[#allocation2 + $0x960] sm:$0xff] %v21419_v3  ;;  %248 = vst [vmem:[#allocation2 + $0x968] sm:$0xff] %v21419_v3  ;;  %v317_v47 = vld [vmem:[%s26808_s1 + $0x170] sm:$0xff]  ;;  %v318_v48 = vld [vmem:[%s26808_s1 + $0x178] sm:$0xff] }
  0x75   : > { %249 = vst [vmem:[#allocation2 + $0x970] sm:$0xff] %v21419_v3  ;;  %250 = vst [vmem:[#allocation2 + $0x978] sm:$0xff] %v21419_v3  ;;  %v319_v49 = vld [vmem:[%s26808_s1 + $0x180] sm:$0xff]  ;;  %v320_v50 = vld [vmem:[%s26808_s1 + $0x188] sm:$0xff] }
  0x76   : > { %251 = vst [vmem:[#allocation2 + $0x980] sm:$0xff] %v21419_v3  ;;  %252 = vst [vmem:[#allocation2 + $0x988] sm:$0xff] %v21419_v3  ;;  %v321_v51 = vld [vmem:[%s26808_s1 + $0x190] sm:$0xff]  ;;  %v322_v52 = vld [vmem:[%s26808_s1 + $0x198] sm:$0xff] }
  0x77   : > { %253 = vst [vmem:[#allocation2 + $0x990] sm:$0xff] %v21419_v3  ;;  %254 = vst [vmem:[#allocation2 + $0x1198] sm:$0xff] %v21419_v3  ;;  %v323_v53 = vld [vmem:[%s26808_s1 + $0x1a0] sm:$0xff]  ;;  %v324_v54 = vld [vmem:[%s26808_s1 + $0x1a8] sm:$0xff] }
  0x78   : > { %255 = vst [vmem:[#allocation2 + $0x11a0] sm:$0xff] %v21419_v3  ;;  %256 = vst [vmem:[#allocation2 + $0x11a8] sm:$0xff] %v21419_v3  ;;  %v325_v55 = vld [vmem:[%s26808_s1 + $0x1b0] sm:$0xff]  ;;  %v326_v56 = vld [vmem:[%s26808_s1 + $0x1b8] sm:$0xff] }
  0x79   : > { %257 = vst [vmem:[#allocation2 + $0x11b0] sm:$0xff] %v21419_v3  ;;  %258 = vst [vmem:[#allocation2 + $0x11b8] sm:$0xff] %v21419_v3  ;;  %v327_v57 = vld [vmem:[%s26808_s1 + $0x1c0] sm:$0xff]  ;;  %v328_v58 = vld [vmem:[%s26808_s1 + $0x1c8] sm:$0xff] }
  0x7a   : > { %259 = vst [vmem:[#allocation2 + $0x11c0] sm:$0xff] %v21419_v3  ;;  %260 = vst [vmem:[#allocation2 + $0x11c8] sm:$0xff] %v21419_v3  ;;  %v329_v59 = vld [vmem:[%s26808_s1 + $0x1d0] sm:$0xff]  ;;  %v330_v60 = vld [vmem:[%s26808_s1 + $0x1d8] sm:$0xff] }
  0x7b   : > { %261 = vst [vmem:[#allocation2 + $0x11d0] sm:$0xff] %v21419_v3  ;;  %262 = vst [vmem:[#allocation2 + $0x11d8] sm:$0xff] %v21419_v3  ;;  %v331_v61 = vld [vmem:[%s26808_s1 + $0x1e0] sm:$0xff]  ;;  %v332_v62 = vld [vmem:[%s26808_s1 + $0x1e8] sm:$0xff] }
  0x7c   : > { %263 = vst [vmem:[#allocation2 + $0x11e0] sm:$0xff] %v21419_v3  ;;  %264 = vst [vmem:[#allocation2 + $0x11e8] sm:$0xff] %v21419_v3  ;;  %v333_v63 = vld [vmem:[%s26808_s1 + $0x1f0] sm:$0xff] }
  0x7d   : > { %265 = vst [vmem:[#allocation2 + $0x11f0] sm:$0xff] %v21419_v3  ;;  %266 = vst [vmem:[#allocation2 + $0x11f8] sm:$0xff] %v21419_v3 }
  0x7e   : > { %267 = vst [vmem:[#allocation2 + $0x1200] sm:$0xff] %v21419_v3  ;;  %268 = vst [vmem:[#allocation2 + $0x1208] sm:$0xff] %v21419_v3 }
  0x7f   : > { %269 = vst [vmem:[#allocation2 + $0x1210] sm:$0xff] %v21419_v3  ;;  %270 = vst [vmem:[#allocation2 + $0x1218] sm:$0xff] %v21419_v3  ;;  %v337_v3 = vld [vmem:[%s26808_s1 + $0x210] sm:$0xff] }
  0x80   : > { %527 = vst [vmem:[#allocation2 + $0x88] sm:$0xff] %v21589_v0  ;;  %528 = vst [vmem:[#allocation2 + $0x90] sm:$0xff] %v21594_v1  ;;  %v334_v0 = vld [vmem:[%s26808_s1 + $0x1f8] sm:$0xff]  ;;  %v335_v1 = vld [vmem:[%s26808_s1 + $0x200] sm:$0xff] }
  0x81   : > { %529 = vst [vmem:[#allocation2 + $0x98] sm:$0xff] %v21599_v2  ;;  %530 = vst [vmem:[#allocation2 + $0xa0] sm:$0xff] %v274_v4  ;;  %v336_v2 = vld [vmem:[%s26808_s1 + $0x208] sm:$0xff]  ;;  %v338_v4 = vld [vmem:[%s26808_s1 + $0x218] sm:$0xff] }
  0x82   : > { %531 = vst [vmem:[#allocation2 + $0xa8] sm:$0xff] %v275_v5  ;;  %532 = vst [vmem:[#allocation2 + $0xb0] sm:$0xff] %v276_v6  ;;  %v339_v5 = vld [vmem:[%s26808_s1 + $0x220] sm:$0xff]  ;;  %v340_v6 = vld [vmem:[%s26808_s1 + $0x228] sm:$0xff] }
  0x83   : > { %533 = vst [vmem:[#allocation2 + $0xb8] sm:$0xff] %v277_v7  ;;  %534 = vst [vmem:[#allocation2 + $0xc0] sm:$0xff] %v278_v8  ;;  %v341_v7 = vld [vmem:[%s26808_s1 + $0x230] sm:$0xff]  ;;  %v342_v8 = vld [vmem:[%s26808_s1 + $0x238] sm:$0xff] }
  0x84   : > { %535 = vst [vmem:[#allocation2 + $0xc8] sm:$0xff] %v279_v9  ;;  %536 = vst [vmem:[#allocation2 + $0xd0] sm:$0xff] %v280_v10  ;;  %v343_v9 = vld [vmem:[%s26808_s1 + $0x240] sm:$0xff]  ;;  %v344_v10 = vld [vmem:[%s26808_s1 + $0x248] sm:$0xff] }
  0x85   : > { %537 = vst [vmem:[#allocation2 + $0xd8] sm:$0xff] %v281_v11  ;;  %538 = vst [vmem:[#allocation2 + $0xe0] sm:$0xff] %v282_v12  ;;  %v345_v11 = vld [vmem:[%s26808_s1 + $0x250] sm:$0xff]  ;;  %v346_v12 = vld [vmem:[%s26808_s1 + $0x258] sm:$0xff] }
  0x86   : > { %539 = vst [vmem:[#allocation2 + $0xe8] sm:$0xff] %v283_v13  ;;  %540 = vst [vmem:[#allocation2 + $0xf0] sm:$0xff] %v284_v14  ;;  %v347_v13 = vld [vmem:[%s26808_s1 + $0x260] sm:$0xff]  ;;  %v348_v14 = vld [vmem:[%s26808_s1 + $0x268] sm:$0xff] }
  0x87   : > { %541 = vst [vmem:[#allocation2 + $0xf8] sm:$0xff] %v285_v15  ;;  %542 = vst [vmem:[#allocation2 + $0x100] sm:$0xff] %v286_v16  ;;  %v349_v15 = vld [vmem:[%s26808_s1 + $0x270] sm:$0xff]  ;;  %v350_v16 = vld [vmem:[%s26808_s1 + $0x278] sm:$0xff] }
  0x88   : > { %543 = vst [vmem:[#allocation2 + $0x108] sm:$0xff] %v287_v17  ;;  %544 = vst [vmem:[#allocation2 + $0x110] sm:$0xff] %v288_v18  ;;  %v351_v17 = vld [vmem:[%s26808_s1 + $0x280] sm:$0xff]  ;;  %v352_v18 = vld [vmem:[%s26808_s1 + $0x288] sm:$0xff] }
  0x89   : > { %545 = vst [vmem:[#allocation2 + $0x118] sm:$0xff] %v289_v19  ;;  %546 = vst [vmem:[#allocation2 + $0x120] sm:$0xff] %v290_v20  ;;  %v353_v19 = vld [vmem:[%s26808_s1 + $0x290] sm:$0xff]  ;;  %v354_v20 = vld [vmem:[%s26808_s1 + $0x298] sm:$0xff] }
  0x8a   : > { %547 = vst [vmem:[#allocation2 + $0x128] sm:$0xff] %v291_v21  ;;  %548 = vst [vmem:[#allocation2 + $0x130] sm:$0xff] %v292_v22  ;;  %v355_v21 = vld [vmem:[%s26808_s1 + $0x2a0] sm:$0xff]  ;;  %v356_v22 = vld [vmem:[%s26808_s1 + $0x2a8] sm:$0xff] }
  0x8b   : > { %549 = vst [vmem:[#allocation2 + $0x138] sm:$0xff] %v293_v23  ;;  %550 = vst [vmem:[#allocation2 + $0x140] sm:$0xff] %v294_v24  ;;  %v357_v23 = vld [vmem:[%s26808_s1 + $0x2b0] sm:$0xff]  ;;  %v358_v24 = vld [vmem:[%s26808_s1 + $0x2b8] sm:$0xff] }
  0x8c   : > { %551 = vst [vmem:[#allocation2 + $0x148] sm:$0xff] %v295_v25  ;;  %552 = vst [vmem:[#allocation2 + $0x150] sm:$0xff] %v296_v26  ;;  %v359_v25 = vld [vmem:[%s26808_s1 + $0x2c0] sm:$0xff]  ;;  %v360_v26 = vld [vmem:[%s26808_s1 + $0x2c8] sm:$0xff] }
  0x8d   : > { %553 = vst [vmem:[#allocation2 + $0x158] sm:$0xff] %v297_v27  ;;  %554 = vst [vmem:[#allocation2 + $0x160] sm:$0xff] %v298_v28  ;;  %v361_v27 = vld [vmem:[%s26808_s1 + $0x2d0] sm:$0xff]  ;;  %v362_v28 = vld [vmem:[%s26808_s1 + $0x2d8] sm:$0xff] }
  0x8e   : > { %555 = vst [vmem:[#allocation2 + $0x168] sm:$0xff] %v299_v29  ;;  %556 = vst [vmem:[#allocation2 + $0x170] sm:$0xff] %v300_v30  ;;  %v363_v29 = vld [vmem:[%s26808_s1 + $0x2e0] sm:$0xff]  ;;  %v364_v30 = vld [vmem:[%s26808_s1 + $0x2e8] sm:$0xff] }
  0x8f   : > { %557 = vst [vmem:[#allocation2 + $0x178] sm:$0xff] %v301_v31  ;;  %558 = vst [vmem:[#allocation2 + $0x180] sm:$0xff] %v302_v32  ;;  %v365_v31 = vld [vmem:[%s26808_s1 + $0x2f0] sm:$0xff]  ;;  %v366_v32 = vld [vmem:[%s26808_s1 + $0x2f8] sm:$0xff] }
  0x90   : > { %559 = vst [vmem:[#allocation2 + $0x188] sm:$0xff] %v303_v33  ;;  %560 = vst [vmem:[#allocation2 + $0x190] sm:$0xff] %v304_v34  ;;  %v367_v33 = vld [vmem:[%s26808_s1 + $0x300] sm:$0xff]  ;;  %v368_v34 = vld [vmem:[%s26808_s1 + $0x308] sm:$0xff] }
  0x91   : > { %561 = vst [vmem:[#allocation2 + $0x198] sm:$0xff] %v305_v35  ;;  %562 = vst [vmem:[#allocation2 + $0x1a0] sm:$0xff] %v306_v36  ;;  %v369_v35 = vld [vmem:[%s26808_s1 + $0x310] sm:$0xff]  ;;  %v370_v36 = vld [vmem:[%s26808_s1 + $0x318] sm:$0xff] }
  0x92   : > { %563 = vst [vmem:[#allocation2 + $0x1a8] sm:$0xff] %v307_v37  ;;  %564 = vst [vmem:[#allocation2 + $0x1b0] sm:$0xff] %v308_v38  ;;  %v371_v37 = vld [vmem:[%s26808_s1 + $0x320] sm:$0xff]  ;;  %v372_v38 = vld [vmem:[%s26808_s1 + $0x328] sm:$0xff] }
  0x93   : > { %565 = vst [vmem:[#allocation2 + $0x1b8] sm:$0xff] %v309_v39  ;;  %566 = vst [vmem:[#allocation2 + $0x1c0] sm:$0xff] %v310_v40  ;;  %v373_v39 = vld [vmem:[%s26808_s1 + $0x330] sm:$0xff]  ;;  %v374_v40 = vld [vmem:[%s26808_s1 + $0x338] sm:$0xff] }
  0x94   : > { %567 = vst [vmem:[#allocation2 + $0x1c8] sm:$0xff] %v311_v41  ;;  %568 = vst [vmem:[#allocation2 + $0x1d0] sm:$0xff] %v312_v42  ;;  %v375_v41 = vld [vmem:[%s26808_s1 + $0x340] sm:$0xff]  ;;  %v376_v42 = vld [vmem:[%s26808_s1 + $0x348] sm:$0xff] }
  0x95   : > { %569 = vst [vmem:[#allocation2 + $0x1d8] sm:$0xff] %v313_v43  ;;  %570 = vst [vmem:[#allocation2 + $0x1e0] sm:$0xff] %v314_v44  ;;  %v377_v43 = vld [vmem:[%s26808_s1 + $0x350] sm:$0xff]  ;;  %v378_v44 = vld [vmem:[%s26808_s1 + $0x358] sm:$0xff] }
  0x96   : > { %571 = vst [vmem:[#allocation2 + $0x1e8] sm:$0xff] %v315_v45  ;;  %572 = vst [vmem:[#allocation2 + $0x1f0] sm:$0xff] %v316_v46  ;;  %v379_v45 = vld [vmem:[%s26808_s1 + $0x360] sm:$0xff]  ;;  %v380_v46 = vld [vmem:[%s26808_s1 + $0x368] sm:$0xff] }
  0x97   : > { %573 = vst [vmem:[#allocation2 + $0x1f8] sm:$0xff] %v317_v47  ;;  %574 = vst [vmem:[#allocation2 + $0x200] sm:$0xff] %v318_v48  ;;  %v381_v47 = vld [vmem:[%s26808_s1 + $0x370] sm:$0xff]  ;;  %v382_v48 = vld [vmem:[%s26808_s1 + $0x378] sm:$0xff] }
  0x98   : > { %575 = vst [vmem:[#allocation2 + $0x208] sm:$0xff] %v319_v49  ;;  %576 = vst [vmem:[#allocation2 + $0x210] sm:$0xff] %v320_v50  ;;  %v383_v49 = vld [vmem:[%s26808_s1 + $0x380] sm:$0xff]  ;;  %v384_v50 = vld [vmem:[%s26808_s1 + $0x388] sm:$0xff] }
  0x99   : > { %577 = vst [vmem:[#allocation2 + $0x218] sm:$0xff] %v321_v51  ;;  %578 = vst [vmem:[#allocation2 + $0x220] sm:$0xff] %v322_v52  ;;  %v385_v51 = vld [vmem:[%s26808_s1 + $0x390] sm:$0xff]  ;;  %v386_v52 = vld [vmem:[%s26808_s1 + $0x398] sm:$0xff] }
  0x9a   : > { %579 = vst [vmem:[#allocation2 + $0x228] sm:$0xff] %v323_v53  ;;  %580 = vst [vmem:[#allocation2 + $0x230] sm:$0xff] %v324_v54  ;;  %v387_v53 = vld [vmem:[%s26808_s1 + $0x3a0] sm:$0xff]  ;;  %v388_v54 = vld [vmem:[%s26808_s1 + $0x3a8] sm:$0xff] }
  0x9b   : > { %581 = vst [vmem:[#allocation2 + $0x238] sm:$0xff] %v325_v55  ;;  %582 = vst [vmem:[#allocation2 + $0x240] sm:$0xff] %v326_v56  ;;  %v389_v55 = vld [vmem:[%s26808_s1 + $0x3b0] sm:$0xff]  ;;  %v390_v56 = vld [vmem:[%s26808_s1 + $0x3b8] sm:$0xff] }
  0x9c   : > { %583 = vst [vmem:[#allocation2 + $0x248] sm:$0xff] %v327_v57  ;;  %584 = vst [vmem:[#allocation2 + $0x250] sm:$0xff] %v328_v58  ;;  %v391_v57 = vld [vmem:[%s26808_s1 + $0x3c0] sm:$0xff]  ;;  %v392_v58 = vld [vmem:[%s26808_s1 + $0x3c8] sm:$0xff] }
  0x9d   : > { %585 = vst [vmem:[#allocation2 + $0x258] sm:$0xff] %v329_v59  ;;  %586 = vst [vmem:[#allocation2 + $0x260] sm:$0xff] %v330_v60  ;;  %v393_v59 = vld [vmem:[%s26808_s1 + $0x3d0] sm:$0xff]  ;;  %v394_v60 = vld [vmem:[%s26808_s1 + $0x3d8] sm:$0xff] }
  0x9e   : > { %587 = vst [vmem:[#allocation2 + $0x268] sm:$0xff] %v331_v61  ;;  %588 = vst [vmem:[#allocation2 + $0x270] sm:$0xff] %v332_v62  ;;  %v395_v61 = vld [vmem:[%s26808_s1 + $0x3e0] sm:$0xff]  ;;  %v396_v62 = vld [vmem:[%s26808_s1 + $0x3e8] sm:$0xff] }
  0x9f   : > { %589 = vst [vmem:[#allocation2 + $0x278] sm:$0xff] %v333_v63  ;;  %590 = vst [vmem:[#allocation2 + $0x280] sm:$0xff] %v334_v0  ;;  %v397_v63 = vld [vmem:[%s26808_s1 + $0x3f0] sm:$0xff]  ;;  %v398_v0 = vld [vmem:[%s26808_s1 + $0x3f8] sm:$0xff] }
  0xa0   : > { %591 = vst [vmem:[#allocation2 + $0x288] sm:$0xff] %v335_v1  ;;  %592 = vst [vmem:[#allocation2 + $0x290] sm:$0xff] %v336_v2  ;;  %v399_v1 = vld [vmem:[%s26808_s1 + $0x400] sm:$0xff]  ;;  %v400_v2 = vld [vmem:[%s26808_s1 + $0x408] sm:$0xff] }
  0xa1   : > { %593 = vst [vmem:[#allocation2 + $0x298] sm:$0xff] %v337_v3  ;;  %594 = vst [vmem:[#allocation2 + $0x2a0] sm:$0xff] %v338_v4  ;;  %v401_v3 = vld [vmem:[%s26808_s1 + $0x410] sm:$0xff]  ;;  %v402_v4 = vld [vmem:[%s26808_s1 + $0x418] sm:$0xff] }
  0xa2   : > { %595 = vst [vmem:[#allocation2 + $0x2a8] sm:$0xff] %v339_v5  ;;  %596 = vst [vmem:[#allocation2 + $0x2b0] sm:$0xff] %v340_v6  ;;  %v403_v5 = vld [vmem:[%s26808_s1 + $0x420] sm:$0xff]  ;;  %v404_v6 = vld [vmem:[%s26808_s1 + $0x428] sm:$0xff] }
  0xa3   : > { %597 = vst [vmem:[#allocation2 + $0x2b8] sm:$0xff] %v341_v7  ;;  %598 = vst [vmem:[#allocation2 + $0x2c0] sm:$0xff] %v342_v8  ;;  %v405_v7 = vld [vmem:[%s26808_s1 + $0x430] sm:$0xff]  ;;  %v406_v8 = vld [vmem:[%s26808_s1 + $0x438] sm:$0xff] }
  0xa4   : > { %599 = vst [vmem:[#allocation2 + $0x2c8] sm:$0xff] %v343_v9  ;;  %600 = vst [vmem:[#allocation2 + $0x2d0] sm:$0xff] %v344_v10  ;;  %v407_v9 = vld [vmem:[%s26808_s1 + $0x440] sm:$0xff]  ;;  %v408_v10 = vld [vmem:[%s26808_s1 + $0x448] sm:$0xff] }
  0xa5   : > { %601 = vst [vmem:[#allocation2 + $0x2d8] sm:$0xff] %v345_v11  ;;  %602 = vst [vmem:[#allocation2 + $0x2e0] sm:$0xff] %v346_v12  ;;  %v409_v11 = vld [vmem:[%s26808_s1 + $0x450] sm:$0xff]  ;;  %v410_v12 = vld [vmem:[%s26808_s1 + $0x458] sm:$0xff] }
  0xa6   : > { %603 = vst [vmem:[#allocation2 + $0x2e8] sm:$0xff] %v347_v13  ;;  %604 = vst [vmem:[#allocation2 + $0x2f0] sm:$0xff] %v348_v14  ;;  %v411_v13 = vld [vmem:[%s26808_s1 + $0x460] sm:$0xff]  ;;  %v412_v14 = vld [vmem:[%s26808_s1 + $0x468] sm:$0xff] }
  0xa7   : > { %605 = vst [vmem:[#allocation2 + $0x2f8] sm:$0xff] %v349_v15  ;;  %606 = vst [vmem:[#allocation2 + $0x300] sm:$0xff] %v350_v16  ;;  %v413_v15 = vld [vmem:[%s26808_s1 + $0x470] sm:$0xff]  ;;  %v414_v16 = vld [vmem:[%s26808_s1 + $0x478] sm:$0xff] }
  0xa8   : > { %607 = vst [vmem:[#allocation2 + $0x308] sm:$0xff] %v351_v17  ;;  %608 = vst [vmem:[#allocation2 + $0x310] sm:$0xff] %v352_v18  ;;  %v415_v17 = vld [vmem:[%s26808_s1 + $0x480] sm:$0xff]  ;;  %v416_v18 = vld [vmem:[%s26808_s1 + $0x488] sm:$0xff] }
  0xa9   : > { %609 = vst [vmem:[#allocation2 + $0x318] sm:$0xff] %v353_v19  ;;  %610 = vst [vmem:[#allocation2 + $0x320] sm:$0xff] %v354_v20  ;;  %v417_v19 = vld [vmem:[%s26808_s1 + $0x490] sm:$0xff]  ;;  %v418_v20 = vld [vmem:[%s26808_s1 + $0x498] sm:$0xff] }
  0xaa   : > { %611 = vst [vmem:[#allocation2 + $0x328] sm:$0xff] %v355_v21  ;;  %612 = vst [vmem:[#allocation2 + $0x330] sm:$0xff] %v356_v22  ;;  %v419_v21 = vld [vmem:[%s26808_s1 + $0x4a0] sm:$0xff]  ;;  %v420_v22 = vld [vmem:[%s26808_s1 + $0x4a8] sm:$0xff] }
  0xab   : > { %613 = vst [vmem:[#allocation2 + $0x338] sm:$0xff] %v357_v23  ;;  %614 = vst [vmem:[#allocation2 + $0x340] sm:$0xff] %v358_v24  ;;  %v421_v23 = vld [vmem:[%s26808_s1 + $0x4b0] sm:$0xff]  ;;  %v422_v24 = vld [vmem:[%s26808_s1 + $0x4b8] sm:$0xff] }
  0xac   : > { %615 = vst [vmem:[#allocation2 + $0x348] sm:$0xff] %v359_v25  ;;  %616 = vst [vmem:[#allocation2 + $0x350] sm:$0xff] %v360_v26  ;;  %v423_v25 = vld [vmem:[%s26808_s1 + $0x4c0] sm:$0xff]  ;;  %v424_v26 = vld [vmem:[%s26808_s1 + $0x4c8] sm:$0xff] }
  0xad   : > { %617 = vst [vmem:[#allocation2 + $0x358] sm:$0xff] %v361_v27  ;;  %618 = vst [vmem:[#allocation2 + $0x360] sm:$0xff] %v362_v28  ;;  %v425_v27 = vld [vmem:[%s26808_s1 + $0x4d0] sm:$0xff]  ;;  %v426_v28 = vld [vmem:[%s26808_s1 + $0x4d8] sm:$0xff] }
  0xae   : > { %619 = vst [vmem:[#allocation2 + $0x368] sm:$0xff] %v363_v29  ;;  %620 = vst [vmem:[#allocation2 + $0x370] sm:$0xff] %v364_v30  ;;  %v427_v29 = vld [vmem:[%s26808_s1 + $0x4e0] sm:$0xff]  ;;  %v428_v30 = vld [vmem:[%s26808_s1 + $0x4e8] sm:$0xff] }
  0xaf   : > { %621 = vst [vmem:[#allocation2 + $0x378] sm:$0xff] %v365_v31  ;;  %622 = vst [vmem:[#allocation2 + $0x380] sm:$0xff] %v366_v32  ;;  %v429_v31 = vld [vmem:[%s26808_s1 + $0x4f0] sm:$0xff]  ;;  %v430_v32 = vld [vmem:[%s26808_s1 + $0x4f8] sm:$0xff] }
  0xb0   : > { %623 = vst [vmem:[#allocation2 + $0x388] sm:$0xff] %v367_v33  ;;  %624 = vst [vmem:[#allocation2 + $0x390] sm:$0xff] %v368_v34  ;;  %v431_v33 = vld [vmem:[%s26808_s1 + $0x500] sm:$0xff]  ;;  %v432_v34 = vld [vmem:[%s26808_s1 + $0x508] sm:$0xff] }
  0xb1   : > { %625 = vst [vmem:[#allocation2 + $0x398] sm:$0xff] %v369_v35  ;;  %626 = vst [vmem:[#allocation2 + $0x3a0] sm:$0xff] %v370_v36  ;;  %v433_v35 = vld [vmem:[%s26808_s1 + $0x510] sm:$0xff]  ;;  %v434_v36 = vld [vmem:[%s26808_s1 + $0x518] sm:$0xff] }
  0xb2   : > { %627 = vst [vmem:[#allocation2 + $0x3a8] sm:$0xff] %v371_v37  ;;  %628 = vst [vmem:[#allocation2 + $0x3b0] sm:$0xff] %v372_v38  ;;  %v435_v37 = vld [vmem:[%s26808_s1 + $0x520] sm:$0xff]  ;;  %v436_v38 = vld [vmem:[%s26808_s1 + $0x528] sm:$0xff] }
  0xb3   : > { %629 = vst [vmem:[#allocation2 + $0x3b8] sm:$0xff] %v373_v39  ;;  %630 = vst [vmem:[#allocation2 + $0x3c0] sm:$0xff] %v374_v40  ;;  %v437_v39 = vld [vmem:[%s26808_s1 + $0x530] sm:$0xff]  ;;  %v438_v40 = vld [vmem:[%s26808_s1 + $0x538] sm:$0xff] }
  0xb4   : > { %631 = vst [vmem:[#allocation2 + $0x3c8] sm:$0xff] %v375_v41  ;;  %632 = vst [vmem:[#allocation2 + $0x3d0] sm:$0xff] %v376_v42  ;;  %v439_v41 = vld [vmem:[%s26808_s1 + $0x540] sm:$0xff]  ;;  %v440_v42 = vld [vmem:[%s26808_s1 + $0x548] sm:$0xff] }
  0xb5   : > { %633 = vst [vmem:[#allocation2 + $0x3d8] sm:$0xff] %v377_v43  ;;  %634 = vst [vmem:[#allocation2 + $0x3e0] sm:$0xff] %v378_v44  ;;  %v441_v43 = vld [vmem:[%s26808_s1 + $0x550] sm:$0xff]  ;;  %v442_v44 = vld [vmem:[%s26808_s1 + $0x558] sm:$0xff] }
  0xb6   : > { %635 = vst [vmem:[#allocation2 + $0x3e8] sm:$0xff] %v379_v45  ;;  %636 = vst [vmem:[#allocation2 + $0x3f0] sm:$0xff] %v380_v46  ;;  %v443_v45 = vld [vmem:[%s26808_s1 + $0x560] sm:$0xff]  ;;  %v444_v46 = vld [vmem:[%s26808_s1 + $0x568] sm:$0xff] }
  0xb7   : > { %637 = vst [vmem:[#allocation2 + $0x3f8] sm:$0xff] %v381_v47  ;;  %638 = vst [vmem:[#allocation2 + $0x400] sm:$0xff] %v382_v48  ;;  %v445_v47 = vld [vmem:[%s26808_s1 + $0x570] sm:$0xff]  ;;  %v446_v48 = vld [vmem:[%s26808_s1 + $0x578] sm:$0xff] }
  0xb8   : > { %639 = vst [vmem:[#allocation2 + $0x408] sm:$0xff] %v383_v49  ;;  %640 = vst [vmem:[#allocation2 + $0x410] sm:$0xff] %v384_v50  ;;  %v447_v49 = vld [vmem:[%s26808_s1 + $0x580] sm:$0xff]  ;;  %v448_v50 = vld [vmem:[%s26808_s1 + $0x588] sm:$0xff] }
  0xb9   : > { %641 = vst [vmem:[#allocation2 + $0x418] sm:$0xff] %v385_v51  ;;  %642 = vst [vmem:[#allocation2 + $0x420] sm:$0xff] %v386_v52  ;;  %v449_v51 = vld [vmem:[%s26808_s1 + $0x590] sm:$0xff]  ;;  %v450_v52 = vld [vmem:[%s26808_s1 + $0x598] sm:$0xff] }
  0xba   : > { %643 = vst [vmem:[#allocation2 + $0x428] sm:$0xff] %v387_v53  ;;  %644 = vst [vmem:[#allocation2 + $0x430] sm:$0xff] %v388_v54  ;;  %v451_v53 = vld [vmem:[%s26808_s1 + $0x5a0] sm:$0xff]  ;;  %v452_v54 = vld [vmem:[%s26808_s1 + $0x5a8] sm:$0xff] }
  0xbb   : > { %645 = vst [vmem:[#allocation2 + $0x438] sm:$0xff] %v389_v55  ;;  %646 = vst [vmem:[#allocation2 + $0x440] sm:$0xff] %v390_v56  ;;  %v453_v55 = vld [vmem:[%s26808_s1 + $0x5b0] sm:$0xff]  ;;  %v454_v56 = vld [vmem:[%s26808_s1 + $0x5b8] sm:$0xff] }
  0xbc   : > { %647 = vst [vmem:[#allocation2 + $0x448] sm:$0xff] %v391_v57  ;;  %648 = vst [vmem:[#allocation2 + $0x450] sm:$0xff] %v392_v58  ;;  %v455_v57 = vld [vmem:[%s26808_s1 + $0x5c0] sm:$0xff]  ;;  %v456_v58 = vld [vmem:[%s26808_s1 + $0x5c8] sm:$0xff] }
  0xbd   : > { %649 = vst [vmem:[#allocation2 + $0x458] sm:$0xff] %v393_v59  ;;  %650 = vst [vmem:[#allocation2 + $0x460] sm:$0xff] %v394_v60  ;;  %v457_v59 = vld [vmem:[%s26808_s1 + $0x5d0] sm:$0xff]  ;;  %v458_v60 = vld [vmem:[%s26808_s1 + $0x5d8] sm:$0xff] }
  0xbe   : > { %651 = vst [vmem:[#allocation2 + $0x468] sm:$0xff] %v395_v61  ;;  %652 = vst [vmem:[#allocation2 + $0x470] sm:$0xff] %v396_v62  ;;  %v459_v61 = vld [vmem:[%s26808_s1 + $0x5e0] sm:$0xff]  ;;  %v460_v62 = vld [vmem:[%s26808_s1 + $0x5e8] sm:$0xff] }
  0xbf   : > { %653 = vst [vmem:[#allocation2 + $0x478] sm:$0xff] %v397_v63  ;;  %654 = vst [vmem:[#allocation2 + $0x480] sm:$0xff] %v398_v0  ;;  %v461_v63 = vld [vmem:[%s26808_s1 + $0x5f0] sm:$0xff]  ;;  %v462_v0 = vld [vmem:[%s26808_s1 + $0x5f8] sm:$0xff] }
  0xc0   : > { %655 = vst [vmem:[#allocation2 + $0x488] sm:$0xff] %v399_v1  ;;  %656 = vst [vmem:[#allocation2 + $0x490] sm:$0xff] %v400_v2  ;;  %v463_v1 = vld [vmem:[%s26808_s1 + $0x600] sm:$0xff]  ;;  %v464_v2 = vld [vmem:[%s26808_s1 + $0x608] sm:$0xff] }
  0xc1   : > { %657 = vst [vmem:[#allocation2 + $0x498] sm:$0xff] %v401_v3  ;;  %658 = vst [vmem:[#allocation2 + $0x4a0] sm:$0xff] %v402_v4  ;;  %v465_v3 = vld [vmem:[%s26808_s1 + $0x610] sm:$0xff]  ;;  %v466_v4 = vld [vmem:[%s26808_s1 + $0x618] sm:$0xff] }
  0xc2   : > { %659 = vst [vmem:[#allocation2 + $0x4a8] sm:$0xff] %v403_v5  ;;  %660 = vst [vmem:[#allocation2 + $0x4b0] sm:$0xff] %v404_v6  ;;  %v467_v5 = vld [vmem:[%s26808_s1 + $0x620] sm:$0xff]  ;;  %v468_v6 = vld [vmem:[%s26808_s1 + $0x628] sm:$0xff] }
  0xc3   : > { %661 = vst [vmem:[#allocation2 + $0x4b8] sm:$0xff] %v405_v7  ;;  %662 = vst [vmem:[#allocation2 + $0x4c0] sm:$0xff] %v406_v8  ;;  %v469_v7 = vld [vmem:[%s26808_s1 + $0x630] sm:$0xff]  ;;  %v470_v8 = vld [vmem:[%s26808_s1 + $0x638] sm:$0xff] }
  0xc4   : > { %663 = vst [vmem:[#allocation2 + $0x4c8] sm:$0xff] %v407_v9  ;;  %664 = vst [vmem:[#allocation2 + $0x4d0] sm:$0xff] %v408_v10  ;;  %v471_v9 = vld [vmem:[%s26808_s1 + $0x640] sm:$0xff]  ;;  %v472_v10 = vld [vmem:[%s26808_s1 + $0x648] sm:$0xff] }
  0xc5   : > { %665 = vst [vmem:[#allocation2 + $0x4d8] sm:$0xff] %v409_v11  ;;  %666 = vst [vmem:[#allocation2 + $0x4e0] sm:$0xff] %v410_v12  ;;  %v473_v11 = vld [vmem:[%s26808_s1 + $0x650] sm:$0xff]  ;;  %v474_v12 = vld [vmem:[%s26808_s1 + $0x658] sm:$0xff] }
  0xc6   : > { %667 = vst [vmem:[#allocation2 + $0x4e8] sm:$0xff] %v411_v13  ;;  %668 = vst [vmem:[#allocation2 + $0x4f0] sm:$0xff] %v412_v14  ;;  %v475_v13 = vld [vmem:[%s26808_s1 + $0x660] sm:$0xff]  ;;  %v476_v14 = vld [vmem:[%s26808_s1 + $0x668] sm:$0xff] }
  0xc7   : > { %669 = vst [vmem:[#allocation2 + $0x4f8] sm:$0xff] %v413_v15  ;;  %670 = vst [vmem:[#allocation2 + $0x500] sm:$0xff] %v414_v16  ;;  %v477_v15 = vld [vmem:[%s26808_s1 + $0x670] sm:$0xff]  ;;  %v478_v16 = vld [vmem:[%s26808_s1 + $0x678] sm:$0xff] }
  0xc8   : > { %671 = vst [vmem:[#allocation2 + $0x508] sm:$0xff] %v415_v17  ;;  %672 = vst [vmem:[#allocation2 + $0x510] sm:$0xff] %v416_v18  ;;  %v479_v17 = vld [vmem:[%s26808_s1 + $0x680] sm:$0xff]  ;;  %v480_v18 = vld [vmem:[%s26808_s1 + $0x688] sm:$0xff] }
  0xc9   : > { %673 = vst [vmem:[#allocation2 + $0x518] sm:$0xff] %v417_v19  ;;  %674 = vst [vmem:[#allocation2 + $0x520] sm:$0xff] %v418_v20  ;;  %v481_v19 = vld [vmem:[%s26808_s1 + $0x690] sm:$0xff]  ;;  %v482_v20 = vld [vmem:[%s26808_s1 + $0x698] sm:$0xff] }
  0xca   : > { %675 = vst [vmem:[#allocation2 + $0x528] sm:$0xff] %v419_v21  ;;  %676 = vst [vmem:[#allocation2 + $0x530] sm:$0xff] %v420_v22  ;;  %v483_v21 = vld [vmem:[%s26808_s1 + $0x6a0] sm:$0xff]  ;;  %v484_v22 = vld [vmem:[%s26808_s1 + $0x6a8] sm:$0xff] }
  0xcb   : > { %677 = vst [vmem:[#allocation2 + $0x538] sm:$0xff] %v421_v23  ;;  %678 = vst [vmem:[#allocation2 + $0x540] sm:$0xff] %v422_v24  ;;  %v485_v23 = vld [vmem:[%s26808_s1 + $0x6b0] sm:$0xff]  ;;  %v486_v24 = vld [vmem:[%s26808_s1 + $0x6b8] sm:$0xff] }
  0xcc   : > { %679 = vst [vmem:[#allocation2 + $0x548] sm:$0xff] %v423_v25  ;;  %680 = vst [vmem:[#allocation2 + $0x550] sm:$0xff] %v424_v26  ;;  %v487_v25 = vld [vmem:[%s26808_s1 + $0x6c0] sm:$0xff]  ;;  %v488_v26 = vld [vmem:[%s26808_s1 + $0x6c8] sm:$0xff] }
  0xcd   : > { %681 = vst [vmem:[#allocation2 + $0x558] sm:$0xff] %v425_v27  ;;  %682 = vst [vmem:[#allocation2 + $0x560] sm:$0xff] %v426_v28  ;;  %v489_v27 = vld [vmem:[%s26808_s1 + $0x6d0] sm:$0xff]  ;;  %v490_v28 = vld [vmem:[%s26808_s1 + $0x6d8] sm:$0xff] }
  0xce   : > { %683 = vst [vmem:[#allocation2 + $0x568] sm:$0xff] %v427_v29  ;;  %684 = vst [vmem:[#allocation2 + $0x570] sm:$0xff] %v428_v30  ;;  %v491_v29 = vld [vmem:[%s26808_s1 + $0x6e0] sm:$0xff]  ;;  %v492_v30 = vld [vmem:[%s26808_s1 + $0x6e8] sm:$0xff] }
  0xcf   : > { %685 = vst [vmem:[#allocation2 + $0x578] sm:$0xff] %v429_v31  ;;  %686 = vst [vmem:[#allocation2 + $0x580] sm:$0xff] %v430_v32  ;;  %v493_v31 = vld [vmem:[%s26808_s1 + $0x6f0] sm:$0xff]  ;;  %v494_v32 = vld [vmem:[%s26808_s1 + $0x6f8] sm:$0xff] }
  0xd0   : > { %687 = vst [vmem:[#allocation2 + $0x588] sm:$0xff] %v431_v33  ;;  %688 = vst [vmem:[#allocation2 + $0x590] sm:$0xff] %v432_v34  ;;  %v495_v33 = vld [vmem:[%s26808_s1 + $0x700] sm:$0xff]  ;;  %v496_v34 = vld [vmem:[%s26808_s1 + $0x708] sm:$0xff] }
  0xd1   : > { %689 = vst [vmem:[#allocation2 + $0x598] sm:$0xff] %v433_v35  ;;  %690 = vst [vmem:[#allocation2 + $0x5a0] sm:$0xff] %v434_v36  ;;  %v497_v35 = vld [vmem:[%s26808_s1 + $0x710] sm:$0xff]  ;;  %v498_v36 = vld [vmem:[%s26808_s1 + $0x718] sm:$0xff] }
  0xd2   : > { %691 = vst [vmem:[#allocation2 + $0x5a8] sm:$0xff] %v435_v37  ;;  %692 = vst [vmem:[#allocation2 + $0x5b0] sm:$0xff] %v436_v38  ;;  %v499_v37 = vld [vmem:[%s26808_s1 + $0x720] sm:$0xff]  ;;  %v500_v38 = vld [vmem:[%s26808_s1 + $0x728] sm:$0xff] }
  0xd3   : > { %693 = vst [vmem:[#allocation2 + $0x5b8] sm:$0xff] %v437_v39  ;;  %694 = vst [vmem:[#allocation2 + $0x5c0] sm:$0xff] %v438_v40  ;;  %v501_v39 = vld [vmem:[%s26808_s1 + $0x730] sm:$0xff]  ;;  %v502_v40 = vld [vmem:[%s26808_s1 + $0x738] sm:$0xff] }
  0xd4   : > { %695 = vst [vmem:[#allocation2 + $0x5c8] sm:$0xff] %v439_v41  ;;  %696 = vst [vmem:[#allocation2 + $0x5d0] sm:$0xff] %v440_v42  ;;  %v503_v41 = vld [vmem:[%s26808_s1 + $0x740] sm:$0xff]  ;;  %v504_v42 = vld [vmem:[%s26808_s1 + $0x748] sm:$0xff] }
  0xd5   : > { %697 = vst [vmem:[#allocation2 + $0x5d8] sm:$0xff] %v441_v43  ;;  %698 = vst [vmem:[#allocation2 + $0x5e0] sm:$0xff] %v442_v44  ;;  %v505_v43 = vld [vmem:[%s26808_s1 + $0x750] sm:$0xff]  ;;  %v506_v44 = vld [vmem:[%s26808_s1 + $0x758] sm:$0xff] }
  0xd6   : > { %699 = vst [vmem:[#allocation2 + $0x5e8] sm:$0xff] %v443_v45  ;;  %700 = vst [vmem:[#allocation2 + $0x5f0] sm:$0xff] %v444_v46  ;;  %v507_v45 = vld [vmem:[%s26808_s1 + $0x760] sm:$0xff]  ;;  %v508_v46 = vld [vmem:[%s26808_s1 + $0x768] sm:$0xff] }
  0xd7   : > { %701 = vst [vmem:[#allocation2 + $0x5f8] sm:$0xff] %v445_v47  ;;  %702 = vst [vmem:[#allocation2 + $0x600] sm:$0xff] %v446_v48  ;;  %v509_v47 = vld [vmem:[%s26808_s1 + $0x770] sm:$0xff]  ;;  %v510_v48 = vld [vmem:[%s26808_s1 + $0x778] sm:$0xff] }
  0xd8   : > { %703 = vst [vmem:[#allocation2 + $0x608] sm:$0xff] %v447_v49  ;;  %704 = vst [vmem:[#allocation2 + $0x610] sm:$0xff] %v448_v50  ;;  %v511_v49 = vld [vmem:[%s26808_s1 + $0x780] sm:$0xff]  ;;  %v512_v50 = vld [vmem:[%s26808_s1 + $0x788] sm:$0xff] }
  0xd9   : > { %705 = vst [vmem:[#allocation2 + $0x618] sm:$0xff] %v449_v51  ;;  %706 = vst [vmem:[#allocation2 + $0x620] sm:$0xff] %v450_v52  ;;  %v513_v51 = vld [vmem:[%s26808_s1 + $0x790] sm:$0xff]  ;;  %v514_v52 = vld [vmem:[%s26808_s1 + $0x798] sm:$0xff] }
  0xda   : > { %707 = vst [vmem:[#allocation2 + $0x628] sm:$0xff] %v451_v53  ;;  %708 = vst [vmem:[#allocation2 + $0x630] sm:$0xff] %v452_v54  ;;  %v515_v53 = vld [vmem:[%s26808_s1 + $0x7a0] sm:$0xff]  ;;  %v516_v54 = vld [vmem:[%s26808_s1 + $0x7a8] sm:$0xff] }
  0xdb   : > { %709 = vst [vmem:[#allocation2 + $0x638] sm:$0xff] %v453_v55  ;;  %710 = vst [vmem:[#allocation2 + $0x640] sm:$0xff] %v454_v56  ;;  %v517_v55 = vld [vmem:[%s26808_s1 + $0x7b0] sm:$0xff]  ;;  %v518_v56 = vld [vmem:[%s26808_s1 + $0x7b8] sm:$0xff] }
  0xdc   : > { %711 = vst [vmem:[#allocation2 + $0x648] sm:$0xff] %v455_v57  ;;  %712 = vst [vmem:[#allocation2 + $0x650] sm:$0xff] %v456_v58  ;;  %v519_v57 = vld [vmem:[%s26808_s1 + $0x7c0] sm:$0xff]  ;;  %v520_v58 = vld [vmem:[%s26808_s1 + $0x7c8] sm:$0xff] }
  0xdd   : > { %713 = vst [vmem:[#allocation2 + $0x658] sm:$0xff] %v457_v59  ;;  %714 = vst [vmem:[#allocation2 + $0x660] sm:$0xff] %v458_v60  ;;  %v521_v59 = vld [vmem:[%s26808_s1 + $0x7d0] sm:$0xff]  ;;  %v522_v60 = vld [vmem:[%s26808_s1 + $0x7d8] sm:$0xff] }
  0xde   : > { %715 = vst [vmem:[#allocation2 + $0x668] sm:$0xff] %v459_v61  ;;  %716 = vst [vmem:[#allocation2 + $0x670] sm:$0xff] %v460_v62  ;;  %v523_v61 = vld [vmem:[%s26808_s1 + $0x7e0] sm:$0xff]  ;;  %v524_v62 = vld [vmem:[%s26808_s1 + $0x7e8] sm:$0xff] }
  0xdf   : > { %717 = vst [vmem:[#allocation2 + $0x678] sm:$0xff] %v461_v63  ;;  %718 = vst [vmem:[#allocation2 + $0x680] sm:$0xff] %v462_v0  ;;  %v525_v63 = vld [vmem:[%s26808_s1 + $0x7f0] sm:$0xff]  ;;  %v526_v0 = vld [vmem:[%s26808_s1 + $0x7f8] sm:$0xff] }
  0xe0   : > { %719 = vst [vmem:[#allocation2 + $0x688] sm:$0xff] %v463_v1  ;;  %720 = vst [vmem:[#allocation2 + $0x690] sm:$0xff] %v464_v2 }
  0xe1   : > { %721 = vst [vmem:[#allocation2 + $0x698] sm:$0xff] %v465_v3  ;;  %722 = vst [vmem:[#allocation2 + $0x6a0] sm:$0xff] %v466_v4 }
  0xe2   : > { %723 = vst [vmem:[#allocation2 + $0x6a8] sm:$0xff] %v467_v5  ;;  %724 = vst [vmem:[#allocation2 + $0x6b0] sm:$0xff] %v468_v6 }
  0xe3   : > { %725 = vst [vmem:[#allocation2 + $0x6b8] sm:$0xff] %v469_v7  ;;  %726 = vst [vmem:[#allocation2 + $0x6c0] sm:$0xff] %v470_v8 }
  0xe4   : > { %727 = vst [vmem:[#allocation2 + $0x6c8] sm:$0xff] %v471_v9  ;;  %728 = vst [vmem:[#allocation2 + $0x6d0] sm:$0xff] %v472_v10 }
  0xe5   : > { %729 = vst [vmem:[#allocation2 + $0x6d8] sm:$0xff] %v473_v11  ;;  %730 = vst [vmem:[#allocation2 + $0x6e0] sm:$0xff] %v474_v12 }
  0xe6   : > { %731 = vst [vmem:[#allocation2 + $0x6e8] sm:$0xff] %v475_v13  ;;  %732 = vst [vmem:[#allocation2 + $0x6f0] sm:$0xff] %v476_v14 }
  0xe7   : > { %733 = vst [vmem:[#allocation2 + $0x6f8] sm:$0xff] %v477_v15  ;;  %734 = vst [vmem:[#allocation2 + $0x700] sm:$0xff] %v478_v16 }
  0xe8   : > { %735 = vst [vmem:[#allocation2 + $0x708] sm:$0xff] %v479_v17  ;;  %736 = vst [vmem:[#allocation2 + $0x710] sm:$0xff] %v480_v18 }
  0xe9   : > { %737 = vst [vmem:[#allocation2 + $0x718] sm:$0xff] %v481_v19  ;;  %738 = vst [vmem:[#allocation2 + $0x720] sm:$0xff] %v482_v20 }
  0xea   : > { %739 = vst [vmem:[#allocation2 + $0x728] sm:$0xff] %v483_v21  ;;  %740 = vst [vmem:[#allocation2 + $0x730] sm:$0xff] %v484_v22 }
  0xeb   : > { %741 = vst [vmem:[#allocation2 + $0x738] sm:$0xff] %v485_v23  ;;  %742 = vst [vmem:[#allocation2 + $0x740] sm:$0xff] %v486_v24 }
  0xec   : > { %743 = vst [vmem:[#allocation2 + $0x748] sm:$0xff] %v487_v25  ;;  %744 = vst [vmem:[#allocation2 + $0x750] sm:$0xff] %v488_v26 }
  0xed   : > { %745 = vst [vmem:[#allocation2 + $0x758] sm:$0xff] %v489_v27  ;;  %746 = vst [vmem:[#allocation2 + $0x760] sm:$0xff] %v490_v28 }
  0xee   : > { %747 = vst [vmem:[#allocation2 + $0x768] sm:$0xff] %v491_v29  ;;  %748 = vst [vmem:[#allocation2 + $0x770] sm:$0xff] %v492_v30 }
  0xef   : > { %749 = vst [vmem:[#allocation2 + $0x778] sm:$0xff] %v493_v31  ;;  %750 = vst [vmem:[#allocation2 + $0x780] sm:$0xff] %v494_v32 }
  0xf0   : > { %751 = vst [vmem:[#allocation2 + $0x788] sm:$0xff] %v495_v33  ;;  %752 = vst [vmem:[#allocation2 + $0x790] sm:$0xff] %v496_v34 }
  0xf1   : > { %753 = vst [vmem:[#allocation2 + $0x798] sm:$0xff] %v497_v35  ;;  %754 = vst [vmem:[#allocation2 + $0x7a0] sm:$0xff] %v498_v36 }
  0xf2   : > { %755 = vst [vmem:[#allocation2 + $0x7a8] sm:$0xff] %v499_v37  ;;  %756 = vst [vmem:[#allocation2 + $0x7b0] sm:$0xff] %v500_v38 }
  0xf3   : > { %757 = vst [vmem:[#allocation2 + $0x7b8] sm:$0xff] %v501_v39  ;;  %758 = vst [vmem:[#allocation2 + $0x7c0] sm:$0xff] %v502_v40 }
  0xf4   : > { %759 = vst [vmem:[#allocation2 + $0x7c8] sm:$0xff] %v503_v41  ;;  %760 = vst [vmem:[#allocation2 + $0x7d0] sm:$0xff] %v504_v42 }
  0xf5   : > { %761 = vst [vmem:[#allocation2 + $0x7d8] sm:$0xff] %v505_v43  ;;  %762 = vst [vmem:[#allocation2 + $0x7e0] sm:$0xff] %v506_v44 }
  0xf6   : > { %763 = vst [vmem:[#allocation2 + $0x7e8] sm:$0xff] %v507_v45  ;;  %764 = vst [vmem:[#allocation2 + $0x7f0] sm:$0xff] %v508_v46 }
  0xf7   : > { %765 = vst [vmem:[#allocation2 + $0x7f8] sm:$0xff] %v509_v47  ;;  %766 = vst [vmem:[#allocation2 + $0x800] sm:$0xff] %v510_v48 }
  0xf8   : > { %767 = vst [vmem:[#allocation2 + $0x808] sm:$0xff] %v511_v49  ;;  %768 = vst [vmem:[#allocation2 + $0x810] sm:$0xff] %v512_v50 }
  0xf9   : > { %769 = vst [vmem:[#allocation2 + $0x818] sm:$0xff] %v513_v51  ;;  %770 = vst [vmem:[#allocation2 + $0x820] sm:$0xff] %v514_v52 }
  0xfa   : > { %771 = vst [vmem:[#allocation2 + $0x828] sm:$0xff] %v515_v53  ;;  %772 = vst [vmem:[#allocation2 + $0x830] sm:$0xff] %v516_v54 }
  0xfb   : > { %773 = vst [vmem:[#allocation2 + $0x838] sm:$0xff] %v517_v55  ;;  %774 = vst [vmem:[#allocation2 + $0x840] sm:$0xff] %v518_v56 }
  0xfc   : > { %775 = vst [vmem:[#allocation2 + $0x848] sm:$0xff] %v519_v57  ;;  %776 = vst [vmem:[#allocation2 + $0x850] sm:$0xff] %v520_v58 }
  0xfd   : > { %777 = vst [vmem:[#allocation2 + $0x858] sm:$0xff] %v521_v59  ;;  %778 = vst [vmem:[#allocation2 + $0x860] sm:$0xff] %v522_v60 }
  0xfe   : > { %779 = vst [vmem:[#allocation2 + $0x868] sm:$0xff] %v523_v61  ;;  %780 = vst [vmem:[#allocation2 + $0x870] sm:$0xff] %v524_v62 }
  0xff   : > { %781 = vst [vmem:[#allocation2 + $0x878] sm:$0xff] %v525_v63  ;;  %782 = vst [vmem:[#allocation2 + $0x880] sm:$0xff] %v526_v0 }
 0x100 PF: > { %s14555_s15 = sshll.u32 %s21476_s0, 7  ;;  %p793_p12 = scmp.lt.s32.totalorder %s21476_s0, 0 }
 0x101   : > { %s22432_s16 = sld [smem:[#allocation5 + %s14555_s15]]  ;;  %s787_s17 = sadd.s32 2, %s14555_s15 }
 0x102   : > { %s22435_s18 = sld [smem:[#allocation5 + %s787_s17]]  ;;  %s789_s19 = sadd.s32 3, %s14555_s15 }
 0x103   : > { %s22437_s20 = sld [smem:[#allocation5 + %s789_s19]]  ;;  %s791_s21 = sadd.s32 4, %s14555_s15 }
 0x104   : > { %s22439_s22 = sld [smem:[#allocation5 + %s791_s21]]  ;;  %s794_s24 = ssub.s32 0, %s21476_s0 }
 0x105   : > { %s14556_s25 = smin.u32 %s21476_s0, %s794_s24  ;;  %s785_s5 = sadd.s32 1, %s14555_s15 }
 0x106   : > { %s796_s12 = sand.u32 1, %s14556_s25   ;;  %s786_s30 = sld [smem:[#allocation5 + %s785_s5]] }
 0x107   : > { %s797_s7 = ssub.s32 0, %s796_s12  ;;  %p14559_p4 = scmp.ne.s32.totalorder %s22432_s16, 5 }
 0x108   : > { %s27025_s7 = smov (!%p793_p12, %s797_s7), %s796_s12  ;;  %v22448_v1 = vmov (!%p14559_p4), 0.0   ;;  %v22450_v2 = vmov (!%p14559_p4), 0.0   ;;  %s22452_s13 = smov (!%p14559_p4), 0  }
 0x109   : > { %p14558_p13 = scmp.lt.s32.totalorder %s27025_s7, 0  ;;  %s803_s11 = sadd.s32 2, %s27025_s7 }
 0x10a   : > { %814 = sbr.rel (%p14559_p4) target bundleno = 1340 (0x53c), region = 48 }
 0x10b   : > { %s27027_s11 = smov (!%p14558_p13, %s803_s11), %s27025_s7 }
 0x10c   : > { %s805_s6 = smul.u32 2320, %s27027_s11  ;;  %s22443_s10 = ssub.s32 1, %s27027_s11 }
 0x10e   : > { %s808_s29 = sadd.s32 136, %s805_s6 }
 0x10f   : > { %s22445_s28 = ssub.s32 %s808_s29, %s786_s30 }
 0x111 LB: >> { %26824 = vst [vmem:[#allocation13_spill] sm:$0xff] %v21370_v1  ;;  %26825 = vst [vmem:[#allocation14_spill] sm:$0xff] %v21374_v2  ;;  %v20826_v3 = vld [vmem:[%s21574_s9 + $0x40] sm:$0xff]   ;;  %v20828_v5 = vld [vmem:[%s21574_s9 + $0x48] sm:$0xff]   ;;  %s22470_s14 = sshll.u32 %s21378_s13, 8  ;;  %s14401_s19 = smul.u32 2320, %s22443_s10  ;;  %s21378_s13 = sphi %s22452_s13, %s820_s13   ;;  %v21374_v2 = vphi %v22450_v2, %v26893_v2   ;;  %v21370_v1 = vphi %v22448_v1, %v26892_v1  }
 0x112   : >> { %v20827_v4 = vld [vmem:[%s21574_s9 + $0x300] sm:$0xff]   ;;  %17702 = vmatprep.subr.bf16.mxu1 %v20826_v3  ;;  %v20829_v6 = vld [vmem:[%s21574_s9 + $0x308] sm:$0xff]   ;;  %v20830_v7 = vld [vmem:[%s21574_s9 + $0x50] sm:$0xff]   ;;  %s824_s15 = sadd.s32 %s22470_s14, %s22445_s28  ;;  %s820_s13 = sadd.s32 1, %s21378_s13  }
 0x113   : >> { %18278 = vmatprep.subr.bf16.mxu0 %v20827_v4  ;;  %17703 = vmatpush3.bf16.msra.mxu1 %v20826_v3  ;;  %v20831_v8 = vld [vmem:[%s21574_s9 + $0x310] sm:$0xff]   ;;  %v20832_v9 = vld [vmem:[%s21574_s9 + $0x58] sm:$0xff]   ;;  %v20834_v11 = vld [vmem:[%s21574_s9 + $0x60] sm:$0xff]   ;;  %s22479_s17 = scalar_lea.vmem [#allocation2], %s824_s15  ;;  %s23977_s21 = sadd.s32 %s22470_s14, %s14401_s19 }
 0x114   : >> { %18279 = vmatpush3.bf16.msra.mxu0 %v20827_v4  ;;  %17704 = vmatprep.subr.bf16.mxu1 %v20828_v5  ;;  %v20833_v10 = vld [vmem:[%s21574_s9 + $0x318] sm:$0xff]   ;;  %v20835_v12 = vld [vmem:[%s21574_s9 + $0x320] sm:$0xff]   ;;  %v20836_v13 = vld [vmem:[%s21574_s9 + $0x68] sm:$0xff]   ;;  %s24049_s24 = scalar_lea.vmem [#allocation2], %s23977_s21  ;;  %p817_p7 = scmp.ge.s32.totalorder %s820_s13, 8  }
 0x115   : >> { %18280 = vmatprep.subr.bf16.mxu0 %v20829_v6  ;;  %v14562_v14 = vld [vmem:[%s22479_s17 + $0x1] sm:$0xff]  ;;  %v14563_v15 = vld [vmem:[%s22479_s17 + $0x9] sm:$0xff]  ;;  %v20838_v21 = vld [vmem:[%s21574_s9 + $0x70] sm:$0xff]  }
 0x116   : >> { %v15197_v16 = vld [vmem:[%s22479_s17 + $0x42] sm:$0xff]  ;;  %v20837_v17 = vld [vmem:[%s21574_s9 + $0x328] sm:$0xff]   ;;  %v924_v18 = vpack.c.bf16 %v14563_v15, %v14562_v14  ;;  %v20839_v22 = vld [vmem:[%s21574_s9 + $0x330] sm:$0xff]  }
 0x117   : >> { %17705 = vmatpush3.bf16.msra.mxu1 %v20828_v5  ;;  %v15198_v19 = vld [vmem:[%s22479_s17 + $0x4a] sm:$0xff]  ;;  %v20840_v23 = vld [vmem:[%s21574_s9 + $0x78] sm:$0xff]   ;;  %v15199_v28 = vld [vmem:[%s22479_s17 + $0x52] sm:$0xff] }
 0x118   : >> { %18281 = vmatpush3.bf16.msra.mxu0 %v20829_v6  ;;  %17706 = vmatprep.subr.bf16.mxu1 %v20830_v7  ;;  %v22486_v20 = vpack.c.bf16 %v15198_v19, %v15197_v16  ;;  %v20841_v24 = vld [vmem:[%s21574_s9 + $0x338] sm:$0xff]   ;;  %v14564_v25 = vld [vmem:[%s22479_s17 + $0x11] sm:$0xff]  ;;  %v20842_v27 = vld [vmem:[%s21574_s9] sm:$0xff]  }
 0x119   : >> { %18282 = vmatprep.subr.bf16.mxu0 %v20831_v8  ;;  %17718 = vmatprep.mubr.bf16.mxu1 %v924_v18  ;;  %v14565_v26 = vld [vmem:[%s22479_s17 + $0x19] sm:$0xff]  ;;  %v20843_v30 = vld [vmem:[%s21574_s9 + $0x340] sm:$0xff]   ;;  %v20844_v37 = vld [vmem:[%s21574_s9 + $0x348] sm:$0xff]  }
 0x11a   : >> { %18294 = vmatprep.mubr.bf16.mxu0 %v22486_v20  ;;  %v15200_v29 = vld [vmem:[%s22479_s17 + $0x5a] sm:$0xff]  ;;  %v14567_v32 = vld [vmem:[%s22479_s17 + $0x29] sm:$0xff]  ;;  %v925_v33 = vpack.c.bf16 %v14565_v26, %v14564_v25  ;;  %v14568_v40 = vld [vmem:[%s22479_s17 + $0x31] sm:$0xff] }
 0x11b   : >> { %17707 = vmatpush3.bf16.msra.mxu1 %v20830_v7  ;;  %v14566_v31 = vld [vmem:[%s22479_s17 + $0x21] sm:$0xff]  ;;  %v15202_v35 = vld [vmem:[%s22479_s17 + $0x6a] sm:$0xff]  ;;  %v22503_v36 = vpack.c.bf16 %v15200_v29, %v15199_v28  ;;  %v14569_v41 = vld [vmem:[%s22479_s17 + $0x39] sm:$0xff] }
 0x11c   : >> { %18283 = vmatpush3.bf16.msra.mxu0 %v20831_v8  ;;  %17708 = vmatprep.subr.bf16.mxu1 %v20832_v9  ;;  %v15201_v34 = vld [vmem:[%s22479_s17 + $0x62] sm:$0xff]  ;;  %v926_v38 = vpack.c.bf16 %v14567_v32, %v14566_v31  ;;  %v20845_v42 = vld [vmem:[%s21574_s9 + $0x8] sm:$0xff]   ;;  %v15204_v44 = vld [vmem:[%s22479_s17 + $0x7a] sm:$0xff]  ;;  %v927_v51 = vpack.c.bf16 %v14569_v41, %v14568_v40 }
 0x11d   : >> { %18284 = vmatprep.subr.bf16.mxu0 %v20833_v10  ;;  %v22506_v39 = vpack.c.bf16 %v15202_v35, %v15201_v34  ;;  %v15203_v43 = vld [vmem:[%s22479_s17 + $0x72] sm:$0xff]  ;;  %v14570_v45 = vld [vmem:[%s22479_s17 + $0x41] sm:$0xff]  ;;  %v14571_v47 = vld [vmem:[%s22479_s17 + $0x49] sm:$0xff] }
 0x11e   : >> { %v20846_v46 = vld [vmem:[%s21574_s9 + $0x350] sm:$0xff]   ;;  %v15205_v48 = vld [vmem:[%s22479_s17 + $0x82] sm:$0xff]  ;;  %v15206_v50 = vld [vmem:[%s22479_s17 + $0x8a] sm:$0xff]  ;;  %v22521_v52 = vpack.c.bf16 %v15204_v44, %v15203_v43  ;;  %v928_v53 = vpack.c.bf16 %v14571_v47, %v14570_v45 }
 0x11f   : >> { %17709 = vmatpush3.bf16.msra.mxu1 %v20832_v9  ;;  %v20848_v49 = vld [vmem:[%s21574_s9 + $0x10] sm:$0xff]   ;;  %v20847_v54 = vld [vmem:[%s21574_s9 + $0x358] sm:$0xff]   ;;  %v22524_v55 = vpack.c.bf16 %v15206_v50, %v15205_v48  ;;  %v20849_v61 = vld [vmem:[%s21574_s9 + $0x360] sm:$0xff]  }
 0x120   : >> { %18285 = vmatpush3.bf16.msra.mxu0 %v20833_v10  ;;  %17710 = vmatprep.subr.bf16.mxu1 %v20834_v11  ;;  %v14572_v56 = vld [vmem:[%s22479_s17 + $0x51] sm:$0xff]  ;;  %v14573_v57 = vld [vmem:[%s22479_s17 + $0x59] sm:$0xff]  ;;  %v14574_v62 = vld [vmem:[%s22479_s17 + $0x61] sm:$0xff] }
 0x121   : >> { %18286 = vmatprep.subr.bf16.mxu0 %v20835_v12  ;;  %v20851_v58 = vld [vmem:[%s21574_s9 + $0x18] sm:$0xff]   ;;  %v15207_v59 = vld [vmem:[%s22479_s17 + $0x92] sm:$0xff]  ;;  %v14575_v63 = vld [vmem:[%s22479_s17 + $0x69] sm:$0xff]  ;;  %v929_v4 = vpack.c.bf16 %v14573_v57, %v14572_v56 }
 0x122   : >> { %v15208_v60 = vld [vmem:[%s22479_s17 + $0x9a] sm:$0xff]  ;;  %v15209_v0 = vld [vmem:[%s22479_s17 + $0xa2] sm:$0xff]  ;;  %v15210_v3 = vld [vmem:[%s22479_s17 + $0xaa] sm:$0xff]  ;;  %v930_v7 = vpack.c.bf16 %v14575_v63, %v14574_v62 }
 0x123   : >> { %17711 = vmatpush3.bf16.msra.mxu1 %v20834_v11  ;;  %v20854_v5 = vld [vmem:[%s21574_s9 + $0x20] sm:$0xff]   ;;  %v22539_v6 = vpack.c.bf16 %v15208_v60, %v15207_v59  ;;  %v22541_v8 = vpack.c.bf16 %v15210_v3, %v15209_v0  ;;  %v20850_v9 = vld [vmem:[%s21574_s9 + $0x368] sm:$0xff]   ;;  %v14577_v11 = vld [vmem:[%s22479_s17 + $0x79] sm:$0xff] }
 0x124   : >> { %18287 = vmatpush3.bf16.msra.mxu0 %v20835_v12  ;;  %17712 = vmatprep.subr.bf16.mxu1 %v20836_v13  ;;  %v14576_v10 = vld [vmem:[%s22479_s17 + $0x71] sm:$0xff]  ;;  %v15212_v14 = vld [vmem:[%s22479_s17 + $0xba] sm:$0xff]  ;;  %v14579_v16 = vld [vmem:[%s22479_s17 + $0x89] sm:$0xff] }
 0x125   : >> { %18288 = vmatprep.subr.bf16.mxu0 %v20837_v17  ;;  %v20856_v12 = vld [vmem:[%s21574_s9 + $0x28] sm:$0xff]   ;;  %v14578_v15 = vld [vmem:[%s22479_s17 + $0x81] sm:$0xff]  ;;  %v14581_v28 = vld [vmem:[%s22479_s17 + $0x99] sm:$0xff] }
 0x126   : >> { %v15254_v18 = vld [vmem:[%s22479_s17 + $0x43] sm:$0xff]  ;;  %v15255_v19 = vld [vmem:[%s22479_s17 + $0x4b] sm:$0xff]  ;;  %v15256_v29 = vld [vmem:[%s22479_s17 + $0x53] sm:$0xff] }
 0x127   : >> { %17713 = vmatpush3.bf16.msra.mxu1 %v20836_v13  ;;  %v15211_v13 = vld [vmem:[%s22479_s17 + $0xb2] sm:$0xff]  ;;  %v4797_v25 = vpack.c.bf16 %v15255_v19, %v15254_v18  ;;  %v20853_v26 = vld [vmem:[%s21574_s9 + $0x378] sm:$0xff]   ;;  %v20855_v32 = vld [vmem:[%s21574_s9 + $0x380] sm:$0xff]  }
 0x128   : >> { %18289 = vmatpush3.bf16.msra.mxu0 %v20837_v17  ;;  %17714 = vmatprep.subr.bf16.mxu1 %v20838_v21  ;;  %v20852_v17 = vld [vmem:[%s21574_s9 + $0x370] sm:$0xff]   ;;  %v20860_v31 = vld [vmem:[%s21574_s9 + $0x38] sm:$0xff]   ;;  %v14583_v34 = vld [vmem:[%s22479_s17 + $0xa9] sm:$0xff] }
 0x129   : >> { %18290 = vmatprep.subr.bf16.mxu0 %v20839_v22  ;;  %v15258_v35 = vld [vmem:[%s22479_s17 + $0x63] sm:$0xff]  ;;  %v20857_v44 = vld [vmem:[%s21574_s9 + $0x388] sm:$0xff]   ;;  %v15261_v48 = vld [vmem:[%s22479_s17 + $0x7b] sm:$0xff] }
 0x12a   : >> { %v22572_v40 = vld [vmem:[%s21574_s9 + $0x80] sm:$0xff]   ;;  %v14584_v45 = vld [vmem:[%s22479_s17 + $0xb1] sm:$0xff]  ;;  %v20861_v60 = vld [vmem:[%s21574_s9 + $0x398] sm:$0xff]  }
 0x12b   : >> { %17715 = vmatpush3.bf16.msra.mxu1 %v20838_v21  ;;  %v931_v21 = vpack.c.bf16 %v14577_v11, %v14576_v10  ;;  %v15260_v47 = vld [vmem:[%s22479_s17 + $0x73] sm:$0xff]  ;;  %v14587_v50 = vld [vmem:[%s22479_s17 + $0xc9] sm:$0xff]  ;;  %v15265_v0 = vld [vmem:[%s22479_s17 + $0x9b] sm:$0xff] }
 0x12c   : >> { %18291 = vmatpush3.bf16.msra.mxu0 %v20839_v22  ;;  %17716 = vmatprep.subr.bf16.mxu1 %v20840_v23  ;;  %v20858_v22 = vld [vmem:[%s21574_s9 + $0x30] sm:$0xff]   ;;  %v4800_v57 = vpack.c.bf16 %v15261_v48, %v15260_v47  ;;  %v14590_v3 = vld [vmem:[%s22479_s17 + $0xe1] sm:$0xff]  ;;  %v832_v47 = vld [vmem:[%s22479_s17 + $0x30] sm:$0xff] }
 0x12d   : >> { %18292 = vmatprep.subr.bf16.mxu0 %v20841_v24  ;;  %v14589_v62 = vld [vmem:[%s22479_s17 + $0xd9] sm:$0xff]  ;;  %v20864_v48 = vld [vmem:[%s21574_s9 + $0x88] sm:$0xff]  }
 0x12e   : >> { %v15264_v63 = vld [vmem:[%s22479_s17 + $0x93] sm:$0xff]  ;;  %v15269_v18 = vld [vmem:[%s22479_s17 + $0xbb] sm:$0xff] }
 0x12f   : >> { %17717 = vmatpush3.bf16.msra.mxu1 %v20840_v23  ;;  %v22557_v23 = vpack.c.bf16 %v15212_v14, %v15211_v13  ;;  %v4802_v11 = vpack.c.bf16 %v15265_v0, %v15264_v63  ;;  %v14592_v14 = vld [vmem:[%s22479_s17 + $0xf1] sm:$0xff]  ;;  %v826_v19 = vld [vmem:[%s22479_s17] sm:$0xff] }
 0x130   : >> { %18293 = vmatpush3.bf16.msra.mxu0 %v20841_v24  ;;  %17750 = vmatprep.subr.bf16.mxu1 %v20842_v27  ;;  %v932_v24 = vpack.c.bf16 %v14579_v16, %v14578_v15  ;;  %v20865_v15 = vld [vmem:[%s21574_s9 + $0x3a8] sm:$0xff]   ;;  %v14593_v16 = vld [vmem:[%s22479_s17 + $0xf9] sm:$0xff] }
 0x131   : >> { %18326 = vmatprep.subr.bf16.mxu0 %v20843_v30  ;;  %v837_v63 = vld [vmem:[%s22479_s17 + $0x58] sm:$0xff]  ;;  %v20868_v0 = vld [vmem:[%s21574_s9 + $0x98] sm:$0xff]  }
 0x132   : >> { %17719 = vmatmul.mubr.bf16.vlgmr.msra.gmra.mrb[0].mxu1 %v925_v33  ;;  %v14582_v33 = vld [vmem:[%s22479_s17 + $0xa1] sm:$0xff] }
 0x133   : >> { %18295 = vmatmul.mubr.bf16.vlgmr.msra.gmra.mrb[0].mxu0 %v22503_v36  ;;  %17751 = vmatpush3.bf16.msra.mxu1 %v20842_v27  ;;  %v14580_v27 = vld [vmem:[%s22479_s17 + $0x91] sm:$0xff] }
 0x134   : >> { %18327 = vmatpush3.bf16.msra.mxu0 %v20843_v30  ;;  %17722 = vmatprep.mubr.bf16.mxu1 %v926_v38  ;;  %v15257_v30 = vld [vmem:[%s22479_s17 + $0x5b] sm:$0xff]  ;;  %v933_v38 = vpack.c.bf16 %v14581_v28, %v14580_v27 }
 0x135   : >> { %18328 = vmatprep.subr.bf16.mxu0 %v20844_v37  ;;  %18298 = vmatprep.mubr.bf16.mxu0 %v22506_v39  ;;  %v4798_v41 = vpack.c.bf16 %v15257_v30, %v15256_v29  ;;  %v20869_v30 = vld [vmem:[%s21574_s9 + $0x3b8] sm:$0xff]  }
 0x136   : >> { %17752 = vmatprep.subr.bf16.mxu1 %v20845_v42 }
 0x137   : >> { %17753 = vmatpush3.bf16.msra.mxu1 %v20845_v42  ;;  %v934_v42 = vpack.c.bf16 %v14583_v34, %v14582_v33  ;;  %v15272_v33 = vld [vmem:[%s22479_s17 + $0xd3] sm:$0xff]  ;;  %v15273_v34 = vld [vmem:[%s22479_s17 + $0xdb] sm:$0xff] }
 0x138   : >> { %18329 = vmatpush3.bf16.msra.mxu0 %v20844_v37  ;;  %17754 = vmatprep.subr.bf16.mxu1 %v20848_v49  ;;  %v15259_v37 = vld [vmem:[%s22479_s17 + $0x6b] sm:$0xff] }
 0x139   : >> { %18330 = vmatprep.subr.bf16.mxu0 %v20846_v46  ;;  %v4799_v43 = vpack.c.bf16 %v15259_v37, %v15258_v35  ;;  %v830_v35 = vld [vmem:[%s22479_s17 + $0x20] sm:$0xff]  ;;  %v831_v37 = vld [vmem:[%s22479_s17 + $0x28] sm:$0xff] }
 0x13a   : >> { %17723 = vmatmul.mubr.bf16.gmra.mrb[4].mxu1 %v927_v51  ;;  %v15262_v51 = vld [vmem:[%s22479_s17 + $0x83] sm:$0xff] }
 0x13b   : >> { %18299 = vmatmul.mubr.bf16.gmra.mrb[4].mxu0 %v22521_v52  ;;  %17726 = vmatprep.mubr.bf16.mxu1 %v928_v53  ;;  %v15263_v53 = vld [vmem:[%s22479_s17 + $0x8b] sm:$0xff] }
 0x13c   : >> { %18331 = vmatpush3.bf16.msra.mxu0 %v20846_v46  ;;  %18302 = vmatprep.mubr.bf16.mxu0 %v22524_v55  ;;  %v14585_v46 = vld [vmem:[%s22479_s17 + $0xb9] sm:$0xff]  ;;  %v4801_v59 = vpack.c.bf16 %v15263_v53, %v15262_v51 }
 0x13d   : >> { %18332 = vmatprep.subr.bf16.mxu0 %v20847_v54  ;;  %17755 = vmatpush3.bf16.msra.mxu1 %v20848_v49  ;;  %v14586_v49 = vld [vmem:[%s22479_s17 + $0xc1] sm:$0xff]  ;;  %v935_v56 = vpack.c.bf16 %v14585_v46, %v14584_v45  ;;  %v860_v45 = vpack.c.bf16 %v831_v37, %v830_v35  ;;  %v15313_v35 = vld [vmem:[%s22479_s17 + $0x54] sm:$0xff] }
 0x13e   : >> { %17756 = vmatprep.subr.bf16.mxu1 %v20851_v58  ;;  %v15277_v51 = vld [vmem:[%s22479_s17 + $0xfb] sm:$0xff] }
 0x13f   : >> { %v834_v53 = vld [vmem:[%s22479_s17 + $0x40] sm:$0xff] }
 0x140   : >> { %18333 = vmatpush3.bf16.msra.mxu0 %v20847_v54  ;;  %v20859_v54 = vld [vmem:[%s21574_s9 + $0x390] sm:$0xff]  }
 0x141   : >> { %18334 = vmatprep.subr.bf16.mxu0 %v20849_v61  ;;  %17757 = vmatpush3.bf16.msra.mxu1 %v20851_v58  ;;  %v936_v58 = vpack.c.bf16 %v14587_v50, %v14586_v49  ;;  %v833_v49 = vld [vmem:[%s22479_s17 + $0x38] sm:$0xff] }
 0x142   : >> { %17727 = vmatmul.mubr.bf16.gmra.mrb[8].mxu1 %v929_v4  ;;  %17758 = vmatprep.subr.bf16.mxu1 %v20854_v5  ;;  %v14591_v4 = vld [vmem:[%s22479_s17 + $0xe9] sm:$0xff]  ;;  %v15276_v50 = vld [vmem:[%s22479_s17 + $0xf3] sm:$0xff]  ;;  %v15314_v37 = vld [vmem:[%s22479_s17 + $0x5c] sm:$0xff] }
 0x143   : >> { %18303 = vmatmul.mubr.bf16.gmra.mrb[8].mxu0 %v22539_v6  ;;  %17730 = vmatprep.mubr.bf16.mxu1 %v930_v7  ;;  %v15267_v7 = vld [vmem:[%s22479_s17 + $0xab] sm:$0xff] }
 0x144   : >> { %18335 = vmatpush3.bf16.msra.mxu0 %v20849_v61  ;;  %18306 = vmatprep.mubr.bf16.mxu0 %v22541_v8  ;;  %v14588_v61 = vld [vmem:[%s22479_s17 + $0xd1] sm:$0xff] }
 0x145   : >> { %18336 = vmatprep.subr.bf16.mxu0 %v20850_v9  ;;  %17759 = vmatpush3.bf16.msra.mxu1 %v20854_v5  ;;  %v15266_v5 = vld [vmem:[%s22479_s17 + $0xa3] sm:$0xff]  ;;  %v937_v10 = vpack.c.bf16 %v14589_v62, %v14588_v61  ;;  %v836_v62 = vld [vmem:[%s22479_s17 + $0x50] sm:$0xff] }
 0x146   : >> { %17760 = vmatprep.subr.bf16.mxu1 %v20856_v12  ;;  %v4803_v13 = vpack.c.bf16 %v15267_v7, %v15266_v5  ;;  %v838_v5 = vld [vmem:[%s22479_s17 + $0x60] sm:$0xff]  ;;  %v839_v7 = vld [vmem:[%s22479_s17 + $0x68] sm:$0xff] }
 0x148   : >> { %18337 = vmatpush3.bf16.msra.mxu0 %v20850_v9  ;;  %v20863_v9 = vld [vmem:[%s21574_s9 + $0x3a0] sm:$0xff]  }
 0x149   : >> { %18338 = vmatprep.subr.bf16.mxu0 %v20852_v17  ;;  %17761 = vmatpush3.bf16.msra.mxu1 %v20856_v12  ;;  %v938_v12 = vpack.c.bf16 %v14591_v4, %v14590_v3  ;;  %v15280_v3 = vld [vmem:[%s22479_s17 + $0x113] sm:$0xff]  ;;  %v15281_v4 = vld [vmem:[%s22479_s17 + $0x11b] sm:$0xff] }
 0x14a   : >> { %17731 = vmatmul.mubr.bf16.gmra.mrb[12].mxu1 %v931_v21  ;;  %17762 = vmatprep.subr.bf16.mxu1 %v20858_v22  ;;  %v827_v21 = vld [vmem:[%s22479_s17 + $0x8] sm:$0xff] }
 0x14b   : >> { %18307 = vmatmul.mubr.bf16.gmra.mrb[12].mxu0 %v22557_v23  ;;  %17734 = vmatprep.mubr.bf16.mxu1 %v932_v24  ;;  %v15271_v24 = vld [vmem:[%s22479_s17 + $0xcb] sm:$0xff]  ;;  %v858_v28 = vpack.c.bf16 %v827_v21, %v826_v19  ;;  %v15284_v19 = vld [vmem:[%s22479_s17 + $0x133] sm:$0xff]  ;;  %v15285_v21 = vld [vmem:[%s22479_s17 + $0x13b] sm:$0xff] }
 0x14c   : >> { %18339 = vmatpush3.bf16.msra.mxu0 %v20852_v17  ;;  %18342 = vmatprep.mubr.bf16.mxu0 %v4797_v25  ;;  %v15268_v17 = vld [vmem:[%s22479_s17 + $0xb3] sm:$0xff] }
 0x14d   : >> { %18340 = vmatprep.subr.bf16.mxu0 %v20853_v26  ;;  %17763 = vmatpush3.bf16.msra.mxu1 %v20858_v22  ;;  %v15270_v22 = vld [vmem:[%s22479_s17 + $0xc3] sm:$0xff]  ;;  %v20867_v25 = vld [vmem:[%s21574_s9 + $0x3b0] sm:$0xff]   ;;  %v4804_v27 = vpack.c.bf16 %v15269_v18, %v15268_v17  ;;  %v20872_v18 = vld [vmem:[%s21574_s9 + $0xa8] sm:$0xff]  }
 0x14e   : >> { %17764 = vmatprep.subr.bf16.mxu1 %v20860_v31  ;;  %v4805_v29 = vpack.c.bf16 %v15271_v24, %v15270_v22  ;;  %v841_v17 = vld [vmem:[%s22479_s17 + $0x78] sm:$0xff]  ;;  %v842_v22 = vld [vmem:[%s22479_s17 + $0x80] sm:$0xff]  ;;  %v843_v24 = vld [vmem:[%s22479_s17 + $0x88] sm:$0xff] }
 0x150   : >> { %18341 = vmatpush3.bf16.msra.mxu0 %v20853_v26  ;;  %v939_v26 = vpack.c.bf16 %v14593_v16, %v14592_v14  ;;  %v22639_v14 = vpack.c.bf16 %v839_v7, %v838_v5  ;;  %v840_v16 = vld [vmem:[%s22479_s17 + $0x70] sm:$0xff]  ;;  %v15322_v7 = vld [vmem:[%s22479_s17 + $0x9c] sm:$0xff] }
 0x151   : >> { %18374 = vmatprep.subr.bf16.mxu0 %v20855_v32  ;;  %17765 = vmatpush3.bf16.msra.mxu1 %v20860_v31  ;;  %v828_v31 = vld [vmem:[%s22479_s17 + $0x10] sm:$0xff] }
 0x152   : >> { %17735 = vmatmul.mubr.bf16.gmra.mrb[16].mxu1 %v933_v38  ;;  %17798 = vmatprep.subr.bf16.mxu1 %v22572_v40  ;;  %v15274_v38 = vld [vmem:[%s22479_s17 + $0xe3] sm:$0xff]  ;;  %v15321_v5 = vld [vmem:[%s22479_s17 + $0x94] sm:$0xff] }
 0x153   : >> { %18343 = vmatmul.mubr.bf16.vlgmr.msra.gmra.mrb[0].mxu0 %v4798_v41  ;;  %17738 = vmatprep.mubr.bf16.mxu1 %v934_v42  ;;  %v15275_v41 = vld [vmem:[%s22479_s17 + $0xeb] sm:$0xff] }
 0x154   : >> { %18375 = vmatpush3.bf16.msra.mxu0 %v20855_v32  ;;  %18346 = vmatprep.mubr.bf16.mxu0 %v4799_v43  ;;  %v829_v32 = vld [vmem:[%s22479_s17 + $0x18] sm:$0xff]  ;;  %v22615_v42 = vld [vmem:[%s21574_s9 + $0x3c0] sm:$0xff]   ;;  %v4807_v46 = vpack.c.bf16 %v15275_v41, %v15274_v38  ;;  %v846_v38 = vld [vmem:[%s22479_s17 + $0xa0] sm:$0xff] }
 0x155   : >> { %18376 = vmatprep.subr.bf16.mxu0 %v20857_v44  ;;  %v859_v43 = vpack.c.bf16 %v829_v32, %v828_v31  ;;  %v844_v32 = vld [vmem:[%s22479_s17 + $0x90] sm:$0xff]  ;;  %v847_v41 = vld [vmem:[%s22479_s17 + $0xa8] sm:$0xff] }
 0x158   : >> { %18377 = vmatpush3.bf16.msra.mxu0 %v20857_v44  ;;  %v4806_v44 = vpack.c.bf16 %v15273_v34, %v15272_v33  ;;  %v20876_v33 = vld [vmem:[%s21574_s9 + $0xb8] sm:$0xff]   ;;  %v845_v34 = vld [vmem:[%s22479_s17 + $0x98] sm:$0xff] }
 0x159   : >> { %18378 = vmatprep.subr.bf16.mxu0 %v20859_v54 }
 0x15a   : >> { %17739 = vmatmul.mubr.bf16.gmra.mrb[20].mxu1 %v935_v56  ;;  %v15278_v56 = vld [vmem:[%s22479_s17 + $0x103] sm:$0xff] }
 0x15b   : >> { %18347 = vmatmul.mubr.bf16.gmra.mrb[4].mxu0 %v4800_v57  ;;  %17742 = vmatprep.mubr.bf16.mxu1 %v936_v58  ;;  %v20866_v57 = vld [vmem:[%s21574_s9 + $0x90] sm:$0xff]   ;;  %v15279_v58 = vld [vmem:[%s22479_s17 + $0x10b] sm:$0xff] }
 0x15c   : >> { %18350 = vmatprep.mubr.bf16.mxu0 %v4801_v59  ;;  %18379 = vmatpush3.bf16.msra.mxu0 %v20859_v54  ;;  %v835_v54 = vld [vmem:[%s22479_s17 + $0x48] sm:$0xff]  ;;  %v861_v59 = vpack.c.bf16 %v833_v49, %v832_v47  ;;  %v4809_v61 = vpack.c.bf16 %v15279_v58, %v15278_v56  ;;  %v5106_v47 = vpack.c.bf16 %v15314_v37, %v15313_v35  ;;  %v15318_v56 = vld [vmem:[%s22479_s17 + $0x7c] sm:$0xff] }
 0x15d   : >> { %18380 = vmatprep.subr.bf16.mxu0 %v20861_v60  ;;  %v851_v58 = vld [vmem:[%s22479_s17 + $0xc8] sm:$0xff] }
 0x160   : >> { %18381 = vmatpush3.bf16.msra.mxu0 %v20861_v60  ;;  %v4808_v60 = vpack.c.bf16 %v15277_v51, %v15276_v50  ;;  %v848_v50 = vld [vmem:[%s22479_s17 + $0xb0] sm:$0xff] }
 0x161   : >> { %18382 = vmatprep.subr.bf16.mxu0 %v20863_v9  ;;  %v20873_v51 = vld [vmem:[%s21574_s9 + $0x3c8] sm:$0xff]  }
 0x162   : >> { %17743 = vmatmul.mubr.bf16.gmra.mrb[24].mxu1 %v937_v10  ;;  %v15283_v10 = vld [vmem:[%s22479_s17 + $0x12b] sm:$0xff] }
 0x163   : >> { %18351 = vmatmul.mubr.bf16.gmra.mrb[8].mxu0 %v4802_v11  ;;  %17746 = vmatprep.mubr.bf16.mxu1 %v938_v12  ;;  %v20870_v11 = vld [vmem:[%s21574_s9 + $0xa0] sm:$0xff]   ;;  %v863_v12 = vpack.c.bf16 %v837_v63, %v836_v62 }
 0x164   : >> { %18354 = vmatprep.mubr.bf16.mxu0 %v4803_v13  ;;  %18383 = vmatpush3.bf16.msra.mxu0 %v20863_v9  ;;  %v15282_v9 = vld [vmem:[%s22479_s17 + $0x123] sm:$0xff]  ;;  %v4810_v13 = vpack.c.bf16 %v15281_v4, %v15280_v3  ;;  %v852_v3 = vld [vmem:[%s22479_s17 + $0xd0] sm:$0xff]  ;;  %v853_v4 = vld [vmem:[%s22479_s17 + $0xd8] sm:$0xff] }
 0x165   : >> { %18384 = vmatprep.subr.bf16.mxu0 %v20865_v15 }
 0x168   : >> { %18385 = vmatpush3.bf16.msra.mxu0 %v20865_v15  ;;  %v4811_v15 = vpack.c.bf16 %v15283_v10, %v15282_v9  ;;  %v854_v9 = vld [vmem:[%s22479_s17 + $0xe0] sm:$0xff]  ;;  %v855_v10 = vld [vmem:[%s22479_s17 + $0xe8] sm:$0xff] }
 0x169   : >> { %18386 = vmatprep.subr.bf16.mxu0 %v20867_v25 }
 0x16a   : >> { %17747 = vmatmul.mubr.bf16.gmra.mrb[28].mxu1 %v939_v26  ;;  %v15312_v26 = vld [vmem:[%s22479_s17 + $0x4c] sm:$0xff] }
 0x16b   : >> { %18355 = vmatmul.mubr.bf16.gmra.mrb[12].mxu0 %v4804_v27  ;;  %17766 = vmatprep.mubr.bf16.mxu1 %v858_v28  ;;  %v20874_v27 = vld [vmem:[%s21574_s9 + $0xb0] sm:$0xff]   ;;  %v22652_v28 = vpack.c.bf16 %v841_v17, %v840_v16  ;;  %v5110_v16 = vpack.c.bf16 %v15322_v7, %v15321_v5  ;;  %v22706_v17 = vpack.c.bf16 %v855_v10, %v854_v9  ;;  %v15336_v5 = vld [vmem:[%s22479_s17 + $0x10c] sm:$0xff]  ;;  %v20884_v10 = vld [vmem:[%s21574_s9 + $0xd8] sm:$0xff]  }
 0x16c   : >> { %18358 = vmatprep.mubr.bf16.mxu0 %v4805_v29  ;;  %18387 = vmatpush3.bf16.msra.mxu0 %v20867_v25  ;;  %v15311_v25 = vld [vmem:[%s22479_s17 + $0x44] sm:$0xff]  ;;  %v4812_v29 = vpack.c.bf16 %v15285_v21, %v15284_v19  ;;  %v20881_v19 = vld [vmem:[%s21574_s9 + $0x3e8] sm:$0xff]  }
 0x16d   : >> { %18388 = vmatprep.subr.bf16.mxu0 %v20869_v30  ;;  %v5105_v31 = vpack.c.bf16 %v15312_v26, %v15311_v25  ;;  %v856_v21 = vld [vmem:[%s22479_s17 + $0xf0] sm:$0xff]  ;;  %v15326_v25 = vld [vmem:[%s22479_s17 + $0xbc] sm:$0xff] }
 0x16e   : >> { %v14627_v26 = vld [vmem:[%s22479_s17 + $0x2] sm:$0xff] }
 0x170   : >> { %18389 = vmatpush3.bf16.msra.mxu0 %v20869_v30  ;;  %v22654_v30 = vpack.c.bf16 %v843_v24, %v842_v22  ;;  %v857_v22 = vld [vmem:[%s22479_s17 + $0xf8] sm:$0xff] }
 0x171   : >> { %18422 = vmatprep.subr.bf16.mxu0 %v22615_v42  ;;  %v15325_v24 = vld [vmem:[%s22479_s17 + $0xb4] sm:$0xff] }
 0x172   : >> { %17767 = vmatmul.mubr.bf16.vlgmr.msra.gmra.mrb[0].mxu1 %v859_v43  ;;  %v15315_v43 = vld [vmem:[%s22479_s17 + $0x64] sm:$0xff] }
 0x173   : >> { %18359 = vmatmul.mubr.bf16.gmra.mrb[16].mxu0 %v4806_v44  ;;  %17799 = vmatpush3.bf16.msra.mxu1 %v22572_v40  ;;  %v862_v40 = vpack.c.bf16 %v835_v54, %v834_v53  ;;  %v15316_v44 = vld [vmem:[%s22479_s17 + $0x6c] sm:$0xff]  ;;  %v849_v53 = vld [vmem:[%s22479_s17 + $0xb8] sm:$0xff] }
 0x174   : >> { %17770 = vmatprep.mubr.bf16.mxu1 %v860_v45  ;;  %18362 = vmatprep.mubr.bf16.mxu0 %v4807_v46  ;;  %v22668_v45 = vld [vmem:[%s21574_s9 + $0xc0] sm:$0xff]   ;;  %v22670_v46 = vpack.c.bf16 %v845_v34, %v844_v32  ;;  %v5107_v49 = vpack.c.bf16 %v15316_v44, %v15315_v43  ;;  %v15317_v54 = vld [vmem:[%s22479_s17 + $0x74] sm:$0xff]  ;;  %v5112_v34 = vpack.c.bf16 %v15326_v25, %v15325_v24  ;;  %v15342_v24 = vld [vmem:[%s22479_s17 + $0x13c] sm:$0xff] }
 0x175   : >> { %17800 = vmatprep.subr.bf16.mxu1 %v20864_v48  ;;  %v5108_v62 = vpack.c.bf16 %v15318_v56, %v15317_v54  ;;  %v20883_v32 = vld [vmem:[%s21574_s9 + $0x3f0] sm:$0xff]   ;;  %v22733_v54 = vld [vmem:[%s21574_s9 + $0x400] sm:$0xff]  }
 0x176   : >> { %v14630_v43 = vld [vmem:[%s22479_s17 + $0x1a] sm:$0xff] }
 0x177   : >> { %17801 = vmatpush3.bf16.msra.mxu1 %v20864_v48  ;;  %v22672_v48 = vpack.c.bf16 %v847_v41, %v846_v38  ;;  %v14629_v38 = vld [vmem:[%s22479_s17 + $0x12] sm:$0xff]  ;;  %v20885_v41 = vld [vmem:[%s21574_s9 + $0x3f8] sm:$0xff]  }
 0x178   : >> { %17802 = vmatprep.subr.bf16.mxu1 %v20866_v57  ;;  %v15329_v44 = vld [vmem:[%s22479_s17 + $0xd4] sm:$0xff]  ;;  %v1410_v56 = vpack.c.bf16 %v14630_v43, %v14629_v38  ;;  %v14685_v38 = vld [vmem:[%s22479_s17 + $0xb] sm:$0xff] }
 0x179   : >> { %v20890_v25 = vld [vmem:[%s21574_s9 + $0xf0] sm:$0xff]  }
 0x17a   : >> { %17771 = vmatmul.mubr.bf16.gmra.mrb[4].mxu1 %v861_v59  ;;  %v15319_v59 = vld [vmem:[%s22479_s17 + $0x84] sm:$0xff] }
 0x17b   : >> { %18363 = vmatmul.mubr.bf16.gmra.mrb[20].mxu0 %v4808_v60  ;;  %17774 = vmatprep.mubr.bf16.mxu1 %v862_v40  ;;  %v15320_v60 = vld [vmem:[%s22479_s17 + $0x8c] sm:$0xff]  ;;  %v20875_v40 = vld [vmem:[%s21574_s9 + $0x3d0] sm:$0xff]  }
 0x17c   : >> { %18366 = vmatprep.mubr.bf16.mxu0 %v4809_v61  ;;  %17803 = vmatpush3.bf16.msra.mxu1 %v20866_v57  ;;  %v850_v57 = vld [vmem:[%s22479_s17 + $0xc0] sm:$0xff]  ;;  %v22688_v61 = vpack.c.bf16 %v849_v53, %v848_v50  ;;  %v14632_v50 = vld [vmem:[%s22479_s17 + $0x2a] sm:$0xff] }
 0x17d   : >> { %17804 = vmatprep.subr.bf16.mxu1 %v20868_v0  ;;  %v22690_v63 = vpack.c.bf16 %v851_v58, %v850_v57  ;;  %v15332_v53 = vld [vmem:[%s22479_s17 + $0xec] sm:$0xff] }
 0x180   : >> { %17805 = vmatpush3.bf16.msra.mxu1 %v20868_v0  ;;  %v20877_v0 = vld [vmem:[%s21574_s9 + $0x3d8] sm:$0xff]  }
 0x181   : >> { %17806 = vmatprep.subr.bf16.mxu1 %v20870_v11 }
 0x182   : >> { %17775 = vmatmul.mubr.bf16.gmra.mrb[8].mxu1 %v863_v12  ;;  %v15324_v12 = vld [vmem:[%s22479_s17 + $0xac] sm:$0xff] }
 0x183   : >> { %18367 = vmatmul.mubr.bf16.gmra.mrb[24].mxu0 %v4810_v13  ;;  %17778 = vmatprep.mubr.bf16.mxu1 %v22639_v14  ;;  %v20879_v13 = vld [vmem:[%s21574_s9 + $0x3e0] sm:$0xff]  }
 0x184   : >> { %18370 = vmatprep.mubr.bf16.mxu0 %v4811_v15  ;;  %17807 = vmatpush3.bf16.msra.mxu1 %v20870_v11  ;;  %v15323_v11 = vld [vmem:[%s22479_s17 + $0xa4] sm:$0xff]  ;;  %v22704_v15 = vpack.c.bf16 %v853_v4, %v852_v3  ;;  %v20882_v4 = vld [vmem:[%s21574_s9 + $0xd0] sm:$0xff]  }
 0x185   : >> { %17808 = vmatprep.subr.bf16.mxu1 %v20872_v18  ;;  %v15335_v3 = vld [vmem:[%s22479_s17 + $0x104] sm:$0xff] }
 0x188   : >> { %17809 = vmatpush3.bf16.msra.mxu1 %v20872_v18  ;;  %v5111_v18 = vpack.c.bf16 %v15324_v12, %v15323_v11  ;;  %v15337_v11 = vld [vmem:[%s22479_s17 + $0x114] sm:$0xff]  ;;  %v15338_v12 = vld [vmem:[%s22479_s17 + $0x11c] sm:$0xff] }
 0x189   : >> { %17810 = vmatprep.subr.bf16.mxu1 %v20874_v27 }
 0x18a   : >> { %17779 = vmatmul.mubr.bf16.gmra.mrb[12].mxu1 %v22652_v28 }
 0x18b   : >> { %18371 = vmatmul.mubr.bf16.gmra.mrb[28].mxu0 %v4812_v29  ;;  %17782 = vmatprep.mubr.bf16.mxu1 %v22654_v30  ;;  %v15327_v29 = vld [vmem:[%s22479_s17 + $0xc4] sm:$0xff] }
 0x18c   : >> { %18390 = vmatprep.mubr.bf16.mxu0 %v5105_v31  ;;  %17811 = vmatpush3.bf16.msra.mxu1 %v20874_v27  ;;  %v14628_v27 = vld [vmem:[%s22479_s17 + $0xa] sm:$0xff] }
 0x18d   : >> { %17812 = vmatprep.subr.bf16.mxu1 %v20876_v33  ;;  %v15328_v31 = vld [vmem:[%s22479_s17 + $0xcc] sm:$0xff]  ;;  %v1409_v35 = vpack.c.bf16 %v14628_v27, %v14627_v26  ;;  %v20892_v27 = vld [vmem:[%s21574_s9 + $0xf8] sm:$0xff]  }
 0x18e   : >> { %v5113_v37 = vpack.c.bf16 %v15328_v31, %v15327_v29  ;;  %v14656_v31 = vld [vmem:[%s22479_s17 + $0xea] sm:$0xff] }
 0x190   : >> { %17813 = vmatpush3.bf16.msra.mxu1 %v20876_v33  ;;  %v22720_v33 = vpack.c.bf16 %v857_v22, %v856_v21  ;;  %v20888_v22 = vld [vmem:[%s21574_s9 + $0xe8] sm:$0xff]  }
 0x191   : >> { %17846 = vmatprep.subr.bf16.mxu1 %v22668_v45 }
 0x192   : >> { %17783 = vmatmul.mubr.bf16.gmra.mrb[16].mxu1 %v22670_v46 }
 0x193   : >> { %18391 = vmatmul.mubr.bf16.vlgmr.msra.gmra.mrb[0].mxu0 %v5106_v47  ;;  %17786 = vmatprep.mubr.bf16.mxu1 %v22672_v48  ;;  %v15330_v47 = vld [vmem:[%s22479_s17 + $0xdc] sm:$0xff] }
 0x194   : >> { %18423 = vmatpush3.bf16.msra.mxu0 %v22615_v42  ;;  %18394 = vmatprep.mubr.bf16.mxu0 %v5107_v49  ;;  %v5109_v42 = vpack.c.bf16 %v15320_v60, %v15319_v59  ;;  %v14631_v49 = vld [vmem:[%s22479_s17 + $0x22] sm:$0xff]  ;;  %v5114_v57 = vpack.c.bf16 %v15330_v47, %v15329_v44  ;;  %v20880_v60 = vld [vmem:[%s21574_s9 + $0xc8] sm:$0xff]  }
 0x195   : >> { %18424 = vmatprep.subr.bf16.mxu0 %v20873_v51  ;;  %v1411_v58 = vpack.c.bf16 %v14632_v50, %v14631_v49  ;;  %v20901_v44 = vld [vmem:[%s21574_s9 + $0x438] sm:$0xff]   ;;  %v14686_v47 = vld [vmem:[%s22479_s17 + $0x13] sm:$0xff]  ;;  %v14689_v50 = vld [vmem:[%s22479_s17 + $0x2b] sm:$0xff] }
 0x196   : >> { %v14687_v49 = vld [vmem:[%s22479_s17 + $0x1b] sm:$0xff] }
 0x198   : >> { %18425 = vmatpush3.bf16.msra.mxu0 %v20873_v51  ;;  %v15331_v51 = vld [vmem:[%s22479_s17 + $0xe4] sm:$0xff] }
 0x199   : >> { %18426 = vmatprep.subr.bf16.mxu0 %v20875_v40  ;;  %v5115_v59 = vpack.c.bf16 %v15332_v53, %v15331_v51  ;;  %v15388_v51 = vld [vmem:[%s22479_s17 + $0x100] sm:$0xff]  ;;  %v15389_v53 = vld [vmem:[%s22479_s17 + $0x108] sm:$0xff] }
 0x19a   : >> { %17787 = vmatmul.mubr.bf16.gmra.mrb[20].mxu1 %v22688_v61 }
 0x19b   : >> { %18395 = vmatmul.mubr.bf16.gmra.mrb[4].mxu0 %v5108_v62  ;;  %17790 = vmatprep.mubr.bf16.mxu1 %v22690_v63  ;;  %v14634_v62 = vld [vmem:[%s22479_s17 + $0x3a] sm:$0xff] }
 0x19c   : >> { %18398 = vmatprep.mubr.bf16.mxu0 %v5109_v42  ;;  %18427 = vmatpush3.bf16.msra.mxu0 %v20875_v40  ;;  %v14633_v40 = vld [vmem:[%s22479_s17 + $0x32] sm:$0xff] }
 0x19d   : >> { %18428 = vmatprep.subr.bf16.mxu0 %v20877_v0  ;;  %v15333_v42 = vld [vmem:[%s22479_s17 + $0xf4] sm:$0xff]  ;;  %v1412_v7 = vpack.c.bf16 %v14634_v62, %v14633_v40  ;;  %v14692_v62 = vld [vmem:[%s22479_s17 + $0x43] sm:$0xff] }
 0x19e   : >> { %v15391_v40 = vld [vmem:[%s22479_s17 + $0x118] sm:$0xff] }
 0x1a0   : >> { %18429 = vmatpush3.bf16.msra.mxu0 %v20877_v0  ;;  %v15334_v0 = vld [vmem:[%s22479_s17 + $0xfc] sm:$0xff] }
 0x1a1   : >> { %18430 = vmatprep.subr.bf16.mxu0 %v20879_v13  ;;  %v5116_v9 = vpack.c.bf16 %v15334_v0, %v15333_v42  ;;  %v14693_v42 = vld [vmem:[%s22479_s17 + $0x4b] sm:$0xff]  ;;  %v15392_v0 = vld [vmem:[%s22479_s17 + $0x120] sm:$0xff] }
 0x1a2   : >> { %17791 = vmatmul.mubr.bf16.gmra.mrb[24].mxu1 %v22704_v15 }
 0x1a3   : >> { %18399 = vmatmul.mubr.bf16.gmra.mrb[8].mxu0 %v5110_v16  ;;  %17794 = vmatprep.mubr.bf16.mxu1 %v22706_v17  ;;  %v15340_v16 = vld [vmem:[%s22479_s17 + $0x12c] sm:$0xff] }
 0x1a4   : >> { %18402 = vmatprep.mubr.bf16.mxu0 %v5111_v18  ;;  %18431 = vmatpush3.bf16.msra.mxu0 %v20879_v13  ;;  %v15339_v13 = vld [vmem:[%s22479_s17 + $0x124] sm:$0xff] }
 0x1a5   : >> { %18432 = vmatprep.subr.bf16.mxu0 %v20881_v19  ;;  %v20886_v18 = vld [vmem:[%s21574_s9 + $0xe0] sm:$0xff]   ;;  %v5119_v21 = vpack.c.bf16 %v15340_v16, %v15339_v13  ;;  %v15395_v13 = vld [vmem:[%s22479_s17 + $0x138] sm:$0xff] }
 0x1a6   : >> { %v14696_v16 = vld [vmem:[%s22479_s17 + $0x63] sm:$0xff] }
 0x1a8   : >> { %18433 = vmatpush3.bf16.msra.mxu0 %v20881_v19  ;;  %v5118_v19 = vpack.c.bf16 %v15338_v12, %v15337_v11  ;;  %v14695_v11 = vld [vmem:[%s22479_s17 + $0x5b] sm:$0xff]  ;;  %v15394_v12 = vld [vmem:[%s22479_s17 + $0x130] sm:$0xff] }
 0x1a9   : >> { %18434 = vmatprep.subr.bf16.mxu0 %v20883_v32 }
 0x1aa   : >> { %17795 = vmatmul.mubr.bf16.gmra.mrb[28].mxu1 %v22720_v33 }
 0x1ab   : >> { %18403 = vmatmul.mubr.bf16.gmra.mrb[12].mxu0 %v5112_v34  ;;  %17814 = vmatprep.mubr.bf16.mxu1 %v1409_v35  ;;  %v14658_v35 = vld [vmem:[%s22479_s17 + $0xfa] sm:$0xff] }
 0x1ac   : >> { %18406 = vmatprep.mubr.bf16.mxu0 %v5113_v37  ;;  %18435 = vmatpush3.bf16.msra.mxu0 %v20883_v32  ;;  %v20895_v32 = vld [vmem:[%s21574_s9 + $0x420] sm:$0xff]  }
 0x1ad   : >> { %18436 = vmatprep.subr.bf16.mxu0 %v20885_v41  ;;  %v14684_v37 = vld [vmem:[%s22479_s17 + $0x3] sm:$0xff] }
 0x1b0   : >> { %18437 = vmatpush3.bf16.msra.mxu0 %v20885_v41  ;;  %v20899_v41 = vld [vmem:[%s21574_s9 + $0x430] sm:$0xff]  }
 0x1b1   : >> { %18470 = vmatprep.subr.bf16.mxu0 %v22733_v54 }
 0x1b2   : >> { %17815 = vmatmul.mubr.bf16.vlgmr.msra.gmra.mrb[0].mxu1 %v1410_v56  ;;  %v1718_v56 = vpack.c.bf16 %v14687_v49, %v14686_v47  ;;  %v14705_v47 = vld [vmem:[%s22479_s17 + $0xab] sm:$0xff]  ;;  %v15429_v49 = vld [vmem:[%s22479_s17 + $0x81] sm:$0xff] }
 0x1b3   : >> { %18407 = vmatmul.mubr.bf16.gmra.mrb[16].mxu0 %v5114_v57  ;;  %17847 = vmatpush3.bf16.msra.mxu1 %v22668_v45  ;;  %v5117_v45 = vpack.c.bf16 %v15336_v5, %v15335_v3  ;;  %v20896_v57 = vld [vmem:[%s21574_s9 + $0x108] sm:$0xff]   ;;  %v20898_v3 = vld [vmem:[%s21574_s9 + $0x110] sm:$0xff]  }
 0x1b4   : >> { %17818 = vmatprep.mubr.bf16.mxu1 %v1411_v58  ;;  %18410 = vmatprep.mubr.bf16.mxu0 %v5115_v59  ;;  %v5423_v58 = vpack.c.bf16 %v15389_v53, %v15388_v51  ;;  %v14690_v59 = vld [vmem:[%s22479_s17 + $0x33] sm:$0xff] }
 0x1b5   : >> { %17848 = vmatprep.subr.bf16.mxu1 %v20880_v60 }
 0x1b7   : >> { %17849 = vmatpush3.bf16.msra.mxu1 %v20880_v60  ;;  %v15390_v60 = vld [vmem:[%s22479_s17 + $0x110] sm:$0xff] }
 0x1b8   : >> { %17850 = vmatprep.subr.bf16.mxu1 %v20882_v4 }
 0x1ba   : >> { %17819 = vmatmul.mubr.bf16.gmra.mrb[4].mxu1 %v1412_v7  ;;  %v1721_v7 = vpack.c.bf16 %v14693_v42, %v14692_v62  ;;  %v14709_v62 = vld [vmem:[%s22479_s17 + $0xcb] sm:$0xff]  ;;  %v15433_v42 = vld [vmem:[%s22479_s17 + $0xa1] sm:$0xff] }
 0x1bb   : >> { %18411 = vmatmul.mubr.bf16.gmra.mrb[20].mxu0 %v5116_v9  ;;  %17822 = vmatprep.mubr.bf16.mxu1 %v22486_v20  ;;  %v15341_v20 = vld [vmem:[%s22479_s17 + $0x134] sm:$0xff] }
 0x1bc   : >> { %18414 = vmatprep.mubr.bf16.mxu0 %v5117_v45  ;;  %17851 = vmatpush3.bf16.msra.mxu1 %v20882_v4  ;;  %v5120_v26 = vpack.c.bf16 %v15342_v24, %v15341_v20  ;;  %v15393_v4 = vld [vmem:[%s22479_s17 + $0x128] sm:$0xff]  ;;  %v20900_v45 = vld [vmem:[%s21574_s9 + $0x118] sm:$0xff]   ;;  %v5426_v24 = vpack.c.bf16 %v15395_v13, %v15394_v12 }
 0x1bd   : >> { %17852 = vmatprep.subr.bf16.mxu1 %v20884_v10  ;;  %v5425_v9 = vpack.c.bf16 %v15393_v4, %v15392_v0  ;;  %v15434_v0 = vld [vmem:[%s22479_s17 + $0xa9] sm:$0xff] }
 0x1be   : >> { %v14712_v12 = vld [vmem:[%s22479_s17 + $0xe3] sm:$0xff]  ;;  %v14713_v13 = vld [vmem:[%s22479_s17 + $0xeb] sm:$0xff] }
 0x1c0   : >> { %17853 = vmatpush3.bf16.msra.mxu1 %v20884_v10  ;;  %v14694_v10 = vld [vmem:[%s22479_s17 + $0x53] sm:$0xff] }
 0x1c1   : >> { %17854 = vmatprep.subr.bf16.mxu1 %v20886_v18  ;;  %v1722_v20 = vpack.c.bf16 %v14695_v11, %v14694_v10  ;;  %v15435_v10 = vld [vmem:[%s22479_s17 + $0xb1] sm:$0xff]  ;;  %v15436_v11 = vld [vmem:[%s22479_s17 + $0xb9] sm:$0xff] }
 0x1c2   : >> { %17823 = vmatmul.mubr.bf16.gmra.mrb[8].mxu1 %v22503_v36  ;;  %v22763_v36 = vld [vmem:[%s21574_s9 + $0x100] sm:$0xff]  }
 0x1c3   : >> { %18415 = vmatmul.mubr.bf16.gmra.mrb[24].mxu0 %v5118_v19  ;;  %17826 = vmatprep.mubr.bf16.mxu1 %v22506_v39  ;;  %v20889_v39 = vld [vmem:[%s21574_s9 + $0x408] sm:$0xff]   ;;  %v15396_v19 = vld [vmem:[%s22479_s17 + $0x140] sm:$0xff] }
 0x1c4   : >> { %18418 = vmatprep.mubr.bf16.mxu0 %v5119_v21  ;;  %17855 = vmatpush3.bf16.msra.mxu1 %v20886_v18  ;;  %v14697_v18 = vld [vmem:[%s22479_s17 + $0x6b] sm:$0xff] }
 0x1c5   : >> { %17856 = vmatprep.subr.bf16.mxu1 %v20888_v22  ;;  %v15397_v21 = vld [vmem:[%s22479_s17 + $0x148] sm:$0xff] }
 0x1c8   : >> { %17857 = vmatpush3.bf16.msra.mxu1 %v20888_v22  ;;  %v20902_v22 = vld [vmem:[%s21574_s9 + $0x120] sm:$0xff]  }
 0x1c9   : >> { %17858 = vmatprep.subr.bf16.mxu1 %v20890_v25 }
 0x1ca   : >> { %17827 = vmatmul.mubr.bf16.gmra.mrb[12].mxu1 %v22521_v52  ;;  %v14651_v52 = vld [vmem:[%s22479_s17 + $0xc2] sm:$0xff] }
 0x1cb   : >> { %18419 = vmatmul.mubr.bf16.gmra.mrb[28].mxu0 %v5120_v26  ;;  %17830 = vmatprep.mubr.bf16.mxu1 %v22524_v55  ;;  %v14652_v55 = vld [vmem:[%s22479_s17 + $0xca] sm:$0xff]  ;;  %v5427_v26 = vpack.c.bf16 %v15397_v21, %v15396_v19 }
 0x1cc   : >> { %18438 = vmatprep.mubr.bf16.mxu0 %v22639_v14  ;;  %17859 = vmatpush3.bf16.msra.mxu1 %v20890_v25  ;;  %v20891_v14 = vld [vmem:[%s21574_s9 + $0x410] sm:$0xff]   ;;  %v22775_v29 = vpack.c.bf16 %v14652_v55, %v14651_v52  ;;  %v22839_v25 = vpack.c.bf16 %v14697_v18, %v14696_v16  ;;  %v15398_v52 = vld [vmem:[%s22479_s17 + $0x150] sm:$0xff]  ;;  %v15437_v16 = vld [vmem:[%s22479_s17 + $0xc1] sm:$0xff] }
 0x1cd   : >> { %17860 = vmatprep.subr.bf16.mxu1 %v20892_v27  ;;  %v15399_v55 = vld [vmem:[%s22479_s17 + $0x158] sm:$0xff]  ;;  %v15438_v18 = vld [vmem:[%s22479_s17 + $0xc9] sm:$0xff] }
 0x1ce   : >> { %v20911_v19 = vld [vmem:[%s21574_s9 + $0x460] sm:$0xff]  }
 0x1d0   : >> { %17861 = vmatpush3.bf16.msra.mxu1 %v20892_v27  ;;  %v20904_v27 = vld [vmem:[%s21574_s9 + $0x128] sm:$0xff]  }
 0x1d1   : >> { %17894 = vmatprep.subr.bf16.mxu1 %v22763_v36 }
 0x1d2   : >> { %17831 = vmatmul.mubr.bf16.gmra.mrb[16].mxu1 %v22539_v6  ;;  %v20893_v6 = vld [vmem:[%s21574_s9 + $0x418] sm:$0xff]  }
 0x1d3   : >> { %18439 = vmatmul.mubr.bf16.vlgmr.msra.gmra.mrb[0].mxu0 %v22652_v28  ;;  %17834 = vmatprep.mubr.bf16.mxu1 %v22541_v8  ;;  %v14653_v8 = vld [vmem:[%s22479_s17 + $0xd2] sm:$0xff]  ;;  %v14654_v28 = vld [vmem:[%s22479_s17 + $0xda] sm:$0xff] }
 0x1d4   : >> { %18471 = vmatpush3.bf16.msra.mxu0 %v22733_v54  ;;  %18442 = vmatprep.mubr.bf16.mxu0 %v22654_v30  ;;  %v14655_v30 = vld [vmem:[%s22479_s17 + $0xe2] sm:$0xff]  ;;  %v22787_v34 = vpack.c.bf16 %v14654_v28, %v14653_v8 }
 0x1d5   : >> { %18472 = vmatprep.subr.bf16.mxu0 %v20889_v39  ;;  %v22814_v54 = vld [vmem:[%s21574_s9 + $0x440] sm:$0xff]  }
 0x1d6   : >> { %v15425_v8 = vld [vmem:[%s22479_s17 + $0x61] sm:$0xff]  ;;  %v15426_v28 = vld [vmem:[%s22479_s17 + $0x69] sm:$0xff] }
 0x1d8   : >> { %18473 = vmatpush3.bf16.msra.mxu0 %v20889_v39  ;;  %v14699_v39 = vld [vmem:[%s22479_s17 + $0x7b] sm:$0xff] }
 0x1d9   : >> { %18474 = vmatprep.subr.bf16.mxu0 %v20891_v14 }
 0x1da   : >> { %17835 = vmatmul.mubr.bf16.gmra.mrb[20].mxu1 %v22557_v23  ;;  %v22789_v23 = vpack.c.bf16 %v14656_v31, %v14655_v30  ;;  %v20906_v30 = vld [vmem:[%s21574_s9 + $0x130] sm:$0xff]  }
 0x1db   : >> { %18443 = vmatmul.mubr.bf16.gmra.mrb[4].mxu0 %v22670_v46  ;;  %17838 = vmatprep.mubr.bf16.mxu1 %v22775_v29  ;;  %v20897_v46 = vld [vmem:[%s21574_s9 + $0x428] sm:$0xff]  }
 0x1dc   : >> { %18446 = vmatprep.mubr.bf16.mxu0 %v22672_v48  ;;  %18475 = vmatpush3.bf16.msra.mxu0 %v20891_v14  ;;  %v14657_v48 = vld [vmem:[%s22479_s17 + $0xf2] sm:$0xff]  ;;  %v14700_v14 = vld [vmem:[%s22479_s17 + $0x83] sm:$0xff] }
 0x1dd   : >> { %18476 = vmatprep.subr.bf16.mxu0 %v20893_v6  ;;  %v22801_v43 = vpack.c.bf16 %v14658_v35, %v14657_v48  ;;  %v5721_v48 = vpack.c.bf16 %v15426_v28, %v15425_v8  ;;  %v20908_v35 = vld [vmem:[%s21574_s9 + $0x138] sm:$0xff]   ;;  %v15442_v8 = vld [vmem:[%s22479_s17 + $0xe9] sm:$0xff]  ;;  %v20915_v28 = vld [vmem:[%s21574_s9 + $0x470] sm:$0xff]  }
 0x1e0   : >> { %18477 = vmatpush3.bf16.msra.mxu0 %v20893_v6  ;;  %v14701_v6 = vld [vmem:[%s22479_s17 + $0x8b] sm:$0xff] }
 0x1e1   : >> { %18478 = vmatprep.subr.bf16.mxu0 %v20895_v32 }
 0x1e2   : >> { %17839 = vmatmul.mubr.bf16.gmra.mrb[24].mxu1 %v22787_v34 }
 0x1e3   : >> { %18447 = vmatmul.mubr.bf16.gmra.mrb[8].mxu0 %v22688_v61  ;;  %17842 = vmatprep.mubr.bf16.mxu1 %v22789_v23  ;;  %v1717_v61 = vpack.c.bf16 %v14685_v38, %v14684_v37  ;;  %v14702_v37 = vld [vmem:[%s22479_s17 + $0x93] sm:$0xff]  ;;  %v14703_v38 = vld [vmem:[%s22479_s17 + $0x9b] sm:$0xff] }
 0x1e4   : >> { %18450 = vmatprep.mubr.bf16.mxu0 %v22690_v63  ;;  %18479 = vmatpush3.bf16.msra.mxu0 %v20895_v32  ;;  %v14688_v63 = vld [vmem:[%s22479_s17 + $0x23] sm:$0xff]  ;;  %v5428_v32 = vpack.c.bf16 %v15399_v55, %v15398_v52  ;;  %v22870_v51 = vpack.c.bf16 %v14703_v38, %v14702_v37  ;;  %v15440_v52 = vld [vmem:[%s22479_s17 + $0xd9] sm:$0xff] }
 0x1e5   : >> { %18480 = vmatprep.subr.bf16.mxu0 %v20897_v46  ;;  %v14741_v55 = vld [vmem:[%s22479_s17 + $0x4] sm:$0xff]  ;;  %v14743_v38 = vld [vmem:[%s22479_s17 + $0x14] sm:$0xff] }
 0x1e6   : >> { %v20917_v37 = vld [vmem:[%s21574_s9 + $0x478] sm:$0xff]  }
 0x1e8   : >> { %18481 = vmatpush3.bf16.msra.mxu0 %v20897_v46  ;;  %v22854_v46 = vpack.c.bf16 %v14701_v6, %v14700_v14  ;;  %v14742_v14 = vld [vmem:[%s22479_s17 + $0xc] sm:$0xff]  ;;  %v15441_v6 = vld [vmem:[%s22479_s17 + $0xe1] sm:$0xff] }
 0x1e9   : >> { %18482 = vmatprep.subr.bf16.mxu0 %v20899_v41 }
 0x1ea   : >> { %17843 = vmatmul.mubr.bf16.gmra.mrb[28].mxu1 %v22801_v43 }
 0x1eb   : >> { %18451 = vmatmul.mubr.bf16.gmra.mrb[12].mxu0 %v22704_v15  ;;  %17862 = vmatprep.mubr.bf16.mxu1 %v1717_v61  ;;  %v1719_v15 = vpack.c.bf16 %v14689_v50, %v14688_v63  ;;  %v15428_v61 = vld [vmem:[%s22479_s17 + $0x79] sm:$0xff]  ;;  %v15430_v63 = vld [vmem:[%s22479_s17 + $0x89] sm:$0xff] }
 0x1ec   : >> { %18454 = vmatprep.mubr.bf16.mxu0 %v22706_v17  ;;  %18483 = vmatpush3.bf16.msra.mxu0 %v20899_v41  ;;  %v14691_v17 = vld [vmem:[%s22479_s17 + $0x3b] sm:$0xff]  ;;  %v15427_v41 = vld [vmem:[%s22479_s17 + $0x71] sm:$0xff]  ;;  %v22868_v50 = vld [vmem:[%s21574_s9 + $0x140] sm:$0xff]  }
 0x1ed   : >> { %18484 = vmatprep.subr.bf16.mxu0 %v20901_v44  ;;  %v1720_v5 = vpack.c.bf16 %v14691_v17, %v14690_v59  ;;  %v5722_v53 = vpack.c.bf16 %v15428_v61, %v15427_v41  ;;  %v14707_v59 = vld [vmem:[%s22479_s17 + $0xbb] sm:$0xff]  ;;  %v15431_v17 = vld [vmem:[%s22479_s17 + $0x91] sm:$0xff] }
 0x1ee   : >> { %v14744_v41 = vld [vmem:[%s22479_s17 + $0x1c] sm:$0xff]  ;;  %v15443_v61 = vld [vmem:[%s22479_s17 + $0xf1] sm:$0xff] }
 0x1f0   : >> { %18485 = vmatpush3.bf16.msra.mxu0 %v20901_v44  ;;  %v14704_v44 = vld [vmem:[%s22479_s17 + $0xa3] sm:$0xff] }
 0x1f1   : >> { %18518 = vmatprep.subr.bf16.mxu0 %v22814_v54 }
 0x1f2   : >> { %17863 = vmatmul.mubr.bf16.vlgmr.msra.gmra.mrb[0].mxu1 %v1718_v56  ;;  %v22872_v56 = vpack.c.bf16 %v14705_v47, %v14704_v44  ;;  %v15444_v44 = vld [vmem:[%s22479_s17 + $0xf9] sm:$0xff]  ;;  %v14745_v47 = vld [vmem:[%s22479_s17 + $0x24] sm:$0xff] }
 0x1f3   : >> { %18455 = vmatmul.mubr.bf16.gmra.mrb[16].mxu0 %v22720_v33  ;;  %17895 = vmatpush3.bf16.msra.mxu1 %v22763_v36  ;;  %v5424_v33 = vpack.c.bf16 %v15391_v40, %v15390_v60  ;;  %v14698_v36 = vld [vmem:[%s22479_s17 + $0x73] sm:$0xff]  ;;  %v14708_v40 = vld [vmem:[%s22479_s17 + $0xc3] sm:$0xff] }
 0x1f4   : >> { %17866 = vmatprep.mubr.bf16.mxu1 %v1719_v15  ;;  %18458 = vmatprep.mubr.bf16.mxu0 %v5423_v58  ;;  %v22852_v31 = vpack.c.bf16 %v14699_v39, %v14698_v36  ;;  %v5723_v15 = vpack.c.bf16 %v15430_v63, %v15429_v49  ;;  %v14706_v58 = vld [vmem:[%s22479_s17 + $0xb3] sm:$0xff]  ;;  %v14715_v36 = vld [vmem:[%s22479_s17 + $0xfb] sm:$0xff] }
 0x1f5   : >> { %17896 = vmatprep.subr.bf16.mxu1 %v20896_v57  ;;  %v15432_v60 = vld [vmem:[%s22479_s17 + $0x99] sm:$0xff]  ;;  %v22888_v4 = vpack.c.bf16 %v14707_v59, %v14706_v58  ;;  %v15439_v39 = vld [vmem:[%s22479_s17 + $0xd1] sm:$0xff]  ;;  %v15445_v63 = vld [vmem:[%s22479_s17 + $0x101] sm:$0xff]  ;;  %v5730_v58 = vpack.c.bf16 %v15444_v44, %v15443_v61 }
 0x1f6   : >> { %v14746_v49 = vld [vmem:[%s22479_s17 + $0x2c] sm:$0xff]  ;;  %v20922_v61 = vld [vmem:[%s21574_s9 + $0x170] sm:$0xff]  }
 0x1f7   : >> { %17897 = vmatpush3.bf16.msra.mxu1 %v20896_v57  ;;  %v20905_v57 = vld [vmem:[%s21574_s9 + $0x448] sm:$0xff]   ;;  %v2027_v59 = vpack.c.bf16 %v14746_v49, %v14745_v47 }
 0x1f8   : >> { %17898 = vmatprep.subr.bf16.mxu1 %v20898_v3 }
 0x1fa   : >> { %17867 = vmatmul.mubr.bf16.gmra.mrb[4].mxu1 %v1720_v5  ;;  %v5724_v5 = vpack.c.bf16 %v15432_v60, %v15431_v17  ;;  %v20912_v60 = vld [vmem:[%s21574_s9 + $0x148] sm:$0xff]  }
 0x1fb   : >> { %18459 = vmatmul.mubr.bf16.gmra.mrb[20].mxu0 %v5424_v33  ;;  %17870 = vmatprep.mubr.bf16.mxu1 %v1721_v7  ;;  %v22890_v33 = vpack.c.bf16 %v14709_v62, %v14708_v40  ;;  %v20909_v7 = vld [vmem:[%s21574_s9 + $0x458] sm:$0xff]   ;;  %v14747_v40 = vld [vmem:[%s22479_s17 + $0x34] sm:$0xff] }
 0x1fc   : >> { %18462 = vmatprep.mubr.bf16.mxu0 %v5425_v9  ;;  %17899 = vmatpush3.bf16.msra.mxu1 %v20898_v3  ;;  %v20907_v3 = vld [vmem:[%s21574_s9 + $0x450] sm:$0xff]  }
 0x1fd   : >> { %17900 = vmatprep.subr.bf16.mxu1 %v20900_v45  ;;  %v14710_v9 = vld [vmem:[%s22479_s17 + $0xd3] sm:$0xff]  ;;  %v14748_v62 = vld [vmem:[%s22479_s17 + $0x3c] sm:$0xff] }
 0x200   : >> { %17901 = vmatpush3.bf16.msra.mxu1 %v20900_v45  ;;  %v14711_v45 = vld [vmem:[%s22479_s17 + $0xdb] sm:$0xff] }
 0x201   : >> { %17902 = vmatprep.subr.bf16.mxu1 %v20902_v22  ;;  %v22904_v21 = vpack.c.bf16 %v14711_v45, %v14710_v9  ;;  %v15450_v9 = vld [vmem:[%s22479_s17 + $0x129] sm:$0xff]  ;;  %v2028_v45 = vpack.c.bf16 %v14748_v62, %v14747_v40 }
 0x202   : >> { %17871 = vmatmul.mubr.bf16.gmra.mrb[8].mxu1 %v1722_v20  ;;  %v22906_v20 = vpack.c.bf16 %v14713_v13, %v14712_v12  ;;  %v20916_v12 = vld [vmem:[%s21574_s9 + $0x158] sm:$0xff]   ;;  %v14751_v13 = vld [vmem:[%s22479_s17 + $0x54] sm:$0xff]  ;;  %v14762_v40 = vld [vmem:[%s22479_s17 + $0xac] sm:$0xff] }
 0x203   : >> { %18463 = vmatmul.mubr.bf16.gmra.mrb[24].mxu0 %v5426_v24  ;;  %17874 = vmatprep.mubr.bf16.mxu1 %v22839_v25  ;;  %v20913_v24 = vld [vmem:[%s21574_s9 + $0x468] sm:$0xff]   ;;  %v15486_v62 = vld [vmem:[%s22479_s17 + $0x82] sm:$0xff] }
 0x204   : >> { %18466 = vmatprep.mubr.bf16.mxu0 %v5427_v26  ;;  %17903 = vmatpush3.bf16.msra.mxu1 %v20902_v22  ;;  %v5726_v22 = vpack.c.bf16 %v15436_v11, %v15435_v10  ;;  %v5727_v26 = vpack.c.bf16 %v15438_v18, %v15437_v16  ;;  %v14752_v16 = vld [vmem:[%s22479_s17 + $0x5c] sm:$0xff]  ;;  %v15451_v18 = vld [vmem:[%s22479_s17 + $0x131] sm:$0xff] }
 0x205   : >> { %17904 = vmatprep.subr.bf16.mxu1 %v20904_v27 }
 0x208   : >> { %17905 = vmatpush3.bf16.msra.mxu1 %v20904_v27  ;;  %v14714_v27 = vld [vmem:[%s22479_s17 + $0xf3] sm:$0xff] }
 0x209   : >> { %17906 = vmatprep.subr.bf16.mxu1 %v20906_v30 }
 0x20a   : >> { %17875 = vmatmul.mubr.bf16.gmra.mrb[12].mxu1 %v22852_v31 }
 0x20b   : >> { %18467 = vmatmul.mubr.bf16.gmra.mrb[28].mxu0 %v5428_v32  ;;  %17878 = vmatprep.mubr.bf16.mxu1 %v22854_v46  ;;  %v5728_v32 = vpack.c.bf16 %v15440_v52, %v15439_v39  ;;  %v2030_v39 = vpack.c.bf16 %v14752_v16, %v14751_v13  ;;  %v14766_v13 = vld [vmem:[%s22479_s17 + $0xcc] sm:$0xff]  ;;  %v15490_v16 = vld [vmem:[%s22479_s17 + $0xa2] sm:$0xff] }
 0x20c   : >> { %18486 = vmatprep.mubr.bf16.mxu0 %v5721_v48  ;;  %17907 = vmatpush3.bf16.msra.mxu1 %v20906_v30  ;;  %v22920_v30 = vpack.c.bf16 %v14715_v36, %v14714_v27  ;;  %v2025_v48 = vpack.c.bf16 %v14742_v14, %v14741_v55  ;;  %v15454_v27 = vld [vmem:[%s22479_s17 + $0x149] sm:$0xff] }
 0x20d   : >> { %17908 = vmatprep.subr.bf16.mxu1 %v20908_v35  ;;  %v20918_v36 = vld [vmem:[%s21574_s9 + $0x160] sm:$0xff]  }
 0x210   : >> { %17909 = vmatpush3.bf16.msra.mxu1 %v20908_v35  ;;  %v5729_v35 = vpack.c.bf16 %v15442_v8, %v15441_v6  ;;  %v20920_v6 = vld [vmem:[%s21574_s9 + $0x168] sm:$0xff]  }
 0x211   : >> { %17942 = vmatprep.subr.bf16.mxu1 %v22868_v50  ;;  %v14755_v8 = vld [vmem:[%s22479_s17 + $0x74] sm:$0xff] }
 0x212   : >> { %17879 = vmatmul.mubr.bf16.gmra.mrb[16].mxu1 %v22870_v51 }
 0x213   : >> { %18487 = vmatmul.mubr.bf16.vlgmr.msra.gmra.mrb[0].mxu0 %v5722_v53  ;;  %17882 = vmatprep.mubr.bf16.mxu1 %v22872_v56  ;;  %v15446_v53 = vld [vmem:[%s22479_s17 + $0x109] sm:$0xff] }
 0x214   : >> { %18519 = vmatpush3.bf16.msra.mxu0 %v22814_v54  ;;  %18490 = vmatprep.mubr.bf16.mxu0 %v5723_v15  ;;  %v5725_v54 = vpack.c.bf16 %v15434_v0, %v15433_v42  ;;  %v2026_v15 = vpack.c.bf16 %v14744_v41, %v14743_v38  ;;  %v5731_v17 = vpack.c.bf16 %v15446_v53, %v15445_v63  ;;  %v15447_v42 = vld [vmem:[%s22479_s17 + $0x111] sm:$0xff]  ;;  %v15448_v0 = vld [vmem:[%s22479_s17 + $0x119] sm:$0xff]  ;;  %v15482_v38 = vld [vmem:[%s22479_s17 + $0x62] sm:$0xff] }
 0x215   : >> { %18520 = vmatprep.subr.bf16.mxu0 %v20905_v57  ;;  %v5732_v10 = vpack.c.bf16 %v15448_v0, %v15447_v42  ;;  %v15483_v41 = vld [vmem:[%s22479_s17 + $0x6a] sm:$0xff]  ;;  %v20924_v53 = vld [vmem:[%s21574_s9 + $0x178] sm:$0xff]  }
 0x216   : >> { %v6029_v63 = vpack.c.bf16 %v15483_v41, %v15482_v38  ;;  %v15487_v42 = vld [vmem:[%s22479_s17 + $0x8a] sm:$0xff]  ;;  %v14771_v38 = vld [vmem:[%s22479_s17 + $0xf4] sm:$0xff]  ;;  %v14772_v41 = vld [vmem:[%s22479_s17 + $0xfc] sm:$0xff] }
 0x217   : >> { %v22986_v0 = vld [vmem:[%s21574_s9 + $0x180] sm:$0xff]  }
 0x218   : >> { %18521 = vmatpush3.bf16.msra.mxu0 %v20905_v57  ;;  %v22933_v57 = vld [vmem:[%s21574_s9 + $0x480] sm:$0xff]  }
 0x219   : >> { %18522 = vmatprep.subr.bf16.mxu0 %v20907_v3 }
 0x21a   : >> { %17883 = vmatmul.mubr.bf16.gmra.mrb[20].mxu1 %v22888_v4 }
 0x21b   : >> { %18491 = vmatmul.mubr.bf16.gmra.mrb[4].mxu0 %v5724_v5  ;;  %17886 = vmatprep.mubr.bf16.mxu1 %v22890_v33  ;;  %v14750_v5 = vld [vmem:[%s22479_s17 + $0x4c] sm:$0xff] }
 0x21c   : >> { %18494 = vmatprep.mubr.bf16.mxu0 %v5725_v54  ;;  %18523 = vmatpush3.bf16.msra.mxu0 %v20907_v3  ;;  %v14749_v3 = vld [vmem:[%s22479_s17 + $0x44] sm:$0xff] }
 0x21d   : >> { %18524 = vmatprep.subr.bf16.mxu0 %v20909_v7  ;;  %v15449_v54 = vld [vmem:[%s22479_s17 + $0x121] sm:$0xff] }
 0x21e   : >> { %v5733_v11 = vpack.c.bf16 %v15450_v9, %v15449_v54  ;;  %v6031_v54 = vpack.c.bf16 %v15487_v42, %v15486_v62  ;;  %v20921_v9 = vld [vmem:[%s21574_s9 + $0x488] sm:$0xff]   ;;  %v23046_v42 = vld [vmem:[%s21574_s9 + $0x4c0] sm:$0xff]  }
 0x21f   : >> { %v15503_v62 = vld [vmem:[%s22479_s17 + $0x10a] sm:$0xff] }
 0x220   : >> { %18525 = vmatpush3.bf16.msra.mxu0 %v20909_v7  ;;  %v20914_v7 = vld [vmem:[%s21574_s9 + $0x150] sm:$0xff]  }
 0x221   : >> { %18526 = vmatprep.subr.bf16.mxu0 %v20911_v19 }
 0x222   : >> { %17887 = vmatmul.mubr.bf16.gmra.mrb[24].mxu1 %v22904_v21 }
 0x223   : >> { %18495 = vmatmul.mubr.bf16.gmra.mrb[8].mxu0 %v5726_v22  ;;  %17890 = vmatprep.mubr.bf16.mxu1 %v22906_v20  ;;  %v14753_v22 = vld [vmem:[%s22479_s17 + $0x64] sm:$0xff] }
 0x224   : >> { %18498 = vmatprep.mubr.bf16.mxu0 %v5727_v26  ;;  %18527 = vmatpush3.bf16.msra.mxu0 %v20911_v19  ;;  %v15452_v19 = vld [vmem:[%s22479_s17 + $0x139] sm:$0xff]  ;;  %v15453_v26 = vld [vmem:[%s22479_s17 + $0x141] sm:$0xff] }
 0x225   : >> { %18528 = vmatprep.subr.bf16.mxu0 %v20913_v24  ;;  %v5734_v52 = vpack.c.bf16 %v15452_v19, %v15451_v18  ;;  %v5735_v14 = vpack.c.bf16 %v15454_v27, %v15453_v26  ;;  %v15491_v18 = vld [vmem:[%s22479_s17 + $0xaa] sm:$0xff]  ;;  %v20923_v19 = vld [vmem:[%s21574_s9 + $0x490] sm:$0xff]   ;;  %v20925_v27 = vld [vmem:[%s21574_s9 + $0x498] sm:$0xff]  }
 0x228   : >> { %18529 = vmatpush3.bf16.msra.mxu0 %v20913_v24  ;;  %v14754_v24 = vld [vmem:[%s22479_s17 + $0x6c] sm:$0xff] }
 0x229   : >> { %18530 = vmatprep.subr.bf16.mxu0 %v20915_v28  ;;  %v22957_v55 = vpack.c.bf16 %v14754_v24, %v14753_v22 }
 0x22a   : >> { %17891 = vmatmul.mubr.bf16.gmra.mrb[28].mxu1 %v22920_v30 }
 0x22b   : >> { %18499 = vmatmul.mubr.bf16.gmra.mrb[12].mxu0 %v5728_v32  ;;  %17910 = vmatprep.mubr.bf16.mxu1 %v2025_v48  ;;  %v15455_v32 = vld [vmem:[%s22479_s17 + $0x151] sm:$0xff]  ;;  %v15456_v48 = vld [vmem:[%s22479_s17 + $0x159] sm:$0xff] }
 0x22c   : >> { %18502 = vmatprep.mubr.bf16.mxu0 %v5729_v35  ;;  %18531 = vmatpush3.bf16.msra.mxu0 %v20915_v28  ;;  %v14756_v28 = vld [vmem:[%s22479_s17 + $0x7c] sm:$0xff]  ;;  %v14757_v35 = vld [vmem:[%s22479_s17 + $0x84] sm:$0xff]  ;;  %v5736_v47 = vpack.c.bf16 %v15456_v48, %v15455_v32 }
 0x22d   : >> { %18532 = vmatprep.subr.bf16.mxu0 %v20917_v37  ;;  %v22970_v44 = vpack.c.bf16 %v14756_v28, %v14755_v8  ;;  %v14770_v8 = vld [vmem:[%s22479_s17 + $0xec] sm:$0xff] }
 0x22e   : >> { %v20927_v28 = vld [vmem:[%s21574_s9 + $0x4a0] sm:$0xff]  }
 0x230   : >> { %18533 = vmatpush3.bf16.msra.mxu0 %v20917_v37  ;;  %v14758_v37 = vld [vmem:[%s22479_s17 + $0x8c] sm:$0xff] }
 0x231   : >> { %18566 = vmatprep.subr.bf16.mxu0 %v22933_v57  ;;  %v22972_v49 = vpack.c.bf16 %v14758_v37, %v14757_v35  ;;  %v20929_v37 = vld [vmem:[%s21574_s9 + $0x4a8] sm:$0xff]  }
 0x232   : >> { %17911 = vmatmul.mubr.bf16.vlgmr.msra.gmra.mrb[0].mxu1 %v2026_v15  ;;  %v14759_v15 = vld [vmem:[%s22479_s17 + $0x94] sm:$0xff] }
 0x233   : >> { %18503 = vmatmul.mubr.bf16.gmra.mrb[16].mxu0 %v5730_v58  ;;  %17943 = vmatpush3.bf16.msra.mxu1 %v22868_v50  ;;  %v2029_v50 = vpack.c.bf16 %v14750_v5, %v14749_v3  ;;  %v14760_v58 = vld [vmem:[%s22479_s17 + $0x9c] sm:$0xff] }
 0x234   : >> { %17914 = vmatprep.mubr.bf16.mxu1 %v2027_v59  ;;  %18506 = vmatprep.mubr.bf16.mxu0 %v5731_v17  ;;  %v15484_v59 = vld [vmem:[%s22479_s17 + $0x72] sm:$0xff]  ;;  %v15485_v17 = vld [vmem:[%s22479_s17 + $0x7a] sm:$0xff]  ;;  %v22988_v3 = vpack.c.bf16 %v14760_v58, %v14759_v15 }
 0x235   : >> { %17944 = vmatprep.subr.bf16.mxu1 %v20912_v60  ;;  %v6030_v5 = vpack.c.bf16 %v15485_v17, %v15484_v59  ;;  %v20933_v58 = vld [vmem:[%s21574_s9 + $0x4b8] sm:$0xff]   ;;  %v14801_v59 = vld [vmem:[%s22479_s17 + $0x38] sm:$0xff] }
 0x236   : >> { %v14802_v17 = vld [vmem:[%s22479_s17 + $0x40] sm:$0xff] }
 0x237   : >> { %17945 = vmatpush3.bf16.msra.mxu1 %v20912_v60  ;;  %v14761_v60 = vld [vmem:[%s22479_s17 + $0xa4] sm:$0xff] }
 0x238   : >> { %17946 = vmatprep.subr.bf16.mxu1 %v20914_v7 }
 0x23a   : >> { %17915 = vmatmul.mubr.bf16.gmra.mrb[4].mxu1 %v2028_v45  ;;  %v14763_v45 = vld [vmem:[%s22479_s17 + $0xb4] sm:$0xff] }
 0x23b   : >> { %18507 = vmatmul.mubr.bf16.gmra.mrb[20].mxu0 %v5732_v10  ;;  %17918 = vmatprep.mubr.bf16.mxu1 %v2029_v50  ;;  %v14764_v10 = vld [vmem:[%s22479_s17 + $0xbc] sm:$0xff]  ;;  %v15488_v50 = vld [vmem:[%s22479_s17 + $0x92] sm:$0xff] }
 0x23c   : >> { %18510 = vmatprep.mubr.bf16.mxu0 %v5733_v11  ;;  %17947 = vmatpush3.bf16.msra.mxu1 %v20914_v7  ;;  %v22990_v7 = vpack.c.bf16 %v14762_v40, %v14761_v60  ;;  %v15489_v11 = vld [vmem:[%s22479_s17 + $0x9a] sm:$0xff]  ;;  %v23006_v22 = vpack.c.bf16 %v14764_v10, %v14763_v45  ;;  %v14803_v60 = vld [vmem:[%s22479_s17 + $0x48] sm:$0xff]  ;;  %v15504_v10 = vld [vmem:[%s22479_s17 + $0x112] sm:$0xff] }
 0x23d   : >> { %17948 = vmatprep.subr.bf16.mxu1 %v20916_v12  ;;  %v6032_v24 = vpack.c.bf16 %v15489_v11, %v15488_v50  ;;  %v15502_v40 = vld [vmem:[%s22479_s17 + $0x102] sm:$0xff]  ;;  %v14805_v45 = vld [vmem:[%s22479_s17 + $0x58] sm:$0xff] }
 0x23e   : >> { %v15505_v50 = vld [vmem:[%s22479_s17 + $0x11a] sm:$0xff] }
 0x23f   : >> { %v14806_v11 = vld [vmem:[%s22479_s17 + $0x60] sm:$0xff] }
 0x240   : >> { %17949 = vmatpush3.bf16.msra.mxu1 %v20916_v12  ;;  %v14765_v12 = vld [vmem:[%s22479_s17 + $0xc4] sm:$0xff] }
 0x241   : >> { %17950 = vmatprep.subr.bf16.mxu1 %v20918_v36  ;;  %v23008_v26 = vpack.c.bf16 %v14766_v13, %v14765_v12  ;;  %v14807_v12 = vld [vmem:[%s22479_s17 + $0x68] sm:$0xff]  ;;  %v20930_v13 = vld [vmem:[%s21574_s9 + $0x190] sm:$0xff]  }
 0x242   : >> { %17919 = vmatmul.mubr.bf16.gmra.mrb[8].mxu1 %v2030_v39  ;;  %v14768_v39 = vld [vmem:[%s22479_s17 + $0xdc] sm:$0xff] }
 0x243   : >> { %18511 = vmatmul.mubr.bf16.gmra.mrb[24].mxu0 %v5734_v52  ;;  %17922 = vmatprep.mubr.bf16.mxu1 %v22957_v55  ;;  %v15492_v52 = vld [vmem:[%s22479_s17 + $0xb2] sm:$0xff] }
 0x244   : >> { %18514 = vmatprep.mubr.bf16.mxu0 %v5735_v14  ;;  %17951 = vmatpush3.bf16.msra.mxu1 %v20918_v36  ;;  %v14767_v36 = vld [vmem:[%s22479_s17 + $0xd4] sm:$0xff] }
 0x245   : >> { %17952 = vmatprep.subr.bf16.mxu1 %v20920_v6  ;;  %v15493_v14 = vld [vmem:[%s22479_s17 + $0xba] sm:$0xff]  ;;  %v23020_v32 = vpack.c.bf16 %v14768_v39, %v14767_v36  ;;  %v15508_v39 = vld [vmem:[%s22479_s17 + $0x132] sm:$0xff] }
 0x246   : >> { %v6034_v48 = vpack.c.bf16 %v15493_v14, %v15492_v52  ;;  %v14809_v36 = vld [vmem:[%s22479_s17 + $0x78] sm:$0xff]  ;;  %v14810_v14 = vld [vmem:[%s22479_s17 + $0x80] sm:$0xff] }
 0x247   : >> { %v15509_v52 = vld [vmem:[%s22479_s17 + $0x13a] sm:$0xff] }
 0x248   : >> { %17953 = vmatpush3.bf16.msra.mxu1 %v20920_v6  ;;  %v14769_v6 = vld [vmem:[%s22479_s17 + $0xe4] sm:$0xff] }
 0x249   : >> { %17954 = vmatprep.subr.bf16.mxu1 %v20922_v61  ;;  %v23022_v35 = vpack.c.bf16 %v14770_v8, %v14769_v6  ;;  %v14811_v6 = vld [vmem:[%s22479_s17 + $0x88] sm:$0xff] }
 0x24a   : >> { %17923 = vmatmul.mubr.bf16.gmra.mrb[12].mxu1 %v22970_v44  ;;  %v15510_v8 = vld [vmem:[%s22479_s17 + $0x142] sm:$0xff] }
 0x24b   : >> { %18515 = vmatmul.mubr.bf16.gmra.mrb[28].mxu0 %v5736_v47  ;;  %17926 = vmatprep.mubr.bf16.mxu1 %v22972_v49  ;;  %v14799_v47 = vld [vmem:[%s22479_s17 + $0x28] sm:$0xff] }
 0x24c   : >> { %18534 = vmatprep.mubr.bf16.mxu0 %v6029_v63  ;;  %17955 = vmatpush3.bf16.msra.mxu1 %v20922_v61  ;;  %v14798_v61 = vld [vmem:[%s22479_s17 + $0x20] sm:$0xff]  ;;  %v20931_v63 = vld [vmem:[%s21574_s9 + $0x4b0] sm:$0xff]  }
 0x24d   : >> { %17956 = vmatprep.subr.bf16.mxu1 %v20924_v53  ;;  %v2333_v15 = vpack.c.bf16 %v14799_v47, %v14798_v61  ;;  %v20936_v47 = vld [vmem:[%s21574_s9 + $0x1a8] sm:$0xff]  }
 0x250   : >> { %17957 = vmatpush3.bf16.msra.mxu1 %v20924_v53  ;;  %v23033_v53 = vpack.c.bf16 %v14772_v41, %v14771_v38  ;;  %v6042_v38 = vpack.c.bf16 %v15509_v52, %v15508_v39  ;;  %v23071_v41 = vpack.c.bf16 %v14811_v6, %v14810_v14  ;;  %v14829_v52 = vld [vmem:[%s22479_s17 + $0x118] sm:$0xff]  ;;  %v14855_v14 = vld [vmem:[%s22479_s17 + $0x21] sm:$0xff]  ;;  %v14856_v6 = vld [vmem:[%s22479_s17 + $0x29] sm:$0xff] }
 0x251   : >> { %17990 = vmatprep.subr.bf16.mxu1 %v22986_v0 }
 0x252   : >> { %17927 = vmatmul.mubr.bf16.gmra.mrb[16].mxu1 %v22988_v3 }
 0x253   : >> { %18535 = vmatmul.mubr.bf16.vlgmr.msra.gmra.mrb[0].mxu0 %v6030_v5  ;;  %17930 = vmatprep.mubr.bf16.mxu1 %v22990_v7  ;;  %v2335_v5 = vpack.c.bf16 %v14803_v60, %v14802_v17  ;;  %v14815_v17 = vld [vmem:[%s22479_s17 + $0xa8] sm:$0xff]  ;;  %v20938_v60 = vld [vmem:[%s21574_s9 + $0x1b0] sm:$0xff]  }
 0x254   : >> { %18567 = vmatpush3.bf16.msra.mxu0 %v22933_v57  ;;  %18538 = vmatprep.mubr.bf16.mxu0 %v6031_v54  ;;  %v6033_v57 = vpack.c.bf16 %v15491_v18, %v15490_v16  ;;  %v6039_v54 = vpack.c.bf16 %v15503_v62, %v15502_v40  ;;  %v15506_v16 = vld [vmem:[%s22479_s17 + $0x122] sm:$0xff]  ;;  %v15507_v18 = vld [vmem:[%s22479_s17 + $0x12a] sm:$0xff] }
 0x255   : >> { %18568 = vmatprep.subr.bf16.mxu0 %v20921_v9 }
 0x258   : >> { %18569 = vmatpush3.bf16.msra.mxu0 %v20921_v9  ;;  %v14804_v9 = vld [vmem:[%s22479_s17 + $0x50] sm:$0xff] }
 0x259   : >> { %18570 = vmatprep.subr.bf16.mxu0 %v20923_v19 }
 0x25a   : >> { %17931 = vmatmul.mubr.bf16.gmra.mrb[20].mxu1 %v23006_v22 }
 0x25b   : >> { %18539 = vmatmul.mubr.bf16.gmra.mrb[4].mxu0 %v6032_v24  ;;  %17934 = vmatprep.mubr.bf16.mxu1 %v23008_v26  ;;  %v6041_v24 = vpack.c.bf16 %v15507_v18, %v15506_v16  ;;  %v14822_v16 = vld [vmem:[%s22479_s17 + $0xe0] sm:$0xff]  ;;  %v14823_v18 = vld [vmem:[%s22479_s17 + $0xe8] sm:$0xff] }
 0x25c   : >> { %18542 = vmatprep.mubr.bf16.mxu0 %v6033_v57  ;;  %18571 = vmatpush3.bf16.msra.mxu0 %v20923_v19  ;;  %v2336_v19 = vpack.c.bf16 %v14805_v45, %v14804_v9  ;;  %v20932_v57 = vld [vmem:[%s21574_s9 + $0x198] sm:$0xff]   ;;  %v14819_v45 = vld [vmem:[%s22479_s17 + $0xc8] sm:$0xff] }
 0x25d   : >> { %18572 = vmatprep.subr.bf16.mxu0 %v20925_v27  ;;  %v14818_v9 = vld [vmem:[%s22479_s17 + $0xc0] sm:$0xff] }
 0x260   : >> { %18573 = vmatpush3.bf16.msra.mxu0 %v20925_v27  ;;  %v14808_v27 = vld [vmem:[%s22479_s17 + $0x70] sm:$0xff] }
 0x261   : >> { %18574 = vmatprep.subr.bf16.mxu0 %v20927_v28 }
 0x262   : >> { %17935 = vmatmul.mubr.bf16.gmra.mrb[24].mxu1 %v23020_v32 }
 0x263   : >> { %18543 = vmatmul.mubr.bf16.gmra.mrb[8].mxu0 %v6034_v48  ;;  %17938 = vmatprep.mubr.bf16.mxu1 %v23022_v35  ;;  %v20934_v48 = vld [vmem:[%s21574_s9 + $0x1a0] sm:$0xff]  }
 0x264   : >> { %18546 = vmatprep.mubr.bf16.mxu0 %v22775_v29  ;;  %18575 = vmatpush3.bf16.msra.mxu0 %v20927_v28  ;;  %v14800_v29 = vld [vmem:[%s22479_s17 + $0x30] sm:$0xff] }
 0x265   : >> { %18576 = vmatprep.subr.bf16.mxu0 %v20929_v37  ;;  %v15511_v28 = vld [vmem:[%s22479_s17 + $0x14a] sm:$0xff] }
 0x266   : >> { %v6043_v61 = vpack.c.bf16 %v15511_v28, %v15510_v8  ;;  %v20947_v8 = vld [vmem:[%s21574_s9 + $0x4f0] sm:$0xff]  }
 0x268   : >> { %18577 = vmatpush3.bf16.msra.mxu0 %v20929_v37  ;;  %v2338_v37 = vpack.c.bf16 %v14809_v36, %v14808_v27  ;;  %v20943_v27 = vld [vmem:[%s21574_s9 + $0x4e0] sm:$0xff]  }
 0x269   : >> { %18578 = vmatprep.subr.bf16.mxu0 %v20931_v63 }
 0x26a   : >> { %17939 = vmatmul.mubr.bf16.gmra.mrb[28].mxu1 %v23033_v53 }
 0x26b   : >> { %18547 = vmatmul.mubr.bf16.gmra.mrb[12].mxu0 %v22787_v34  ;;  %17958 = vmatprep.mubr.bf16.mxu1 %v2333_v15  ;;  %v2334_v34 = vpack.c.bf16 %v14801_v59, %v14800_v29  ;;  %v14813_v15 = vld [vmem:[%s22479_s17 + $0x98] sm:$0xff]  ;;  %v14814_v59 = vld [vmem:[%s22479_s17 + $0xa0] sm:$0xff] }
 0x26c   : >> { %18550 = vmatprep.mubr.bf16.mxu0 %v22789_v23  ;;  %18579 = vmatpush3.bf16.msra.mxu0 %v20931_v63  ;;  %v20928_v23 = vld [vmem:[%s21574_s9 + $0x188] sm:$0xff]   ;;  %v15513_v29 = vld [vmem:[%s22479_s17 + $0x15a] sm:$0xff] }
 0x26d   : >> { %18580 = vmatprep.subr.bf16.mxu0 %v20933_v58  ;;  %v14812_v63 = vld [vmem:[%s22479_s17 + $0x90] sm:$0xff] }
 0x26e   : >> { %v23082_v40 = vpack.c.bf16 %v14813_v15, %v14812_v63  ;;  %v15560_v63 = vld [vmem:[%s22479_s17 + $0x10b] sm:$0xff] }
 0x26f   : >> { %v23154_v15 = vld [vmem:[%s21574_s9 + $0x500] sm:$0xff]  }
 0x270   : >> { %18581 = vmatpush3.bf16.msra.mxu0 %v20933_v58  ;;  %v15512_v58 = vld [vmem:[%s22479_s17 + $0x152] sm:$0xff] }
 0x271   : >> { %18614 = vmatprep.subr.bf16.mxu0 %v23046_v42  ;;  %v6044_v62 = vpack.c.bf16 %v15513_v29, %v15512_v58 }
 0x272   : >> { %17959 = vmatmul.mubr.bf16.vlgmr.msra.gmra.mrb[0].mxu1 %v2334_v34  ;;  %v23084_v34 = vpack.c.bf16 %v14815_v17, %v14814_v59  ;;  %v14861_v59 = vld [vmem:[%s22479_s17 + $0x51] sm:$0xff]  ;;  %v14862_v17 = vld [vmem:[%s22479_s17 + $0x59] sm:$0xff] }
 0x273   : >> { %18551 = vmatmul.mubr.bf16.gmra.mrb[16].mxu0 %v22801_v43  ;;  %17991 = vmatpush3.bf16.msra.mxu1 %v22986_v0  ;;  %v6040_v43 = vpack.c.bf16 %v15505_v50, %v15504_v10  ;;  %v2337_v0 = vpack.c.bf16 %v14807_v12, %v14806_v11  ;;  %v23095_v10 = vld [vmem:[%s21574_s9 + $0x1c0] sm:$0xff]   ;;  %v23099_v11 = vpack.c.bf16 %v14819_v45, %v14818_v9  ;;  %v20937_v12 = vld [vmem:[%s21574_s9 + $0x4c8] sm:$0xff]  }
 0x274   : >> { %17962 = vmatprep.mubr.bf16.mxu1 %v2335_v5  ;;  %18554 = vmatprep.mubr.bf16.mxu0 %v6039_v54  ;;  %v20940_v5 = vld [vmem:[%s21574_s9 + $0x1b8] sm:$0xff]   ;;  %v14816_v54 = vld [vmem:[%s22479_s17 + $0xb0] sm:$0xff] }
 0x275   : >> { %17992 = vmatprep.subr.bf16.mxu1 %v20928_v23  ;;  %v15563_v9 = vld [vmem:[%s22479_s17 + $0x123] sm:$0xff]  ;;  %v15564_v45 = vld [vmem:[%s22479_s17 + $0x12b] sm:$0xff] }
 0x277   : >> { %17993 = vmatpush3.bf16.msra.mxu1 %v20928_v23  ;;  %v14817_v23 = vld [vmem:[%s22479_s17 + $0xb8] sm:$0xff] }
 0x278   : >> { %17994 = vmatprep.subr.bf16.mxu1 %v20930_v13  ;;  %v23097_v50 = vpack.c.bf16 %v14817_v23, %v14816_v54  ;;  %v14864_v54 = vld [vmem:[%s22479_s17 + $0x69] sm:$0xff]  ;;  %v20946_v23 = vld [vmem:[%s21574_s9 + $0x1d0] sm:$0xff]  }
 0x27a   : >> { %17963 = vmatmul.mubr.bf16.gmra.mrb[4].mxu1 %v2336_v19  ;;  %v20939_v19 = vld [vmem:[%s21574_s9 + $0x4d0] sm:$0xff]  }
 0x27b   : >> { %18555 = vmatmul.mubr.bf16.gmra.mrb[20].mxu0 %v6040_v43  ;;  %17966 = vmatprep.mubr.bf16.mxu1 %v2337_v0  ;;  %v20941_v0 = vld [vmem:[%s21574_s9 + $0x4d8] sm:$0xff]  }
 0x27c   : >> { %18558 = vmatprep.mubr.bf16.mxu0 %v6041_v24  ;;  %17995 = vmatpush3.bf16.msra.mxu1 %v20930_v13  ;;  %v14821_v13 = vld [vmem:[%s22479_s17 + $0xd8] sm:$0xff]  ;;  %v14826_v24 = vld [vmem:[%s22479_s17 + $0x100] sm:$0xff] }
 0x27d   : >> { %17996 = vmatprep.subr.bf16.mxu1 %v20932_v57 }
 0x280   : >> { %17997 = vmatpush3.bf16.msra.mxu1 %v20932_v57  ;;  %v14827_v57 = vld [vmem:[%s22479_s17 + $0x108] sm:$0xff] }
 0x281   : >> { %17998 = vmatprep.subr.bf16.mxu1 %v20934_v48  ;;  %v23129_v39 = vpack.c.bf16 %v14827_v57, %v14826_v24  ;;  %v15567_v24 = vld [vmem:[%s22479_s17 + $0x143] sm:$0xff]  ;;  %v15568_v57 = vld [vmem:[%s22479_s17 + $0x14b] sm:$0xff] }
 0x282   : >> { %17967 = vmatmul.mubr.bf16.gmra.mrb[8].mxu1 %v2338_v37  ;;  %v14858_v37 = vld [vmem:[%s22479_s17 + $0x39] sm:$0xff] }
 0x283   : >> { %18559 = vmatmul.mubr.bf16.gmra.mrb[24].mxu0 %v6042_v38  ;;  %17970 = vmatprep.mubr.bf16.mxu1 %v23071_v41  ;;  %v14859_v38 = vld [vmem:[%s22479_s17 + $0x41] sm:$0xff] }
 0x284   : >> { %18562 = vmatprep.mubr.bf16.mxu0 %v6043_v61  ;;  %17999 = vmatpush3.bf16.msra.mxu1 %v20934_v48  ;;  %v20949_v48 = vld [vmem:[%s21574_s9 + $0x4f8] sm:$0xff]   ;;  %v14860_v61 = vld [vmem:[%s22479_s17 + $0x49] sm:$0xff] }
 0x285   : >> { %18000 = vmatprep.subr.bf16.mxu1 %v20936_v47  ;;  %v2643_v58 = vpack.c.bf16 %v14860_v61, %v14859_v38  ;;  %v14872_v38 = vld [vmem:[%s22479_s17 + $0xa9] sm:$0xff]  ;;  %v20954_v61 = vld [vmem:[%s21574_s9 + $0x1f0] sm:$0xff]  }
 0x288   : >> { %18001 = vmatpush3.bf16.msra.mxu1 %v20936_v47  ;;  %v15559_v47 = vld [vmem:[%s22479_s17 + $0x103] sm:$0xff] }
 0x289   : >> { %18002 = vmatprep.subr.bf16.mxu1 %v20938_v60  ;;  %v6347_v29 = vpack.c.bf16 %v15560_v63, %v15559_v47 }
 0x28a   : >> { %17971 = vmatmul.mubr.bf16.gmra.mrb[12].mxu1 %v23082_v40 }
 0x28b   : >> { %18563 = vmatmul.mubr.bf16.gmra.mrb[28].mxu0 %v6044_v62  ;;  %17974 = vmatprep.mubr.bf16.mxu1 %v23084_v34  ;;  %v15562_v62 = vld [vmem:[%s22479_s17 + $0x11b] sm:$0xff] }
 0x28c   : >> { %18582 = vmatprep.mubr.bf16.mxu0 %v22839_v25  ;;  %18003 = vmatpush3.bf16.msra.mxu1 %v20938_v60  ;;  %v14820_v25 = vld [vmem:[%s22479_s17 + $0xd0] sm:$0xff] }
 0x28d   : >> { %18004 = vmatprep.subr.bf16.mxu1 %v20940_v5  ;;  %v23113_v43 = vpack.c.bf16 %v14821_v13, %v14820_v25  ;;  %v15561_v60 = vld [vmem:[%s22479_s17 + $0x113] sm:$0xff]  ;;  %v6349_v25 = vpack.c.bf16 %v15564_v45, %v15563_v9  ;;  %v20948_v13 = vld [vmem:[%s21574_s9 + $0x1d8] sm:$0xff]   ;;  %v14880_v45 = vld [vmem:[%s22479_s17 + $0xe9] sm:$0xff] }
 0x28e   : >> { %v14879_v9 = vld [vmem:[%s22479_s17 + $0xe1] sm:$0xff] }
 0x290   : >> { %18005 = vmatpush3.bf16.msra.mxu1 %v20940_v5  ;;  %v14863_v5 = vld [vmem:[%s22479_s17 + $0x61] sm:$0xff] }
 0x291   : >> { %18038 = vmatprep.subr.bf16.mxu1 %v23095_v10 }
 0x292   : >> { %17975 = vmatmul.mubr.bf16.gmra.mrb[16].mxu1 %v23097_v50 }
 0x293   : >> { %18583 = vmatmul.mubr.bf16.vlgmr.msra.gmra.mrb[0].mxu0 %v22852_v31  ;;  %17978 = vmatprep.mubr.bf16.mxu1 %v23099_v11  ;;  %v23115_v31 = vpack.c.bf16 %v14823_v18, %v14822_v16  ;;  %v14865_v16 = vld [vmem:[%s22479_s17 + $0x71] sm:$0xff]  ;;  %v14866_v18 = vld [vmem:[%s22479_s17 + $0x79] sm:$0xff] }
 0x294   : >> { %18615 = vmatpush3.bf16.msra.mxu0 %v23046_v42  ;;  %18586 = vmatprep.mubr.bf16.mxu0 %v22854_v46  ;;  %v14824_v46 = vld [vmem:[%s22479_s17 + $0xf0] sm:$0xff]  ;;  %v14825_v42 = vld [vmem:[%s22479_s17 + $0xf8] sm:$0xff] }
 0x295   : >> { %18616 = vmatprep.subr.bf16.mxu0 %v20937_v12  ;;  %v23127_v36 = vpack.c.bf16 %v14825_v42, %v14824_v46  ;;  %v14867_v46 = vld [vmem:[%s22479_s17 + $0x81] sm:$0xff]  ;;  %v14868_v42 = vld [vmem:[%s22479_s17 + $0x89] sm:$0xff] }
 0x298   : >> { %18617 = vmatpush3.bf16.msra.mxu0 %v20937_v12  ;;  %v2644_v12 = vpack.c.bf16 %v14862_v17, %v14861_v59  ;;  %v14875_v59 = vld [vmem:[%s22479_s17 + $0xc1] sm:$0xff]  ;;  %v14876_v17 = vld [vmem:[%s22479_s17 + $0xc9] sm:$0xff] }
 0x299   : >> { %18618 = vmatprep.subr.bf16.mxu0 %v20939_v19 }
 0x29a   : >> { %17979 = vmatmul.mubr.bf16.gmra.mrb[20].mxu1 %v23113_v43 }
 0x29b   : >> { %18587 = vmatmul.mubr.bf16.gmra.mrb[4].mxu0 %v22870_v51  ;;  %17982 = vmatprep.mubr.bf16.mxu1 %v23115_v31  ;;  %v20945_v51 = vld [vmem:[%s21574_s9 + $0x4e8] sm:$0xff]  }
 0x29c   : >> { %18590 = vmatprep.mubr.bf16.mxu0 %v22872_v56  ;;  %18619 = vmatpush3.bf16.msra.mxu0 %v20939_v19  ;;  %v14828_v56 = vld [vmem:[%s22479_s17 + $0x110] sm:$0xff] }
 0x29d   : >> { %18620 = vmatprep.subr.bf16.mxu0 %v20941_v0  ;;  %v23141_v28 = vpack.c.bf16 %v14829_v52, %v14828_v56  ;;  %v15565_v19 = vld [vmem:[%s22479_s17 + $0x133] sm:$0xff]  ;;  %v23179_v52 = vpack.c.bf16 %v14868_v42, %v14867_v46  ;;  %v14912_v46 = vld [vmem:[%s22479_s17 + $0x22] sm:$0xff]  ;;  %v14913_v42 = vld [vmem:[%s22479_s17 + $0x2a] sm:$0xff] }
 0x2a0   : >> { %18621 = vmatpush3.bf16.msra.mxu0 %v20941_v0  ;;  %v15566_v0 = vld [vmem:[%s22479_s17 + $0x13b] sm:$0xff] }
 0x2a1   : >> { %18622 = vmatprep.subr.bf16.mxu0 %v20943_v27  ;;  %v6350_v56 = vpack.c.bf16 %v15566_v0, %v15565_v19  ;;  %v14886_v0 = vld [vmem:[%s22479_s17 + $0x119] sm:$0xff] }
 0x2a2   : >> { %17983 = vmatmul.mubr.bf16.gmra.mrb[24].mxu1 %v23127_v36 }
 0x2a3   : >> { %18591 = vmatmul.mubr.bf16.gmra.mrb[8].mxu0 %v22888_v4  ;;  %17986 = vmatprep.mubr.bf16.mxu1 %v23129_v39  ;;  %v2641_v4 = vpack.c.bf16 %v14856_v6, %v14855_v14  ;;  %v6351_v14 = vpack.c.bf16 %v15568_v57, %v15567_v24  ;;  %v20952_v6 = vld [vmem:[%s21574_s9 + $0x1e8] sm:$0xff]   ;;  %v20963_v24 = vld [vmem:[%s21574_s9 + $0x530] sm:$0xff]  }
 0x2a4   : >> { %18594 = vmatprep.mubr.bf16.mxu0 %v22890_v33  ;;  %18623 = vmatpush3.bf16.msra.mxu0 %v20943_v27  ;;  %v14857_v33 = vld [vmem:[%s22479_s17 + $0x31] sm:$0xff]  ;;  %v20950_v27 = vld [vmem:[%s21574_s9 + $0x1e0] sm:$0xff]  }
 0x2a5   : >> { %18624 = vmatprep.subr.bf16.mxu0 %v20945_v51 }
 0x2a8   : >> { %18625 = vmatpush3.bf16.msra.mxu0 %v20945_v51  ;;  %v2646_v51 = vpack.c.bf16 %v14866_v18, %v14865_v16  ;;  %v20959_v16 = vld [vmem:[%s21574_s9 + $0x520] sm:$0xff]  }
 0x2a9   : >> { %18626 = vmatprep.subr.bf16.mxu0 %v20947_v8 }
 0x2aa   : >> { %17987 = vmatmul.mubr.bf16.gmra.mrb[28].mxu1 %v23141_v28 }
 0x2ab   : >> { %18595 = vmatmul.mubr.bf16.gmra.mrb[12].mxu0 %v22904_v21  ;;  %18006 = vmatprep.mubr.bf16.mxu1 %v2641_v4  ;;  %v2642_v21 = vpack.c.bf16 %v14858_v37, %v14857_v33  ;;  %v14870_v4 = vld [vmem:[%s22479_s17 + $0x99] sm:$0xff]  ;;  %v14871_v37 = vld [vmem:[%s22479_s17 + $0xa1] sm:$0xff] }
 0x2ac   : >> { %18598 = vmatprep.mubr.bf16.mxu0 %v22906_v20  ;;  %18627 = vmatpush3.bf16.msra.mxu0 %v20947_v8  ;;  %v20944_v20 = vld [vmem:[%s21574_s9 + $0x1c8] sm:$0xff]   ;;  %v15570_v33 = vld [vmem:[%s22479_s17 + $0x15b] sm:$0xff] }
 0x2ad   : >> { %18628 = vmatprep.subr.bf16.mxu0 %v20949_v48  ;;  %v14869_v8 = vld [vmem:[%s22479_s17 + $0x91] sm:$0xff] }
 0x2ae   : >> { %v23190_v47 = vpack.c.bf16 %v14870_v4, %v14869_v8  ;;  %v15617_v8 = vld [vmem:[%s22479_s17 + $0x10c] sm:$0xff] }
 0x2af   : >> { %v23262_v4 = vld [vmem:[%s21574_s9 + $0x540] sm:$0xff]  }
 0x2b0   : >> { %18629 = vmatpush3.bf16.msra.mxu0 %v20949_v48  ;;  %v15569_v48 = vld [vmem:[%s22479_s17 + $0x153] sm:$0xff] }
 0x2b1   : >> { %18662 = vmatprep.subr.bf16.mxu0 %v23154_v15  ;;  %v6352_v63 = vpack.c.bf16 %v15570_v33, %v15569_v48 }
 0x2b2   : >> { %18007 = vmatmul.mubr.bf16.vlgmr.msra.gmra.mrb[0].mxu1 %v2642_v21  ;;  %v23192_v21 = vpack.c.bf16 %v14872_v38, %v14871_v37  ;;  %v14918_v37 = vld [vmem:[%s22479_s17 + $0x52] sm:$0xff]  ;;  %v14919_v38 = vld [vmem:[%s22479_s17 + $0x5a] sm:$0xff] }
 0x2b3   : >> { %18599 = vmatmul.mubr.bf16.gmra.mrb[16].mxu0 %v22920_v30  ;;  %18039 = vmatpush3.bf16.msra.mxu1 %v23095_v10  ;;  %v6348_v30 = vpack.c.bf16 %v15562_v62, %v15561_v60  ;;  %v2645_v10 = vpack.c.bf16 %v14864_v54, %v14863_v5  ;;  %v23203_v60 = vld [vmem:[%s21574_s9 + $0x200] sm:$0xff]   ;;  %v23207_v5 = vpack.c.bf16 %v14876_v17, %v14875_v59  ;;  %v20953_v54 = vld [vmem:[%s21574_s9 + $0x508] sm:$0xff]  }
 0x2b4   : >> { %18010 = vmatprep.mubr.bf16.mxu1 %v2643_v58  ;;  %18602 = vmatprep.mubr.bf16.mxu0 %v6347_v29  ;;  %v20956_v58 = vld [vmem:[%s21574_s9 + $0x1f8] sm:$0xff]   ;;  %v14873_v29 = vld [vmem:[%s22479_s17 + $0xb1] sm:$0xff] }
 0x2b5   : >> { %18040 = vmatprep.subr.bf16.mxu1 %v20944_v20  ;;  %v15620_v59 = vld [vmem:[%s22479_s17 + $0x124] sm:$0xff]  ;;  %v15621_v17 = vld [vmem:[%s22479_s17 + $0x12c] sm:$0xff] }
 0x2b7   : >> { %18041 = vmatpush3.bf16.msra.mxu1 %v20944_v20  ;;  %v14874_v20 = vld [vmem:[%s22479_s17 + $0xb9] sm:$0xff] }
 0x2b8   : >> { %18042 = vmatprep.subr.bf16.mxu1 %v20946_v23  ;;  %v23205_v62 = vpack.c.bf16 %v14874_v20, %v14873_v29  ;;  %v14921_v29 = vld [vmem:[%s22479_s17 + $0x6a] sm:$0xff]  ;;  %v20962_v20 = vld [vmem:[%s21574_s9 + $0x210] sm:$0xff]  }
 0x2ba   : >> { %18011 = vmatmul.mubr.bf16.gmra.mrb[4].mxu1 %v2644_v12  ;;  %v20955_v12 = vld [vmem:[%s21574_s9 + $0x510] sm:$0xff]  }
 0x2bb   : >> { %18603 = vmatmul.mubr.bf16.gmra.mrb[20].mxu0 %v6348_v30  ;;  %18014 = vmatprep.mubr.bf16.mxu1 %v2645_v10  ;;  %v20957_v10 = vld [vmem:[%s21574_s9 + $0x518] sm:$0xff]  }
 0x2bc   : >> { %18606 = vmatprep.mubr.bf16.mxu0 %v6349_v25  ;;  %18043 = vmatpush3.bf16.msra.mxu1 %v20946_v23  ;;  %v14878_v23 = vld [vmem:[%s22479_s17 + $0xd9] sm:$0xff]  ;;  %v14883_v25 = vld [vmem:[%s22479_s17 + $0x101] sm:$0xff] }
 0x2bd   : >> { %18044 = vmatprep.subr.bf16.mxu1 %v20948_v13 }
 0x2c0   : >> { %18045 = vmatpush3.bf16.msra.mxu1 %v20948_v13  ;;  %v14884_v13 = vld [vmem:[%s22479_s17 + $0x109] sm:$0xff] }
 0x2c1   : >> { %18046 = vmatprep.subr.bf16.mxu1 %v20950_v27  ;;  %v23237_v19 = vpack.c.bf16 %v14884_v13, %v14883_v25  ;;  %v15624_v25 = vld [vmem:[%s22479_s17 + $0x144] sm:$0xff]  ;;  %v15625_v13 = vld [vmem:[%s22479_s17 + $0x14c] sm:$0xff] }
 0x2c2   : >> { %18015 = vmatmul.mubr.bf16.gmra.mrb[8].mxu1 %v2646_v51  ;;  %v14915_v51 = vld [vmem:[%s22479_s17 + $0x3a] sm:$0xff] }
 0x2c3   : >> { %18607 = vmatmul.mubr.bf16.gmra.mrb[24].mxu0 %v6350_v56  ;;  %18018 = vmatprep.mubr.bf16.mxu1 %v23179_v52  ;;  %v14916_v56 = vld [vmem:[%s22479_s17 + $0x42] sm:$0xff] }
 0x2c4   : >> { %18610 = vmatprep.mubr.bf16.mxu0 %v6351_v14  ;;  %18047 = vmatpush3.bf16.msra.mxu1 %v20950_v27  ;;  %v20965_v27 = vld [vmem:[%s21574_s9 + $0x538] sm:$0xff]   ;;  %v14917_v14 = vld [vmem:[%s22479_s17 + $0x4a] sm:$0xff] }
 0x2c5   : >> { %18048 = vmatprep.subr.bf16.mxu1 %v20952_v6  ;;  %v2951_v48 = vpack.c.bf16 %v14917_v14, %v14916_v56  ;;  %v14929_v56 = vld [vmem:[%s22479_s17 + $0xaa] sm:$0xff]  ;;  %v20970_v14 = vld [vmem:[%s21574_s9 + $0x230] sm:$0xff]  }
 0x2c8   : >> { %18049 = vmatpush3.bf16.msra.mxu1 %v20952_v6  ;;  %v15616_v6 = vld [vmem:[%s22479_s17 + $0x104] sm:$0xff] }
 0x2c9   : >> { %18050 = vmatprep.subr.bf16.mxu1 %v20954_v61  ;;  %v6655_v33 = vpack.c.bf16 %v15617_v8, %v15616_v6 }
 0x2ca   : >> { %18019 = vmatmul.mubr.bf16.gmra.mrb[12].mxu1 %v23190_v47 }
 0x2cb   : >> { %18611 = vmatmul.mubr.bf16.gmra.mrb[28].mxu0 %v6352_v63  ;;  %18022 = vmatprep.mubr.bf16.mxu1 %v23192_v21  ;;  %v15619_v63 = vld [vmem:[%s22479_s17 + $0x11c] sm:$0xff] }
 0x2cc   : >> { %18630 = vmatprep.mubr.bf16.mxu0 %v22957_v55  ;;  %18051 = vmatpush3.bf16.msra.mxu1 %v20954_v61  ;;  %v14877_v55 = vld [vmem:[%s22479_s17 + $0xd1] sm:$0xff] }
 0x2cd   : >> { %18052 = vmatprep.subr.bf16.mxu1 %v20956_v58  ;;  %v23221_v30 = vpack.c.bf16 %v14878_v23, %v14877_v55  ;;  %v15618_v61 = vld [vmem:[%s22479_s17 + $0x114] sm:$0xff]  ;;  %v6657_v55 = vpack.c.bf16 %v15621_v17, %v15620_v59  ;;  %v20964_v23 = vld [vmem:[%s21574_s9 + $0x218] sm:$0xff]   ;;  %v14937_v17 = vld [vmem:[%s22479_s17 + $0xea] sm:$0xff] }
 0x2ce   : >> { %v14936_v59 = vld [vmem:[%s22479_s17 + $0xe2] sm:$0xff] }
 0x2d0   : >> { %18053 = vmatpush3.bf16.msra.mxu1 %v20956_v58  ;;  %v14920_v58 = vld [vmem:[%s22479_s17 + $0x62] sm:$0xff] }
 0x2d1   : >> { %18086 = vmatprep.subr.bf16.mxu1 %v23203_v60 }
 0x2d2   : >> { %18023 = vmatmul.mubr.bf16.gmra.mrb[16].mxu1 %v23205_v62 }
 0x2d3   : >> { %18631 = vmatmul.mubr.bf16.vlgmr.msra.gmra.mrb[0].mxu0 %v22970_v44  ;;  %18026 = vmatprep.mubr.bf16.mxu1 %v23207_v5  ;;  %v23223_v44 = vpack.c.bf16 %v14880_v45, %v14879_v9  ;;  %v14922_v9 = vld [vmem:[%s22479_s17 + $0x72] sm:$0xff]  ;;  %v14923_v45 = vld [vmem:[%s22479_s17 + $0x7a] sm:$0xff] }
 0x2d4   : >> { %18663 = vmatpush3.bf16.msra.mxu0 %v23154_v15  ;;  %18634 = vmatprep.mubr.bf16.mxu0 %v22972_v49  ;;  %v14881_v49 = vld [vmem:[%s22479_s17 + $0xf1] sm:$0xff]  ;;  %v14882_v15 = vld [vmem:[%s22479_s17 + $0xf9] sm:$0xff] }
 0x2d5   : >> { %18664 = vmatprep.subr.bf16.mxu0 %v20953_v54  ;;  %v23235_v18 = vpack.c.bf16 %v14882_v15, %v14881_v49  ;;  %v14924_v49 = vld [vmem:[%s22479_s17 + $0x82] sm:$0xff]  ;;  %v14925_v15 = vld [vmem:[%s22479_s17 + $0x8a] sm:$0xff] }
 0x2d8   : >> { %18665 = vmatpush3.bf16.msra.mxu0 %v20953_v54  ;;  %v2952_v54 = vpack.c.bf16 %v14919_v38, %v14918_v37  ;;  %v14932_v37 = vld [vmem:[%s22479_s17 + $0xc2] sm:$0xff]  ;;  %v14933_v38 = vld [vmem:[%s22479_s17 + $0xca] sm:$0xff] }
 0x2d9   : >> { %18666 = vmatprep.subr.bf16.mxu0 %v20955_v12 }
 0x2da   : >> { %18027 = vmatmul.mubr.bf16.gmra.mrb[20].mxu1 %v23221_v30 }
 0x2db   : >> { %18635 = vmatmul.mubr.bf16.gmra.mrb[4].mxu0 %v22988_v3  ;;  %18030 = vmatprep.mubr.bf16.mxu1 %v23223_v44  ;;  %v20961_v3 = vld [vmem:[%s21574_s9 + $0x528] sm:$0xff]  }
 0x2dc   : >> { %18638 = vmatprep.mubr.bf16.mxu0 %v22990_v7  ;;  %18667 = vmatpush3.bf16.msra.mxu0 %v20955_v12  ;;  %v14885_v7 = vld [vmem:[%s22479_s17 + $0x111] sm:$0xff] }
 0x2dd   : >> { %18668 = vmatprep.subr.bf16.mxu0 %v20957_v10  ;;  %v23249_v57 = vpack.c.bf16 %v14886_v0, %v14885_v7  ;;  %v15622_v12 = vld [vmem:[%s22479_s17 + $0x134] sm:$0xff]  ;;  %v23287_v0 = vpack.c.bf16 %v14925_v15, %v14924_v49  ;;  %v14969_v49 = vld [vmem:[%s22479_s17 + $0x23] sm:$0xff]  ;;  %v14970_v15 = vld [vmem:[%s22479_s17 + $0x2b] sm:$0xff] }
 0x2e0   : >> { %18669 = vmatpush3.bf16.msra.mxu0 %v20957_v10  ;;  %v15623_v10 = vld [vmem:[%s22479_s17 + $0x13c] sm:$0xff] }
 0x2e1   : >> { %18670 = vmatprep.subr.bf16.mxu0 %v20959_v16  ;;  %v6658_v7 = vpack.c.bf16 %v15623_v10, %v15622_v12  ;;  %v14943_v10 = vld [vmem:[%s22479_s17 + $0x11a] sm:$0xff] }
 0x2e2   : >> { %18031 = vmatmul.mubr.bf16.gmra.mrb[24].mxu1 %v23235_v18 }
 0x2e3   : >> { %18639 = vmatmul.mubr.bf16.gmra.mrb[8].mxu0 %v23006_v22  ;;  %18034 = vmatprep.mubr.bf16.mxu1 %v23237_v19  ;;  %v2949_v22 = vpack.c.bf16 %v14913_v42, %v14912_v46  ;;  %v6659_v46 = vpack.c.bf16 %v15625_v13, %v15624_v25  ;;  %v20968_v42 = vld [vmem:[%s21574_s9 + $0x228] sm:$0xff]   ;;  %v20979_v25 = vld [vmem:[%s21574_s9 + $0x570] sm:$0xff]  }
 0x2e4   : >> { %18642 = vmatprep.mubr.bf16.mxu0 %v23008_v26  ;;  %18671 = vmatpush3.bf16.msra.mxu0 %v20959_v16  ;;  %v14914_v26 = vld [vmem:[%s22479_s17 + $0x32] sm:$0xff]  ;;  %v20966_v16 = vld [vmem:[%s21574_s9 + $0x220] sm:$0xff]  }
 0x2e5   : >> { %18672 = vmatprep.subr.bf16.mxu0 %v20961_v3 }
 0x2e8   : >> { %18673 = vmatpush3.bf16.msra.mxu0 %v20961_v3  ;;  %v2954_v3 = vpack.c.bf16 %v14923_v45, %v14922_v9  ;;  %v20975_v9 = vld [vmem:[%s21574_s9 + $0x560] sm:$0xff]  }
 0x2e9   : >> { %18674 = vmatprep.subr.bf16.mxu0 %v20963_v24 }
 0x2ea   : >> { %18035 = vmatmul.mubr.bf16.gmra.mrb[28].mxu1 %v23249_v57 }
 0x2eb   : >> { %18643 = vmatmul.mubr.bf16.gmra.mrb[12].mxu0 %v23020_v32  ;;  %18054 = vmatprep.mubr.bf16.mxu1 %v2949_v22  ;;  %v2950_v32 = vpack.c.bf16 %v14915_v51, %v14914_v26  ;;  %v14927_v22 = vld [vmem:[%s22479_s17 + $0x9a] sm:$0xff]  ;;  %v14928_v51 = vld [vmem:[%s22479_s17 + $0xa2] sm:$0xff] }
 0x2ec   : >> { %18646 = vmatprep.mubr.bf16.mxu0 %v23022_v35  ;;  %18675 = vmatpush3.bf16.msra.mxu0 %v20963_v24  ;;  %v20960_v35 = vld [vmem:[%s21574_s9 + $0x208] sm:$0xff]   ;;  %v15627_v26 = vld [vmem:[%s22479_s17 + $0x15c] sm:$0xff] }
 0x2ed   : >> { %18676 = vmatprep.subr.bf16.mxu0 %v20965_v27  ;;  %v14926_v24 = vld [vmem:[%s22479_s17 + $0x92] sm:$0xff] }
 0x2ee   : >> { %v23298_v6 = vpack.c.bf16 %v14927_v22, %v14926_v24  ;;  %v15674_v24 = vld [vmem:[%s22479_s17 + $0x128] sm:$0xff] }
 0x2ef   : >> { %v23370_v22 = vld [vmem:[%s21574_s9 + $0x580] sm:$0xff]  }
 0x2f0   : >> { %18677 = vmatpush3.bf16.msra.mxu0 %v20965_v27  ;;  %v15626_v27 = vld [vmem:[%s22479_s17 + $0x154] sm:$0xff] }
 0x2f1   : >> { %18710 = vmatprep.subr.bf16.mxu0 %v23262_v4  ;;  %v6660_v8 = vpack.c.bf16 %v15627_v26, %v15626_v27 }
 0x2f2   : >> { %18055 = vmatmul.mubr.bf16.vlgmr.msra.gmra.mrb[0].mxu1 %v2950_v32  ;;  %v23300_v32 = vpack.c.bf16 %v14929_v56, %v14928_v51  ;;  %v14975_v51 = vld [vmem:[%s22479_s17 + $0x53] sm:$0xff]  ;;  %v14976_v56 = vld [vmem:[%s22479_s17 + $0x5b] sm:$0xff] }
 0x2f3   : >> { %18647 = vmatmul.mubr.bf16.gmra.mrb[16].mxu0 %v23033_v53  ;;  %18087 = vmatpush3.bf16.msra.mxu1 %v23203_v60  ;;  %v6656_v53 = vpack.c.bf16 %v15619_v63, %v15618_v61  ;;  %v2953_v60 = vpack.c.bf16 %v14921_v29, %v14920_v58  ;;  %v23311_v61 = vld [vmem:[%s21574_s9 + $0x240] sm:$0xff]   ;;  %v23315_v58 = vpack.c.bf16 %v14933_v38, %v14932_v37  ;;  %v20969_v29 = vld [vmem:[%s21574_s9 + $0x548] sm:$0xff]   ;;  %v15677_v37 = vld [vmem:[%s22479_s17 + $0x140] sm:$0xff] }
 0x2f4   : >> { %18058 = vmatprep.mubr.bf16.mxu1 %v2951_v48  ;;  %18650 = vmatprep.mubr.bf16.mxu0 %v6655_v33  ;;  %v20972_v48 = vld [vmem:[%s21574_s9 + $0x238] sm:$0xff]   ;;  %v14930_v33 = vld [vmem:[%s22479_s17 + $0xb2] sm:$0xff]  ;;  %v15678_v38 = vld [vmem:[%s22479_s17 + $0x148] sm:$0xff] }
 0x2f5   : >> { %18088 = vmatprep.subr.bf16.mxu1 %v20960_v35 }
 0x2f7   : >> { %18089 = vmatpush3.bf16.msra.mxu1 %v20960_v35  ;;  %v14931_v35 = vld [vmem:[%s22479_s17 + $0xba] sm:$0xff] }
 0x2f8   : >> { %18090 = vmatprep.subr.bf16.mxu1 %v20962_v20  ;;  %v23313_v63 = vpack.c.bf16 %v14931_v35, %v14930_v33  ;;  %v14978_v33 = vld [vmem:[%s22479_s17 + $0x6b] sm:$0xff]  ;;  %v20978_v35 = vld [vmem:[%s21574_s9 + $0x250] sm:$0xff]  }
 0x2fa   : >> { %18059 = vmatmul.mubr.bf16.gmra.mrb[4].mxu1 %v2952_v54  ;;  %v20971_v54 = vld [vmem:[%s21574_s9 + $0x550] sm:$0xff]  }
 0x2fb   : >> { %18651 = vmatmul.mubr.bf16.gmra.mrb[20].mxu0 %v6656_v53  ;;  %18062 = vmatprep.mubr.bf16.mxu1 %v2953_v60  ;;  %v20973_v60 = vld [vmem:[%s21574_s9 + $0x558] sm:$0xff]  }
 0x2fc   : >> { %18654 = vmatprep.mubr.bf16.mxu0 %v6657_v55  ;;  %18091 = vmatpush3.bf16.msra.mxu1 %v20962_v20  ;;  %v14935_v20 = vld [vmem:[%s22479_s17 + $0xda] sm:$0xff]  ;;  %v14940_v55 = vld [vmem:[%s22479_s17 + $0x102] sm:$0xff] }
 0x2fd   : >> { %18092 = vmatprep.subr.bf16.mxu1 %v20964_v23 }
 0x300   : >> { %18093 = vmatpush3.bf16.msra.mxu1 %v20964_v23  ;;  %v14941_v23 = vld [vmem:[%s22479_s17 + $0x10a] sm:$0xff] }
 0x301   : >> { %18094 = vmatprep.subr.bf16.mxu1 %v20966_v16  ;;  %v23345_v12 = vpack.c.bf16 %v14941_v23, %v14940_v55  ;;  %v15681_v55 = vld [vmem:[%s22479_s17 + $0x160] sm:$0xff]  ;;  %v15682_v23 = vld [vmem:[%s22479_s17 + $0x168] sm:$0xff] }
 0x302   : >> { %18063 = vmatmul.mubr.bf16.gmra.mrb[8].mxu1 %v2954_v3  ;;  %v14972_v3 = vld [vmem:[%s22479_s17 + $0x3b] sm:$0xff] }
 0x303   : >> { %18655 = vmatmul.mubr.bf16.gmra.mrb[24].mxu0 %v6658_v7  ;;  %18066 = vmatprep.mubr.bf16.mxu1 %v23287_v0  ;;  %v14973_v7 = vld [vmem:[%s22479_s17 + $0x43] sm:$0xff] }
 0x304   : >> { %18658 = vmatprep.mubr.bf16.mxu0 %v6659_v46  ;;  %18095 = vmatpush3.bf16.msra.mxu1 %v20966_v16  ;;  %v20981_v16 = vld [vmem:[%s21574_s9 + $0x578] sm:$0xff]   ;;  %v14974_v46 = vld [vmem:[%s22479_s17 + $0x4b] sm:$0xff] }
 0x305   : >> { %18096 = vmatprep.subr.bf16.mxu1 %v20968_v42  ;;  %v3259_v27 = vpack.c.bf16 %v14974_v46, %v14973_v7  ;;  %v14986_v7 = vld [vmem:[%s22479_s17 + $0xab] sm:$0xff]  ;;  %v20986_v46 = vld [vmem:[%s21574_s9 + $0x270] sm:$0xff]  }
 0x308   : >> { %18097 = vmatpush3.bf16.msra.mxu1 %v20968_v42  ;;  %v15673_v42 = vld [vmem:[%s22479_s17 + $0x120] sm:$0xff] }
 0x309   : >> { %18098 = vmatprep.subr.bf16.mxu1 %v20970_v14  ;;  %v6963_v26 = vpack.c.bf16 %v15674_v24, %v15673_v42 }
 0x30a   : >> { %18067 = vmatmul.mubr.bf16.gmra.mrb[12].mxu1 %v23298_v6 }
 0x30b   : >> { %18659 = vmatmul.mubr.bf16.gmra.mrb[28].mxu0 %v6660_v8  ;;  %18070 = vmatprep.mubr.bf16.mxu1 %v23300_v32  ;;  %v15676_v8 = vld [vmem:[%s22479_s17 + $0x138] sm:$0xff] }
 0x30c   : >> { %18678 = vmatprep.mubr.bf16.mxu0 %v23071_v41  ;;  %18099 = vmatpush3.bf16.msra.mxu1 %v20970_v14  ;;  %v14934_v41 = vld [vmem:[%s22479_s17 + $0xd2] sm:$0xff] }
 0x30d   : >> { %18100 = vmatprep.subr.bf16.mxu1 %v20972_v48  ;;  %v23329_v53 = vpack.c.bf16 %v14935_v20, %v14934_v41  ;;  %v15675_v14 = vld [vmem:[%s22479_s17 + $0x130] sm:$0xff]  ;;  %v6965_v41 = vpack.c.bf16 %v15678_v38, %v15677_v37  ;;  %v20980_v20 = vld [vmem:[%s21574_s9 + $0x258] sm:$0xff]  }
 0x30e   : >> { %v14993_v37 = vld [vmem:[%s22479_s17 + $0xe3] sm:$0xff]  ;;  %v14994_v38 = vld [vmem:[%s22479_s17 + $0xeb] sm:$0xff] }
 0x310   : >> { %18101 = vmatpush3.bf16.msra.mxu1 %v20972_v48  ;;  %v14977_v48 = vld [vmem:[%s22479_s17 + $0x63] sm:$0xff] }
 0x311   : >> { %18134 = vmatprep.subr.bf16.mxu1 %v23311_v61 }
 0x312   : >> { %18071 = vmatmul.mubr.bf16.gmra.mrb[16].mxu1 %v23313_v63 }
 0x313   : >> { %18679 = vmatmul.mubr.bf16.vlgmr.msra.gmra.mrb[0].mxu0 %v23082_v40  ;;  %18074 = vmatprep.mubr.bf16.mxu1 %v23315_v58  ;;  %v23331_v40 = vpack.c.bf16 %v14937_v17, %v14936_v59  ;;  %v14979_v59 = vld [vmem:[%s22479_s17 + $0x73] sm:$0xff]  ;;  %v14980_v17 = vld [vmem:[%s22479_s17 + $0x7b] sm:$0xff] }
 0x314   : >> { %18711 = vmatpush3.bf16.msra.mxu0 %v23262_v4  ;;  %18682 = vmatprep.mubr.bf16.mxu0 %v23084_v34  ;;  %v14938_v34 = vld [vmem:[%s22479_s17 + $0xf2] sm:$0xff]  ;;  %v14939_v4 = vld [vmem:[%s22479_s17 + $0xfa] sm:$0xff] }
 0x315   : >> { %18712 = vmatprep.subr.bf16.mxu0 %v20969_v29  ;;  %v23343_v45 = vpack.c.bf16 %v14939_v4, %v14938_v34  ;;  %v14981_v34 = vld [vmem:[%s22479_s17 + $0x83] sm:$0xff]  ;;  %v14982_v4 = vld [vmem:[%s22479_s17 + $0x8b] sm:$0xff] }
 0x318   : >> { %18713 = vmatpush3.bf16.msra.mxu0 %v20969_v29  ;;  %v3260_v29 = vpack.c.bf16 %v14976_v56, %v14975_v51  ;;  %v14989_v51 = vld [vmem:[%s22479_s17 + $0xc3] sm:$0xff]  ;;  %v14990_v56 = vld [vmem:[%s22479_s17 + $0xcb] sm:$0xff] }
 0x319   : >> { %18714 = vmatprep.subr.bf16.mxu0 %v20971_v54 }
 0x31a   : >> { %18075 = vmatmul.mubr.bf16.gmra.mrb[20].mxu1 %v23329_v53 }
 0x31b   : >> { %18683 = vmatmul.mubr.bf16.gmra.mrb[4].mxu0 %v23097_v50  ;;  %18078 = vmatprep.mubr.bf16.mxu1 %v23331_v40  ;;  %v20977_v50 = vld [vmem:[%s21574_s9 + $0x568] sm:$0xff]  }
 0x31c   : >> { %18686 = vmatprep.mubr.bf16.mxu0 %v23099_v11  ;;  %18715 = vmatpush3.bf16.msra.mxu0 %v20971_v54  ;;  %v14942_v11 = vld [vmem:[%s22479_s17 + $0x112] sm:$0xff] }
 0x31d   : >> { %18716 = vmatprep.subr.bf16.mxu0 %v20973_v60  ;;  %v23357_v13 = vpack.c.bf16 %v14943_v10, %v14942_v11  ;;  %v15679_v54 = vld [vmem:[%s22479_s17 + $0x150] sm:$0xff]  ;;  %v23395_v10 = vpack.c.bf16 %v14982_v4, %v14981_v34  ;;  %v15026_v34 = vld [vmem:[%s22479_s17 + $0x24] sm:$0xff] }
 0x31e   : >> { %v15027_v4 = vld [vmem:[%s22479_s17 + $0x2c] sm:$0xff] }
 0x320   : >> { %18717 = vmatpush3.bf16.msra.mxu0 %v20973_v60  ;;  %v15680_v60 = vld [vmem:[%s22479_s17 + $0x158] sm:$0xff] }
 0x321   : >> { %18718 = vmatprep.subr.bf16.mxu0 %v20975_v9  ;;  %v6966_v11 = vpack.c.bf16 %v15680_v60, %v15679_v54  ;;  %v15000_v60 = vld [vmem:[%s22479_s17 + $0x11b] sm:$0xff] }
 0x322   : >> { %18079 = vmatmul.mubr.bf16.gmra.mrb[24].mxu1 %v23343_v45 }
 0x323   : >> { %18687 = vmatmul.mubr.bf16.gmra.mrb[8].mxu0 %v23113_v43  ;;  %18082 = vmatprep.mubr.bf16.mxu1 %v23345_v12  ;;  %v3257_v43 = vpack.c.bf16 %v14970_v15, %v14969_v49  ;;  %v6967_v49 = vpack.c.bf16 %v15682_v23, %v15681_v55  ;;  %v20984_v15 = vld [vmem:[%s21574_s9 + $0x268] sm:$0xff]   ;;  %v20995_v55 = vld [vmem:[%s21574_s9 + $0x5b0] sm:$0xff]  }
 0x324   : >> { %18690 = vmatprep.mubr.bf16.mxu0 %v23115_v31  ;;  %18719 = vmatpush3.bf16.msra.mxu0 %v20975_v9  ;;  %v14971_v31 = vld [vmem:[%s22479_s17 + $0x33] sm:$0xff]  ;;  %v20982_v9 = vld [vmem:[%s21574_s9 + $0x260] sm:$0xff]  }
 0x325   : >> { %18720 = vmatprep.subr.bf16.mxu0 %v20977_v50 }
 0x328   : >> { %18721 = vmatpush3.bf16.msra.mxu0 %v20977_v50  ;;  %v3262_v50 = vpack.c.bf16 %v14980_v17, %v14979_v59  ;;  %v20991_v59 = vld [vmem:[%s21574_s9 + $0x5a0] sm:$0xff]  }
 0x329   : >> { %18722 = vmatprep.subr.bf16.mxu0 %v20979_v25 }
 0x32a   : >> { %18083 = vmatmul.mubr.bf16.gmra.mrb[28].mxu1 %v23357_v13 }
 0x32b   : >> { %18691 = vmatmul.mubr.bf16.gmra.mrb[12].mxu0 %v23127_v36  ;;  %18102 = vmatprep.mubr.bf16.mxu1 %v3257_v43  ;;  %v3258_v36 = vpack.c.bf16 %v14972_v3, %v14971_v31  ;;  %v14984_v43 = vld [vmem:[%s22479_s17 + $0x9b] sm:$0xff]  ;;  %v14985_v3 = vld [vmem:[%s22479_s17 + $0xa3] sm:$0xff] }
 0x32c   : >> { %18694 = vmatprep.mubr.bf16.mxu0 %v23129_v39  ;;  %18723 = vmatpush3.bf16.msra.mxu0 %v20979_v25  ;;  %v20976_v39 = vld [vmem:[%s21574_s9 + $0x248] sm:$0xff]   ;;  %v15684_v31 = vld [vmem:[%s22479_s17 + $0x178] sm:$0xff] }
 0x32d   : >> { %18724 = vmatprep.subr.bf16.mxu0 %v20981_v16  ;;  %v14983_v25 = vld [vmem:[%s22479_s17 + $0x93] sm:$0xff] }
 0x32e   : >> { %v23406_v42 = vpack.c.bf16 %v14984_v43, %v14983_v25  ;;  %v15731_v25 = vld [vmem:[%s22479_s17 + $0x129] sm:$0xff] }
 0x32f   : >> { %v23478_v43 = vld [vmem:[%s21574_s9 + $0x5c0] sm:$0xff]  }
 0x330   : >> { %18725 = vmatpush3.bf16.msra.mxu0 %v20981_v16  ;;  %v15683_v16 = vld [vmem:[%s22479_s17 + $0x170] sm:$0xff] }
 0x331   : >> { %18758 = vmatprep.subr.bf16.mxu0 %v23370_v22  ;;  %v6968_v24 = vpack.c.bf16 %v15684_v31, %v15683_v16 }
 0x332   : >> { %18103 = vmatmul.mubr.bf16.vlgmr.msra.gmra.mrb[0].mxu1 %v3258_v36  ;;  %v23408_v36 = vpack.c.bf16 %v14986_v7, %v14985_v3  ;;  %v15032_v3 = vld [vmem:[%s22479_s17 + $0x54] sm:$0xff]  ;;  %v15033_v7 = vld [vmem:[%s22479_s17 + $0x5c] sm:$0xff] }
 0x333   : >> { %18695 = vmatmul.mubr.bf16.gmra.mrb[16].mxu0 %v23141_v28  ;;  %18135 = vmatpush3.bf16.msra.mxu1 %v23311_v61  ;;  %v6964_v28 = vpack.c.bf16 %v15676_v8, %v15675_v14  ;;  %v3261_v61 = vpack.c.bf16 %v14978_v33, %v14977_v48  ;;  %v23419_v14 = vld [vmem:[%s21574_s9 + $0x280] sm:$0xff]   ;;  %v23423_v48 = vpack.c.bf16 %v14990_v56, %v14989_v51  ;;  %v20985_v33 = vld [vmem:[%s21574_s9 + $0x588] sm:$0xff]  }
 0x334   : >> { %18106 = vmatprep.mubr.bf16.mxu1 %v3259_v27  ;;  %18698 = vmatprep.mubr.bf16.mxu0 %v6963_v26  ;;  %v20988_v27 = vld [vmem:[%s21574_s9 + $0x278] sm:$0xff]   ;;  %v14987_v26 = vld [vmem:[%s22479_s17 + $0xb3] sm:$0xff]  ;;  %v15735_v56 = vld [vmem:[%s22479_s17 + $0x149] sm:$0xff] }
 0x335   : >> { %18136 = vmatprep.subr.bf16.mxu1 %v20976_v39  ;;  %v15734_v51 = vld [vmem:[%s22479_s17 + $0x141] sm:$0xff] }
 0x337   : >> { %18137 = vmatpush3.bf16.msra.mxu1 %v20976_v39  ;;  %v14988_v39 = vld [vmem:[%s22479_s17 + $0xbb] sm:$0xff] }
 0x338   : >> { %18138 = vmatprep.subr.bf16.mxu1 %v20978_v35  ;;  %v23421_v8 = vpack.c.bf16 %v14988_v39, %v14987_v26  ;;  %v15035_v26 = vld [vmem:[%s22479_s17 + $0x6c] sm:$0xff]  ;;  %v20994_v39 = vld [vmem:[%s21574_s9 + $0x290] sm:$0xff]  }
 0x33a   : >> { %18107 = vmatmul.mubr.bf16.gmra.mrb[4].mxu1 %v3260_v29  ;;  %v20987_v29 = vld [vmem:[%s21574_s9 + $0x590] sm:$0xff]  }
 0x33b   : >> { %18699 = vmatmul.mubr.bf16.gmra.mrb[20].mxu0 %v6964_v28  ;;  %18110 = vmatprep.mubr.bf16.mxu1 %v3261_v61  ;;  %v20989_v61 = vld [vmem:[%s21574_s9 + $0x598] sm:$0xff]  }
 0x33c   : >> { %18702 = vmatprep.mubr.bf16.mxu0 %v6965_v41  ;;  %18139 = vmatpush3.bf16.msra.mxu1 %v20978_v35  ;;  %v14992_v35 = vld [vmem:[%s22479_s17 + $0xdb] sm:$0xff]  ;;  %v14997_v41 = vld [vmem:[%s22479_s17 + $0x103] sm:$0xff] }
 0x33d   : >> { %18140 = vmatprep.subr.bf16.mxu1 %v20980_v20 }
 0x340   : >> { %18141 = vmatpush3.bf16.msra.mxu1 %v20980_v20  ;;  %v14998_v20 = vld [vmem:[%s22479_s17 + $0x10b] sm:$0xff] }
 0x341   : >> { %18142 = vmatprep.subr.bf16.mxu1 %v20982_v9  ;;  %v23453_v54 = vpack.c.bf16 %v14998_v20, %v14997_v41  ;;  %v15738_v41 = vld [vmem:[%s22479_s17 + $0x161] sm:$0xff]  ;;  %v15739_v20 = vld [vmem:[%s22479_s17 + $0x169] sm:$0xff] }
 0x342   : >> { %18111 = vmatmul.mubr.bf16.gmra.mrb[8].mxu1 %v3262_v50  ;;  %v15029_v50 = vld [vmem:[%s22479_s17 + $0x3c] sm:$0xff] }
 0x343   : >> { %18703 = vmatmul.mubr.bf16.gmra.mrb[24].mxu0 %v6966_v11  ;;  %18114 = vmatprep.mubr.bf16.mxu1 %v23395_v10  ;;  %v15030_v11 = vld [vmem:[%s22479_s17 + $0x44] sm:$0xff] }
 0x344   : >> { %18706 = vmatprep.mubr.bf16.mxu0 %v6967_v49  ;;  %18143 = vmatpush3.bf16.msra.mxu1 %v20982_v9  ;;  %v20997_v9 = vld [vmem:[%s21574_s9 + $0x5b8] sm:$0xff]   ;;  %v15031_v49 = vld [vmem:[%s22479_s17 + $0x4c] sm:$0xff] }
 0x345   : >> { %18144 = vmatprep.subr.bf16.mxu1 %v20984_v15  ;;  %v3567_v16 = vpack.c.bf16 %v15031_v49, %v15030_v11  ;;  %v15043_v11 = vld [vmem:[%s22479_s17 + $0xac] sm:$0xff]  ;;  %v21002_v49 = vld [vmem:[%s21574_s9 + $0x2b0] sm:$0xff]  }
 0x348   : >> { %18145 = vmatpush3.bf16.msra.mxu1 %v20984_v15  ;;  %v15730_v15 = vld [vmem:[%s22479_s17 + $0x121] sm:$0xff] }
 0x349   : >> { %18146 = vmatprep.subr.bf16.mxu1 %v20986_v46  ;;  %v7271_v31 = vpack.c.bf16 %v15731_v25, %v15730_v15 }
 0x34a   : >> { %18115 = vmatmul.mubr.bf16.gmra.mrb[12].mxu1 %v23406_v42 }
 0x34b   : >> { %18707 = vmatmul.mubr.bf16.gmra.mrb[28].mxu0 %v6968_v24  ;;  %18118 = vmatprep.mubr.bf16.mxu1 %v23408_v36  ;;  %v15733_v24 = vld [vmem:[%s22479_s17 + $0x139] sm:$0xff] }
 0x34c   : >> { %18726 = vmatprep.mubr.bf16.mxu0 %v23179_v52  ;;  %18147 = vmatpush3.bf16.msra.mxu1 %v20986_v46  ;;  %v14991_v52 = vld [vmem:[%s22479_s17 + $0xd3] sm:$0xff] }
 0x34d   : >> { %18148 = vmatprep.subr.bf16.mxu1 %v20988_v27  ;;  %v23437_v28 = vpack.c.bf16 %v14992_v35, %v14991_v52  ;;  %v15732_v46 = vld [vmem:[%s22479_s17 + $0x131] sm:$0xff]  ;;  %v7273_v52 = vpack.c.bf16 %v15735_v56, %v15734_v51  ;;  %v20996_v35 = vld [vmem:[%s21574_s9 + $0x298] sm:$0xff]  }
 0x34e   : >> { %v15050_v51 = vld [vmem:[%s22479_s17 + $0xe4] sm:$0xff]  ;;  %v15051_v56 = vld [vmem:[%s22479_s17 + $0xec] sm:$0xff] }
 0x350   : >> { %18149 = vmatpush3.bf16.msra.mxu1 %v20988_v27  ;;  %v15034_v27 = vld [vmem:[%s22479_s17 + $0x64] sm:$0xff] }
 0x351   : >> { %18182 = vmatprep.subr.bf16.mxu1 %v23419_v14 }
 0x352   : >> { %18119 = vmatmul.mubr.bf16.gmra.mrb[16].mxu1 %v23421_v8 }
 0x353   : >> { %18727 = vmatmul.mubr.bf16.vlgmr.msra.gmra.mrb[0].mxu0 %v23190_v47  ;;  %18122 = vmatprep.mubr.bf16.mxu1 %v23423_v48  ;;  %v23439_v47 = vpack.c.bf16 %v14994_v38, %v14993_v37  ;;  %v15036_v37 = vld [vmem:[%s22479_s17 + $0x74] sm:$0xff]  ;;  %v15037_v38 = vld [vmem:[%s22479_s17 + $0x7c] sm:$0xff] }
 0x354   : >> { %18759 = vmatpush3.bf16.msra.mxu0 %v23370_v22  ;;  %18730 = vmatprep.mubr.bf16.mxu0 %v23192_v21  ;;  %v14995_v21 = vld [vmem:[%s22479_s17 + $0xf3] sm:$0xff]  ;;  %v14996_v22 = vld [vmem:[%s22479_s17 + $0xfb] sm:$0xff] }
 0x355   : >> { %18760 = vmatprep.subr.bf16.mxu0 %v20985_v33  ;;  %v23451_v17 = vpack.c.bf16 %v14996_v22, %v14995_v21  ;;  %v15038_v21 = vld [vmem:[%s22479_s17 + $0x84] sm:$0xff]  ;;  %v15039_v22 = vld [vmem:[%s22479_s17 + $0x8c] sm:$0xff] }
 0x358   : >> { %18761 = vmatpush3.bf16.msra.mxu0 %v20985_v33  ;;  %v3568_v33 = vpack.c.bf16 %v15033_v7, %v15032_v3  ;;  %v15046_v3 = vld [vmem:[%s22479_s17 + $0xc4] sm:$0xff]  ;;  %v15047_v7 = vld [vmem:[%s22479_s17 + $0xcc] sm:$0xff] }
 0x359   : >> { %18762 = vmatprep.subr.bf16.mxu0 %v20987_v29 }
 0x35a   : >> { %18123 = vmatmul.mubr.bf16.gmra.mrb[20].mxu1 %v23437_v28 }
 0x35b   : >> { %18731 = vmatmul.mubr.bf16.gmra.mrb[4].mxu0 %v23205_v62  ;;  %18126 = vmatprep.mubr.bf16.mxu1 %v23439_v47  ;;  %v20993_v62 = vld [vmem:[%s21574_s9 + $0x5a8] sm:$0xff]  }
 0x35c   : >> { %18734 = vmatprep.mubr.bf16.mxu0 %v23207_v5  ;;  %18763 = vmatpush3.bf16.msra.mxu0 %v20987_v29  ;;  %v14999_v5 = vld [vmem:[%s22479_s17 + $0x113] sm:$0xff] }
 0x35d   : >> { %18764 = vmatprep.subr.bf16.mxu0 %v20989_v61  ;;  %v23465_v23 = vpack.c.bf16 %v15000_v60, %v14999_v5  ;;  %v15736_v29 = vld [vmem:[%s22479_s17 + $0x151] sm:$0xff]  ;;  %v23503_v60 = vpack.c.bf16 %v15039_v22, %v15038_v21  ;;  %v15083_v21 = vld [vmem:[%s22479_s17 + $0x40] sm:$0xff]  ;;  %v15084_v22 = vld [vmem:[%s22479_s17 + $0x48] sm:$0xff] }
 0x360   : >> { %18765 = vmatpush3.bf16.msra.mxu0 %v20989_v61  ;;  %v15737_v61 = vld [vmem:[%s22479_s17 + $0x159] sm:$0xff] }
 0x361   : >> { %18766 = vmatprep.subr.bf16.mxu0 %v20991_v59  ;;  %v7274_v5 = vpack.c.bf16 %v15737_v61, %v15736_v29  ;;  %v15057_v61 = vld [vmem:[%s22479_s17 + $0x11c] sm:$0xff] }
 0x362   : >> { %18127 = vmatmul.mubr.bf16.gmra.mrb[24].mxu1 %v23451_v17 }
 0x363   : >> { %18735 = vmatmul.mubr.bf16.gmra.mrb[8].mxu0 %v23221_v30  ;;  %18130 = vmatprep.mubr.bf16.mxu1 %v23453_v54  ;;  %v3565_v30 = vpack.c.bf16 %v15027_v4, %v15026_v34  ;;  %v7275_v34 = vpack.c.bf16 %v15739_v20, %v15738_v41  ;;  %v21000_v4 = vld [vmem:[%s21574_s9 + $0x2a8] sm:$0xff]   ;;  %v21011_v41 = vld [vmem:[%s21574_s9 + $0x5f0] sm:$0xff]  }
 0x364   : >> { %18738 = vmatprep.mubr.bf16.mxu0 %v23223_v44  ;;  %18767 = vmatpush3.bf16.msra.mxu0 %v20991_v59  ;;  %v15028_v44 = vld [vmem:[%s22479_s17 + $0x34] sm:$0xff]  ;;  %v20998_v59 = vld [vmem:[%s21574_s9 + $0x2a0] sm:$0xff]  }
 0x365   : >> { %18768 = vmatprep.subr.bf16.mxu0 %v20993_v62 }
 0x368   : >> { %18769 = vmatpush3.bf16.msra.mxu0 %v20993_v62  ;;  %v3570_v62 = vpack.c.bf16 %v15037_v38, %v15036_v37  ;;  %v21007_v37 = vld [vmem:[%s21574_s9 + $0x5e0] sm:$0xff]  }
 0x369   : >> { %18770 = vmatprep.subr.bf16.mxu0 %v20995_v55 }
 0x36a   : >> { %18131 = vmatmul.mubr.bf16.gmra.mrb[28].mxu1 %v23465_v23 }
 0x36b   : >> { %18739 = vmatmul.mubr.bf16.gmra.mrb[12].mxu0 %v23235_v18  ;;  %18150 = vmatprep.mubr.bf16.mxu1 %v3565_v30  ;;  %v3566_v18 = vpack.c.bf16 %v15029_v50, %v15028_v44  ;;  %v15041_v30 = vld [vmem:[%s22479_s17 + $0x9c] sm:$0xff]  ;;  %v15042_v50 = vld [vmem:[%s22479_s17 + $0xa4] sm:$0xff] }
 0x36c   : >> { %18742 = vmatprep.mubr.bf16.mxu0 %v23237_v19  ;;  %18771 = vmatpush3.bf16.msra.mxu0 %v20995_v55  ;;  %v20992_v19 = vld [vmem:[%s21574_s9 + $0x288] sm:$0xff]   ;;  %v15741_v44 = vld [vmem:[%s22479_s17 + $0x179] sm:$0xff] }
 0x36d   : >> { %18772 = vmatprep.subr.bf16.mxu0 %v20997_v9  ;;  %v15040_v55 = vld [vmem:[%s22479_s17 + $0x94] sm:$0xff] }
 0x36e   : >> { %v23514_v15 = vpack.c.bf16 %v15041_v30, %v15040_v55  ;;  %v15788_v55 = vld [vmem:[%s22479_s17 + $0x12a] sm:$0xff] }
 0x36f   : >> { %v23586_v30 = vld [vmem:[%s21574_s9 + $0x600] sm:$0xff]  }
 0x370   : >> { %18773 = vmatpush3.bf16.msra.mxu0 %v20997_v9  ;;  %v15740_v9 = vld [vmem:[%s22479_s17 + $0x171] sm:$0xff] }
 0x371   : >> { %18806 = vmatprep.subr.bf16.mxu0 %v23478_v43  ;;  %v7276_v25 = vpack.c.bf16 %v15741_v44, %v15740_v9 }
 0x372   : >> { %18151 = vmatmul.mubr.bf16.vlgmr.msra.gmra.mrb[0].mxu1 %v3566_v18  ;;  %v23516_v18 = vpack.c.bf16 %v15043_v11, %v15042_v50  ;;  %v15089_v50 = vld [vmem:[%s22479_s17 + $0x70] sm:$0xff]  ;;  %v15090_v11 = vld [vmem:[%s22479_s17 + $0x78] sm:$0xff] }
 0x373   : >> { %18743 = vmatmul.mubr.bf16.gmra.mrb[16].mxu0 %v23249_v57  ;;  %18183 = vmatpush3.bf16.msra.mxu1 %v23419_v14  ;;  %v7272_v57 = vpack.c.bf16 %v15733_v24, %v15732_v46  ;;  %v3569_v14 = vpack.c.bf16 %v15035_v26, %v15034_v27  ;;  %v23527_v46 = vld [vmem:[%s21574_s9 + $0x2c0] sm:$0xff]   ;;  %v23531_v27 = vpack.c.bf16 %v15047_v7, %v15046_v3  ;;  %v21001_v26 = vld [vmem:[%s21574_s9 + $0x5c8] sm:$0xff]  }
 0x374   : >> { %18154 = vmatprep.mubr.bf16.mxu1 %v3567_v16  ;;  %18746 = vmatprep.mubr.bf16.mxu0 %v7271_v31  ;;  %v21004_v16 = vld [vmem:[%s21574_s9 + $0x2b8] sm:$0xff]   ;;  %v15044_v31 = vld [vmem:[%s22479_s17 + $0xb4] sm:$0xff]  ;;  %v15792_v7 = vld [vmem:[%s22479_s17 + $0x14a] sm:$0xff] }
 0x375   : >> { %18184 = vmatprep.subr.bf16.mxu1 %v20992_v19  ;;  %v15791_v3 = vld [vmem:[%s22479_s17 + $0x142] sm:$0xff] }
 0x377   : >> { %18185 = vmatpush3.bf16.msra.mxu1 %v20992_v19  ;;  %v15045_v19 = vld [vmem:[%s22479_s17 + $0xbc] sm:$0xff] }
 0x378   : >> { %18186 = vmatprep.subr.bf16.mxu1 %v20994_v39  ;;  %v23529_v24 = vpack.c.bf16 %v15045_v19, %v15044_v31  ;;  %v15092_v31 = vld [vmem:[%s22479_s17 + $0x88] sm:$0xff]  ;;  %v21010_v19 = vld [vmem:[%s21574_s9 + $0x2d0] sm:$0xff]  }
 0x37a   : >> { %18155 = vmatmul.mubr.bf16.gmra.mrb[4].mxu1 %v3568_v33  ;;  %v21003_v33 = vld [vmem:[%s21574_s9 + $0x5d0] sm:$0xff]  }
 0x37b   : >> { %18747 = vmatmul.mubr.bf16.gmra.mrb[20].mxu0 %v7272_v57  ;;  %18158 = vmatprep.mubr.bf16.mxu1 %v3569_v14  ;;  %v21005_v14 = vld [vmem:[%s21574_s9 + $0x5d8] sm:$0xff]  }
 0x37c   : >> { %18750 = vmatprep.mubr.bf16.mxu0 %v7273_v52  ;;  %18187 = vmatpush3.bf16.msra.mxu1 %v20994_v39  ;;  %v15049_v39 = vld [vmem:[%s22479_s17 + $0xdc] sm:$0xff]  ;;  %v15054_v52 = vld [vmem:[%s22479_s17 + $0x104] sm:$0xff] }
 0x37d   : >> { %18188 = vmatprep.subr.bf16.mxu1 %v20996_v35 }
 0x380   : >> { %18189 = vmatpush3.bf16.msra.mxu1 %v20996_v35  ;;  %v15055_v35 = vld [vmem:[%s22479_s17 + $0x10c] sm:$0xff] }
 0x381   : >> { %18190 = vmatprep.subr.bf16.mxu1 %v20998_v59  ;;  %v23561_v29 = vpack.c.bf16 %v15055_v35, %v15054_v52  ;;  %v15795_v52 = vld [vmem:[%s22479_s17 + $0x162] sm:$0xff]  ;;  %v15796_v35 = vld [vmem:[%s22479_s17 + $0x16a] sm:$0xff] }
 0x382   : >> { %18159 = vmatmul.mubr.bf16.gmra.mrb[8].mxu1 %v3570_v62  ;;  %v15086_v62 = vld [vmem:[%s22479_s17 + $0x58] sm:$0xff] }
 0x383   : >> { %18751 = vmatmul.mubr.bf16.gmra.mrb[24].mxu0 %v7274_v5  ;;  %18162 = vmatprep.mubr.bf16.mxu1 %v23503_v60  ;;  %v15087_v5 = vld [vmem:[%s22479_s17 + $0x60] sm:$0xff] }
 0x384   : >> { %18754 = vmatprep.mubr.bf16.mxu0 %v7275_v34  ;;  %18191 = vmatpush3.bf16.msra.mxu1 %v20998_v59  ;;  %v21013_v59 = vld [vmem:[%s21574_s9 + $0x5f8] sm:$0xff]   ;;  %v15088_v34 = vld [vmem:[%s22479_s17 + $0x68] sm:$0xff] }
 0x385   : >> { %18192 = vmatprep.subr.bf16.mxu1 %v21000_v4  ;;  %v3875_v9 = vpack.c.bf16 %v15088_v34, %v15087_v5  ;;  %v15100_v5 = vld [vmem:[%s22479_s17 + $0xc8] sm:$0xff]  ;;  %v21018_v34 = vld [vmem:[%s21574_s9 + $0x2f0] sm:$0xff]  }
 0x388   : >> { %18193 = vmatpush3.bf16.msra.mxu1 %v21000_v4  ;;  %v15787_v4 = vld [vmem:[%s22479_s17 + $0x122] sm:$0xff] }
 0x389   : >> { %18194 = vmatprep.subr.bf16.mxu1 %v21002_v49  ;;  %v23588_v44 = vpack.c.bf16 %v15788_v55, %v15787_v4 }
 0x38a   : >> { %18163 = vmatmul.mubr.bf16.gmra.mrb[12].mxu1 %v23514_v15 }
 0x38b   : >> { %18755 = vmatmul.mubr.bf16.gmra.mrb[28].mxu0 %v7276_v25  ;;  %18166 = vmatprep.mubr.bf16.mxu1 %v23516_v18  ;;  %v15790_v25 = vld [vmem:[%s22479_s17 + $0x13a] sm:$0xff] }
 0x38c   : >> { %18774 = vmatprep.mubr.bf16.mxu0 %v23287_v0  ;;  %18195 = vmatpush3.bf16.msra.mxu1 %v21002_v49  ;;  %v15048_v0 = vld [vmem:[%s22479_s17 + $0xd4] sm:$0xff] }
 0x38d   : >> { %18196 = vmatprep.subr.bf16.mxu1 %v21004_v16  ;;  %v23545_v57 = vpack.c.bf16 %v15049_v39, %v15048_v0  ;;  %v15789_v49 = vld [vmem:[%s22479_s17 + $0x132] sm:$0xff]  ;;  %v7581_v0 = vpack.c.bf16 %v15792_v7, %v15791_v3  ;;  %v21012_v39 = vld [vmem:[%s21574_s9 + $0x2d8] sm:$0xff]  }
 0x38e   : >> { %v15106_v3 = vld [vmem:[%s22479_s17 + $0xf8] sm:$0xff]  ;;  %v15107_v7 = vld [vmem:[%s22479_s17 + $0x100] sm:$0xff] }
 0x390   : >> { %18197 = vmatpush3.bf16.msra.mxu1 %v21004_v16  ;;  %v15091_v16 = vld [vmem:[%s22479_s17 + $0x80] sm:$0xff] }
 0x391   : >> { %18230 = vmatprep.subr.bf16.mxu1 %v23527_v46 }
 0x392   : >> { %18167 = vmatmul.mubr.bf16.gmra.mrb[16].mxu1 %v23529_v24 }
 0x393   : >> { %18775 = vmatmul.mubr.bf16.vlgmr.msra.gmra.mrb[0].mxu0 %v23298_v6  ;;  %18170 = vmatprep.mubr.bf16.mxu1 %v23531_v27  ;;  %v23547_v6 = vpack.c.bf16 %v15051_v56, %v15050_v51  ;;  %v15093_v51 = vld [vmem:[%s22479_s17 + $0x90] sm:$0xff]  ;;  %v15094_v56 = vld [vmem:[%s22479_s17 + $0x98] sm:$0xff] }
 0x394   : >> { %18807 = vmatpush3.bf16.msra.mxu0 %v23478_v43  ;;  %18778 = vmatprep.mubr.bf16.mxu0 %v23300_v32  ;;  %v15052_v32 = vld [vmem:[%s22479_s17 + $0xf4] sm:$0xff]  ;;  %v15053_v43 = vld [vmem:[%s22479_s17 + $0xfc] sm:$0xff] }
 0x395   : >> { %18808 = vmatprep.subr.bf16.mxu0 %v21001_v26  ;;  %v23559_v38 = vpack.c.bf16 %v15053_v43, %v15052_v32  ;;  %v15095_v32 = vld [vmem:[%s22479_s17 + $0xa0] sm:$0xff]  ;;  %v15096_v43 = vld [vmem:[%s22479_s17 + $0xa8] sm:$0xff] }
 0x398   : >> { %18809 = vmatpush3.bf16.msra.mxu0 %v21001_v26  ;;  %v3877_v26 = vpack.c.bf16 %v15092_v31, %v15091_v16  ;;  %v21017_v31 = vld [vmem:[%s21574_s9 + $0x608] sm:$0xff]  }
 0x399   : >> { %18810 = vmatprep.subr.bf16.mxu0 %v21003_v33 }
 0x39a   : >> { %18171 = vmatmul.mubr.bf16.gmra.mrb[20].mxu1 %v23545_v57 }
 0x39b   : >> { %18779 = vmatmul.mubr.bf16.gmra.mrb[4].mxu0 %v23313_v63  ;;  %18174 = vmatprep.mubr.bf16.mxu1 %v23547_v6  ;;  %v21009_v63 = vld [vmem:[%s21574_s9 + $0x5e8] sm:$0xff]  }
 0x39c   : >> { %18782 = vmatprep.mubr.bf16.mxu0 %v23315_v58  ;;  %18811 = vmatpush3.bf16.msra.mxu0 %v21003_v33  ;;  %v15056_v58 = vld [vmem:[%s22479_s17 + $0x114] sm:$0xff] }
 0x39d   : >> { %18812 = vmatprep.subr.bf16.mxu0 %v21005_v14  ;;  %v23573_v20 = vpack.c.bf16 %v15057_v61, %v15056_v58  ;;  %v15793_v33 = vld [vmem:[%s22479_s17 + $0x152] sm:$0xff]  ;;  %v3879_v61 = vpack.c.bf16 %v15096_v43, %v15095_v32 }
 0x39e   : >> { %v15113_v43 = vld [vmem:[%s22479_s17 + $0x130] sm:$0xff] }
 0x3a0   : >> { %18813 = vmatpush3.bf16.msra.mxu0 %v21005_v14  ;;  %v15794_v14 = vld [vmem:[%s22479_s17 + $0x15a] sm:$0xff] }
 0x3a1   : >> { %18814 = vmatprep.subr.bf16.mxu0 %v21007_v37  ;;  %v7582_v58 = vpack.c.bf16 %v15794_v14, %v15793_v33  ;;  %v21022_v33 = vld [vmem:[%s21574_s9 + $0x620] sm:$0xff]  }
 0x3a2   : >> { %18175 = vmatmul.mubr.bf16.gmra.mrb[24].mxu1 %v23559_v38 }
 0x3a3   : >> { %18783 = vmatmul.mubr.bf16.gmra.mrb[8].mxu0 %v23329_v53  ;;  %18178 = vmatprep.mubr.bf16.mxu1 %v23561_v29  ;;  %v3873_v53 = vpack.c.bf16 %v15084_v22, %v15083_v21  ;;  %v7583_v21 = vpack.c.bf16 %v15796_v35, %v15795_v52  ;;  %v21016_v22 = vld [vmem:[%s21574_s9 + $0x2e8] sm:$0xff]   ;;  %v15140_v52 = vld [vmem:[%s22479_s17 + $0x41] sm:$0xff] }
 0x3a4   : >> { %18786 = vmatprep.mubr.bf16.mxu0 %v23331_v40  ;;  %18815 = vmatpush3.bf16.msra.mxu0 %v21007_v37  ;;  %v15085_v40 = vld [vmem:[%s22479_s17 + $0x50] sm:$0xff]  ;;  %v21014_v37 = vld [vmem:[%s21574_s9 + $0x2e0] sm:$0xff]  }
 0x3a5   : >> { %18816 = vmatprep.subr.bf16.mxu0 %v21009_v63  ;;  %v15141_v35 = vld [vmem:[%s22479_s17 + $0x49] sm:$0xff] }
 0x3a8   : >> { %18817 = vmatpush3.bf16.msra.mxu0 %v21009_v63  ;;  %v3878_v63 = vpack.c.bf16 %v15094_v56, %v15093_v51  ;;  %v15111_v51 = vld [vmem:[%s22479_s17 + $0x120] sm:$0xff]  ;;  %v15112_v56 = vld [vmem:[%s22479_s17 + $0x128] sm:$0xff] }
 0x3a9   : >> { %18818 = vmatprep.subr.bf16.mxu0 %v21011_v41  ;;  %v3887_v32 = vpack.c.bf16 %v15112_v56, %v15111_v51  ;;  %v21030_v51 = vld [vmem:[%s21574_s9 + $0x320] sm:$0xff]   ;;  %v15154_v56 = vld [vmem:[%s22479_s17 + $0xb1] sm:$0xff] }
 0x3aa   : >> { %18179 = vmatmul.mubr.bf16.gmra.mrb[28].mxu1 %v23573_v20 }
 0x3ab   : >> { %18787 = vmatmul.mubr.bf16.gmra.mrb[12].mxu0 %v23343_v45  ;;  %18198 = vmatprep.mubr.bf16.mxu1 %v3873_v53  ;;  %v3874_v45 = vpack.c.bf16 %v15086_v62, %v15085_v40  ;;  %v15098_v53 = vld [vmem:[%s22479_s17 + $0xb8] sm:$0xff]  ;;  %v15099_v62 = vld [vmem:[%s22479_s17 + $0xc0] sm:$0xff] }
 0x3ac   : >> { %18790 = vmatprep.mubr.bf16.mxu0 %v23345_v12  ;;  %18819 = vmatpush3.bf16.msra.mxu0 %v21011_v41  ;;  %v21008_v12 = vld [vmem:[%s21574_s9 + $0x2c8] sm:$0xff]   ;;  %v15798_v40 = vld [vmem:[%s22479_s17 + $0x17a] sm:$0xff] }
 0x3ad   : >> { %18820 = vmatprep.subr.bf16.mxu0 %v21013_v59  ;;  %v15097_v41 = vld [vmem:[%s22479_s17 + $0xb0] sm:$0xff] }
 0x3ae   : >> { %v3880_v4 = vpack.c.bf16 %v15098_v53, %v15097_v41  ;;  %v15844_v41 = vld [vmem:[%s22479_s17 + $0x123] sm:$0xff]  ;;  %v15845_v53 = vld [vmem:[%s22479_s17 + $0x12b] sm:$0xff] }
 0x3b0   : >> { %18821 = vmatpush3.bf16.msra.mxu0 %v21013_v59  ;;  %v15797_v59 = vld [vmem:[%s22479_s17 + $0x172] sm:$0xff] }
 0x3b1   : >> { %18854 = vmatprep.subr.bf16.mxu0 %v23586_v30  ;;  %v7584_v55 = vpack.c.bf16 %v15798_v40, %v15797_v59  ;;  %v7887_v40 = vpack.c.bf16 %v15845_v53, %v15844_v41  ;;  %v15162_v53 = vld [vmem:[%s22479_s17 + $0xf1] sm:$0xff] }
 0x3b2   : >> { %18199 = vmatmul.mubr.bf16.vlgmr.msra.gmra.mrb[0].mxu1 %v3874_v45  ;;  %v3881_v45 = vpack.c.bf16 %v15100_v5, %v15099_v62  ;;  %v15147_v62 = vld [vmem:[%s22479_s17 + $0x79] sm:$0xff] }
 0x3b3   : >> { %18791 = vmatmul.mubr.bf16.gmra.mrb[16].mxu0 %v23357_v13  ;;  %18231 = vmatpush3.bf16.msra.mxu1 %v23527_v46  ;;  %v3876_v13 = vpack.c.bf16 %v15090_v11, %v15089_v50  ;;  %v23604_v46 = vpack.c.bf16 %v15790_v25, %v15789_v49  ;;  %v15102_v50 = vld [vmem:[%s22479_s17 + $0xd8] sm:$0xff]  ;;  %v15103_v11 = vld [vmem:[%s22479_s17 + $0xe0] sm:$0xff]  ;;  %v15104_v49 = vld [vmem:[%s22479_s17 + $0xe8] sm:$0xff] }
 0x3b4   : >> { %18202 = vmatprep.mubr.bf16.mxu1 %v3875_v9  ;;  %18794 = vmatprep.mubr.bf16.mxu0 %v23588_v44  ;;  %v21020_v9 = vld [vmem:[%s21574_s9 + $0x2f8] sm:$0xff]   ;;  %v3883_v16 = vpack.c.bf16 %v15104_v49, %v15103_v11  ;;  %v15846_v5 = vld [vmem:[%s22479_s17 + $0x133] sm:$0xff] }
 0x3b5   : >> { %18232 = vmatprep.subr.bf16.mxu1 %v21008_v12 }
 0x3b7   : >> { %18233 = vmatpush3.bf16.msra.mxu1 %v21008_v12  ;;  %v15101_v12 = vld [vmem:[%s22479_s17 + $0xd0] sm:$0xff] }
 0x3b8   : >> { %18234 = vmatprep.subr.bf16.mxu1 %v21010_v19  ;;  %v3882_v25 = vpack.c.bf16 %v15102_v50, %v15101_v12  ;;  %v15849_v12 = vld [vmem:[%s22479_s17 + $0x14b] sm:$0xff] }
 0x3ba   : >> { %18203 = vmatmul.mubr.bf16.gmra.mrb[4].mxu1 %v3876_v13  ;;  %v15108_v13 = vld [vmem:[%s22479_s17 + $0x108] sm:$0xff] }
 0x3bb   : >> { %18795 = vmatmul.mubr.bf16.gmra.mrb[20].mxu0 %v23604_v46  ;;  %18206 = vmatprep.mubr.bf16.mxu1 %v3877_v26  ;;  %v21019_v26 = vld [vmem:[%s21574_s9 + $0x610] sm:$0xff]  }
 0x3bc   : >> { %18798 = vmatprep.mubr.bf16.mxu0 %v7581_v0  ;;  %18235 = vmatpush3.bf16.msra.mxu1 %v21010_v19  ;;  %v23633_v19 = vld [vmem:[%s21574_s9 + $0x300] sm:$0xff]  }
 0x3bd   : >> { %18236 = vmatprep.subr.bf16.mxu1 %v21012_v39 }
 0x3c0   : >> { %18237 = vmatpush3.bf16.msra.mxu1 %v21012_v39  ;;  %v3885_v39 = vpack.c.bf16 %v15108_v13, %v15107_v7  ;;  %v15153_v7 = vld [vmem:[%s22479_s17 + $0xa9] sm:$0xff] }
 0x3c1   : >> { %18238 = vmatprep.subr.bf16.mxu1 %v21014_v37  ;;  %v15852_v13 = vld [vmem:[%s22479_s17 + $0x163] sm:$0xff] }
 0x3c2   : >> { %18207 = vmatmul.mubr.bf16.gmra.mrb[8].mxu1 %v3878_v63 }
 0x3c3   : >> { %18799 = vmatmul.mubr.bf16.gmra.mrb[24].mxu0 %v7582_v58  ;;  %18210 = vmatprep.mubr.bf16.mxu1 %v3879_v61  ;;  %v4181_v58 = vpack.c.bf16 %v15141_v35, %v15140_v52  ;;  %v15142_v61 = vld [vmem:[%s22479_s17 + $0x51] sm:$0xff] }
 0x3c4   : >> { %18802 = vmatprep.mubr.bf16.mxu0 %v7583_v21  ;;  %18239 = vmatpush3.bf16.msra.mxu1 %v21014_v37  ;;  %v21024_v37 = vld [vmem:[%s21574_s9 + $0x630] sm:$0xff]   ;;  %v15144_v21 = vld [vmem:[%s22479_s17 + $0x61] sm:$0xff] }
 0x3c5   : >> { %18240 = vmatprep.subr.bf16.mxu1 %v21016_v22 }
 0x3c8   : >> { %18241 = vmatpush3.bf16.msra.mxu1 %v21016_v22  ;;  %v15145_v22 = vld [vmem:[%s22479_s17 + $0x69] sm:$0xff] }
 0x3c9   : >> { %18242 = vmatprep.subr.bf16.mxu1 %v21018_v34 }
 0x3ca   : >> { %18211 = vmatmul.mubr.bf16.gmra.mrb[12].mxu1 %v3880_v4  ;;  %v15148_v4 = vld [vmem:[%s22479_s17 + $0x81] sm:$0xff] }
 0x3cb   : >> { %18803 = vmatmul.mubr.bf16.gmra.mrb[28].mxu0 %v7584_v55  ;;  %18214 = vmatprep.mubr.bf16.mxu1 %v3881_v45  ;;  %v15149_v55 = vld [vmem:[%s22479_s17 + $0x89] sm:$0xff] }
 0x3cc   : >> { %18822 = vmatprep.mubr.bf16.mxu0 %v23395_v10  ;;  %18243 = vmatpush3.bf16.msra.mxu1 %v21018_v34  ;;  %v15105_v10 = vld [vmem:[%s22479_s17 + $0xf0] sm:$0xff]  ;;  %v15847_v34 = vld [vmem:[%s22479_s17 + $0x13b] sm:$0xff]  ;;  %v4185_v11 = vpack.c.bf16 %v15149_v55, %v15148_v4 }
 0x3cd   : >> { %18244 = vmatprep.subr.bf16.mxu1 %v21020_v9  ;;  %v3884_v0 = vpack.c.bf16 %v15106_v3, %v15105_v10  ;;  %v21027_v45 = vld [vmem:[%s21574_s9 + $0x308] sm:$0xff]   ;;  %v7888_v50 = vpack.c.bf16 %v15847_v34, %v15846_v5  ;;  %v15851_v10 = vld [vmem:[%s22479_s17 + $0x15b] sm:$0xff] }
 0x3ce   : >> { %v15152_v3 = vld [vmem:[%s22479_s17 + $0xa1] sm:$0xff]  ;;  %v15169_v34 = vld [vmem:[%s22479_s17 + $0x129] sm:$0xff]  ;;  %v15171_v55 = vld [vmem:[%s22479_s17 + $0x139] sm:$0xff] }
 0x3cf   : >> { %v15168_v5 = vld [vmem:[%s22479_s17 + $0x121] sm:$0xff] }
 0x3d0   : >> { %18245 = vmatpush3.bf16.msra.mxu1 %v21020_v9  ;;  %v15848_v9 = vld [vmem:[%s22479_s17 + $0x143] sm:$0xff]  ;;  %v4195_v4 = vpack.c.bf16 %v15169_v34, %v15168_v5 }
 0x3d1   : >> { %19526 = vmatprep.subr.bf16.mxu1 %v23633_v19  ;;  %v7889_v49 = vpack.c.bf16 %v15849_v12, %v15848_v9 }
 0x3d2   : >> { %18215 = vmatmul.mubr.bf16.gmra.mrb[16].mxu1 %v3882_v25  ;;  %v21028_v25 = vld [vmem:[%s21574_s9 + $0x310] sm:$0xff]  }
 0x3d3   : >> { %18823 = vmatmul.mubr.bf16.vlgmr.msra.gmra.mrb[0].mxu0 %v23406_v42  ;;  %18218 = vmatprep.mubr.bf16.mxu1 %v3883_v16  ;;  %v21021_v42 = vld [vmem:[%s21574_s9 + $0x618] sm:$0xff]   ;;  %v15150_v16 = vld [vmem:[%s22479_s17 + $0x91] sm:$0xff] }
 0x3d4   : >> { %18855 = vmatpush3.bf16.msra.mxu0 %v23586_v30  ;;  %18826 = vmatprep.mubr.bf16.mxu0 %v23408_v36  ;;  %v15109_v30 = vld [vmem:[%s22479_s17 + $0x110] sm:$0xff]  ;;  %v15110_v36 = vld [vmem:[%s22479_s17 + $0x118] sm:$0xff] }
 0x3d5   : >> { %18856 = vmatprep.subr.bf16.mxu0 %v21017_v31  ;;  %v3886_v14 = vpack.c.bf16 %v15110_v36, %v15109_v30  ;;  %v4187_v30 = vpack.c.bf16 %v15153_v7, %v15152_v3  ;;  %v15221_v3 = vld [vmem:[%s22479_s17 + $0x102] sm:$0xff]  ;;  %v15222_v7 = vld [vmem:[%s22479_s17 + $0x10a] sm:$0xff] }
 0x3d8   : >> { %18857 = vmatpush3.bf16.msra.mxu0 %v21017_v31  ;;  %v15151_v31 = vld [vmem:[%s22479_s17 + $0x99] sm:$0xff] }
 0x3d9   : >> { %18858 = vmatprep.subr.bf16.mxu0 %v21019_v26 }
 0x3da   : >> { %18219 = vmatmul.mubr.bf16.gmra.mrb[20].mxu1 %v3884_v0  ;;  %v21029_v0 = vld [vmem:[%s21574_s9 + $0x318] sm:$0xff]  }
 0x3db   : >> { %18827 = vmatmul.mubr.bf16.gmra.mrb[4].mxu0 %v23421_v8  ;;  %18222 = vmatprep.mubr.bf16.mxu1 %v3885_v39  ;;  %v21023_v8 = vld [vmem:[%s21574_s9 + $0x628] sm:$0xff]   ;;  %v4186_v39 = vpack.c.bf16 %v15151_v31, %v15150_v16 }
 0x3dc   : >> { %18830 = vmatprep.mubr.bf16.mxu0 %v23423_v48  ;;  %18859 = vmatpush3.bf16.msra.mxu0 %v21019_v26  ;;  %v15114_v48 = vld [vmem:[%s22479_s17 + $0x138] sm:$0xff]  ;;  %v15853_v26 = vld [vmem:[%s22479_s17 + $0x16b] sm:$0xff] }
 0x3dd   : >> { %18860 = vmatprep.subr.bf16.mxu0 %v21021_v42  ;;  %v3888_v63 = vpack.c.bf16 %v15114_v48, %v15113_v43  ;;  %v7891_v36 = vpack.c.bf16 %v15853_v26, %v15852_v13  ;;  %v15157_v43 = vld [vmem:[%s22479_s17 + $0xc9] sm:$0xff] }
 0x3de   : >> { %v21031_v48 = vld [vmem:[%s21574_s9 + $0x328] sm:$0xff]   ;;  %v15905_v13 = vld [vmem:[%s22479_s17 + $0x144] sm:$0xff] }
 0x3df   : >> { %v15906_v26 = vld [vmem:[%s22479_s17 + $0x14c] sm:$0xff] }
 0x3e0   : >> { %18861 = vmatpush3.bf16.msra.mxu0 %v21021_v42 }
 0x3e1   : >> { %18862 = vmatprep.subr.bf16.mxu0 %v21022_v33 }
 0x3e2   : >> { %18223 = vmatmul.mubr.bf16.gmra.mrb[24].mxu1 %v3886_v14  ;;  %v15854_v14 = vld [vmem:[%s22479_s17 + $0x173] sm:$0xff] }
 0x3e3   : >> { %18831 = vmatmul.mubr.bf16.gmra.mrb[8].mxu0 %v23437_v28  ;;  %18226 = vmatprep.mubr.bf16.mxu1 %v3887_v32  ;;  %v21025_v28 = vld [vmem:[%s21574_s9 + $0x638] sm:$0xff]  }
 0x3e4   : >> { %18834 = vmatprep.mubr.bf16.mxu0 %v23439_v47  ;;  %18863 = vmatpush3.bf16.msra.mxu0 %v21022_v33  ;;  %v15143_v47 = vld [vmem:[%s22479_s17 + $0x59] sm:$0xff] }
 0x3e5   : >> { %18864 = vmatprep.subr.bf16.mxu0 %v21023_v8  ;;  %v4182_v59 = vpack.c.bf16 %v15143_v47, %v15142_v61  ;;  %v15155_v33 = vld [vmem:[%s22479_s17 + $0xb9] sm:$0xff]  ;;  %v15160_v61 = vld [vmem:[%s22479_s17 + $0xe1] sm:$0xff]  ;;  %v15161_v47 = vld [vmem:[%s22479_s17 + $0xe9] sm:$0xff] }
 0x3e6   : >> { %v15855_v32 = vld [vmem:[%s22479_s17 + $0x17b] sm:$0xff]  ;;  %v4188_v52 = vpack.c.bf16 %v15155_v33, %v15154_v56  ;;  %v4191_v41 = vpack.c.bf16 %v15161_v47, %v15160_v61  ;;  %v15909_v33 = vld [vmem:[%s22479_s17 + $0x164] sm:$0xff] }
 0x3e7   : >> { %v7892_v35 = vpack.c.bf16 %v15855_v32, %v15854_v14  ;;  %v15908_v56 = vld [vmem:[%s22479_s17 + $0x15c] sm:$0xff]  ;;  %v15910_v14 = vld [vmem:[%s22479_s17 + $0x16c] sm:$0xff] }
 0x3e8   : >> { %18865 = vmatpush3.bf16.msra.mxu0 %v21023_v8  ;;  %v15156_v8 = vld [vmem:[%s22479_s17 + $0xc1] sm:$0xff] }
 0x3e9   : >> { %18866 = vmatprep.subr.bf16.mxu0 %v21024_v37 }
 0x3ea   : >> { %18227 = vmatmul.mubr.bf16.gmra.mrb[28].mxu1 %v3888_v63  ;;  %v21032_v63 = vld [vmem:[%s21574_s9 + $0x330] sm:$0xff]  }
 0x3eb   : >> { %18835 = vmatmul.mubr.bf16.gmra.mrb[12].mxu0 %v23451_v17  ;;  %18246 = vmatprep.mubr.bf16.mxu1 %v4181_v58  ;;  %v4183_v17 = vpack.c.bf16 %v15145_v22, %v15144_v21  ;;  %v15158_v58 = vld [vmem:[%s22479_s17 + $0xd1] sm:$0xff]  ;;  %v21033_v21 = vld [vmem:[%s21574_s9 + $0x338] sm:$0xff]  }
 0x3ec   : >> { %18838 = vmatprep.mubr.bf16.mxu0 %v23453_v54  ;;  %18867 = vmatpush3.bf16.msra.mxu0 %v21024_v37  ;;  %v15146_v54 = vld [vmem:[%s22479_s17 + $0x71] sm:$0xff]  ;;  %v4189_v37 = vpack.c.bf16 %v15157_v43, %v15156_v8  ;;  %v8199_v43 = vpack.c.bf16 %v15910_v14, %v15909_v33 }
 0x3ed   : >> { %18868 = vmatprep.subr.bf16.mxu0 %v21025_v28 }
 0x3f0   : >> { %18869 = vmatpush3.bf16.msra.mxu0 %v21025_v28  ;;  %v15159_v28 = vld [vmem:[%s22479_s17 + $0xd9] sm:$0xff] }
 0x3f1   : >> { %v4190_v22 = vpack.c.bf16 %v15159_v28, %v15158_v58  ;;  %v23754_v28 = vstv %s22470_s14 }
 0x3f2   : >> { %18247 = vmatmul.mubr.bf16.vlgmr.msra.gmra.mrb[0].mxu1 %v4182_v59  ;;  %v15163_v59 = vld [vmem:[%s22479_s17 + $0xf9] sm:$0xff] }
 0x3f3   : >> { %18839 = vmatmul.mubr.bf16.gmra.mrb[16].mxu0 %v23465_v23  ;;  %19534 = vmatpush3.bf16.msra.mxu1 %v23633_v19  ;;  %v4184_v23 = vpack.c.bf16 %v15147_v62, %v15146_v54  ;;  %v15850_v19 = vld [vmem:[%s22479_s17 + $0x153] sm:$0xff] }
 0x3f4   : >> { %18250 = vmatprep.mubr.bf16.mxu1 %v4183_v17  ;;  %18842 = vmatprep.mubr.bf16.mxu0 %v7887_v40  ;;  %v7890_v42 = vpack.c.bf16 %v15851_v10, %v15850_v19  ;;  %v15165_v17 = vld [vmem:[%s22479_s17 + $0x109] sm:$0xff]  ;;  %v4192_v40 = vpack.c.bf16 %v15163_v59, %v15162_v53  ;;  %v15166_v62 = vld [vmem:[%s22479_s17 + $0x111] sm:$0xff]  ;;  %v15220_v19 = vld [vmem:[%s22479_s17 + $0xfa] sm:$0xff] }
 0x3f5   : >> { %19527 = vmatprep.subr.bf16.mxu1 %v21027_v45  ;;  %v15904_v10 = vld [vmem:[%s22479_s17 + $0x13c] sm:$0xff] }
 0x3f7   : >> { %19535 = vmatpush3.bf16.msra.mxu1 %v21027_v45  ;;  %v15213_v45 = vld [vmem:[%s22479_s17 + $0xc2] sm:$0xff] }
 0x3f8   : >> { %19528 = vmatprep.subr.bf16.mxu1 %v21028_v25 }
 0x3fa   : >> { %18251 = vmatmul.mubr.bf16.gmra.mrb[4].mxu1 %v4184_v23  ;;  %v15216_v23 = vld [vmem:[%s22479_s17 + $0xda] sm:$0xff] }
 0x3fb   : >> { %18843 = vmatmul.mubr.bf16.gmra.mrb[20].mxu0 %v7888_v50  ;;  %18254 = vmatprep.mubr.bf16.mxu1 %v4185_v11  ;;  %v15217_v50 = vld [vmem:[%s22479_s17 + $0xe2] sm:$0xff] }
 0x3fc   : >> { %18846 = vmatprep.mubr.bf16.mxu0 %v7889_v49  ;;  %19536 = vmatpush3.bf16.msra.mxu1 %v21028_v25  ;;  %v15901_v11 = vld [vmem:[%s22479_s17 + $0x124] sm:$0xff]  ;;  %v15902_v49 = vld [vmem:[%s22479_s17 + $0x12c] sm:$0xff] }
 0x3fd   : >> { %19529 = vmatprep.subr.bf16.mxu1 %v21029_v0  ;;  %v8195_v31 = vpack.c.bf16 %v15902_v49, %v15901_v11 }
 0x400   : >> { %19537 = vmatpush3.bf16.msra.mxu1 %v21029_v0 }
 0x401   : >> { %19530 = vmatprep.subr.bf16.mxu1 %v21030_v51 }
 0x402   : >> { %18255 = vmatmul.mubr.bf16.gmra.mrb[8].mxu1 %v4186_v39 }
 0x403   : >> { %18847 = vmatmul.mubr.bf16.gmra.mrb[24].mxu0 %v7890_v42  ;;  %18258 = vmatprep.mubr.bf16.mxu1 %v4187_v30  ;;  %v4501_v42 = vpack.c.bf16 %v15222_v7, %v15221_v3  ;;  %v15223_v30 = vld [vmem:[%s22479_s17 + $0x112] sm:$0xff] }
 0x404   : >> { %18850 = vmatprep.mubr.bf16.mxu0 %v7891_v36  ;;  %19538 = vmatpush3.bf16.msra.mxu1 %v21030_v51  ;;  %v15224_v36 = vld [vmem:[%s22479_s17 + $0x11a] sm:$0xff] }
 0x405   : >> { %19531 = vmatprep.subr.bf16.mxu1 %v21031_v48  ;;  %v15907_v51 = vld [vmem:[%s22479_s17 + $0x154] sm:$0xff]  ;;  %v4502_v32 = vpack.c.bf16 %v15224_v36, %v15223_v30 }
 0x406   : >> { %v8198_v8 = vpack.c.bf16 %v15908_v56, %v15907_v51 }
 0x408   : >> { %19539 = vmatpush3.bf16.msra.mxu1 %v21031_v48  ;;  %v15911_v48 = vld [vmem:[%s22479_s17 + $0x174] sm:$0xff] }
 0x409   : >> { %19532 = vmatprep.subr.bf16.mxu1 %v21032_v63 }
 0x40a   : >> { %18259 = vmatmul.mubr.bf16.gmra.mrb[12].mxu1 %v4188_v52  ;;  %v15912_v52 = vld [vmem:[%s22479_s17 + $0x17c] sm:$0xff] }
 0x40b   : >> { %18851 = vmatmul.mubr.bf16.gmra.mrb[28].mxu0 %v7892_v35  ;;  %18262 = vmatprep.mubr.bf16.mxu1 %v4189_v37  ;;  %v8200_v35 = vpack.c.bf16 %v15912_v52, %v15911_v48  ;;  %v8459_v37 = vlaneseq }
 0x40c   : >> { %18870 = vmatprep.mubr.bf16.mxu0 %v23503_v60  ;;  %19540 = vmatpush3.bf16.msra.mxu1 %v21032_v63  ;;  %v15164_v60 = vld [vmem:[%s22479_s17 + $0x101] sm:$0xff] }
 0x40d   : >> { %19533 = vmatprep.subr.bf16.mxu1 %v21033_v21  ;;  %v4193_v54 = vpack.c.bf16 %v15165_v17, %v15164_v60  ;;  %v23750_v63 = vshrl.u32 %v8459_v37, 7 }
 0x40f   : >> { %v8462_v58 = vadd.s32 16, %v23750_v63  ;;  %v8463_v47 = vadd.s32 24, %v23750_v63  ;;  %v8464_v60 = vadd.s32 32, %v23750_v63  ;;  %v8467_v17 = vadd.s32 56, %v23750_v63 }
 0x410   : >> { %19541 = vmatpush3.bf16.msra.mxu1 %v21033_v21  ;;  %v8461_v21 = vadd.s32 8, %v23750_v63  ;;  %v8469_v33 = vadd.s32 72, %v23750_v63  ;;  %v8474_v48 = vadd.s32 112, %v23750_v63  ;;  %v8475_v37 = vadd.s32 120, %v23750_v63 }
 0x411   : >> { %v8495_v61 = vadd.s32 %v23754_v28, %v8462_v58  ;;  %v8483_v1 = vadd.s32 184, %v23750_v63 }
 0x412   : >> { %18263 = vmatmul.mubr.bf16.gmra.mrb[16].mxu1 %v4190_v22  ;;  %v8494_v59 = vadd.s32 %v23754_v28, %v8461_v21 }
 0x413   : >> { %18871 = vmatmul.mubr.bf16.vlgmr.msra.gmra.mrb[0].mxu0 %v23514_v15  ;;  %18266 = vmatprep.mubr.bf16.mxu1 %v4191_v41  ;;  %v15167_v15 = vld [vmem:[%s22479_s17 + $0x119] sm:$0xff]  ;;  %v8559_v22 = vshra.s32 %v8495_v61, 5  ;;  %v8496_v41 = vadd.s32 %v23754_v28, %v8463_v47 }
 0x414   : >> { %18874 = vmatprep.mubr.bf16.mxu0 %v23516_v18  ;;  %v4194_v18 = vpack.c.bf16 %v15167_v15, %v15166_v62  ;;  %v8526_v49 = vand.u32 31, %v8494_v59 }
 0x415   : >> { %v8591_v62 = vand.u32 31, %v8559_v22  ;;  %v8560_v34 = vshra.s32 %v8496_v41, 5 }
 0x41a   : >> { %18267 = vmatmul.mubr.bf16.gmra.mrb[20].mxu1 %v4192_v40 }
 0x41b   : >> { %18875 = vmatmul.mubr.bf16.gmra.mrb[4].mxu0 %v23529_v24  ;;  %18270 = vmatprep.mubr.bf16.mxu1 %v4193_v54  ;;  %v15170_v24 = vld [vmem:[%s22479_s17 + $0x131] sm:$0xff]  ;;  %v8527_v54 = vand.u32 31, %v8495_v61 }
 0x41c   : >> { %18878 = vmatprep.mubr.bf16.mxu0 %v23531_v27  ;;  %v15214_v27 = vld [vmem:[%s22479_s17 + $0xca] sm:$0xff]  ;;  %v4196_v9 = vpack.c.bf16 %v15171_v55, %v15170_v24 }
 0x41d   : >> { %v4497_v12 = vpack.c.bf16 %v15214_v27, %v15213_v45  ;;  %v8558_v45 = vshra.s32 %v8494_v59, 5  ;;  %v8497_v27 = vadd.s32 %v23754_v28, %v8464_v60  ;;  %vm8625_vm0 = vcmp.gt.s32.totalorder %v8527_v54, %v8591_v62 }
 0x41e   : >> { %v23847_v60 = vadd.s32 %v23754_v28, %v8474_v48 }
 0x41f   : >> { %v8529_v51 = vand.u32 31, %v8497_v27 }
 0x422   : >> { %18271 = vmatmul.mubr.bf16.gmra.mrb[24].mxu1 %v4194_v18  ;;  %v8465_v18 = vadd.s32 40, %v23750_v63 }
 0x423   : >> { %18879 = vmatmul.mubr.bf16.gmra.mrb[8].mxu0 %v23545_v57  ;;  %18274 = vmatprep.mubr.bf16.mxu1 %v4195_v4  ;;  %v15215_v57 = vld [vmem:[%s22479_s17 + $0xd2] sm:$0xff] }
 0x424   : >> { %18882 = vmatprep.mubr.bf16.mxu0 %v23547_v6  ;;  %v15218_v6 = vld [vmem:[%s22479_s17 + $0xea] sm:$0xff]  ;;  %v4498_v25 = vpack.c.bf16 %v15216_v23, %v15215_v57  ;;  %v8470_v23 = vadd.s32 80, %v23750_v63  ;;  %v23782_v11 = vadd.s32 %v23754_v28, %v8465_v18 }
 0x425   : >> { %v4499_v16 = vpack.c.bf16 %v15218_v6, %v15217_v50  ;;  %v8528_v50 = vand.u32 31, %v8496_v41  ;;  %v8592_v6 = vand.u32 31, %v8560_v34  ;;  %v23856_v34 = vadd.s32 %v23754_v28, %v8475_v37 }
 0x426   : >> { %v8530_v58 = vand.u32 31, %v23782_v11 }
 0x427   : >> { %vm23800_vm2 = vcmp.gt.s32.totalorder %v8528_v50, %v8592_v6 }
 0x428   : >> { %v23830_v21 = vsel %vm23800_vm2, %v8528_v50, %v8592_v6  ;;  %v8476_v50 = vadd.s32 128, %v23750_v63  ;;  %v8479_v6 = vadd.s32 152, %v23750_v63 }
 0x42a   : >> { %18275 = vmatmul.mubr.bf16.gmra.mrb[28].mxu1 %v4196_v9 }
 0x42b   : >> { %18883 = vmatmul.mubr.bf16.gmra.mrb[12].mxu0 %v23559_v38  ;;  %18310 = vmatprep.mubr.bf16.mxu1 %v4497_v12  ;;  %v15219_v38 = vld [vmem:[%s22479_s17 + $0xf2] sm:$0xff]  ;;  %v23778_v12 = vadd.s32 %v23754_v28, %v8467_v17 }
 0x42c   : >> { %18886 = vmatprep.mubr.bf16.mxu0 %v23561_v29  ;;  %v15903_v29 = vld [vmem:[%s22479_s17 + $0x134] sm:$0xff]  ;;  %v4500_v0 = vpack.c.bf16 %v15220_v19, %v15219_v38  ;;  %v8468_v19 = vadd.s32 64, %v23750_v63 }
 0x42d   : >> { %v8196_v39 = vpack.c.bf16 %v15904_v10, %v15903_v29  ;;  %v8564_v38 = vshra.s32 %v23778_v12, 5  ;;  %v23791_v10 = vstv %s22435_s18 }
 0x42e   : >> { %vm8689_vm12 = vcmp.lt.s32.totalorder %v23830_v21, %v23791_v10 }
 0x432   : >> { %18311 = vmatmul.mubr.bf16.vlgmr.msra.gmra.mrb[16].mxu1 %v4498_v25  ;;  %v8590_v25 = vand.u32 31, %v8558_v45 }
 0x433   : >> { %18887 = vmatmul.mubr.bf16.gmra.mrb[16].mxu0 %v23573_v20  ;;  %18314 = vmatprep.mubr.bf16.mxu1 %v4499_v16  ;;  %v8197_v20 = vpack.c.bf16 %v15906_v26, %v15905_v13  ;;  %v8561_v16 = vshra.s32 %v8497_v27, 5  ;;  %v23794_v13 = vadd.s32 %v23754_v28, %v8470_v23  ;;  %v8478_v23 = vadd.s32 144, %v23750_v63 }
 0x434   : >> { %18890 = vmatprep.mubr.bf16.mxu0 %v8195_v31  ;;  %v23784_v31 = vsel %vm8625_vm0, %v8527_v54, %v8591_v62  ;;  %vm23808_vm3 = vcmp.gt.s32.totalorder %v8526_v49, %v8590_v25 }
 0x435   : >> { %v8593_v56 = vand.u32 31, %v8561_v16  ;;  %v8567_v52 = vshra.s32 %v23794_v13, 5  ;;  %v23834_v22 = vsel %vm23808_vm3, %v8526_v49, %v8590_v25  ;;  %v8535_v54 = vand.u32 31, %v23794_v13 }
 0x436   : >> { %v8571_v16 = vshra.s32 %v23847_v60, 5  ;;  %v8572_v13 = vshra.s32 %v23856_v34, 5  ;;  %vm8688_vm9 = vcmp.lt.s32.totalorder %v23784_v31, %v23791_v10  ;;  %vm8687_vm15 = vcmp.lt.s32.totalorder %v23834_v22, %v23791_v10 }
 0x437   : >> { %vm8629_vm5 = vcmp.gt.s32.totalorder %v8529_v51, %v8593_v56  ;;  %v8599_v62 = vand.u32 31, %v8567_v52 }
 0x439   : >> { %vm23885_vm8 = vcmp.gt.s32.totalorder %v8535_v54, %v8599_v62 }
 0x43a   : >> { %18315 = vmatmul.mubr.bf16.gmra.mrb[20].mxu1 %v4500_v0 }
 0x43b   : >> { %18891 = vmatmul.mubr.bf16.gmra.mrb[20].mxu0 %v8196_v39  ;;  %18318 = vmatprep.mubr.bf16.mxu1 %v4501_v42  ;;  %v8562_v42 = vshra.s32 %v23782_v11, 5 }
 0x43c   : >> { %18894 = vmatprep.mubr.bf16.mxu0 %v8197_v20  ;;  %v8471_v20 = vadd.s32 88, %v23750_v63 }
 0x43d   : >> { %v8594_v61 = vand.u32 31, %v8562_v42 }
 0x43e   : >> { %v23825_v47 = vadd.s32 %v23754_v28, %v8471_v20 }
 0x43f   : >> { %vm23862_vm7 = vcmp.gt.s32.totalorder %v8530_v58, %v8594_v61 }
 0x440   : >> { %v8568_v45 = vshra.s32 %v23825_v47, 5  ;;  %v8536_v39 = vand.u32 31, %v23825_v47  ;;  %v8540_v47 = vand.u32 31, %v23856_v34 }
 0x442   : >> { %18319 = vmatmul.mubr.bf16.gmra.mrb[24].mxu1 %v4502_v32  ;;  %v8532_v32 = vand.u32 31, %v23778_v12  ;;  %v8600_v42 = vand.u32 31, %v8568_v45 }
 0x443   : >> { %18895 = vmatmul.mubr.bf16.gmra.mrb[24].mxu0 %v8198_v8  ;;  %18322 = vmatprep.mubr.bf16.mxu1 %v23588_v44  ;;  %v8493_v44 = vadd.s32 %v23754_v28, %v23750_v63  ;;  %v8596_v8 = vand.u32 31, %v8564_v38  ;;  %v8477_v38 = vadd.s32 136, %v23750_v63 }
 0x444   : >> { %18898 = vmatprep.mubr.bf16.mxu0 %v8199_v43  ;;  %v23817_v43 = vadd.s32 %v23754_v28, %v8468_v19  ;;  %vm23941_vm13 = vcmp.gt.s32.totalorder %v8536_v39, %v8600_v42 }
 0x445   : >> { %v8557_v53 = vshra.s32 %v8493_v44, 5  ;;  %v8525_v24 = vand.u32 31, %v8493_v44  ;;  %v8473_v44 = vadd.s32 104, %v23750_v63  ;;  %vm23841_vm6 = vcmp.gt.s32.totalorder %v8532_v32, %v8596_v8 }
 0x446   : >> { %v8565_v59 = vshra.s32 %v23817_v43, 5  ;;  %v23880_v49 = vsel %vm23841_vm6, %v8532_v32, %v8596_v8  ;;  %v8533_v25 = vand.u32 31, %v23817_v43  ;;  %v23901_v32 = vadd.s32 %v23754_v28, %v8479_v6 }
 0x447   : >> { %v8589_v55 = vand.u32 31, %v8557_v53  ;;  %v23868_v27 = vadd.s32 %v23754_v28, %v8473_v44  ;;  %v8539_v8 = vand.u32 31, %v23847_v60  ;;  %v8603_v43 = vand.u32 31, %v8571_v16 }
 0x448   : >> { %v23906_v52 = vadd.s32 %v23754_v28, %v8477_v38  ;;  %v8604_v44 = vand.u32 31, %v8572_v13  ;;  %v23922_v60 = vsel %vm23885_vm8, %v8535_v54, %v8599_v62 }
 0x449   : >> { %vm8621_vm1 = vcmp.gt.s32.totalorder %v8525_v24, %v8589_v55  ;;  %v8570_v36 = vshra.s32 %v23868_v27, 5  ;;  %vm23953_vm0 = vcmp.gt.s32.totalorder %v8539_v8, %v8603_v43 }
 0x44a   : >> { %18323 = vmatmul.mubr.bf16.gmra.mrb[28].mxu1 %v23604_v46  ;;  %v8466_v46 = vadd.s32 48, %v23750_v63  ;;  %v23798_v0 = vsel %vm8621_vm1, %v8525_v24, %v8589_v55  ;;  %v23860_v24 = vsel %vm8629_vm5, %v8529_v51, %v8593_v56  ;;  %v23895_v56 = vadd.s32 %v23754_v28, %v8478_v23 }
 0x44b   : >> { %18899 = vmatmul.mubr.bf16.gmra.mrb[28].mxu0 %v8200_v35  ;;  %v8472_v35 = vadd.s32 96, %v23750_v63  ;;  %v8602_v45 = vand.u32 31, %v8570_v36  ;;  %vm8686_vm10 = vcmp.lt.s32.totalorder %v23798_v0, %v23791_v10  ;;  %v8574_v23 = vshra.s32 %v23906_v52, 5 }
 0x44c   : >> { %v8499_v15 = vadd.s32 %v23754_v28, %v8466_v46  ;;  %v23837_v46 = vadd.s32 %v23754_v28, %v8469_v33  ;;  %v23898_v33 = vadd.s32 %v23754_v28, %v8476_v50  ;;  %v8575_v55 = vshra.s32 %v23895_v56, 5 }
 0x44d   : >> { %v8480_v50 = vadd.s32 160, %v23750_v63  ;;  %vm23961_vm2 = vcmp.gt.s32.totalorder %v8540_v47, %v8604_v44  ;;  %v8543_v13 = vand.u32 31, %v23895_v56  ;;  %vm8690_vm5 = vcmp.lt.s32.totalorder %v23860_v24, %v23791_v10 }
 0x44e   : >> { %v8563_v57 = vshra.s32 %v8499_v15, 5  ;;  %v8531_v3 = vand.u32 31, %v8499_v15  ;;  %v23853_v15 = vadd.s32 %v23754_v28, %v8472_v35  ;;  %v8534_v20 = vand.u32 31, %v23837_v46 }
 0x44f   : >> { %v8541_v36 = vand.u32 31, %v23898_v33  ;;  %v8607_v2 = vand.u32 31, %v8575_v55  ;;  %v23985_v56 = vadd.s32 %v23754_v28, %v8480_v50  ;;  %v23997_v55 = vsel %vm23953_vm0, %v8539_v8, %v8603_v43 }
 0x450   : >> { %v8595_v7 = vand.u32 31, %v8563_v57  ;;  %v8566_v57 = vshra.s32 %v23837_v46, 5  ;;  %v8537_v48 = vand.u32 31, %v23853_v15  ;;  %v8482_v46 = vadd.s32 176, %v23750_v63 }
 0x451   : >> { %vm24020_vm6 = vcmp.gt.s32.totalorder %v8543_v13, %v8607_v2 }
 0x452   : >> { %vm8633_vm4 = vcmp.gt.s32.totalorder %v8531_v3, %v8595_v7  ;;  %v8598_v51 = vand.u32 31, %v8566_v57  ;;  %v23966_v19 = vadd.s32 %v23754_v28, %v8482_v46  ;;  %v24064_v50 = vsel %vm24020_vm6, %v8543_v13, %v8607_v2 }
 0x453   : >> { %v23839_v41 = vsel %vm8633_vm4, %v8531_v3, %v8595_v7  ;;  %v8597_v3 = vand.u32 31, %v8565_v59  ;;  %v8569_v7 = vshra.s32 %v23853_v15, 5  ;;  %v23918_v59 = vsel %vm23862_vm7, %v8530_v58, %v8594_v61 }
 0x454   : >> { %v8538_v15 = vand.u32 31, %v23868_v27  ;;  %v8573_v58 = vshra.s32 %v23898_v33, 5  ;;  %v8576_v61 = vshra.s32 %v23901_v32, 5  ;;  %vm23945_vm14 = vcmp.gt.s32.totalorder %v8534_v20, %v8598_v51 }
 0x455   : >> { %v8601_v37 = vand.u32 31, %v8569_v7  ;;  %vm23929_vm11 = vcmp.gt.s32.totalorder %v8533_v25, %v8597_v3  ;;  %v23989_v33 = vsel %vm23941_vm13, %v8536_v39, %v8600_v42  ;;  %vm8692_vm4 = vcmp.lt.s32.totalorder %v23839_v41, %v23791_v10 }
 0x456   : >> { %vm23968_vm3 = vcmp.gt.s32.totalorder %v8538_v15, %v8602_v45  ;;  %v23981_v46 = vsel %vm23929_vm11, %v8533_v25, %v8597_v3  ;;  %v8579_v25 = vshra.s32 %v23966_v19, 5  ;;  %v24008_v39 = vsel %vm23961_vm2, %v8540_v47, %v8604_v44 }
 0x457   : >> { %vm23957_vm1 = vcmp.gt.s32.totalorder %v8537_v48, %v8601_v37  ;;  %v24012_v42 = vsel %vm23968_vm3, %v8538_v15, %v8602_v45  ;;  %vm8693_vm11 = vcmp.lt.s32.totalorder %v23880_v49, %v23791_v10  ;;  %v8547_v44 = vand.u32 31, %v23966_v19 }
 0x458   : >> { %v8577_v15 = vshra.s32 %v23985_v56, 5  ;;  %v8486_v27 = vadd.s32 208, %v23750_v63  ;;  %v8545_v2 = vand.u32 31, %v23985_v56  ;;  %vm8700_vm3 = vcmp.lt.s32.totalorder %v23997_v55, %v23791_v10 }
 0x459   : >> { %vm8699_vm6 = vcmp.lt.s32.totalorder %v24012_v42, %v23791_v10 }
 0x45a   : >> { %v8609_v16 = vand.u32 31, %v8577_v15 }
 0x45c   : >> { %vm24105_vm0 = vcmp.gt.s32.totalorder %v8545_v2, %v8609_v16 }
 0x4c5   : >> { %v23766_v40 = vpop.f32.mrb[0].mxu1 }
 0x4c6   : >> { %v23769_v5 = vpop.f32.mrb[1].mxu1 }
 0x4c7   : >> { %v23772_v4 = vpop.f32.mrb[2].mxu1 }
 0x4c8   : >> { %v23775_v9 = vpop.f32.mrb[3].mxu1 }
 0x4cd   : >> { %v23788_v29 = vpop.f32.mrb[4].mxu1 }
 0x4ce   : >> { %v23796_v26 = vpop.f32.mrb[5].mxu1 }
 0x4cf   : >> { %v23806_v30 = vpop.f32.mrb[6].mxu1 }
 0x4d0   : >> { %v23813_v14 = vpop.f32.mrb[7].mxu1 }
 0x4d5   : >> { %v23849_v17 = vpop.f32.mrb[8].mxu1 }
 0x4d6   : >> { %v23858_v18 = vpop.f32.mrb[9].mxu1 }
 0x4d7   : >> { %v23870_v12 = vpop.f32.mrb[10].mxu1 }
 0x4d8   : >> { %v23876_v11 = vpop.f32.mrb[11].mxu1 }
 0x4d9   : >> { %26834 = vst [vmem:[#allocation15_spill] sm:$0xff] %v23876_v11  ;;  %v8606_v11 = vand.u32 31, %v8574_v23 }
 0x4dd   : >> { %v23908_v35 = vpop.f32.mrb[12].mxu1 }
 0x4de   : >> { %26837 = vst [vmem:[#allocation16_spill] sm:$0xff] %v23908_v35  ;;  %v23912_v53 = vpop.f32.mrb[13].mxu1  ;;  %v8542_v35 = vand.u32 31, %v23906_v52  ;;  %v24004_v52 = vsel %vm23957_vm1, %v8537_v48, %v8601_v37  ;;  %v8484_v37 = vadd.s32 192, %v23750_v63 }
 0x4df   : >> { %26838 = vst [vmem:[#allocation17_spill] sm:$0xff] %v23912_v53  ;;  %v23925_v34 = vpop.f32.mrb[14].mxu1  ;;  %v8608_v53 = vand.u32 31, %v8576_v61  ;;  %v8481_v61 = vadd.s32 168, %v23750_v63 }
 0x4e0   : >> { %26839 = vst [vmem:[#allocation18_spill] sm:$0xff] %v23925_v34  ;;  %v23937_v54 = vpop.f32.mrb[15].mxu1  ;;  %v8544_v34 = vand.u32 31, %v23901_v32  ;;  %v23993_v32 = vsel %vm23945_vm14, %v8534_v20, %v8598_v51  ;;  %v24015_v20 = vadd.s32 %v23754_v28, %v8483_v1  ;;  %vm24035_vm13 = vcmp.gt.s32.totalorder %v8542_v35, %v8606_v11 }
 0x4e1   : >> { %26842 = vst [vmem:[#allocation19_spill] sm:$0xff] %v23937_v54  ;;  %v8605_v54 = vand.u32 31, %v8573_v58  ;;  %vm8691_vm14 = vcmp.lt.s32.totalorder %v23918_v59, %v23791_v10  ;;  %v24080_v21 = vsel %vm24035_vm13, %v8542_v35, %v8606_v11  ;;  %v24094_v35 = vadd.s32 %v23754_v28, %v8481_v61 }
 0x4e2   : >> { %vm24028_vm8 = vcmp.gt.s32.totalorder %v8544_v34, %v8608_v53  ;;  %v8580_v62 = vshra.s32 %v24015_v20, 5  ;;  %v8548_v13 = vand.u32 31, %v24015_v20  ;;  %vm8695_vm1 = vcmp.lt.s32.totalorder %v23993_v32, %v23791_v10 }
 0x4e3   : >> { %vm24024_vm7 = vcmp.gt.s32.totalorder %v8541_v36, %v8605_v54  ;;  %v8578_v41 = vshra.s32 %v24094_v35, 5 }
 0x4e4   : >> { %v24068_v0 = vsel %vm24024_vm7, %v8541_v36, %v8605_v54  ;;  %v8612_v11 = vand.u32 31, %v8580_v62  ;;  %v8487_v62 = vadd.s32 216, %v23750_v63 }
 0x4e5   : >> { %vm8702_vm13 = vcmp.lt.s32.totalorder %v24068_v0, %v23791_v10 }
 0x4e6   : >> { %v18872_v3 = vpop.f32.mrb[0].mxu0  ;;  %vm24121_vm2 = vcmp.gt.s32.totalorder %v8548_v13, %v8612_v11 }
 0x4e7   : >> { %v19542_v51 = vadd.f32 %v18872_v3, %v23766_v40  ;;  %v8300_v8 = vpop.f32.mrb[1].mxu0  ;;  %v24151_v19 = vsel %vm24121_vm2, %v8548_v13, %v8612_v11 }
 0x4e8   : >> { %v19543_v1 = vadd.f32 %v8300_v8, %v23769_v5  ;;  %v18873_v40 = vpop.f32.mrb[2].mxu0  ;;  %v8611_v5 = vand.u32 31, %v8579_v25 }
 0x4e9   : >> { %v8720_v45 = vsel %vm8688_vm9, %v19542_v51, 0.0  ;;  %v19544_v57 = vadd.f32 %v18873_v40, %v23772_v4  ;;  %v8303_v58 = vpop.f32.mrb[3].mxu0  ;;  %vm8696_vm9 = vcmp.lt.s32.totalorder %v23922_v60, %v23791_v10 }
 0x4ea   : >> { %15940 = vst [vmem:[%s24049_s24 + $0x98] sm:$0xff] %v8720_v45  ;;  %v8718_v31 = vsel %vm8686_vm10, %v19543_v1, 0.0  ;;  %v19545_v4 = vadd.f32 %v8303_v58, %v23775_v9  ;;  %v24072_v9 = vsel %vm24028_vm8, %v8544_v34, %v8608_v53  ;;  %vm24089_vm10 = vcmp.gt.s32.totalorder %v8547_v44, %v8611_v5 }
 0x4eb   : >> { %15938 = vst [vmem:[%s24049_s24 + $0x88] sm:$0xff] %v8718_v31  ;;  %v8721_v23 = vsel %vm8689_vm12, %v19544_v57, 0.0  ;;  %v8822_v38 = vmul.f32 %v8718_v31, %v8718_v31  ;;  %v24097_v34 = vadd.s32 %v23754_v28, %v8486_v27  ;;  %v8824_v36 = vmul.f32 %v8720_v45, %v8720_v45 }
 0x4ec   : >> { %15941 = vst [vmem:[%s24049_s24 + $0xa0] sm:$0xff] %v8721_v23  ;;  %v8719_v6 = vsel %vm8687_vm15, %v19545_v4, 0.0  ;;  %vm8694_vm12 = vcmp.lt.s32.totalorder %v23981_v46, %v23791_v10  ;;  %v8825_v51 = vmul.f32 %v8721_v23, %v8721_v23  ;;  %vm8697_vm15 = vcmp.lt.s32.totalorder %v23989_v33, %v23791_v10 }
 0x4ed   : >> { %15939 = vst [vmem:[%s24049_s24 + $0x90] sm:$0xff] %v8719_v6  ;;  %v8784_v54 = vadd.f32 %v8719_v6, %v8718_v31  ;;  %v8823_v7 = vmul.f32 %v8719_v6, %v8719_v6  ;;  %v24142_v4 = vsel %vm24105_vm0, %v8545_v2, %v8609_v16  ;;  %v8546_v6 = vand.u32 31, %v24094_v35 }
 0x4ee   : >> { %v18876_v53 = vpop.f32.mrb[4].mxu0  ;;  %v24157_v2 = vadd.s32 %v23754_v28, %v8484_v37  ;;  %vm8704_vm8 = vcmp.lt.s32.totalorder %v24064_v50, %v23791_v10  ;;  %vm8706_vm0 = vcmp.lt.s32.totalorder %v24142_v4, %v23791_v10  ;;  %v8489_v50 = vadd.s32 232, %v23750_v63 }
 0x4ef   : >> { %v8785_v56 = vadd.f32 %v8784_v54, %v8720_v45  ;;  %v8854_v25 = vadd.f32 %v8823_v7, %v8822_v38  ;;  %v19546_v3 = vadd.f32 %v18876_v53, %v23788_v29  ;;  %v8316_v20 = vpop.f32.mrb[5].mxu0 }
 0x4f0   : >> { %v19547_v8 = vadd.f32 %v8316_v20, %v23796_v26  ;;  %v18877_v43 = vpop.f32.mrb[6].mxu0  ;;  %v8581_v60 = vshra.s32 %v24157_v2, 5 }
 0x4f1   : >> { %v8855_v1 = vadd.f32 %v8854_v25, %v8824_v36  ;;  %v8724_v29 = vsel %vm8692_vm4, %v19546_v3, 0.0  ;;  %v8786_v40 = vadd.f32 %v8785_v56, %v8721_v23  ;;  %v19548_v26 = vadd.f32 %v18877_v43, %v23806_v30  ;;  %v8319_v47 = vpop.f32.mrb[7].mxu0 }
 0x4f2   : >> { %15944 = vst [vmem:[%s24049_s24 + $0xb8] sm:$0xff] %v8724_v29  ;;  %v8722_v15 = vsel %vm8690_vm5, %v19547_v8, 0.0  ;;  %v19549_v45 = vadd.f32 %v8319_v47, %v23813_v14  ;;  %v24138_v14 = vsel %vm24089_vm10, %v8547_v44, %v8611_v5  ;;  %v24153_v44 = vand.u32 31, %v8578_v41  ;;  %v26869_v8 = vld [vmem:[#allocation15_spill] sm:$0xff] }
 0x4f3   : >> { %15942 = vst [vmem:[%s24049_s24 + $0xa8] sm:$0xff] %v8722_v15  ;;  %v8787_v30 = vadd.f32 %v8786_v40, %v8722_v15  ;;  %v8826_v58 = vmul.f32 %v8722_v15, %v8722_v15  ;;  %v8856_v61 = vadd.f32 %v8855_v1, %v8825_v51  ;;  %v8725_v31 = vsel %vm8693_vm11, %v19548_v26, 0.0 }
 0x4f4   : >> { %15945 = vst [vmem:[%s24049_s24 + $0xc0] sm:$0xff] %v8725_v31  ;;  %v8723_v24 = vsel %vm8691_vm14, %v19549_v45, 0.0  ;;  %v8583_v5 = vshra.s32 %v24097_v34, 5  ;;  %v8828_v16 = vmul.f32 %v8724_v29, %v8724_v29  ;;  %vm8698_vm4 = vcmp.lt.s32.totalorder %v24004_v52, %v23791_v10 }
 0x4f5   : >> { %v8857_v27 = vadd.f32 %v8856_v61, %v8826_v58  ;;  %15943 = vst [vmem:[%s24049_s24 + $0xb0] sm:$0xff] %v8723_v24  ;;  %v8788_v49 = vadd.f32 %v8787_v30, %v8723_v24  ;;  %v8827_v23 = vmul.f32 %v8723_v24, %v8723_v24  ;;  %v8829_v22 = vmul.f32 %v8725_v31, %v8725_v31 }
 0x4f6   : >> { %v18880_v59 = vpop.f32.mrb[8].mxu0  ;;  %vm8701_vm5 = vcmp.lt.s32.totalorder %v24008_v39, %v23791_v10  ;;  %v8551_v36 = vand.u32 31, %v24097_v34  ;;  %v24167_v56 = vadd.s32 %v23754_v28, %v8487_v62  ;;  %v8615_v48 = vand.u32 31, %v8583_v5  ;;  %v26875_v5 = vld [vmem:[#allocation17_spill] sm:$0xff] }
 0x4f7   : >> { %v8789_v38 = vadd.f32 %v8788_v49, %v8724_v29  ;;  %v8858_v54 = vadd.f32 %v8857_v27, %v8827_v23  ;;  %v19550_v7 = vadd.f32 %v18880_v59, %v23849_v17  ;;  %v8332_v53 = vpop.f32.mrb[9].mxu0  ;;  %v8549_v40 = vand.u32 31, %v24157_v2  ;;  %v26874_v27 = vld [vmem:[#allocation16_spill] sm:$0xff] }
 0x4f8   : >> { %v19551_v13 = vadd.f32 %v8332_v53, %v23858_v18  ;;  %v18881_v11 = vpop.f32.mrb[10].mxu0  ;;  %v8584_v26 = vshra.s32 %v24167_v56, 5  ;;  %v8485_v47 = vadd.s32 200, %v23750_v63  ;;  %vm24196_vm7 = vcmp.gt.s32.totalorder %v8546_v6, %v24153_v44 }
 0x4f9   : >> { %v8859_v25 = vadd.f32 %v8858_v54, %v8828_v16  ;;  %v8728_v17 = vsel %vm8696_vm9, %v19550_v7, 0.0  ;;  %v8790_v3 = vadd.f32 %v8789_v38, %v8725_v31  ;;  %v19552_v20 = vadd.f32 %v18881_v11, %v23870_v12  ;;  %v8335_v18 = vpop.f32.mrb[11].mxu0 }
 0x4fa   : >> { %15948 = vst [vmem:[%s24049_s24 + $0xd8] sm:$0xff] %v8728_v17  ;;  %v8726_v51 = vsel %vm8694_vm12, %v19551_v13, 0.0  ;;  %v19553_v43 = vadd.f32 %v8335_v18, %v26869_v8  ;;  %vm24204_vm11 = vcmp.gt.s32.totalorder %v8551_v36, %v8615_v48  ;;  %v8613_v30 = vand.u32 31, %v8581_v60  ;;  %v26876_v13 = vld [vmem:[#allocation18_spill] sm:$0xff] }
 0x4fb   : >> { %15946 = vst [vmem:[%s24049_s24 + $0xc8] sm:$0xff] %v8726_v51  ;;  %v8791_v37 = vadd.f32 %v8790_v3, %v8726_v51  ;;  %v8830_v1 = vmul.f32 %v8726_v51, %v8726_v51  ;;  %v8860_v29 = vadd.f32 %v8859_v25, %v8829_v22  ;;  %v8729_v12 = vsel %vm8697_vm15, %v19552_v20, 0.0  ;;  %v26877_v3 = vld [vmem:[#allocation19_spill] sm:$0xff] }
 0x4fc   : >> { %15949 = vst [vmem:[%s24049_s24 + $0xe0] sm:$0xff] %v8729_v12  ;;  %v8727_v46 = vsel %vm8695_vm1, %v19553_v43, 0.0  ;;  %v8552_v58 = vand.u32 31, %v24167_v56  ;;  %v8490_v61 = vadd.s32 240, %v23750_v63  ;;  %v8832_v31 = vmul.f32 %v8728_v17, %v8728_v17 }
 0x4fd   : >> { %v8861_v15 = vadd.f32 %v8860_v29, %v8830_v1  ;;  %15947 = vst [vmem:[%s24049_s24 + $0xd0] sm:$0xff] %v8727_v46  ;;  %v8792_v45 = vadd.f32 %v8791_v37, %v8727_v46  ;;  %v8831_v57 = vmul.f32 %v8727_v46, %v8727_v46  ;;  %v8833_v59 = vmul.f32 %v8729_v12, %v8729_v12 }
 0x4fe   : >> { %v18884_v41 = vpop.f32.mrb[12].mxu0  ;;  %vm8705_vm14 = vcmp.lt.s32.totalorder %v24072_v9, %v23791_v10  ;;  %v24216_v38 = vand.u32 31, %v8584_v26  ;;  %v24219_v54 = vadd.s32 %v23754_v28, %v8485_v47  ;;  %vm8703_vm9 = vcmp.lt.s32.totalorder %v24080_v21, %v23791_v10 }
 0x4ff   : >> { %v8793_v24 = vadd.f32 %v8792_v45, %v8728_v17  ;;  %v8862_v62 = vadd.f32 %v8861_v15, %v8831_v57  ;;  %v19554_v49 = vadd.f32 %v18884_v41, %v26874_v27  ;;  %v8348_v23 = vpop.f32.mrb[13].mxu0  ;;  %vm24232_vm10 = vcmp.gt.s32.totalorder %v8549_v40, %v8613_v30 }
 0x500   : >> { %v19555_v2 = vadd.f32 %v8348_v23, %v26875_v5  ;;  %v18885_v16 = vpop.f32.mrb[14].mxu0  ;;  %v24237_v55 = vadd.s32 %v23754_v28, %v8490_v61  ;;  %v24252_v37 = vsel %vm24196_vm7, %v8546_v6, %v24153_v44  ;;  %v24258_v1 = vsel %vm24204_vm11, %v8551_v36, %v8615_v48 }
 0x501   : >> { %v8863_v7 = vadd.f32 %v8862_v62, %v8832_v31  ;;  %v8732_v53 = vsel %vm8700_vm3, %v19554_v49, 0.0  ;;  %v8794_v22 = vadd.f32 %v8793_v24, %v8729_v12  ;;  %v19556_v11 = vadd.f32 %v18885_v16, %v26876_v13  ;;  %v8351_v25 = vpop.f32.mrb[15].mxu0 }
 0x502   : >> { %15952 = vst [vmem:[%s24049_s24 + $0xf8] sm:$0xff] %v8732_v53  ;;  %v8730_v17 = vsel %vm8698_vm4, %v19555_v2, 0.0  ;;  %v19557_v20 = vadd.f32 %v8351_v25, %v26877_v3  ;;  %v8582_v39 = vshra.s32 %v24219_v54, 5  ;;  %v8488_v26 = vadd.s32 224, %v23750_v63 }
 0x503   : >> { %15950 = vst [vmem:[%s24049_s24 + $0xe8] sm:$0xff] %v8730_v17  ;;  %v8795_v51 = vadd.f32 %v8794_v22, %v8730_v17  ;;  %v8834_v8 = vmul.f32 %v8730_v17, %v8730_v17  ;;  %v8864_v43 = vadd.f32 %v8863_v7, %v8833_v59  ;;  %v8733_v60 = vsel %vm8701_vm5, %v19556_v11, 0.0 }
 0x504   : >> { %15953 = vst [vmem:[%s24049_s24 + $0x100] sm:$0xff] %v8733_v60  ;;  %v8731_v52 = vsel %vm8699_vm6, %v19557_v20, 0.0  ;;  %vm8708_vm12 = vcmp.lt.s32.totalorder %v24138_v14, %v23791_v10  ;;  %v24267_v34 = vsel %vm24232_vm10, %v8549_v40, %v8613_v30  ;;  %vm24272_vm15 = vcmp.gt.s32.totalorder %v8552_v58, %v24216_v38 }
 0x505   : >> { %v8865_v29 = vadd.f32 %v8864_v43, %v8834_v8  ;;  %15951 = vst [vmem:[%s24049_s24 + $0xf0] sm:$0xff] %v8731_v52  ;;  %v8796_v12 = vadd.f32 %v8795_v51, %v8731_v52  ;;  %v8835_v42 = vmul.f32 %v8731_v52, %v8731_v52  ;;  %v18312_v46 = vpop.f32.mrb[16].mxu1  ;;  %v8550_v44 = vand.u32 31, %v24219_v54 }
 0x506   : >> { %v18888_v35 = vpop.f32.mrb[16].mxu0  ;;  %v4668_v47 = vpop.f32.mrb[17].mxu1  ;;  %v8587_v36 = vshra.s32 %v24237_v55, 5  ;;  %v8836_v48 = vmul.f32 %v8732_v53, %v8732_v53  ;;  %v8837_v40 = vmul.f32 %v8733_v60, %v8733_v60  ;;  %vm8709_vm1 = vcmp.lt.s32.totalorder %v24151_v19, %v23791_v10 }
 0x507   : >> { %v8797_v15 = vadd.f32 %v8796_v12, %v8732_v53  ;;  %v8866_v45 = vadd.f32 %v8865_v29, %v8835_v42  ;;  %v19558_v57 = vadd.f32 %v18888_v35, %v18312_v46  ;;  %v8364_v33 = vpop.f32.mrb[17].mxu0  ;;  %v18313_v41 = vpop.f32.mrb[18].mxu1  ;;  %v8614_v31 = vand.u32 31, %v8582_v39 }
 0x508   : >> { %v19559_v32 = vadd.f32 %v8364_v33, %v4668_v47  ;;  %v18889_v30 = vpop.f32.mrb[18].mxu0  ;;  %v4671_v61 = vpop.f32.mrb[19].mxu1  ;;  %v8491_v24 = vadd.s32 248, %v23750_v63  ;;  %vm8707_vm2 = vcmp.lt.s32.totalorder %v24252_v37, %v23791_v10  ;;  %v24293_v16 = vadd.s32 %v23754_v28, %v8488_v26 }
 0x509   : >> { %v8867_v62 = vadd.f32 %v8866_v45, %v8836_v48  ;;  %v8736_v27 = vsel %vm8704_vm8, %v19558_v57, 0.0  ;;  %v8798_v49 = vadd.f32 %v8797_v15, %v8733_v60  ;;  %v19560_v23 = vadd.f32 %v18889_v30, %v18313_v41  ;;  %v8367_v59 = vpop.f32.mrb[19].mxu0 }
 0x50a   : >> { %15956 = vst [vmem:[%s24049_s24 + $0x118] sm:$0xff] %v8736_v27  ;;  %v8734_v5 = vsel %vm8702_vm13, %v19559_v32, 0.0  ;;  %v19561_v2 = vadd.f32 %v8367_v59, %v4671_v61  ;;  %v24309_v13 = vsel %vm24272_vm15, %v8552_v58, %v24216_v38  ;;  %v8555_v63 = vand.u32 31, %v24237_v55 }
 0x50b   : >> { %15954 = vst [vmem:[%s24049_s24 + $0x108] sm:$0xff] %v8734_v5  ;;  %v8799_v54 = vadd.f32 %v8798_v49, %v8734_v5  ;;  %v8838_v7 = vmul.f32 %v8734_v5, %v8734_v5  ;;  %v8868_v53 = vadd.f32 %v8867_v62, %v8837_v40  ;;  %v8737_v22 = vsel %vm8705_vm14, %v19560_v23, 0.0 }
 0x50c   : >> { %15957 = vst [vmem:[%s24049_s24 + $0x120] sm:$0xff] %v8737_v22  ;;  %v8735_v0 = vsel %vm8703_vm9, %v19561_v2, 0.0  ;;  %v24313_v11 = vadd.s32 %v23754_v28, %v8491_v24  ;;  %vm24316_vm3 = vcmp.gt.s32.totalorder %v8550_v44, %v8614_v31  ;;  %vm8712_vm4 = vcmp.lt.s32.totalorder %v24258_v1, %v23791_v10 }
 0x50d   : >> { %v8869_v25 = vadd.f32 %v8868_v53, %v8838_v7  ;;  %15955 = vst [vmem:[%s24049_s24 + $0x110] sm:$0xff] %v8735_v0  ;;  %v8800_v9 = vadd.f32 %v8799_v54, %v8735_v0  ;;  %v8839_v17 = vmul.f32 %v8735_v0, %v8735_v0  ;;  %v18316_v3 = vpop.f32.mrb[20].mxu1  ;;  %v8619_v58 = vand.u32 31, %v8587_v36 }
 0x50e   : >> { %v18892_v20 = vpop.f32.mrb[20].mxu0  ;;  %v4684_v56 = vpop.f32.mrb[21].mxu1  ;;  %v8553_v38 = vand.u32 31, %v24293_v16  ;;  %v8585_v18 = vshra.s32 %v24293_v16, 5  ;;  %v24325_v51 = vadd.s32 %v23754_v28, %v8489_v50  ;;  %v8840_v8 = vmul.f32 %v8736_v27, %v8736_v27 }
 0x50f   : >> { %v8801_v43 = vadd.f32 %v8800_v9, %v8736_v27  ;;  %v8870_v60 = vadd.f32 %v8869_v25, %v8839_v17  ;;  %v19562_v52 = vadd.f32 %v18892_v20, %v18316_v3  ;;  %v8380_v39 = vpop.f32.mrb[21].mxu0  ;;  %v18317_v29 = vpop.f32.mrb[22].mxu1  ;;  %vm8710_vm5 = vcmp.lt.s32.totalorder %v24267_v34, %v23791_v10 }
 0x510   : >> { %v8841_v12 = vmul.f32 %v8737_v22, %v8737_v22  ;;  %v19563_v42 = vadd.f32 %v8380_v39, %v4684_v56  ;;  %v18893_v46 = vpop.f32.mrb[22].mxu0  ;;  %v4687_v26 = vpop.f32.mrb[23].mxu1  ;;  %v24331_v35 = vsel %vm24316_vm3, %v8550_v44, %v8614_v31  ;;  %v8588_v28 = vshra.s32 %v24313_v11, 5 }
 0x511   : >> { %v8871_v47 = vadd.f32 %v8870_v60, %v8840_v8  ;;  %v8740_v6 = vsel %vm8708_vm12, %v19562_v52, 0.0  ;;  %v8802_v36 = vadd.f32 %v8801_v43, %v8737_v22  ;;  %v19564_v48 = vadd.f32 %v18893_v46, %v18317_v29  ;;  %v8383_v15 = vpop.f32.mrb[23].mxu0 }
 0x512   : >> { %15960 = vst [vmem:[%s24049_s24 + $0x138] sm:$0xff] %v8740_v6  ;;  %v8738_v45 = vsel %vm8706_vm0, %v19563_v42, 0.0  ;;  %v19565_v57 = vadd.f32 %v8383_v15, %v4687_v26  ;;  %v8617_v44 = vand.u32 31, %v8585_v18  ;;  %v8586_v33 = vshra.s32 %v24325_v51, 5 }
 0x513   : >> { %15958 = vst [vmem:[%s24049_s24 + $0x128] sm:$0xff] %v8738_v45  ;;  %v8803_v41 = vadd.f32 %v8802_v36, %v8738_v45  ;;  %v8842_v40 = vmul.f32 %v8738_v45, %v8738_v45  ;;  %v8872_v32 = vadd.f32 %v8871_v47, %v8841_v12  ;;  %v8741_v14 = vsel %vm8709_vm1, %v19564_v48, 0.0 }
 0x514   : >> { %15961 = vst [vmem:[%s24049_s24 + $0x140] sm:$0xff] %v8741_v14  ;;  %v8739_v30 = vsel %vm8707_vm2, %v19565_v57, 0.0  ;;  %vm8713_vm6 = vcmp.lt.s32.totalorder %v24309_v13, %v23791_v10  ;;  %v8556_v4 = vand.u32 31, %v24313_v11  ;;  %v8620_v61 = vand.u32 31, %v8588_v28 }
 0x515   : >> { %v8873_v31 = vadd.f32 %v8872_v32, %v8842_v40  ;;  %15959 = vst [vmem:[%s24049_s24 + $0x130] sm:$0xff] %v8739_v30  ;;  %v8804_v24 = vadd.f32 %v8803_v41, %v8739_v30  ;;  %v8843_v62 = vmul.f32 %v8739_v30, %v8739_v30  ;;  %v18320_v27 = vpop.f32.mrb[24].mxu1  ;;  %vm24356_vm7 = vcmp.gt.s32.totalorder %v8555_v63, %v8619_v58 }
 0x516   : >> { %v18896_v49 = vpop.f32.mrb[24].mxu0  ;;  %v4700_v37 = vpop.f32.mrb[25].mxu1  ;;  %vm8711_vm8 = vcmp.lt.s32.totalorder %v24331_v35, %v23791_v10  ;;  %vm24364_vm11 = vcmp.gt.s32.totalorder %v8553_v38, %v8617_v44  ;;  %v8554_v59 = vand.u32 31, %v24325_v51  ;;  %v8618_v5 = vand.u32 31, %v8586_v33 }
 0x517   : >> { %v8844_v2 = vmul.f32 %v8740_v6, %v8740_v6  ;;  %v8805_v50 = vadd.f32 %v8804_v24, %v8740_v6  ;;  %v8874_v54 = vadd.f32 %v8873_v31, %v8843_v62  ;;  %v19566_v7 = vadd.f32 %v18896_v49, %v18320_v27  ;;  %v8396_v53 = vpop.f32.mrb[25].mxu0  ;;  %v18321_v22 = vpop.f32.mrb[26].mxu1 }
 0x518   : >> { %v8845_v0 = vmul.f32 %v8741_v14, %v8741_v14  ;;  %v19567_v11 = vadd.f32 %v8396_v53, %v4700_v37  ;;  %v18897_v25 = vpop.f32.mrb[26].mxu0  ;;  %v4703_v9 = vpop.f32.mrb[27].mxu1  ;;  %v8682_v17 = vsel %vm24356_vm7, %v8555_v63, %v8619_v58  ;;  %vm24373_vm13 = vcmp.gt.s32.totalorder %v8556_v4, %v8620_v61 }
 0x519   : >> { %v8875_v21 = vadd.f32 %v8874_v54, %v8844_v2  ;;  %v8744_v20 = vsel %vm8712_vm4, %v19566_v7, 0.0  ;;  %v8806_v56 = vadd.f32 %v8805_v50, %v8741_v14  ;;  %v19568_v18 = vadd.f32 %v18897_v25, %v18321_v22  ;;  %v8399_v51 = vpop.f32.mrb[27].mxu0 }
 0x51a   : >> { %15964 = vst [vmem:[%s24049_s24 + $0x158] sm:$0xff] %v8744_v20  ;;  %v8742_v55 = vsel %vm8710_vm5, %v19567_v11, 0.0  ;;  %v19569_v63 = vadd.f32 %v8399_v51, %v4703_v9  ;;  %v8678_v58 = vsel %vm24364_vm11, %v8553_v38, %v8617_v44  ;;  %vm8679_vm14 = vcmp.gt.s32.totalorder %v8554_v59, %v8618_v5 }
 0x51b   : >> { %15962 = vst [vmem:[%s24049_s24 + $0x148] sm:$0xff] %v8742_v55  ;;  %v8807_v8 = vadd.f32 %v8806_v56, %v8742_v55  ;;  %v8846_v1 = vmul.f32 %v8742_v55, %v8742_v55  ;;  %v8876_v43 = vadd.f32 %v8875_v21, %v8845_v0  ;;  %v8745_v60 = vsel %vm8713_vm6, %v19568_v18, 0.0  ;;  %v26890_v21 = vld [vmem:[#allocation14_spill] sm:$0xff]  ;;  %v26891_v18 = vld [vmem:[#allocation13_spill] sm:$0xff] }
 0x51c   : >> { %15965 = vst [vmem:[%s24049_s24 + $0x160] sm:$0xff] %v8745_v60  ;;  %v8743_v34 = vsel %vm8711_vm8, %v19569_v63, 0.0  ;;  %v8684_v16 = vsel %vm24373_vm13, %v8556_v4, %v8620_v61  ;;  %v8680_v12 = vsel %vm8679_vm14, %v8554_v59, %v8618_v5  ;;  %vm8716_vm9 = vcmp.lt.s32.totalorder %v8682_v17, %v23791_v10 }
 0x51d   : >> { %v8877_v52 = vadd.f32 %v8876_v43, %v8846_v1  ;;  %15963 = vst [vmem:[%s24049_s24 + $0x150] sm:$0xff] %v8743_v34  ;;  %v8808_v38 = vadd.f32 %v8807_v8, %v8743_v34  ;;  %v8847_v39 = vmul.f32 %v8743_v34, %v8743_v34  ;;  %v18324_v29 = vpop.f32.mrb[28].mxu1  ;;  %vm8714_vm10 = vcmp.lt.s32.totalorder %v8678_v58, %v23791_v10 }
 0x51e   : >> { %v18900_v42 = vpop.f32.mrb[28].mxu0  ;;  %v4716_v46 = vpop.f32.mrb[29].mxu1  ;;  %v8848_v13 = vmul.f32 %v8744_v20, %v8744_v20  ;;  %v8849_v36 = vmul.f32 %v8745_v60, %v8745_v60  ;;  %vm8717_vm12 = vcmp.lt.s32.totalorder %v8684_v16, %v23791_v10  ;;  %vm8715_vm15 = vcmp.lt.s32.totalorder %v8680_v12, %v23791_v10 }
 0x51f   : >> { %v8809_v26 = vadd.f32 %v8808_v38, %v8744_v20  ;;  %v8878_v35 = vadd.f32 %v8877_v52, %v8847_v39  ;;  %v19570_v28 = vadd.f32 %v18900_v42, %v18324_v29  ;;  %v8412_v47 = vpop.f32.mrb[29].mxu0  ;;  %v18325_v6 = vpop.f32.mrb[30].mxu1 }
 0x520   : >> { %v19571_v48 = vadd.f32 %v8412_v47, %v4716_v46  ;;  %v18901_v15 = vpop.f32.mrb[30].mxu0  ;;  %v4719_v45 = vpop.f32.mrb[31].mxu1 }
 0x521   : >> { %v8879_v57 = vadd.f32 %v8878_v35, %v8848_v13  ;;  %v8748_v44 = vsel %vm8716_vm9, %v19570_v28, 0.0  ;;  %v8810_v33 = vadd.f32 %v8809_v26, %v8745_v60  ;;  %v19572_v41 = vadd.f32 %v18901_v15, %v18325_v6  ;;  %v8415_v40 = vpop.f32.mrb[31].mxu0 }
 0x522   : >> { %15968 = vst [vmem:[%s24049_s24 + $0x178] sm:$0xff] %v8748_v44  ;;  %v8746_v32 = vsel %vm8714_vm10, %v19571_v48, 0.0  ;;  %v19573_v14 = vadd.f32 %v8415_v40, %v4719_v45  ;;  %v8852_v49 = vmul.f32 %v8748_v44, %v8748_v44 }
 0x523   : >> { %15966 = vst [vmem:[%s24049_s24 + $0x168] sm:$0xff] %v8746_v32  ;;  %v8811_v30 = vadd.f32 %v8810_v33, %v8746_v32  ;;  %v8850_v4 = vmul.f32 %v8746_v32, %v8746_v32  ;;  %v8880_v61 = vadd.f32 %v8879_v57, %v8849_v36  ;;  %v8749_v31 = vsel %vm8717_vm12, %v19572_v41, 0.0 }
 0x524   : >> { %15969 = vst [vmem:[%s24049_s24 + $0x180] sm:$0xff] %v8749_v31  ;;  %v8747_v24 = vsel %vm8715_vm15, %v19573_v14, 0.0  ;;  %v8853_v59 = vmul.f32 %v8749_v31, %v8749_v31 }
 0x525   : >> { %v8881_v62 = vadd.f32 %v8880_v61, %v8850_v4  ;;  %15967 = vst [vmem:[%s24049_s24 + $0x170] sm:$0xff] %v8747_v24  ;;  %v8812_v27 = vadd.f32 %v8811_v30, %v8747_v24  ;;  %v8851_v19 = vmul.f32 %v8747_v24, %v8747_v24 }
 0x527   : >> { %v8813_v37 = vadd.f32 %v8812_v27, %v8748_v44  ;;  %v8882_v23 = vadd.f32 %v8881_v62, %v8851_v19 }
 0x529   : >> { %v8814_v5 = vadd.f32 %v8813_v37, %v8749_v31  ;;  %v8883_v2 = vadd.f32 %v8882_v23, %v8852_v49 }
 0x52b   : >> { %v8815_v10 = vrot.slane %v8814_v5, 4  ;;  %v8884_v50 = vadd.f32 %v8883_v2, %v8853_v59 }
 0x52d   : >> { %v8816_v54 = vadd.f32 %v8815_v10, %v8814_v5  ;;  %v8885_v7 = vrot.slane %v8884_v50, 4 }
 0x52f   : >> { %v8817_v53 = vrot.slane %v8816_v54, 2  ;;  %v8886_v22 = vadd.f32 %v8885_v7, %v8884_v50 }
 0x531   : >> { %v8818_v0 = vadd.f32 %v8817_v53, %v8816_v54  ;;  %v8887_v11 = vrot.slane %v8886_v22, 2 }
 0x533   : >> { %v8819_v25 = vrot.slane %v8818_v0, 1  ;;  %v8888_v9 = vadd.f32 %v8887_v11, %v8886_v22 }
 0x535   : >> { %v8820_v17 = vadd.f32 %v8819_v25, %v8818_v0  ;;  %v8889_v3 = vrot.slane %v8888_v9, 1  ;;  %819 = sbr.rel (!%p817_p7) target bundleno = 273 (0x111), region = 207 }
 0x537   : >> { %v8821_v20 = vadd.f32 %v26890_v21, %v8820_v17   ;;  %v8890_v56 = vadd.f32 %v8889_v3, %v8888_v9 }
 0x539   : >> { %v8891_v51 = vadd.f32 %v26891_v18, %v8890_v56   ;;  %v26893_v2 = vmov %v8821_v20  ;;  %8892 = vst [vmem:[#allocation3] sm:$0x1] (%p817_p7), %v8821_v20 }
 0x53b   : >> { %v26892_v1 = vmov %v8891_v51  ;;  %8893 = vst [vmem:[#allocation3 + $0x1] sm:$0x1] (%p817_p7), %v8891_v51 }
 0x53c PF: > { %p15970_p8 = scmp.ne.s32.totalorder %s22432_s16, 3 }
 0x53d   : > { %v24421_v55 = vmov (!%p15970_p8), 0.0   ;;  %v24423_v63 = vmov (!%p15970_p8), 0.0   ;;  %s24425_s25 = smov (!%p15970_p8), 0  }
 0x53e   : > { %8897 = sbr.rel (%p15970_p8) target bundleno = 1904 (0x770), region = 59 }
 0x545 LB: >> { %26894 = vst [vmem:[#allocation20_spill] sm:$0xff] %v21382_v55  ;;  %26895 = vst [vmem:[#allocation21_spill] sm:$0xff] %v21386_v63  ;;  %v21034_v58 = vld [vmem:[%s21574_s9 + $0x40] sm:$0xff]   ;;  %v21036_v1 = vld [vmem:[%s21574_s9 + $0x48] sm:$0xff]   ;;  %s24443_s5 = sshll.u32 %s21390_s25, 8  ;;  %s14441_s30 = smul.u32 2320, %s22443_s10  ;;  %s21390_s25 = sphi %s24425_s25, %s8903_s25   ;;  %v21386_v63 = vphi %v24423_v63, %v26963_v63   ;;  %v21382_v55 = vphi %v24421_v55, %v26962_v55  }
 0x546   : >> { %v21035_v8 = vld [vmem:[%s21574_s9 + $0x180] sm:$0xff]   ;;  %18902 = vmatprep.subr.bf16.mxu1 %v21034_v58  ;;  %v21037_v43 = vld [vmem:[%s21574_s9 + $0x188] sm:$0xff]   ;;  %v21038_v60 = vld [vmem:[%s21574_s9 + $0x50] sm:$0xff]   ;;  %s8907_s12 = sadd.s32 %s24443_s5, %s22445_s28  ;;  %s8903_s25 = sadd.s32 1, %s21390_s25  }
 0x547   : >> { %19094 = vmatprep.subr.bf16.mxu0 %v21035_v8  ;;  %18903 = vmatpush3.bf16.msra.mxu1 %v21034_v58  ;;  %v21039_v34 = vld [vmem:[%s21574_s9 + $0x190] sm:$0xff]   ;;  %v21040_v16 = vld [vmem:[%s21574_s9 + $0x58] sm:$0xff]   ;;  %v21042_v38 = vld [vmem:[%s21574_s9 + $0x60] sm:$0xff]   ;;  %s24452_s7 = scalar_lea.vmem [#allocation2], %s8907_s12  ;;  %s25116_s11 = sadd.s32 %s24443_s5, %s14441_s30 }
 0x548   : >> { %19095 = vmatpush3.bf16.msra.mxu0 %v21035_v8  ;;  %18904 = vmatprep.subr.bf16.mxu1 %v21036_v1  ;;  %v21041_v52 = vld [vmem:[%s21574_s9 + $0x198] sm:$0xff]   ;;  %v21043_v39 = vld [vmem:[%s21574_s9 + $0x1a0] sm:$0xff]   ;;  %v21044_v29 = vld [vmem:[%s21574_s9 + $0x68] sm:$0xff]   ;;  %s25188_s6 = scalar_lea.vmem [#allocation2], %s25116_s11  ;;  %p8900_p11 = scmp.ge.s32.totalorder %s8903_s25, 8  }
 0x549   : >> { %19096 = vmatprep.subr.bf16.mxu0 %v21037_v43  ;;  %v15973_v12 = vld [vmem:[%s24452_s7 + $0x1] sm:$0xff]  ;;  %v15974_v42 = vld [vmem:[%s24452_s7 + $0x9] sm:$0xff]  ;;  %v21046_v47 = vld [vmem:[%s21574_s9 + $0x70] sm:$0xff]  }
 0x54a   : >> { %v16152_v46 = vld [vmem:[%s24452_s7 + $0x21] sm:$0xff]  ;;  %v21045_v13 = vld [vmem:[%s21574_s9 + $0x1a8] sm:$0xff]   ;;  %v9007_v26 = vpack.c.bf16 %v15974_v42, %v15973_v12  ;;  %v21047_v6 = vld [vmem:[%s21574_s9 + $0x1b0] sm:$0xff]  }
 0x54b   : >> { %18905 = vmatpush3.bf16.msra.mxu1 %v21036_v1  ;;  %v16153_v35 = vld [vmem:[%s24452_s7 + $0x29] sm:$0xff]  ;;  %v21048_v36 = vld [vmem:[%s21574_s9 + $0x78] sm:$0xff]   ;;  %v15975_v15 = vld [vmem:[%s24452_s7 + $0x11] sm:$0xff] }
 0x54c   : >> { %19097 = vmatpush3.bf16.msra.mxu0 %v21037_v43  ;;  %18906 = vmatprep.subr.bf16.mxu1 %v21038_v60  ;;  %v10108_v28 = vpack.c.bf16 %v16153_v35, %v16152_v46  ;;  %v21049_v48 = vld [vmem:[%s21574_s9 + $0x1b8] sm:$0xff]   ;;  %v21050_v57 = vld [vmem:[%s21574_s9] sm:$0xff]   ;;  %v16154_v44 = vld [vmem:[%s24452_s7 + $0x31] sm:$0xff] }
 0x54d   : >> { %19098 = vmatprep.subr.bf16.mxu0 %v21039_v34  ;;  %18918 = vmatprep.mubr.bf16.mxu1 %v9007_v26  ;;  %v15976_v45 = vld [vmem:[%s24452_s7 + $0x19] sm:$0xff]  ;;  %v21051_v41 = vld [vmem:[%s21574_s9 + $0x1c0] sm:$0xff]   ;;  %v21052_v4 = vld [vmem:[%s21574_s9 + $0x1c8] sm:$0xff]  }
 0x54e   : >> { %19110 = vmatprep.mubr.bf16.mxu0 %v10108_v28  ;;  %v16155_v33 = vld [vmem:[%s24452_s7 + $0x39] sm:$0xff]  ;;  %v9008_v40 = vpack.c.bf16 %v15976_v45, %v15975_v15  ;;  %v16156_v32 = vld [vmem:[%s24452_s7 + $0x41] sm:$0xff]  ;;  %v16157_v14 = vld [vmem:[%s24452_s7 + $0x49] sm:$0xff] }
 0x54f   : >> { %18907 = vmatpush3.bf16.msra.mxu1 %v21038_v60  ;;  %v10109_v30 = vpack.c.bf16 %v16155_v33, %v16154_v44  ;;  %v24472_v61 = vpack.c.bf16 %v16157_v14, %v16156_v32  ;;  %v21053_v31 = vld [vmem:[%s21574_s9 + $0x8] sm:$0xff]   ;;  %v16159_v62 = vld [vmem:[%s24452_s7 + $0x59] sm:$0xff]  ;;  %v16160_v19 = vld [vmem:[%s24452_s7 + $0x61] sm:$0xff] }
 0x550   : >> { %19099 = vmatpush3.bf16.msra.mxu0 %v21039_v34  ;;  %18908 = vmatprep.subr.bf16.mxu1 %v21040_v16  ;;  %v16158_v24 = vld [vmem:[%s24452_s7 + $0x51] sm:$0xff]  ;;  %v16161_v37 = vld [vmem:[%s24452_s7 + $0x69] sm:$0xff]  ;;  %v21055_v5 = vld [vmem:[%s21574_s9 + $0x1d8] sm:$0xff]  }
 0x551   : >> { %19100 = vmatprep.subr.bf16.mxu0 %v21041_v52  ;;  %v21054_v27 = vld [vmem:[%s21574_s9 + $0x1d0] sm:$0xff]   ;;  %v24482_v23 = vpack.c.bf16 %v16159_v62, %v16158_v24  ;;  %v24484_v59 = vpack.c.bf16 %v16161_v37, %v16160_v19  ;;  %v21059_v2 = vld [vmem:[%s21574_s9 + $0x18] sm:$0xff]   ;;  %v21057_v54 = vld [vmem:[%s21574_s9 + $0x1e0] sm:$0xff]  }
 0x552   : >> { %v21056_v49 = vld [vmem:[%s21574_s9 + $0x10] sm:$0xff]   ;;  %v16164_v7 = vld [vmem:[%s24452_s7 + $0x81] sm:$0xff]  ;;  %v16165_v53 = vld [vmem:[%s24452_s7 + $0x89] sm:$0xff] }
 0x553   : >> { %18909 = vmatpush3.bf16.msra.mxu1 %v21040_v16  ;;  %v16162_v10 = vld [vmem:[%s24452_s7 + $0x71] sm:$0xff]  ;;  %v16163_v50 = vld [vmem:[%s24452_s7 + $0x79] sm:$0xff]  ;;  %v21062_v22 = vld [vmem:[%s21574_s9 + $0x20] sm:$0xff]   ;;  %v24499_v11 = vpack.c.bf16 %v16165_v53, %v16164_v7 }
 0x554   : >> { %19101 = vmatpush3.bf16.msra.mxu0 %v21041_v52  ;;  %18910 = vmatprep.subr.bf16.mxu1 %v21042_v38  ;;  %v24497_v0 = vpack.c.bf16 %v16163_v50, %v16162_v10  ;;  %v21058_v25 = vld [vmem:[%s21574_s9 + $0x1e8] sm:$0xff]   ;;  %v16167_v3 = vld [vmem:[%s24452_s7 + $0x99] sm:$0xff]  ;;  %v16209_v20 = vld [vmem:[%s24452_s7 + $0x22] sm:$0xff] }
 0x555   : >> { %19102 = vmatprep.subr.bf16.mxu0 %v21043_v39  ;;  %v21064_v9 = vld [vmem:[%s21574_s9 + $0x28] sm:$0xff]   ;;  %v21060_v21 = vld [vmem:[%s21574_s9 + $0x1f0] sm:$0xff]   ;;  %v21061_v8 = vld [vmem:[%s21574_s9 + $0x1f8] sm:$0xff]  }
 0x556   : >> { %v16166_v17 = vld [vmem:[%s24452_s7 + $0x91] sm:$0xff]  ;;  %v21068_v43 = vld [vmem:[%s21574_s9 + $0x38] sm:$0xff]   ;;  %v15994_v16 = vld [vmem:[%s24452_s7 + $0xa9] sm:$0xff] }
 0x557   : >> { %18911 = vmatpush3.bf16.msra.mxu1 %v21042_v38  ;;  %v16210_v56 = vld [vmem:[%s24452_s7 + $0x2a] sm:$0xff]  ;;  %v21066_v18 = vld [vmem:[%s21574_s9 + $0x30] sm:$0xff]   ;;  %v24513_v51 = vpack.c.bf16 %v16167_v3, %v16166_v17  ;;  %v15993_v34 = vld [vmem:[%s24452_s7 + $0xa1] sm:$0xff] }
 0x558   : >> { %19103 = vmatpush3.bf16.msra.mxu0 %v21043_v39  ;;  %18912 = vmatprep.subr.bf16.mxu1 %v21044_v29  ;;  %v24515_v58 = vpack.c.bf16 %v16210_v56, %v16209_v20  ;;  %v16211_v1 = vld [vmem:[%s24452_s7 + $0x32] sm:$0xff]  ;;  %v16212_v60 = vld [vmem:[%s24452_s7 + $0x3a] sm:$0xff]  ;;  %v21063_v52 = vld [vmem:[%s21574_s9 + $0x280] sm:$0xff]   ;;  %v24535_v42 = vpack.c.bf16 %v15994_v16, %v15993_v34 }
 0x559   : >> { %19104 = vmatprep.subr.bf16.mxu0 %v21045_v13  ;;  %v16213_v38 = vld [vmem:[%s24452_s7 + $0x42] sm:$0xff]  ;;  %v16214_v39 = vld [vmem:[%s24452_s7 + $0x4a] sm:$0xff]  ;;  %v24533_v12 = vpack.c.bf16 %v16212_v60, %v16211_v1  ;;  %v15996_v35 = vld [vmem:[%s24452_s7 + $0xb9] sm:$0xff] }
 0x55a   : >> { %v24537_v46 = vpack.c.bf16 %v16214_v39, %v16213_v38  ;;  %v15995_v26 = vld [vmem:[%s24452_s7 + $0xb1] sm:$0xff]  ;;  %v21069_v32 = vld [vmem:[%s21574_s9 + $0x298] sm:$0xff]   ;;  %v16002_v24 = vld [vmem:[%s24452_s7 + $0xe9] sm:$0xff] }
 0x55b   : >> { %18913 = vmatpush3.bf16.msra.mxu1 %v21044_v29  ;;  %v24531_v29 = vld [vmem:[%s21574_s9 + $0x80] sm:$0xff]   ;;  %v21067_v45 = vld [vmem:[%s21574_s9 + $0x290] sm:$0xff]   ;;  %v8913_v16 = vld [vmem:[%s24452_s7 + $0x20] sm:$0xff] }
 0x55c   : >> { %19105 = vmatpush3.bf16.msra.mxu0 %v21045_v13  ;;  %18914 = vmatprep.subr.bf16.mxu1 %v21046_v47  ;;  %v21065_v13 = vld [vmem:[%s21574_s9 + $0x288] sm:$0xff]   ;;  %v16000_v14 = vld [vmem:[%s24452_s7 + $0xd9] sm:$0xff]  ;;  %v16221_v62 = vld [vmem:[%s24452_s7 + $0x82] sm:$0xff] }
 0x55d   : >> { %19106 = vmatprep.subr.bf16.mxu0 %v21047_v6  ;;  %v16218_v15 = vld [vmem:[%s24452_s7 + $0x6a] sm:$0xff]  ;;  %v16004_v50 = vld [vmem:[%s24452_s7 + $0xf9] sm:$0xff]  ;;  %v16229_v38 = vld [vmem:[%s24452_s7 + $0xc2] sm:$0xff] }
 0x55e   : >> { %v21071_v19 = vld [vmem:[%s21574_s9 + $0x2a0] sm:$0xff]   ;;  %v16003_v10 = vld [vmem:[%s24452_s7 + $0xf1] sm:$0xff]  ;;  %v16224_v53 = vld [vmem:[%s24452_s7 + $0x9a] sm:$0xff] }
 0x55f   : >> { %18915 = vmatpush3.bf16.msra.mxu1 %v21046_v47  ;;  %v16216_v47 = vld [vmem:[%s24452_s7 + $0x5a] sm:$0xff]  ;;  %v16223_v7 = vld [vmem:[%s24452_s7 + $0x92] sm:$0xff]  ;;  %v16226_v17 = vld [vmem:[%s24452_s7 + $0xaa] sm:$0xff] }
 0x560   : >> { %19107 = vmatpush3.bf16.msra.mxu0 %v21047_v6  ;;  %18916 = vmatprep.subr.bf16.mxu1 %v21048_v36  ;;  %v15997_v6 = vld [vmem:[%s24452_s7 + $0xc1] sm:$0xff]  ;;  %v21075_v3 = vld [vmem:[%s21574_s9 + $0x2b0] sm:$0xff]   ;;  %v24600_v20 = vpack.c.bf16 %v16224_v53, %v16223_v7  ;;  %v16230_v39 = vld [vmem:[%s24452_s7 + $0xca] sm:$0xff] }
 0x561   : >> { %19108 = vmatprep.subr.bf16.mxu0 %v21049_v48  ;;  %v8912_v1 = vld [vmem:[%s24452_s7 + $0x18] sm:$0xff]  ;;  %v8921_v7 = vld [vmem:[%s24452_s7 + $0x60] sm:$0xff]  ;;  %v8922_v53 = vld [vmem:[%s24452_s7 + $0x68] sm:$0xff] }
 0x562   : >> { %v16227_v60 = vld [vmem:[%s24452_s7 + $0xb2] sm:$0xff]  ;;  %v16228_v34 = vld [vmem:[%s24452_s7 + $0xba] sm:$0xff] }
 0x563   : >> { %18917 = vmatpush3.bf16.msra.mxu1 %v21048_v36  ;;  %v15998_v36 = vld [vmem:[%s24452_s7 + $0xc9] sm:$0xff] }
 0x564   : >> { %19109 = vmatpush3.bf16.msra.mxu0 %v21049_v48  ;;  %18950 = vmatprep.subr.bf16.mxu1 %v21050_v57  ;;  %v16217_v48 = vld [vmem:[%s24452_s7 + $0x62] sm:$0xff]  ;;  %v24558_v33 = vpack.c.bf16 %v15998_v36, %v15997_v6  ;;  %v8915_v6 = vld [vmem:[%s24452_s7 + $0x30] sm:$0xff]  ;;  %v8916_v36 = vld [vmem:[%s24452_s7 + $0x38] sm:$0xff] }
 0x565   : >> { %19142 = vmatprep.subr.bf16.mxu0 %v21051_v41 }
 0x566   : >> { %18919 = vmatmul.mubr.bf16.vlgmr.msra.gmra.mrb[0].mxu1 %v9008_v40  ;;  %v15999_v40 = vld [vmem:[%s24452_s7 + $0xd1] sm:$0xff] }
 0x567   : >> { %19111 = vmatmul.mubr.bf16.vlgmr.msra.gmra.mrb[0].mxu0 %v10109_v30  ;;  %18951 = vmatpush3.bf16.msra.mxu1 %v21050_v57  ;;  %v24554_v57 = vpack.c.bf16 %v15996_v35, %v15995_v26  ;;  %v24619_v35 = vpack.c.bf16 %v16228_v34, %v16227_v60  ;;  %v8924_v60 = vld [vmem:[%s24452_s7 + $0x78] sm:$0xff] }
 0x568   : >> { %19143 = vmatpush3.bf16.msra.mxu0 %v21051_v41  ;;  %18922 = vmatprep.mubr.bf16.mxu1 %v10108_v28  ;;  %v16215_v28 = vld [vmem:[%s24452_s7 + $0x52] sm:$0xff]  ;;  %v24560_v41 = vpack.c.bf16 %v16218_v15, %v16217_v48 }
 0x569   : >> { %19144 = vmatprep.subr.bf16.mxu0 %v21052_v4  ;;  %19114 = vmatprep.mubr.bf16.mxu0 %v24472_v61  ;;  %v24556_v44 = vpack.c.bf16 %v16216_v47, %v16215_v28  ;;  %v24623_v47 = vpack.c.bf16 %v16230_v39, %v16229_v38  ;;  %v21072_v48 = vld [vmem:[%s21574_s9 + $0x88] sm:$0xff]   ;;  %v8926_v38 = vld [vmem:[%s24452_s7 + $0x88] sm:$0xff]  ;;  %v21082_v39 = vld [vmem:[%s21574_s9 + $0xb0] sm:$0xff]  }
 0x56a   : >> { %18952 = vmatprep.subr.bf16.mxu1 %v21053_v31  ;;  %v16231_v15 = vld [vmem:[%s24452_s7 + $0xd2] sm:$0xff] }
 0x56b   : >> { %18953 = vmatpush3.bf16.msra.mxu1 %v21053_v31  ;;  %v16001_v31 = vld [vmem:[%s24452_s7 + $0xe1] sm:$0xff]  ;;  %v16239_v34 = vld [vmem:[%s24452_s7 + $0x112] sm:$0xff] }
 0x56c   : >> { %19145 = vmatpush3.bf16.msra.mxu0 %v21052_v4  ;;  %18954 = vmatprep.subr.bf16.mxu1 %v21056_v49  ;;  %v16220_v4 = vld [vmem:[%s24452_s7 + $0x7a] sm:$0xff] }
 0x56d   : >> { %19146 = vmatprep.subr.bf16.mxu0 %v21054_v27 }
 0x56e   : >> { %18923 = vmatmul.mubr.bf16.gmra.mrb[4].mxu1 %v10109_v30  ;;  %v16219_v30 = vld [vmem:[%s24452_s7 + $0x72] sm:$0xff] }
 0x56f   : >> { %19115 = vmatmul.mubr.bf16.gmra.mrb[4].mxu0 %v24482_v23  ;;  %18926 = vmatprep.mubr.bf16.mxu1 %v24472_v61  ;;  %v24578_v37 = vpack.c.bf16 %v16220_v4, %v16219_v30  ;;  %v21074_v30 = vld [vmem:[%s21574_s9 + $0x90] sm:$0xff]   ;;  %v16234_v4 = vld [vmem:[%s24452_s7 + $0xea] sm:$0xff] }
 0x570   : >> { %19147 = vmatpush3.bf16.msra.mxu0 %v21054_v27  ;;  %19118 = vmatprep.mubr.bf16.mxu0 %v24484_v59  ;;  %v16222_v27 = vld [vmem:[%s24452_s7 + $0x8a] sm:$0xff] }
 0x571   : >> { %19148 = vmatprep.subr.bf16.mxu0 %v21055_v5  ;;  %18955 = vmatpush3.bf16.msra.mxu1 %v21056_v49  ;;  %v24576_v49 = vpack.c.bf16 %v16000_v14, %v15999_v40  ;;  %v8917_v40 = vld [vmem:[%s24452_s7 + $0x40] sm:$0xff] }
 0x572   : >> { %18956 = vmatprep.subr.bf16.mxu1 %v21059_v2  ;;  %v16233_v14 = vld [vmem:[%s24452_s7 + $0xe2] sm:$0xff] }
 0x574   : >> { %19149 = vmatpush3.bf16.msra.mxu0 %v21055_v5  ;;  %v24580_v5 = vpack.c.bf16 %v16002_v24, %v16001_v31  ;;  %v24640_v31 = vpack.c.bf16 %v8916_v36, %v8915_v6 }
 0x575   : >> { %19150 = vmatprep.subr.bf16.mxu0 %v21057_v54  ;;  %18957 = vmatpush3.bf16.msra.mxu1 %v21059_v2  ;;  %v24582_v2 = vpack.c.bf16 %v16222_v27, %v16221_v62  ;;  %v24646_v62 = vpack.c.bf16 %v16234_v4, %v16233_v14  ;;  %v21076_v27 = vld [vmem:[%s21574_s9 + $0x98] sm:$0xff]   ;;  %v24692_v14 = vld [vmem:[%s21574_s9 + $0x140] sm:$0xff]  }
 0x576   : >> { %18927 = vmatmul.mubr.bf16.gmra.mrb[8].mxu1 %v24482_v23  ;;  %18958 = vmatprep.subr.bf16.mxu1 %v21062_v22 }
 0x577   : >> { %19119 = vmatmul.mubr.bf16.gmra.mrb[8].mxu0 %v24497_v0  ;;  %18930 = vmatprep.mubr.bf16.mxu1 %v24484_v59 }
 0x578   : >> { %19151 = vmatpush3.bf16.msra.mxu0 %v21057_v54  ;;  %19122 = vmatprep.mubr.bf16.mxu0 %v24499_v11  ;;  %v21073_v54 = vld [vmem:[%s21574_s9 + $0x2a8] sm:$0xff]  }
 0x579   : >> { %19152 = vmatprep.subr.bf16.mxu0 %v21058_v25  ;;  %18959 = vmatpush3.bf16.msra.mxu1 %v21062_v22  ;;  %v8909_v22 = vld [vmem:[%s24452_s7] sm:$0xff] }
 0x57a   : >> { %18960 = vmatprep.subr.bf16.mxu1 %v21064_v9 }
 0x57c   : >> { %19153 = vmatpush3.bf16.msra.mxu0 %v21058_v25  ;;  %v8910_v25 = vld [vmem:[%s24452_s7 + $0x8] sm:$0xff] }
 0x57d   : >> { %19154 = vmatprep.subr.bf16.mxu0 %v21060_v21  ;;  %18961 = vmatpush3.bf16.msra.mxu1 %v21064_v9  ;;  %v16225_v9 = vld [vmem:[%s24452_s7 + $0xa2] sm:$0xff]  ;;  %v8941_v56 = vpack.c.bf16 %v8910_v25, %v8909_v22  ;;  %v16238_v25 = vld [vmem:[%s24452_s7 + $0x10a] sm:$0xff] }
 0x57e   : >> { %18931 = vmatmul.mubr.bf16.gmra.mrb[12].mxu1 %v24497_v0  ;;  %18962 = vmatprep.subr.bf16.mxu1 %v21066_v18  ;;  %v16237_v22 = vld [vmem:[%s24452_s7 + $0x102] sm:$0xff] }
 0x57f   : >> { %19123 = vmatmul.mubr.bf16.gmra.mrb[12].mxu0 %v24513_v51  ;;  %18934 = vmatprep.mubr.bf16.mxu1 %v24499_v11 }
 0x580   : >> { %19155 = vmatpush3.bf16.msra.mxu0 %v21060_v21  ;;  %19158 = vmatprep.mubr.bf16.mxu0 %v24515_v58  ;;  %v24598_v21 = vpack.c.bf16 %v16004_v50, %v16003_v10  ;;  %v8920_v10 = vld [vmem:[%s24452_s7 + $0x58] sm:$0xff] }
 0x581   : >> { %19156 = vmatprep.subr.bf16.mxu0 %v21061_v8  ;;  %18963 = vmatpush3.bf16.msra.mxu1 %v21066_v18  ;;  %v24602_v18 = vpack.c.bf16 %v16226_v17, %v16225_v9  ;;  %v16235_v50 = vld [vmem:[%s24452_s7 + $0xf2] sm:$0xff]  ;;  %v21078_v9 = vld [vmem:[%s21574_s9 + $0xa0] sm:$0xff]  }
 0x582   : >> { %18964 = vmatprep.subr.bf16.mxu1 %v21068_v43 }
 0x584   : >> { %19157 = vmatpush3.bf16.msra.mxu0 %v21061_v8  ;;  %v8911_v8 = vld [vmem:[%s24452_s7 + $0x10] sm:$0xff] }
 0x585   : >> { %19190 = vmatprep.subr.bf16.mxu0 %v21063_v52  ;;  %18965 = vmatpush3.bf16.msra.mxu1 %v21068_v43  ;;  %v21077_v43 = vld [vmem:[%s21574_s9 + $0x2b8] sm:$0xff]   ;;  %v8942_v26 = vpack.c.bf16 %v8912_v1, %v8911_v8  ;;  %v10430_v8 = vpack.c.bf16 %v16238_v25, %v16237_v22  ;;  %v21080_v1 = vld [vmem:[%s21574_s9 + $0xa8] sm:$0xff]  }
 0x586   : >> { %18935 = vmatmul.mubr.bf16.gmra.mrb[16].mxu1 %v24513_v51  ;;  %18998 = vmatprep.subr.bf16.mxu1 %v24531_v29  ;;  %v21085_v25 = vld [vmem:[%s21574_s9 + $0x2d8] sm:$0xff]  }
 0x587   : >> { %19159 = vmatmul.mubr.bf16.vlgmr.msra.gmra.mrb[0].mxu0 %v24533_v12  ;;  %18938 = vmatprep.mubr.bf16.mxu1 %v24535_v42 }
 0x588   : >> { %19191 = vmatpush3.bf16.msra.mxu0 %v21063_v52  ;;  %19162 = vmatprep.mubr.bf16.mxu0 %v24537_v46  ;;  %v8914_v52 = vld [vmem:[%s24452_s7 + $0x28] sm:$0xff] }
 0x589   : >> { %19192 = vmatprep.subr.bf16.mxu0 %v21065_v13  ;;  %v24621_v28 = vpack.c.bf16 %v8914_v52, %v8913_v16  ;;  %v16240_v16 = vld [vmem:[%s24452_s7 + $0x11a] sm:$0xff] }
 0x58a   : >> { %v8925_v52 = vld [vmem:[%s24452_s7 + $0x80] sm:$0xff]  ;;  %v10431_v6 = vpack.c.bf16 %v16240_v16, %v16239_v34  ;;  %v21089_v16 = vld [vmem:[%s21574_s9 + $0x2e8] sm:$0xff]  }
 0x58b   : >> { %v24681_v36 = vpack.c.bf16 %v8926_v38, %v8925_v52  ;;  %v8939_v52 = vld [vmem:[%s24452_s7 + $0xf0] sm:$0xff]  ;;  %v8940_v38 = vld [vmem:[%s24452_s7 + $0xf8] sm:$0xff] }
 0x58c   : >> { %19193 = vmatpush3.bf16.msra.mxu0 %v21065_v13  ;;  %v24617_v13 = vld [vmem:[%s21574_s9 + $0x2c0] sm:$0xff]  }
 0x58d   : >> { %19194 = vmatprep.subr.bf16.mxu0 %v21067_v45 }
 0x58e   : >> { %18939 = vmatmul.mubr.bf16.gmra.mrb[20].mxu1 %v24554_v57 }
 0x58f   : >> { %19163 = vmatmul.mubr.bf16.gmra.mrb[4].mxu0 %v24556_v44  ;;  %18942 = vmatprep.mubr.bf16.mxu1 %v24558_v33 }
 0x590   : >> { %19166 = vmatprep.mubr.bf16.mxu0 %v24560_v41  ;;  %19195 = vmatpush3.bf16.msra.mxu0 %v21067_v45  ;;  %v16232_v45 = vld [vmem:[%s24452_s7 + $0xda] sm:$0xff] }
 0x591   : >> { %19196 = vmatprep.subr.bf16.mxu0 %v21069_v32  ;;  %v24642_v24 = vpack.c.bf16 %v16232_v45, %v16231_v15  ;;  %v8927_v15 = vld [vmem:[%s24452_s7 + $0x90] sm:$0xff]  ;;  %v8928_v45 = vld [vmem:[%s24452_s7 + $0x98] sm:$0xff] }
 0x594   : >> { %19197 = vmatpush3.bf16.msra.mxu0 %v21069_v32  ;;  %v8918_v32 = vld [vmem:[%s24452_s7 + $0x48] sm:$0xff] }
 0x595   : >> { %19198 = vmatprep.subr.bf16.mxu0 %v21071_v19 }
 0x596   : >> { %18943 = vmatmul.mubr.bf16.gmra.mrb[24].mxu1 %v24576_v49 }
 0x597   : >> { %19167 = vmatmul.mubr.bf16.gmra.mrb[8].mxu0 %v24578_v37  ;;  %18946 = vmatprep.mubr.bf16.mxu1 %v24580_v5 }
 0x598   : >> { %19170 = vmatprep.mubr.bf16.mxu0 %v24582_v2  ;;  %19199 = vmatpush3.bf16.msra.mxu0 %v21071_v19  ;;  %v8919_v19 = vld [vmem:[%s24452_s7 + $0x50] sm:$0xff] }
 0x599   : >> { %19200 = vmatprep.subr.bf16.mxu0 %v21073_v54  ;;  %v24662_v17 = vpack.c.bf16 %v8920_v10, %v8919_v19  ;;  %v8931_v19 = vld [vmem:[%s24452_s7 + $0xb0] sm:$0xff]  ;;  %v8932_v10 = vld [vmem:[%s24452_s7 + $0xb8] sm:$0xff] }
 0x59c   : >> { %19201 = vmatpush3.bf16.msra.mxu0 %v21073_v54  ;;  %v16236_v54 = vld [vmem:[%s24452_s7 + $0xfa] sm:$0xff] }
 0x59d   : >> { %19202 = vmatprep.subr.bf16.mxu0 %v21075_v3 }
 0x59e   : >> { %18947 = vmatmul.mubr.bf16.gmra.mrb[28].mxu1 %v24598_v21 }
 0x59f   : >> { %19171 = vmatmul.mubr.bf16.gmra.mrb[12].mxu0 %v24600_v20  ;;  %18966 = vmatprep.mubr.bf16.mxu1 %v8941_v56  ;;  %v24666_v56 = vpack.c.bf16 %v8922_v53, %v8921_v7  ;;  %v21083_v7 = vld [vmem:[%s21574_s9 + $0x2d0] sm:$0xff]   ;;  %v24710_v53 = vpack.c.bf16 %v8932_v10, %v8931_v19  ;;  %v21095_v19 = vld [vmem:[%s21574_s9 + $0x300] sm:$0xff]  }
 0x5a0   : >> { %19174 = vmatprep.mubr.bf16.mxu0 %v24602_v18  ;;  %19203 = vmatpush3.bf16.msra.mxu0 %v21075_v3  ;;  %v24664_v3 = vpack.c.bf16 %v16236_v54, %v16235_v50  ;;  %v8933_v50 = vld [vmem:[%s24452_s7 + $0xc0] sm:$0xff]  ;;  %v8934_v54 = vld [vmem:[%s24452_s7 + $0xc8] sm:$0xff] }
 0x5a1   : >> { %19204 = vmatprep.subr.bf16.mxu0 %v21077_v43  ;;  %v24712_v22 = vpack.c.bf16 %v8934_v54, %v8933_v50  ;;  %v21088_v50 = vld [vmem:[%s21574_s9 + $0x148] sm:$0xff]   ;;  %v21090_v54 = vld [vmem:[%s21574_s9 + $0x150] sm:$0xff]  }
 0x5a4   : >> { %19205 = vmatpush3.bf16.msra.mxu0 %v21077_v43  ;;  %v8923_v43 = vld [vmem:[%s24452_s7 + $0x70] sm:$0xff] }
 0x5a5   : >> { %19238 = vmatprep.subr.bf16.mxu0 %v24617_v13 }
 0x5a6   : >> { %18967 = vmatmul.mubr.bf16.vlgmr.msra.gmra.mrb[0].mxu1 %v8942_v26  ;;  %v24679_v26 = vpack.c.bf16 %v8924_v60, %v8923_v43  ;;  %v21087_v43 = vld [vmem:[%s21574_s9 + $0x2e0] sm:$0xff]  }
 0x5a7   : >> { %19175 = vmatmul.mubr.bf16.gmra.mrb[16].mxu0 %v24619_v35  ;;  %18999 = vmatpush3.bf16.msra.mxu1 %v24531_v29  ;;  %v24644_v29 = vpack.c.bf16 %v8918_v32, %v8917_v40  ;;  %v8929_v40 = vld [vmem:[%s24452_s7 + $0xa0] sm:$0xff]  ;;  %v8930_v32 = vld [vmem:[%s24452_s7 + $0xa8] sm:$0xff] }
 0x5a8   : >> { %18970 = vmatprep.mubr.bf16.mxu1 %v24621_v28  ;;  %19178 = vmatprep.mubr.bf16.mxu0 %v24623_v47  ;;  %v24696_v4 = vpack.c.bf16 %v8930_v32, %v8929_v40  ;;  %v21093_v40 = vld [vmem:[%s21574_s9 + $0x2f8] sm:$0xff]   ;;  %v16040_v32 = vld [vmem:[%s24452_s7 + $0x12] sm:$0xff] }
 0x5a9   : >> { %19000 = vmatprep.subr.bf16.mxu1 %v21072_v48 }
 0x5ab   : >> { %19001 = vmatpush3.bf16.msra.mxu1 %v21072_v48  ;;  %v21084_v48 = vld [vmem:[%s21574_s9 + $0xb8] sm:$0xff]  }
 0x5ac   : >> { %19002 = vmatprep.subr.bf16.mxu1 %v21074_v30 }
 0x5ae   : >> { %18971 = vmatmul.mubr.bf16.gmra.mrb[4].mxu1 %v24640_v31 }
 0x5af   : >> { %19179 = vmatmul.mubr.bf16.gmra.mrb[20].mxu0 %v24642_v24  ;;  %18974 = vmatprep.mubr.bf16.mxu1 %v24644_v29 }
 0x5b0   : >> { %19182 = vmatprep.mubr.bf16.mxu0 %v24646_v62  ;;  %19003 = vmatpush3.bf16.msra.mxu1 %v21074_v30  ;;  %v24694_v30 = vpack.c.bf16 %v8928_v45, %v8927_v15  ;;  %v24738_v15 = vpack.c.bf16 %v8940_v38, %v8939_v52  ;;  %v16297_v38 = vld [vmem:[%s24452_s7 + $0x138] sm:$0xff] }
 0x5b1   : >> { %19004 = vmatprep.subr.bf16.mxu1 %v21076_v27 }
 0x5b4   : >> { %19005 = vmatpush3.bf16.msra.mxu1 %v21076_v27  ;;  %v21081_v27 = vld [vmem:[%s21574_s9 + $0x2c8] sm:$0xff]  }
 0x5b5   : >> { %19006 = vmatprep.subr.bf16.mxu1 %v21078_v9 }
 0x5b6   : >> { %18975 = vmatmul.mubr.bf16.gmra.mrb[8].mxu1 %v24662_v17 }
 0x5b7   : >> { %19183 = vmatmul.mubr.bf16.gmra.mrb[24].mxu0 %v24664_v3  ;;  %18978 = vmatprep.mubr.bf16.mxu1 %v24666_v56 }
 0x5b8   : >> { %19186 = vmatprep.mubr.bf16.mxu0 %v10430_v8  ;;  %19007 = vmatpush3.bf16.msra.mxu1 %v21078_v9  ;;  %v8936_v9 = vld [vmem:[%s24452_s7 + $0xd8] sm:$0xff]  ;;  %v8937_v8 = vld [vmem:[%s24452_s7 + $0xe0] sm:$0xff] }
 0x5b9   : >> { %19008 = vmatprep.subr.bf16.mxu1 %v21080_v1 }
 0x5bc   : >> { %19009 = vmatpush3.bf16.msra.mxu1 %v21080_v1  ;;  %v8938_v1 = vld [vmem:[%s24452_s7 + $0xe8] sm:$0xff] }
 0x5bd   : >> { %19010 = vmatprep.subr.bf16.mxu1 %v21082_v39  ;;  %v24726_v34 = vpack.c.bf16 %v8938_v1, %v8937_v8  ;;  %v16294_v8 = vld [vmem:[%s24452_s7 + $0x120] sm:$0xff]  ;;  %v16295_v1 = vld [vmem:[%s24452_s7 + $0x128] sm:$0xff] }
 0x5be   : >> { %18979 = vmatmul.mubr.bf16.gmra.mrb[12].mxu1 %v24679_v26  ;;  %v10738_v52 = vpack.c.bf16 %v16295_v1, %v16294_v8  ;;  %v16168_v1 = vld [vmem:[%s24452_s7 + $0xa1] sm:$0xff] }
 0x5bf   : >> { %19187 = vmatmul.mubr.bf16.gmra.mrb[28].mxu0 %v10431_v6  ;;  %18982 = vmatprep.mubr.bf16.mxu1 %v24681_v36  ;;  %v16039_v6 = vld [vmem:[%s24452_s7 + $0xa] sm:$0xff] }
 0x5c0   : >> { %19206 = vmatprep.mubr.bf16.mxu0 %v24644_v29  ;;  %19011 = vmatpush3.bf16.msra.mxu1 %v21082_v39  ;;  %v16038_v39 = vld [vmem:[%s24452_s7 + $0x2] sm:$0xff] }
 0x5c1   : >> { %19012 = vmatprep.subr.bf16.mxu1 %v21084_v48  ;;  %v9492_v45 = vpack.c.bf16 %v16039_v6, %v16038_v39  ;;  %v21098_v39 = vld [vmem:[%s21574_s9 + $0x170] sm:$0xff]  }
 0x5c4   : >> { %19013 = vmatpush3.bf16.msra.mxu1 %v21084_v48  ;;  %v21091_v48 = vld [vmem:[%s21574_s9 + $0x2f0] sm:$0xff]  }
 0x5c5   : >> { %19046 = vmatprep.subr.bf16.mxu1 %v24692_v14 }
 0x5c6   : >> { %18983 = vmatmul.mubr.bf16.gmra.mrb[16].mxu1 %v24694_v30 }
 0x5c7   : >> { %19207 = vmatmul.mubr.bf16.vlgmr.msra.gmra.mrb[0].mxu0 %v24662_v17  ;;  %18986 = vmatprep.mubr.bf16.mxu1 %v24696_v4 }
 0x5c8   : >> { %19239 = vmatpush3.bf16.msra.mxu0 %v24617_v13  ;;  %19210 = vmatprep.mubr.bf16.mxu0 %v24666_v56  ;;  %v8935_v13 = vld [vmem:[%s24452_s7 + $0xd0] sm:$0xff] }
 0x5c9   : >> { %19240 = vmatprep.subr.bf16.mxu0 %v21081_v27  ;;  %v24724_v60 = vpack.c.bf16 %v8936_v9, %v8935_v13  ;;  %v21092_v9 = vld [vmem:[%s21574_s9 + $0x158] sm:$0xff]  }
 0x5cc   : >> { %19241 = vmatpush3.bf16.msra.mxu0 %v21081_v27  ;;  %v16041_v27 = vld [vmem:[%s24452_s7 + $0x1a] sm:$0xff] }
 0x5cd   : >> { %19242 = vmatprep.subr.bf16.mxu0 %v21083_v7  ;;  %v9493_v10 = vpack.c.bf16 %v16041_v27, %v16040_v32  ;;  %v16385_v32 = vld [vmem:[%s24452_s7 + $0x6a] sm:$0xff]  ;;  %v21113_v27 = vld [vmem:[%s21574_s9 + $0x1b8] sm:$0xff]  }
 0x5ce   : >> { %18987 = vmatmul.mubr.bf16.gmra.mrb[20].mxu1 %v24710_v53 }
 0x5cf   : >> { %19211 = vmatmul.mubr.bf16.gmra.mrb[4].mxu0 %v24679_v26  ;;  %18990 = vmatprep.mubr.bf16.mxu1 %v24712_v22 }
 0x5d0   : >> { %19214 = vmatprep.mubr.bf16.mxu0 %v24681_v36  ;;  %19243 = vmatpush3.bf16.msra.mxu0 %v21083_v7  ;;  %v16290_v7 = vld [vmem:[%s24452_s7 + $0x100] sm:$0xff] }
 0x5d1   : >> { %19244 = vmatprep.subr.bf16.mxu0 %v21085_v25 }
 0x5d4   : >> { %19245 = vmatpush3.bf16.msra.mxu0 %v21085_v25  ;;  %v16291_v25 = vld [vmem:[%s24452_s7 + $0x108] sm:$0xff] }
 0x5d5   : >> { %19246 = vmatprep.subr.bf16.mxu0 %v21087_v43  ;;  %v24755_v13 = vpack.c.bf16 %v16291_v25, %v16290_v7 }
 0x5d6   : >> { %18991 = vmatmul.mubr.bf16.gmra.mrb[24].mxu1 %v24724_v60 }
 0x5d7   : >> { %19215 = vmatmul.mubr.bf16.gmra.mrb[8].mxu0 %v24694_v30  ;;  %18994 = vmatprep.mubr.bf16.mxu1 %v24726_v34 }
 0x5d8   : >> { %19218 = vmatprep.mubr.bf16.mxu0 %v24696_v4  ;;  %19247 = vmatpush3.bf16.msra.mxu0 %v21087_v43  ;;  %v21094_v43 = vld [vmem:[%s21574_s9 + $0x160] sm:$0xff]  }
 0x5d9   : >> { %19248 = vmatprep.subr.bf16.mxu0 %v21089_v16 }
 0x5dc   : >> { %19249 = vmatpush3.bf16.msra.mxu0 %v21089_v16 }
 0x5dd   : >> { %19250 = vmatprep.subr.bf16.mxu0 %v21091_v48 }
 0x5de   : >> { %18995 = vmatmul.mubr.bf16.gmra.mrb[28].mxu1 %v24738_v15 }
 0x5df   : >> { %19219 = vmatmul.mubr.bf16.gmra.mrb[12].mxu0 %v24710_v53  ;;  %19014 = vmatprep.mubr.bf16.mxu1 %v9492_v45  ;;  %v16383_v45 = vld [vmem:[%s24452_s7 + $0x5a] sm:$0xff] }
 0x5e0   : >> { %19222 = vmatprep.mubr.bf16.mxu0 %v24712_v22  ;;  %19251 = vmatpush3.bf16.msra.mxu0 %v21091_v48  ;;  %v21100_v48 = vld [vmem:[%s21574_s9 + $0x178] sm:$0xff]  }
 0x5e1   : >> { %19252 = vmatprep.subr.bf16.mxu0 %v21093_v40 }
 0x5e4   : >> { %19253 = vmatpush3.bf16.msra.mxu0 %v21093_v40  ;;  %v16384_v40 = vld [vmem:[%s24452_s7 + $0x62] sm:$0xff] }
 0x5e5   : >> { %19286 = vmatprep.subr.bf16.mxu0 %v21095_v19 }
 0x5e6   : >> { %19015 = vmatmul.mubr.bf16.vlgmr.msra.gmra.mrb[0].mxu1 %v9493_v10  ;;  %v11342_v10 = vpack.c.bf16 %v16385_v32, %v16384_v40  ;;  %v16411_v40 = vld [vmem:[%s24452_s7 + $0x13a] sm:$0xff] }
 0x5e7   : >> { %19223 = vmatmul.mubr.bf16.gmra.mrb[16].mxu0 %v24724_v60  ;;  %19047 = vmatpush3.bf16.msra.mxu1 %v24692_v14  ;;  %v16293_v14 = vld [vmem:[%s24452_s7 + $0x118] sm:$0xff] }
 0x5e8   : >> { %19018 = vmatprep.mubr.bf16.mxu1 %v24515_v58  ;;  %19226 = vmatprep.mubr.bf16.mxu0 %v24726_v34  ;;  %v16292_v58 = vld [vmem:[%s24452_s7 + $0x110] sm:$0xff] }
 0x5e9   : >> { %19048 = vmatprep.subr.bf16.mxu1 %v21088_v50  ;;  %v24767_v16 = vpack.c.bf16 %v16293_v14, %v16292_v58  ;;  %v16393_v58 = vld [vmem:[%s24452_s7 + $0xaa] sm:$0xff] }
 0x5eb   : >> { %19049 = vmatpush3.bf16.msra.mxu1 %v21088_v50  ;;  %v16388_v50 = vld [vmem:[%s24452_s7 + $0x82] sm:$0xff] }
 0x5ec   : >> { %19050 = vmatprep.subr.bf16.mxu1 %v21090_v54 }
 0x5ee   : >> { %19019 = vmatmul.mubr.bf16.gmra.mrb[4].mxu1 %v24533_v12  ;;  %v21096_v12 = vld [vmem:[%s21574_s9 + $0x168] sm:$0xff]  }
 0x5ef   : >> { %19227 = vmatmul.mubr.bf16.gmra.mrb[20].mxu0 %v24738_v15  ;;  %19022 = vmatprep.mubr.bf16.mxu1 %v24537_v46  ;;  %v16296_v46 = vld [vmem:[%s24452_s7 + $0x130] sm:$0xff] }
 0x5f0   : >> { %19230 = vmatprep.mubr.bf16.mxu0 %v24755_v13  ;;  %19051 = vmatpush3.bf16.msra.mxu1 %v21090_v54  ;;  %v10739_v6 = vpack.c.bf16 %v16297_v38, %v16296_v46  ;;  %v16389_v54 = vld [vmem:[%s24452_s7 + $0x8a] sm:$0xff] }
 0x5f1   : >> { %19052 = vmatprep.subr.bf16.mxu1 %v21092_v9  ;;  %v11344_v25 = vpack.c.bf16 %v16389_v54, %v16388_v50 }
 0x5f4   : >> { %19053 = vmatpush3.bf16.msra.mxu1 %v21092_v9  ;;  %v16392_v9 = vld [vmem:[%s24452_s7 + $0xa2] sm:$0xff] }
 0x5f5   : >> { %19054 = vmatprep.subr.bf16.mxu1 %v21094_v43  ;;  %v11346_v8 = vpack.c.bf16 %v16393_v58, %v16392_v9 }
 0x5f6   : >> { %19023 = vmatmul.mubr.bf16.gmra.mrb[8].mxu1 %v24556_v44  ;;  %v21097_v44 = vld [vmem:[%s21574_s9 + $0x308] sm:$0xff]  }
 0x5f7   : >> { %19231 = vmatmul.mubr.bf16.gmra.mrb[24].mxu0 %v24767_v16  ;;  %19026 = vmatprep.mubr.bf16.mxu1 %v24560_v41  ;;  %v21106_v41 = vld [vmem:[%s21574_s9 + $0x180] sm:$0xff]  }
 0x5f8   : >> { %19234 = vmatprep.mubr.bf16.mxu0 %v10738_v52  ;;  %19055 = vmatpush3.bf16.msra.mxu1 %v21094_v43  ;;  %v16169_v43 = vld [vmem:[%s24452_s7 + $0xa9] sm:$0xff] }
 0x5f9   : >> { %19056 = vmatprep.subr.bf16.mxu1 %v21096_v12  ;;  %v16396_v52 = vld [vmem:[%s24452_s7 + $0xc2] sm:$0xff] }
 0x5fc   : >> { %19057 = vmatpush3.bf16.msra.mxu1 %v21096_v12  ;;  %v16397_v12 = vld [vmem:[%s24452_s7 + $0xca] sm:$0xff] }
 0x5fd   : >> { %19058 = vmatprep.subr.bf16.mxu1 %v21098_v39  ;;  %v11348_v38 = vpack.c.bf16 %v16397_v12, %v16396_v52 }
 0x5fe   : >> { %19027 = vmatmul.mubr.bf16.gmra.mrb[12].mxu1 %v24578_v37  ;;  %v21101_v37 = vld [vmem:[%s21574_s9 + $0x318] sm:$0xff]  }
 0x5ff   : >> { %19235 = vmatmul.mubr.bf16.gmra.mrb[28].mxu0 %v10739_v6  ;;  %19030 = vmatprep.mubr.bf16.mxu1 %v24582_v2  ;;  %v21108_v2 = vld [vmem:[%s21574_s9 + $0x190] sm:$0xff]  }
 0x600   : >> { %19254 = vmatprep.mubr.bf16.mxu0 %v24472_v61  ;;  %19059 = vmatpush3.bf16.msra.mxu1 %v21098_v39  ;;  %v21099_v61 = vld [vmem:[%s21574_s9 + $0x310] sm:$0xff]  }
 0x601   : >> { %19060 = vmatprep.subr.bf16.mxu1 %v21100_v48  ;;  %v16171_v39 = vld [vmem:[%s24452_s7 + $0xb9] sm:$0xff] }
 0x602   : >> { %v16398_v6 = vld [vmem:[%s24452_s7 + $0xd2] sm:$0xff] }
 0x604   : >> { %19061 = vmatpush3.bf16.msra.mxu1 %v21100_v48  ;;  %v16399_v48 = vld [vmem:[%s24452_s7 + $0xda] sm:$0xff] }
 0x605   : >> { %20310 = vmatprep.subr.bf16.mxu1 %v21106_v41 }
 0x606   : >> { %19031 = vmatmul.mubr.bf16.gmra.mrb[16].mxu1 %v24600_v20  ;;  %v16351_v20 = vld [vmem:[%s24452_s7 + $0x121] sm:$0xff] }
 0x607   : >> { %19255 = vmatmul.mubr.bf16.vlgmr.msra.gmra.mrb[0].mxu0 %v24482_v23  ;;  %19034 = vmatprep.mubr.bf16.mxu1 %v24602_v18  ;;  %v21102_v23 = vld [vmem:[%s21574_s9 + $0x320] sm:$0xff]  }
 0x608   : >> { %19287 = vmatpush3.bf16.msra.mxu0 %v21095_v19  ;;  %19258 = vmatprep.mubr.bf16.mxu0 %v24484_v59  ;;  %v21103_v59 = vld [vmem:[%s21574_s9 + $0x328] sm:$0xff]  }
 0x609   : >> { %19288 = vmatprep.subr.bf16.mxu0 %v21097_v44  ;;  %v16352_v18 = vld [vmem:[%s24452_s7 + $0x129] sm:$0xff] }
 0x60c   : >> { %19289 = vmatpush3.bf16.msra.mxu0 %v21097_v44  ;;  %v16172_v44 = vld [vmem:[%s24452_s7 + $0xc1] sm:$0xff] }
 0x60d   : >> { %19290 = vmatprep.subr.bf16.mxu0 %v21099_v61 }
 0x60e   : >> { %19035 = vmatmul.mubr.bf16.gmra.mrb[20].mxu1 %v24619_v35  ;;  %v21109_v35 = vld [vmem:[%s21574_s9 + $0x198] sm:$0xff]  }
 0x60f   : >> { %19259 = vmatmul.mubr.bf16.gmra.mrb[4].mxu0 %v24497_v0  ;;  %19038 = vmatprep.mubr.bf16.mxu1 %v24623_v47  ;;  %v21104_v0 = vld [vmem:[%s21574_s9 + $0x330] sm:$0xff]   ;;  %v11046_v47 = vpack.c.bf16 %v16352_v18, %v16351_v20  ;;  %v16405_v20 = vld [vmem:[%s24452_s7 + $0x10a] sm:$0xff] }
 0x610   : >> { %19262 = vmatprep.mubr.bf16.mxu0 %v24499_v11  ;;  %19291 = vmatpush3.bf16.msra.mxu0 %v21099_v61  ;;  %v21105_v11 = vld [vmem:[%s21574_s9 + $0x338] sm:$0xff]  }
 0x611   : >> { %19292 = vmatprep.subr.bf16.mxu0 %v21101_v37  ;;  %v16400_v61 = vld [vmem:[%s24452_s7 + $0xe2] sm:$0xff] }
 0x614   : >> { %19293 = vmatpush3.bf16.msra.mxu0 %v21101_v37  ;;  %v16401_v37 = vld [vmem:[%s24452_s7 + $0xea] sm:$0xff] }
 0x615   : >> { %19294 = vmatprep.subr.bf16.mxu0 %v21102_v23 }
 0x616   : >> { %19039 = vmatmul.mubr.bf16.gmra.mrb[24].mxu1 %v24642_v24  ;;  %v16354_v24 = vld [vmem:[%s24452_s7 + $0x139] sm:$0xff] }
 0x617   : >> { %19263 = vmatmul.mubr.bf16.gmra.mrb[8].mxu0 %v24513_v51  ;;  %19042 = vmatprep.mubr.bf16.mxu1 %v24646_v62  ;;  %v21107_v51 = vld [vmem:[%s21574_s9 + $0x188] sm:$0xff]  }
 0x618   : >> { %19266 = vmatprep.mubr.bf16.mxu0 %v24535_v42  ;;  %19295 = vmatpush3.bf16.msra.mxu0 %v21102_v23  ;;  %v16347_v42 = vld [vmem:[%s24452_s7 + $0x101] sm:$0xff]  ;;  %v16381_v62 = vld [vmem:[%s24452_s7 + $0x4a] sm:$0xff]  ;;  %v11349_v23 = vpack.c.bf16 %v16399_v48, %v16398_v6 }
 0x619   : >> { %19296 = vmatprep.subr.bf16.mxu0 %v21103_v59 }
 0x61c   : >> { %19297 = vmatpush3.bf16.msra.mxu0 %v21103_v59 }
 0x61d   : >> { %19298 = vmatprep.subr.bf16.mxu0 %v21104_v0 }
 0x61e   : >> { %19043 = vmatmul.mubr.bf16.gmra.mrb[28].mxu1 %v24664_v3 }
 0x61f   : >> { %19267 = vmatmul.mubr.bf16.gmra.mrb[12].mxu0 %v24554_v57  ;;  %19062 = vmatprep.mubr.bf16.mxu1 %v24621_v28  ;;  %v16348_v57 = vld [vmem:[%s24452_s7 + $0x109] sm:$0xff] }
 0x620   : >> { %19270 = vmatprep.mubr.bf16.mxu0 %v24558_v33  ;;  %19299 = vmatpush3.bf16.msra.mxu0 %v21104_v0  ;;  %v24811_v33 = vpack.c.bf16 %v16348_v57, %v16347_v42  ;;  %v11350_v0 = vpack.c.bf16 %v16401_v37, %v16400_v61  ;;  %v16402_v42 = vld [vmem:[%s24452_s7 + $0xf2] sm:$0xff]  ;;  %v16403_v57 = vld [vmem:[%s24452_s7 + $0xfa] sm:$0xff] }
 0x621   : >> { %19300 = vmatprep.subr.bf16.mxu0 %v21105_v11 }
 0x624   : >> { %19301 = vmatpush3.bf16.msra.mxu0 %v21105_v11  ;;  %v16174_v11 = vld [vmem:[%s24452_s7 + $0xd1] sm:$0xff] }
 0x626   : >> { %19063 = vmatmul.mubr.bf16.vlgmr.msra.gmra.mrb[0].mxu1 %v24640_v31  ;;  %v16353_v31 = vld [vmem:[%s24452_s7 + $0x131] sm:$0xff] }
 0x627   : >> { %19271 = vmatmul.mubr.bf16.gmra.mrb[16].mxu0 %v24576_v49  ;;  %20318 = vmatpush3.bf16.msra.mxu1 %v21106_v41  ;;  %v16349_v49 = vld [vmem:[%s24452_s7 + $0x111] sm:$0xff]  ;;  %v11047_v3 = vpack.c.bf16 %v16354_v24, %v16353_v31  ;;  %v16173_v41 = vld [vmem:[%s24452_s7 + $0xc9] sm:$0xff]  ;;  %v16179_v24 = vld [vmem:[%s24452_s7 + $0xf9] sm:$0xff] }
 0x628   : >> { %19066 = vmatprep.mubr.bf16.mxu1 %v24644_v29  ;;  %19274 = vmatprep.mubr.bf16.mxu0 %v24580_v5  ;;  %v16350_v5 = vld [vmem:[%s24452_s7 + $0x119] sm:$0xff]  ;;  %v16380_v29 = vld [vmem:[%s24452_s7 + $0x42] sm:$0xff]  ;;  %v10118_v59 = vpack.c.bf16 %v16173_v41, %v16172_v44  ;;  %v16178_v31 = vld [vmem:[%s24452_s7 + $0xf1] sm:$0xff] }
 0x629   : >> { %20311 = vmatprep.subr.bf16.mxu1 %v21107_v51  ;;  %v24823_v28 = vpack.c.bf16 %v16350_v5, %v16349_v49  ;;  %v16177_v49 = vld [vmem:[%s24452_s7 + $0xe9] sm:$0xff] }
 0x62a   : >> { %v16404_v5 = vld [vmem:[%s24452_s7 + $0x102] sm:$0xff] }
 0x62b   : >> { %20319 = vmatpush3.bf16.msra.mxu1 %v21107_v51  ;;  %v16175_v51 = vld [vmem:[%s24452_s7 + $0xd9] sm:$0xff] }
 0x62c   : >> { %20312 = vmatprep.subr.bf16.mxu1 %v21108_v2  ;;  %v10119_v18 = vpack.c.bf16 %v16175_v51, %v16174_v11 }
 0x62e   : >> { %19067 = vmatmul.mubr.bf16.gmra.mrb[4].mxu1 %v24662_v17  ;;  %v21111_v17 = vld [vmem:[%s21574_s9 + $0x1a8] sm:$0xff]  }
 0x62f   : >> { %19275 = vmatmul.mubr.bf16.gmra.mrb[20].mxu0 %v24598_v21  ;;  %19070 = vmatprep.mubr.bf16.mxu1 %v24666_v56  ;;  %v21110_v21 = vld [vmem:[%s21574_s9 + $0x1a0] sm:$0xff]   ;;  %v11340_v56 = vpack.c.bf16 %v16381_v62, %v16380_v29  ;;  %v16406_v29 = vld [vmem:[%s24452_s7 + $0x112] sm:$0xff]  ;;  %v16407_v62 = vld [vmem:[%s24452_s7 + $0x11a] sm:$0xff] }
 0x630   : >> { %19278 = vmatprep.mubr.bf16.mxu0 %v24811_v33  ;;  %20320 = vmatpush3.bf16.msra.mxu1 %v21108_v2  ;;  %v16176_v2 = vld [vmem:[%s24452_s7 + $0xe1] sm:$0xff] }
 0x631   : >> { %20313 = vmatprep.subr.bf16.mxu1 %v21109_v35 }
 0x634   : >> { %20321 = vmatpush3.bf16.msra.mxu1 %v21109_v35  ;;  %v11351_v35 = vpack.c.bf16 %v16403_v57, %v16402_v42  ;;  %v24930_v57 = vstv %s22435_s18 }
 0x635   : >> { %20314 = vmatprep.subr.bf16.mxu1 %v21110_v21 }
 0x636   : >> { %19071 = vmatmul.mubr.bf16.gmra.mrb[8].mxu1 %v24679_v26  ;;  %v21112_v26 = vld [vmem:[%s21574_s9 + $0x1b0] sm:$0xff]  }
 0x637   : >> { %19279 = vmatmul.mubr.bf16.gmra.mrb[24].mxu0 %v24823_v28  ;;  %19074 = vmatprep.mubr.bf16.mxu1 %v24681_v36  ;;  %v16382_v36 = vld [vmem:[%s24452_s7 + $0x52] sm:$0xff] }
 0x638   : >> { %19282 = vmatprep.mubr.bf16.mxu0 %v11046_v47  ;;  %20322 = vmatpush3.bf16.msra.mxu1 %v21110_v21  ;;  %v11341_v19 = vpack.c.bf16 %v16383_v45, %v16382_v36  ;;  %v10120_v47 = vpack.c.bf16 %v16177_v49, %v16176_v2  ;;  %v11352_v21 = vpack.c.bf16 %v16405_v20, %v16404_v5  ;;  %v16410_v45 = vld [vmem:[%s24452_s7 + $0x132] sm:$0xff] }
 0x639   : >> { %20315 = vmatprep.subr.bf16.mxu1 %v21111_v17  ;;  %v11355_v32 = vpack.c.bf16 %v16411_v40, %v16410_v45 }
 0x63c   : >> { %20323 = vmatpush3.bf16.msra.mxu1 %v21111_v17  ;;  %v16408_v17 = vld [vmem:[%s24452_s7 + $0x122] sm:$0xff] }
 0x63d   : >> { %20316 = vmatprep.subr.bf16.mxu1 %v21112_v26 }
 0x63e   : >> { %19075 = vmatmul.mubr.bf16.gmra.mrb[12].mxu1 %v24694_v30  ;;  %v16386_v30 = vld [vmem:[%s24452_s7 + $0x72] sm:$0xff] }
 0x63f   : >> { %19283 = vmatmul.mubr.bf16.gmra.mrb[28].mxu0 %v11047_v3  ;;  %19078 = vmatprep.mubr.bf16.mxu1 %v24696_v4  ;;  %v16387_v4 = vld [vmem:[%s24452_s7 + $0x7a] sm:$0xff]  ;;  %v16409_v3 = vld [vmem:[%s24452_s7 + $0x12a] sm:$0xff] }
 0x640   : >> { %19302 = vmatprep.mubr.bf16.mxu0 %v11340_v56  ;;  %20324 = vmatpush3.bf16.msra.mxu1 %v21112_v26  ;;  %v11343_v7 = vpack.c.bf16 %v16387_v4, %v16386_v30  ;;  %v10121_v56 = vpack.c.bf16 %v16179_v24, %v16178_v31  ;;  %v11353_v26 = vpack.c.bf16 %v16407_v62, %v16406_v29  ;;  %v24893_v30 = vstv %s24443_s5 }
 0x641   : >> { %20317 = vmatprep.subr.bf16.mxu1 %v21113_v27  ;;  %v11354_v36 = vpack.c.bf16 %v16409_v3, %v16408_v17 }
 0x644   : >> { %20325 = vmatpush3.bf16.msra.mxu1 %v21113_v27  ;;  %v11614_v27 = vlaneseq }
 0x646   : >> { %19079 = vmatmul.mubr.bf16.gmra.mrb[16].mxu1 %v24710_v53  ;;  %v16390_v53 = vld [vmem:[%s24452_s7 + $0x92] sm:$0xff] }
 0x647   : >> { %19303 = vmatmul.mubr.bf16.vlgmr.msra.gmra.mrb[0].mxu0 %v11341_v19  ;;  %19082 = vmatprep.mubr.bf16.mxu1 %v24712_v22  ;;  %v16391_v22 = vld [vmem:[%s24452_s7 + $0x9a] sm:$0xff]  ;;  %v24889_v19 = vshrl.u32 %v11614_v27, 7 }
 0x648   : >> { %19306 = vmatprep.mubr.bf16.mxu0 %v11342_v10  ;;  %v11345_v14 = vpack.c.bf16 %v16391_v22, %v16390_v53 }
 0x649   : >> { %v11617_v10 = vadd.s32 16, %v24889_v19  ;;  %v11618_v50 = vadd.s32 24, %v24889_v19  ;;  %v11616_v54 = vadd.s32 8, %v24889_v19  ;;  %v11619_v9 = vadd.s32 32, %v24889_v19 }
 0x64a   : >> { %v11622_v58 = vadd.s32 56, %v24889_v19  ;;  %v11620_v52 = vadd.s32 40, %v24889_v19  ;;  %v11625_v44 = vadd.s32 80, %v24889_v19  ;;  %v11623_v51 = vadd.s32 64, %v24889_v19 }
 0x64b   : >> { %v11650_v4 = vadd.s32 %v24893_v30, %v11617_v10  ;;  %v11649_v22 = vadd.s32 %v24893_v30, %v11616_v54  ;;  %v11624_v17 = vadd.s32 72, %v24889_v19  ;;  %v11629_v45 = vadd.s32 112, %v24889_v19 }
 0x64c   : >> { %v24917_v6 = vadd.s32 %v24893_v30, %v11622_v58  ;;  %v24921_v37 = vadd.s32 %v24893_v30, %v11620_v52  ;;  %v24933_v5 = vadd.s32 %v24893_v30, %v11625_v44  ;;  %v11630_v27 = vadd.s32 120, %v24889_v19 }
 0x64d   : >> { %v11633_v44 = vadd.s32 144, %v24889_v19  ;;  %v11638_v55 = vadd.s32 184, %v24889_v19 }
 0x64e   : >> { %19083 = vmatmul.mubr.bf16.gmra.mrb[20].mxu1 %v24724_v60  ;;  %v16394_v60 = vld [vmem:[%s24452_s7 + $0xb2] sm:$0xff]  ;;  %v11719_v11 = vshra.s32 %v24917_v6, 5  ;;  %v11722_v40 = vshra.s32 %v24933_v5, 5  ;;  %v11685_v10 = vand.u32 31, %v24921_v37 }
 0x64f   : >> { %19307 = vmatmul.mubr.bf16.gmra.mrb[4].mxu0 %v11343_v7  ;;  %19086 = vmatprep.mubr.bf16.mxu1 %v24726_v34  ;;  %v16395_v34 = vld [vmem:[%s24452_s7 + $0xba] sm:$0xff]  ;;  %v11714_v7 = vshra.s32 %v11650_v4, 5 }
 0x650   : >> { %19310 = vmatprep.mubr.bf16.mxu0 %v11344_v25  ;;  %v11347_v46 = vpack.c.bf16 %v16395_v34, %v16394_v60  ;;  %v11651_v25 = vadd.s32 %v24893_v30, %v11618_v50 }
 0x651   : >> { %v11746_v60 = vand.u32 31, %v11714_v7 }
 0x652   : >> { %v11683_v41 = vand.u32 31, %v11651_v25 }
 0x656   : >> { %19087 = vmatmul.mubr.bf16.gmra.mrb[24].mxu1 %v24738_v15  ;;  %v10116_v15 = vpack.c.bf16 %v16169_v43, %v16168_v1  ;;  %v11715_v43 = vshra.s32 %v11651_v25, 5 }
 0x657   : >> { %19311 = vmatmul.mubr.bf16.gmra.mrb[8].mxu0 %v11345_v14  ;;  %19090 = vmatprep.mubr.bf16.mxu1 %v24755_v13  ;;  %v16170_v13 = vld [vmem:[%s24452_s7 + $0xb1] sm:$0xff] }
 0x658   : >> { %19314 = vmatprep.mubr.bf16.mxu0 %v11346_v8  ;;  %v11682_v8 = vand.u32 31, %v11650_v4  ;;  %v11747_v61 = vand.u32 31, %v11715_v43  ;;  %v24995_v43 = vadd.s32 %v24893_v30, %v11630_v27 }
 0x65a   : >> { %vm11780_vm0 = vcmp.gt.s32.totalorder %v11682_v8, %v11746_v60  ;;  %vm24939_vm2 = vcmp.gt.s32.totalorder %v11683_v41, %v11747_v61 }
 0x65b   : >> { %v24969_v54 = vsel %vm24939_vm2, %v11683_v41, %v11747_v61  ;;  %v11631_v41 = vadd.s32 128, %v24889_v19  ;;  %v11634_v61 = vadd.s32 152, %v24889_v19 }
 0x65c   : >> { %vm11844_vm9 = vcmp.lt.s32.totalorder %v24969_v54, %v24930_v57 }
 0x65e   : >> { %19091 = vmatmul.mubr.bf16.gmra.mrb[28].mxu1 %v24767_v16  ;;  %v10117_v16 = vpack.c.bf16 %v16171_v39, %v16170_v13  ;;  %v11652_v13 = vadd.s32 %v24893_v30, %v11619_v9  ;;  %v24986_v9 = vadd.s32 %v24893_v30, %v11629_v45 }
 0x65f   : >> { %19315 = vmatmul.mubr.bf16.gmra.mrb[12].mxu0 %v11347_v46  ;;  %19126 = vmatprep.mubr.bf16.mxu1 %v10116_v15 }
 0x660   : >> { %19318 = vmatprep.mubr.bf16.mxu0 %v11348_v38  ;;  %v11713_v38 = vshra.s32 %v11649_v22, 5  ;;  %v11684_v29 = vand.u32 31, %v11652_v13 }
 0x666   : >> { %19127 = vmatmul.mubr.bf16.vlgmr.msra.gmra.mrb[16].mxu1 %v10117_v16  ;;  %v11681_v16 = vand.u32 31, %v11649_v22 }
 0x667   : >> { %19319 = vmatmul.mubr.bf16.gmra.mrb[16].mxu0 %v11349_v23  ;;  %19130 = vmatprep.mubr.bf16.mxu1 %v10118_v59  ;;  %v11745_v23 = vand.u32 31, %v11713_v38  ;;  %v11716_v59 = vshra.s32 %v11652_v13, 5 }
 0x668   : >> { %19322 = vmatprep.mubr.bf16.mxu0 %v11350_v0  ;;  %v24923_v0 = vsel %vm11780_vm0, %v11682_v8, %v11746_v60  ;;  %v11690_v8 = vand.u32 31, %v24933_v5  ;;  %v11754_v60 = vand.u32 31, %v11722_v40  ;;  %v11727_v5 = vshra.s32 %v24995_v43, 5 }
 0x669   : >> { %vm24947_vm3 = vcmp.gt.s32.totalorder %v11681_v16, %v11745_v23  ;;  %v11748_v62 = vand.u32 31, %v11716_v59  ;;  %v11726_v59 = vshra.s32 %v24986_v9, 5  ;;  %vm11843_vm11 = vcmp.lt.s32.totalorder %v24923_v0, %v24930_v57 }
 0x66a   : >> { %v24973_v7 = vsel %vm24947_vm3, %v11681_v16, %v11745_v23  ;;  %vm25024_vm8 = vcmp.gt.s32.totalorder %v11690_v8, %v11754_v60 }
 0x66b   : >> { %vm11784_vm5 = vcmp.gt.s32.totalorder %v11684_v29, %v11748_v62  ;;  %vm11842_vm15 = vcmp.lt.s32.totalorder %v24973_v7, %v24930_v57 }
 0x66e   : >> { %19131 = vmatmul.mubr.bf16.gmra.mrb[20].mxu1 %v10119_v18 }
 0x66f   : >> { %19323 = vmatmul.mubr.bf16.gmra.mrb[20].mxu0 %v11351_v35  ;;  %19134 = vmatprep.mubr.bf16.mxu1 %v10120_v47  ;;  %v11717_v47 = vshra.s32 %v24921_v37, 5 }
 0x670   : >> { %19326 = vmatprep.mubr.bf16.mxu0 %v11352_v21  ;;  %v11626_v21 = vadd.s32 88, %v24889_v19 }
 0x671   : >> { %v11749_v4 = vand.u32 31, %v11717_v47 }
 0x672   : >> { %v24964_v50 = vadd.s32 %v24893_v30, %v11626_v21 }
 0x673   : >> { %vm25001_vm7 = vcmp.gt.s32.totalorder %v11685_v10, %v11749_v4 }
 0x674   : >> { %v11723_v38 = vshra.s32 %v24964_v50, 5  ;;  %v11691_v35 = vand.u32 31, %v24964_v50  ;;  %v11695_v50 = vand.u32 31, %v24995_v43 }
 0x676   : >> { %19135 = vmatmul.mubr.bf16.gmra.mrb[24].mxu1 %v10121_v56  ;;  %v11687_v56 = vand.u32 31, %v24917_v6  ;;  %v11755_v47 = vand.u32 31, %v11723_v38 }
 0x677   : >> { %19327 = vmatmul.mubr.bf16.gmra.mrb[24].mxu0 %v11353_v26  ;;  %19138 = vmatprep.mubr.bf16.mxu1 %v24811_v33  ;;  %v11648_v33 = vadd.s32 %v24893_v30, %v24889_v19  ;;  %v11751_v26 = vand.u32 31, %v11719_v11  ;;  %v11632_v11 = vadd.s32 136, %v24889_v19 }
 0x678   : >> { %19330 = vmatprep.mubr.bf16.mxu0 %v11354_v36  ;;  %v24956_v36 = vadd.s32 %v24893_v30, %v11623_v51  ;;  %vm25080_vm10 = vcmp.gt.s32.totalorder %v11691_v35, %v11755_v47 }
 0x679   : >> { %v11712_v53 = vshra.s32 %v11648_v33, 5  ;;  %v11680_v46 = vand.u32 31, %v11648_v33  ;;  %v11628_v33 = vadd.s32 104, %v24889_v19  ;;  %vm24980_vm6 = vcmp.gt.s32.totalorder %v11687_v56, %v11751_v26 }
 0x67a   : >> { %v11720_v22 = vshra.s32 %v24956_v36, 5  ;;  %v25019_v16 = vsel %vm24980_vm6, %v11687_v56, %v11751_v26  ;;  %v11688_v23 = vand.u32 31, %v24956_v36  ;;  %v25040_v56 = vadd.s32 %v24893_v30, %v11634_v61 }
 0x67b   : >> { %v11744_v15 = vand.u32 31, %v11712_v53  ;;  %v25007_v13 = vadd.s32 %v24893_v30, %v11628_v33  ;;  %v11694_v26 = vand.u32 31, %v24986_v9  ;;  %v11758_v36 = vand.u32 31, %v11726_v59 }
 0x67c   : >> { %v25045_v40 = vadd.s32 %v24893_v30, %v11632_v11  ;;  %v11759_v33 = vand.u32 31, %v11727_v5  ;;  %v25061_v9 = vsel %vm25024_vm8, %v11690_v8, %v11754_v60 }
 0x67d   : >> { %vm11776_vm1 = vcmp.gt.s32.totalorder %v11680_v46, %v11744_v15  ;;  %v11725_v24 = vshra.s32 %v25007_v13, 5  ;;  %vm25092_vm0 = vcmp.gt.s32.totalorder %v11694_v26, %v11758_v36 }
 0x67e   : >> { %19139 = vmatmul.mubr.bf16.gmra.mrb[28].mxu1 %v24823_v28  ;;  %v11621_v28 = vadd.s32 48, %v24889_v19  ;;  %v24937_v18 = vsel %vm11776_vm1, %v11680_v46, %v11744_v15  ;;  %v24999_v46 = vsel %vm11784_vm5, %v11684_v29, %v11748_v62  ;;  %v25034_v62 = vadd.s32 %v24893_v30, %v11633_v44 }
 0x67f   : >> { %19331 = vmatmul.mubr.bf16.gmra.mrb[28].mxu0 %v11355_v32  ;;  %v11627_v32 = vadd.s32 96, %v24889_v19  ;;  %v11757_v38 = vand.u32 31, %v11725_v24  ;;  %vm11841_vm13 = vcmp.lt.s32.totalorder %v24937_v18, %v24930_v57  ;;  %v11729_v44 = vshra.s32 %v25045_v40, 5 }
 0x680   : >> { %v11654_v34 = vadd.s32 %v24893_v30, %v11621_v28  ;;  %v24976_v28 = vadd.s32 %v24893_v30, %v11624_v17  ;;  %v25037_v17 = vadd.s32 %v24893_v30, %v11631_v41  ;;  %v11730_v15 = vshra.s32 %v25034_v62, 5 }
 0x681   : >> { %v11635_v41 = vadd.s32 160, %v24889_v19  ;;  %vm25100_vm2 = vcmp.gt.s32.totalorder %v11695_v50, %v11759_v33  ;;  %v11698_v5 = vand.u32 31, %v25034_v62  ;;  %vm11845_vm5 = vcmp.lt.s32.totalorder %v24999_v46, %v24930_v57 }
 0x682   : >> { %v11718_v48 = vshra.s32 %v11654_v34, 5  ;;  %v11686_v2 = vand.u32 31, %v11654_v34  ;;  %v24992_v34 = vadd.s32 %v24893_v30, %v11627_v32  ;;  %v11689_v21 = vand.u32 31, %v24976_v28 }
 0x683   : >> { %v11696_v24 = vand.u32 31, %v25037_v17  ;;  %v11762_v63 = vand.u32 31, %v11730_v15  ;;  %v25124_v62 = vadd.s32 %v24893_v30, %v11635_v41  ;;  %v25136_v15 = vsel %vm25092_vm0, %v11694_v26, %v11758_v36 }
 0x684   : >> { %v11750_v49 = vand.u32 31, %v11718_v48  ;;  %v11721_v48 = vshra.s32 %v24976_v28, 5  ;;  %v11692_v45 = vand.u32 31, %v24992_v34  ;;  %v11637_v28 = vadd.s32 176, %v24889_v19 }
 0x685   : >> { %vm25159_vm6 = vcmp.gt.s32.totalorder %v11698_v5, %v11762_v63 }
 0x686   : >> { %vm11788_vm4 = vcmp.gt.s32.totalorder %v11686_v2, %v11750_v49  ;;  %v11753_v29 = vand.u32 31, %v11721_v48  ;;  %v25105_v51 = vadd.s32 %v24893_v30, %v11637_v28  ;;  %v25203_v41 = vsel %vm25159_vm6, %v11698_v5, %v11762_v63 }
 0x687   : >> { %v24978_v25 = vsel %vm11788_vm4, %v11686_v2, %v11750_v49  ;;  %v11752_v2 = vand.u32 31, %v11720_v22  ;;  %v11724_v49 = vshra.s32 %v24992_v34, 5  ;;  %v25057_v22 = vsel %vm25001_vm7, %v11685_v10, %v11749_v4 }
 0x688   : >> { %v11693_v34 = vand.u32 31, %v25007_v13  ;;  %v11728_v10 = vshra.s32 %v25037_v17, 5  ;;  %v11731_v4 = vshra.s32 %v25040_v56, 5  ;;  %vm25084_vm12 = vcmp.gt.s32.totalorder %v11689_v21, %v11753_v29 }
 0x689   : >> { %v11756_v27 = vand.u32 31, %v11724_v49  ;;  %vm25068_vm14 = vcmp.gt.s32.totalorder %v11688_v23, %v11752_v2  ;;  %v25128_v17 = vsel %vm25080_vm10, %v11691_v35, %v11755_v47  ;;  %vm11847_vm4 = vcmp.lt.s32.totalorder %v24978_v25, %v24930_v57 }
 0x68a   : >> { %vm25107_vm3 = vcmp.gt.s32.totalorder %v11693_v34, %v11757_v38  ;;  %v25120_v28 = vsel %vm25068_vm14, %v11688_v23, %v11752_v2  ;;  %v11734_v23 = vshra.s32 %v25105_v51, 5  ;;  %v25147_v35 = vsel %vm25100_vm2, %v11695_v50, %v11759_v33 }
 0x68b   : >> { %vm25096_vm1 = vcmp.gt.s32.totalorder %v11692_v45, %v11756_v27  ;;  %v25151_v47 = vsel %vm25107_vm3, %v11693_v34, %v11757_v38  ;;  %vm11848_vm14 = vcmp.lt.s32.totalorder %v25019_v16, %v24930_v57  ;;  %v11702_v33 = vand.u32 31, %v25105_v51 }
 0x68c   : >> { %v11732_v34 = vshra.s32 %v25124_v62, 5  ;;  %v11641_v13 = vadd.s32 208, %v24889_v19  ;;  %v11700_v63 = vand.u32 31, %v25124_v62  ;;  %vm11855_vm3 = vcmp.lt.s32.totalorder %v25136_v15, %v24930_v57 }
 0x68d   : >> { %vm11854_vm6 = vcmp.lt.s32.totalorder %v25151_v47, %v24930_v57 }
 0x68e   : >> { %v11764_v59 = vand.u32 31, %v11732_v34 }
 0x690   : >> { %vm25244_vm0 = vcmp.gt.s32.totalorder %v11700_v63, %v11764_v59 }
 0x6f9   : >> { %v24905_v14 = vpop.f32.mrb[0].mxu1 }
 0x6fa   : >> { %v24908_v1 = vpop.f32.mrb[1].mxu1 }
 0x6fb   : >> { %v24911_v12 = vpop.f32.mrb[2].mxu1 }
 0x6fc   : >> { %v24914_v39 = vpop.f32.mrb[3].mxu1 }
 0x701   : >> { %v24927_v42 = vpop.f32.mrb[4].mxu1 }
 0x702   : >> { %v24935_v20 = vpop.f32.mrb[5].mxu1 }
 0x703   : >> { %v24945_v31 = vpop.f32.mrb[6].mxu1 }
 0x704   : >> { %v24952_v3 = vpop.f32.mrb[7].mxu1 }
 0x709   : >> { %v24988_v58 = vpop.f32.mrb[8].mxu1 }
 0x70a   : >> { %v24997_v52 = vpop.f32.mrb[9].mxu1 }
 0x70b   : >> { %v25009_v6 = vpop.f32.mrb[10].mxu1 }
 0x70c   : >> { %v25015_v37 = vpop.f32.mrb[11].mxu1 }
 0x70d   : >> { %26904 = vst [vmem:[#allocation22_spill] sm:$0xff] %v25015_v37  ;;  %v11761_v37 = vand.u32 31, %v11729_v44 }
 0x711   : >> { %v25047_v32 = vpop.f32.mrb[12].mxu1 }
 0x712   : >> { %26907 = vst [vmem:[#allocation23_spill] sm:$0xff] %v25047_v32  ;;  %v25051_v53 = vpop.f32.mrb[13].mxu1  ;;  %v11697_v32 = vand.u32 31, %v25045_v40  ;;  %v25143_v40 = vsel %vm25096_vm1, %v11692_v45, %v11756_v27  ;;  %v11639_v27 = vadd.s32 192, %v24889_v19 }
 0x713   : >> { %26908 = vst [vmem:[#allocation24_spill] sm:$0xff] %v25051_v53  ;;  %v25064_v43 = vpop.f32.mrb[14].mxu1  ;;  %v11763_v53 = vand.u32 31, %v11731_v4  ;;  %v11636_v4 = vadd.s32 168, %v24889_v19 }
 0x714   : >> { %26909 = vst [vmem:[#allocation25_spill] sm:$0xff] %v25064_v43  ;;  %v25076_v8 = vpop.f32.mrb[15].mxu1  ;;  %v11699_v43 = vand.u32 31, %v25040_v56  ;;  %v25132_v56 = vsel %vm25084_vm12, %v11689_v21, %v11753_v29  ;;  %v25154_v21 = vadd.s32 %v24893_v30, %v11638_v55  ;;  %vm25174_vm10 = vcmp.gt.s32.totalorder %v11697_v32, %v11761_v37 }
 0x715   : >> { %26912 = vst [vmem:[#allocation26_spill] sm:$0xff] %v25076_v8  ;;  %v11760_v8 = vand.u32 31, %v11728_v10  ;;  %vm11846_vm12 = vcmp.lt.s32.totalorder %v25057_v22, %v24930_v57  ;;  %v25219_v54 = vsel %vm25174_vm10, %v11697_v32, %v11761_v37  ;;  %v25233_v32 = vadd.s32 %v24893_v30, %v11636_v4 }
 0x716   : >> { %vm25167_vm8 = vcmp.gt.s32.totalorder %v11699_v43, %v11763_v53  ;;  %v11735_v60 = vshra.s32 %v25154_v21, 5  ;;  %v11703_v5 = vand.u32 31, %v25154_v21  ;;  %vm11850_vm1 = vcmp.lt.s32.totalorder %v25132_v56, %v24930_v57 }
 0x717   : >> { %vm25163_vm7 = vcmp.gt.s32.totalorder %v11696_v24, %v11760_v8  ;;  %v11733_v25 = vshra.s32 %v25233_v32, 5 }
 0x718   : >> { %v25207_v18 = vsel %vm25163_vm7, %v11696_v24, %v11760_v8  ;;  %v11767_v37 = vand.u32 31, %v11735_v60  ;;  %v11642_v60 = vadd.s32 216, %v24889_v19 }
 0x719   : >> { %vm11857_vm10 = vcmp.lt.s32.totalorder %v25207_v18, %v24930_v57 }
 0x71a   : >> { %v19304_v2 = vpop.f32.mrb[0].mxu0  ;;  %vm25260_vm2 = vcmp.gt.s32.totalorder %v11703_v5, %v11767_v37 }
 0x71b   : >> { %v20326_v29 = vadd.f32 %v19304_v2, %v24905_v14  ;;  %v11455_v26 = vpop.f32.mrb[1].mxu0  ;;  %v25290_v51 = vsel %vm25260_vm2, %v11703_v5, %v11767_v37 }
 0x71c   : >> { %v20327_v55 = vadd.f32 %v11455_v26, %v24908_v1  ;;  %v19305_v14 = vpop.f32.mrb[2].mxu0  ;;  %v11766_v1 = vand.u32 31, %v11734_v23 }
 0x71d   : >> { %v11875_v38 = vsel %vm11843_vm11, %v20326_v29, 0.0  ;;  %v20328_v48 = vadd.f32 %v19305_v14, %v24911_v12  ;;  %v11458_v10 = vpop.f32.mrb[3].mxu0  ;;  %vm11851_vm11 = vcmp.lt.s32.totalorder %v25061_v9, %v24930_v57 }
 0x71e   : >> { %16439 = vst [vmem:[%s25188_s6 + $0x98] sm:$0xff] %v11875_v38  ;;  %v11873_v0 = vsel %vm11841_vm13, %v20327_v55, 0.0  ;;  %v20329_v12 = vadd.f32 %v11458_v10, %v24914_v39  ;;  %v25211_v39 = vsel %vm25167_vm8, %v11699_v43, %v11763_v53  ;;  %vm25228_vm13 = vcmp.gt.s32.totalorder %v11702_v33, %v11766_v1 }
 0x71f   : >> { %16437 = vst [vmem:[%s25188_s6 + $0x88] sm:$0xff] %v11873_v0  ;;  %v11876_v44 = vsel %vm11844_vm9, %v20328_v48, 0.0  ;;  %v11977_v11 = vmul.f32 %v11873_v0, %v11873_v0  ;;  %v25236_v43 = vadd.s32 %v24893_v30, %v11641_v13  ;;  %v11979_v24 = vmul.f32 %v11875_v38, %v11875_v38 }
 0x720   : >> { %16440 = vst [vmem:[%s25188_s6 + $0xa0] sm:$0xff] %v11876_v44  ;;  %v11874_v61 = vsel %vm11842_vm15, %v20329_v12, 0.0  ;;  %vm11849_vm9 = vcmp.lt.s32.totalorder %v25120_v28, %v24930_v57  ;;  %v11980_v29 = vmul.f32 %v11876_v44, %v11876_v44  ;;  %vm11852_vm15 = vcmp.lt.s32.totalorder %v25128_v17, %v24930_v57 }
 0x721   : >> { %16438 = vst [vmem:[%s25188_s6 + $0x90] sm:$0xff] %v11874_v61  ;;  %v11939_v8 = vadd.f32 %v11874_v61, %v11873_v0  ;;  %v11978_v49 = vmul.f32 %v11874_v61, %v11874_v61  ;;  %v25281_v12 = vsel %vm25244_vm0, %v11700_v63, %v11764_v59  ;;  %v11701_v61 = vand.u32 31, %v25233_v32 }
 0x722   : >> { %v19308_v53 = vpop.f32.mrb[4].mxu0  ;;  %v25296_v63 = vadd.s32 %v24893_v30, %v11639_v27  ;;  %vm11859_vm8 = vcmp.lt.s32.totalorder %v25203_v41, %v24930_v57  ;;  %vm11861_vm0 = vcmp.lt.s32.totalorder %v25281_v12, %v24930_v57  ;;  %v11644_v41 = vadd.s32 232, %v24889_v19 }
 0x723   : >> { %v11940_v62 = vadd.f32 %v11939_v8, %v11875_v38  ;;  %v12009_v23 = vadd.f32 %v11978_v49, %v11977_v11  ;;  %v20330_v2 = vadd.f32 %v19308_v53, %v24927_v42  ;;  %v11471_v21 = vpop.f32.mrb[5].mxu0 }
 0x724   : >> { %v20331_v26 = vadd.f32 %v11471_v21, %v24935_v20  ;;  %v19309_v36 = vpop.f32.mrb[6].mxu0  ;;  %v11736_v9 = vshra.s32 %v25296_v63, 5 }
 0x725   : >> { %v12010_v55 = vadd.f32 %v12009_v23, %v11979_v24  ;;  %v11879_v42 = vsel %vm11847_vm4, %v20330_v2, 0.0  ;;  %v11941_v14 = vadd.f32 %v11940_v62, %v11876_v44  ;;  %v20332_v20 = vadd.f32 %v19309_v36, %v24945_v31  ;;  %v11474_v50 = vpop.f32.mrb[7].mxu0 }
 0x726   : >> { %16443 = vst [vmem:[%s25188_s6 + $0xb8] sm:$0xff] %v11879_v42  ;;  %v11877_v34 = vsel %vm11845_vm5, %v20331_v26, 0.0  ;;  %v20333_v38 = vadd.f32 %v11474_v50, %v24952_v3  ;;  %v25277_v3 = vsel %vm25228_vm13, %v11702_v33, %v11766_v1  ;;  %v25292_v33 = vand.u32 31, %v11733_v25  ;;  %v26939_v26 = vld [vmem:[#allocation22_spill] sm:$0xff] }
 0x727   : >> { %16441 = vst [vmem:[%s25188_s6 + $0xa8] sm:$0xff] %v11877_v34  ;;  %v11942_v31 = vadd.f32 %v11941_v14, %v11877_v34  ;;  %v11981_v10 = vmul.f32 %v11877_v34, %v11877_v34  ;;  %v12011_v4 = vadd.f32 %v12010_v55, %v11980_v29  ;;  %v11880_v0 = vsel %vm11848_vm14, %v20332_v20, 0.0 }
 0x728   : >> { %16444 = vst [vmem:[%s25188_s6 + $0xc0] sm:$0xff] %v11880_v0  ;;  %v11878_v46 = vsel %vm11846_vm12, %v20333_v38, 0.0  ;;  %v11738_v1 = vshra.s32 %v25236_v43, 5  ;;  %v11983_v59 = vmul.f32 %v11879_v42, %v11879_v42  ;;  %vm11853_vm4 = vcmp.lt.s32.totalorder %v25143_v40, %v24930_v57 }
 0x729   : >> { %v12012_v13 = vadd.f32 %v12011_v4, %v11981_v10  ;;  %16442 = vst [vmem:[%s25188_s6 + $0xb0] sm:$0xff] %v11878_v46  ;;  %v11943_v16 = vadd.f32 %v11942_v31, %v11878_v46  ;;  %v11982_v44 = vmul.f32 %v11878_v46, %v11878_v46  ;;  %v11984_v7 = vmul.f32 %v11880_v0, %v11880_v0 }
 0x72a   : >> { %v19312_v22 = vpop.f32.mrb[8].mxu0  ;;  %vm11856_vm5 = vcmp.lt.s32.totalorder %v25147_v35, %v24930_v57  ;;  %v11706_v24 = vand.u32 31, %v25236_v43  ;;  %v25306_v62 = vadd.s32 %v24893_v30, %v11642_v60  ;;  %v11770_v45 = vand.u32 31, %v11738_v1  ;;  %v26945_v1 = vld [vmem:[#allocation24_spill] sm:$0xff] }
 0x72b   : >> { %v11944_v11 = vadd.f32 %v11943_v16, %v11879_v42  ;;  %v12013_v8 = vadd.f32 %v12012_v13, %v11982_v44  ;;  %v20334_v49 = vadd.f32 %v19312_v22, %v24988_v58  ;;  %v11487_v53 = vpop.f32.mrb[9].mxu0  ;;  %v11704_v14 = vand.u32 31, %v25296_v63  ;;  %v26944_v13 = vld [vmem:[#allocation23_spill] sm:$0xff] }
 0x72c   : >> { %v20335_v5 = vadd.f32 %v11487_v53, %v24997_v52  ;;  %v19313_v37 = vpop.f32.mrb[10].mxu0  ;;  %v11739_v20 = vshra.s32 %v25306_v62, 5  ;;  %v11640_v50 = vadd.s32 200, %v24889_v19  ;;  %vm25335_vm7 = vcmp.gt.s32.totalorder %v11701_v61, %v25292_v33 }
 0x72d   : >> { %v12014_v23 = vadd.f32 %v12013_v8, %v11983_v59  ;;  %v11883_v58 = vsel %vm11851_vm11, %v20334_v49, 0.0  ;;  %v11945_v2 = vadd.f32 %v11944_v11, %v11880_v0  ;;  %v20336_v21 = vadd.f32 %v19313_v37, %v25009_v6  ;;  %v11490_v52 = vpop.f32.mrb[11].mxu0 }
 0x72e   : >> { %16447 = vst [vmem:[%s25188_s6 + $0xd8] sm:$0xff] %v11883_v58  ;;  %v11881_v29 = vsel %vm11849_vm9, %v20335_v5, 0.0  ;;  %v20337_v36 = vadd.f32 %v11490_v52, %v26939_v26  ;;  %vm25343_vm14 = vcmp.gt.s32.totalorder %v11706_v24, %v11770_v45  ;;  %v11768_v31 = vand.u32 31, %v11736_v9  ;;  %v26946_v5 = vld [vmem:[#allocation25_spill] sm:$0xff] }
 0x72f   : >> { %16445 = vst [vmem:[%s25188_s6 + $0xc8] sm:$0xff] %v11881_v29  ;;  %v11946_v27 = vadd.f32 %v11945_v2, %v11881_v29  ;;  %v11985_v55 = vmul.f32 %v11881_v29, %v11881_v29  ;;  %v12015_v42 = vadd.f32 %v12014_v23, %v11984_v7  ;;  %v11884_v6 = vsel %vm11852_vm15, %v20336_v21, 0.0  ;;  %v26947_v2 = vld [vmem:[#allocation26_spill] sm:$0xff] }
 0x730   : >> { %16448 = vst [vmem:[%s25188_s6 + $0xe0] sm:$0xff] %v11884_v6  ;;  %v11882_v28 = vsel %vm11850_vm1, %v20337_v36, 0.0  ;;  %v11707_v10 = vand.u32 31, %v25306_v62  ;;  %v11645_v4 = vadd.s32 240, %v24889_v19  ;;  %v11987_v0 = vmul.f32 %v11883_v58, %v11883_v58 }
 0x731   : >> { %v12016_v34 = vadd.f32 %v12015_v42, %v11985_v55  ;;  %16446 = vst [vmem:[%s25188_s6 + $0xd0] sm:$0xff] %v11882_v28  ;;  %v11947_v38 = vadd.f32 %v11946_v27, %v11882_v28  ;;  %v11986_v48 = vmul.f32 %v11882_v28, %v11882_v28  ;;  %v11988_v22 = vmul.f32 %v11884_v6, %v11884_v6 }
 0x732   : >> { %v19316_v25 = vpop.f32.mrb[12].mxu0  ;;  %vm11860_vm12 = vcmp.lt.s32.totalorder %v25211_v39, %v24930_v57  ;;  %v25355_v11 = vand.u32 31, %v11739_v20  ;;  %v25358_v8 = vadd.s32 %v24893_v30, %v11640_v50  ;;  %vm11858_vm11 = vcmp.lt.s32.totalorder %v25219_v54, %v24930_v57 }
 0x733   : >> { %v11948_v46 = vadd.f32 %v11947_v38, %v11883_v58  ;;  %v12017_v60 = vadd.f32 %v12016_v34, %v11986_v48  ;;  %v20338_v16 = vadd.f32 %v19316_v25, %v26944_v13  ;;  %v11503_v44 = vpop.f32.mrb[13].mxu0  ;;  %vm25371_vm13 = vcmp.gt.s32.totalorder %v11704_v14, %v11768_v31 }
 0x734   : >> { %v20339_v63 = vadd.f32 %v11503_v44, %v26945_v1  ;;  %v19317_v59 = vpop.f32.mrb[14].mxu0  ;;  %v25376_v15 = vadd.s32 %v24893_v30, %v11645_v4  ;;  %v25391_v27 = vsel %vm25335_vm7, %v11701_v61, %v25292_v33  ;;  %v25397_v55 = vsel %vm25343_vm14, %v11706_v24, %v11770_v45 }
 0x735   : >> { %v12018_v49 = vadd.f32 %v12017_v60, %v11987_v0  ;;  %v11887_v53 = vsel %vm11855_vm3, %v20338_v16, 0.0  ;;  %v11949_v7 = vadd.f32 %v11948_v46, %v11884_v6  ;;  %v20340_v37 = vadd.f32 %v19317_v59, %v26946_v5  ;;  %v11506_v23 = vpop.f32.mrb[15].mxu0 }
 0x736   : >> { %16451 = vst [vmem:[%s25188_s6 + $0xf8] sm:$0xff] %v11887_v53  ;;  %v11885_v58 = vsel %vm11853_vm4, %v20339_v63, 0.0  ;;  %v20341_v21 = vadd.f32 %v11506_v23, %v26947_v2  ;;  %v11737_v35 = vshra.s32 %v25358_v8, 5  ;;  %v11643_v20 = vadd.s32 224, %v24889_v19 }
 0x737   : >> { %16449 = vst [vmem:[%s25188_s6 + $0xe8] sm:$0xff] %v11885_v58  ;;  %v11950_v29 = vadd.f32 %v11949_v7, %v11885_v58  ;;  %v11989_v26 = vmul.f32 %v11885_v58, %v11885_v58  ;;  %v12019_v36 = vadd.f32 %v12018_v49, %v11988_v22  ;;  %v11888_v9 = vsel %vm11856_vm5, %v20340_v37, 0.0 }
 0x738   : >> { %16452 = vst [vmem:[%s25188_s6 + $0x100] sm:$0xff] %v11888_v9  ;;  %v11886_v40 = vsel %vm11854_vm6, %v20341_v21, 0.0  ;;  %vm11863_vm9 = vcmp.lt.s32.totalorder %v25277_v3, %v24930_v57  ;;  %v25406_v43 = vsel %vm25371_vm13, %v11704_v14, %v11768_v31  ;;  %vm25411_vm15 = vcmp.gt.s32.totalorder %v11707_v10, %v25355_v11 }
 0x739   : >> { %v12020_v42 = vadd.f32 %v12019_v36, %v11989_v26  ;;  %16450 = vst [vmem:[%s25188_s6 + $0xf0] sm:$0xff] %v11886_v40  ;;  %v11951_v6 = vadd.f32 %v11950_v29, %v11886_v40  ;;  %v11990_v47 = vmul.f32 %v11886_v40, %v11886_v40  ;;  %v19128_v28 = vpop.f32.mrb[16].mxu1  ;;  %v11705_v33 = vand.u32 31, %v25358_v8 }
 0x73a   : >> { %v19320_v32 = vpop.f32.mrb[16].mxu0  ;;  %v10287_v50 = vpop.f32.mrb[17].mxu1  ;;  %v11742_v24 = vshra.s32 %v25376_v15, 5  ;;  %v11991_v45 = vmul.f32 %v11887_v53, %v11887_v53  ;;  %v11992_v14 = vmul.f32 %v11888_v9, %v11888_v9  ;;  %vm11864_vm1 = vcmp.lt.s32.totalorder %v25290_v51, %v24930_v57 }
 0x73b   : >> { %v11952_v34 = vadd.f32 %v11951_v6, %v11887_v53  ;;  %v12021_v38 = vadd.f32 %v12020_v42, %v11990_v47  ;;  %v20342_v48 = vadd.f32 %v19320_v32, %v19128_v28  ;;  %v11519_v17 = vpop.f32.mrb[17].mxu0  ;;  %v19129_v25 = vpop.f32.mrb[18].mxu1  ;;  %v11769_v0 = vand.u32 31, %v11737_v35 }
 0x73c   : >> { %v20343_v56 = vadd.f32 %v11519_v17, %v10287_v50  ;;  %v19321_v31 = vpop.f32.mrb[18].mxu0  ;;  %v10290_v4 = vpop.f32.mrb[19].mxu1  ;;  %v11646_v46 = vadd.s32 248, %v24889_v19  ;;  %vm11862_vm2 = vcmp.lt.s32.totalorder %v25391_v27, %v24930_v57  ;;  %v25432_v59 = vadd.s32 %v24893_v30, %v11643_v20 }
 0x73d   : >> { %v12022_v60 = vadd.f32 %v12021_v38, %v11991_v45  ;;  %v11891_v13 = vsel %vm11859_vm8, %v20342_v48, 0.0  ;;  %v11953_v16 = vadd.f32 %v11952_v34, %v11888_v9  ;;  %v20344_v44 = vadd.f32 %v19321_v31, %v19129_v25  ;;  %v11522_v22 = vpop.f32.mrb[19].mxu0 }
 0x73e   : >> { %16455 = vst [vmem:[%s25188_s6 + $0x118] sm:$0xff] %v11891_v13  ;;  %v11889_v1 = vsel %vm11857_vm10, %v20343_v56, 0.0  ;;  %v20345_v63 = vadd.f32 %v11522_v22, %v10290_v4  ;;  %v25448_v5 = vsel %vm25411_vm15, %v11707_v10, %v25355_v11  ;;  %v11710_v19 = vand.u32 31, %v25376_v15 }
 0x73f   : >> { %16453 = vst [vmem:[%s25188_s6 + $0x108] sm:$0xff] %v11889_v1  ;;  %v11954_v8 = vadd.f32 %v11953_v16, %v11889_v1  ;;  %v11993_v49 = vmul.f32 %v11889_v1, %v11889_v1  ;;  %v12023_v53 = vadd.f32 %v12022_v60, %v11992_v14  ;;  %v11892_v7 = vsel %vm11860_vm12, %v20344_v44, 0.0 }
 0x740   : >> { %16456 = vst [vmem:[%s25188_s6 + $0x120] sm:$0xff] %v11892_v7  ;;  %v11890_v18 = vsel %vm11858_vm11, %v20345_v63, 0.0  ;;  %v25452_v37 = vadd.s32 %v24893_v30, %v11646_v46  ;;  %vm25455_vm3 = vcmp.gt.s32.totalorder %v11705_v33, %v11769_v0  ;;  %vm11867_vm4 = vcmp.lt.s32.totalorder %v25397_v55, %v24930_v57 }
 0x741   : >> { %v12024_v23 = vadd.f32 %v12023_v53, %v11993_v49  ;;  %16454 = vst [vmem:[%s25188_s6 + $0x110] sm:$0xff] %v11890_v18  ;;  %v11955_v39 = vadd.f32 %v11954_v8, %v11890_v18  ;;  %v11994_v58 = vmul.f32 %v11890_v18, %v11890_v18  ;;  %v19132_v2 = vpop.f32.mrb[20].mxu1  ;;  %v11774_v10 = vand.u32 31, %v11742_v24 }
 0x742   : >> { %v19324_v21 = vpop.f32.mrb[20].mxu0  ;;  %v10303_v62 = vpop.f32.mrb[21].mxu1  ;;  %v11708_v11 = vand.u32 31, %v25432_v59  ;;  %v11740_v52 = vshra.s32 %v25432_v59, 5  ;;  %v25464_v29 = vadd.s32 %v24893_v30, %v11644_v41  ;;  %v11995_v26 = vmul.f32 %v11891_v13, %v11891_v13 }
 0x743   : >> { %v11956_v36 = vadd.f32 %v11955_v39, %v11891_v13  ;;  %v12025_v9 = vadd.f32 %v12024_v23, %v11994_v58  ;;  %v20346_v40 = vadd.f32 %v19324_v21, %v19132_v2  ;;  %v11535_v35 = vpop.f32.mrb[21].mxu0  ;;  %v19133_v42 = vpop.f32.mrb[22].mxu1  ;;  %vm11865_vm5 = vcmp.lt.s32.totalorder %v25406_v43, %v24930_v57 }
 0x744   : >> { %v11996_v6 = vmul.f32 %v11892_v7, %v11892_v7  ;;  %v20347_v47 = vadd.f32 %v11535_v35, %v10303_v62  ;;  %v19325_v28 = vpop.f32.mrb[22].mxu0  ;;  %v10306_v20 = vpop.f32.mrb[23].mxu1  ;;  %v25470_v32 = vsel %vm25455_vm3, %v11705_v33, %v11769_v0  ;;  %v11743_v30 = vshra.s32 %v25452_v37, 5 }
 0x745   : >> { %v12026_v50 = vadd.f32 %v12025_v9, %v11995_v26  ;;  %v11895_v61 = vsel %vm11863_vm9, %v20346_v40, 0.0  ;;  %v11957_v24 = vadd.f32 %v11956_v36, %v11892_v7  ;;  %v20348_v45 = vadd.f32 %v19325_v28, %v19133_v42  ;;  %v11538_v34 = vpop.f32.mrb[23].mxu0 }
 0x746   : >> { %16459 = vst [vmem:[%s25188_s6 + $0x138] sm:$0xff] %v11895_v61  ;;  %v11893_v38 = vsel %vm11861_vm0, %v20347_v47, 0.0  ;;  %v20349_v48 = vadd.f32 %v11538_v34, %v10306_v20  ;;  %v11772_v33 = vand.u32 31, %v11740_v52  ;;  %v11741_v17 = vshra.s32 %v25464_v29, 5 }
 0x747   : >> { %16457 = vst [vmem:[%s25188_s6 + $0x128] sm:$0xff] %v11893_v38  ;;  %v11958_v25 = vadd.f32 %v11957_v24, %v11893_v38  ;;  %v11997_v14 = vmul.f32 %v11893_v38, %v11893_v38  ;;  %v12027_v56 = vadd.f32 %v12026_v50, %v11996_v6  ;;  %v11896_v3 = vsel %vm11864_vm1, %v20348_v45, 0.0 }
 0x748   : >> { %16460 = vst [vmem:[%s25188_s6 + $0x140] sm:$0xff] %v11896_v3  ;;  %v11894_v31 = vsel %vm11862_vm2, %v20349_v48, 0.0  ;;  %vm11868_vm6 = vcmp.lt.s32.totalorder %v25448_v5, %v24930_v57  ;;  %v11711_v12 = vand.u32 31, %v25452_v37  ;;  %v11775_v4 = vand.u32 31, %v11743_v30 }
 0x749   : >> { %v12028_v0 = vadd.f32 %v12027_v56, %v11997_v14  ;;  %16458 = vst [vmem:[%s25188_s6 + $0x130] sm:$0xff] %v11894_v31  ;;  %v11959_v46 = vadd.f32 %v11958_v25, %v11894_v31  ;;  %v11998_v60 = vmul.f32 %v11894_v31, %v11894_v31  ;;  %v19136_v13 = vpop.f32.mrb[24].mxu1  ;;  %vm25495_vm7 = vcmp.gt.s32.totalorder %v11710_v19, %v11774_v10 }
 0x74a   : >> { %v19328_v16 = vpop.f32.mrb[24].mxu0  ;;  %v10319_v27 = vpop.f32.mrb[25].mxu1  ;;  %vm11866_vm8 = vcmp.lt.s32.totalorder %v25470_v32, %v24930_v57  ;;  %vm25503_vm14 = vcmp.gt.s32.totalorder %v11708_v11, %v11772_v33  ;;  %v11709_v22 = vand.u32 31, %v25464_v29  ;;  %v11773_v1 = vand.u32 31, %v11741_v17 }
 0x74b   : >> { %v11999_v63 = vmul.f32 %v11895_v61, %v11895_v61  ;;  %v11960_v41 = vadd.f32 %v11959_v46, %v11895_v61  ;;  %v12029_v8 = vadd.f32 %v12028_v0, %v11998_v60  ;;  %v20350_v49 = vadd.f32 %v19328_v16, %v19136_v13  ;;  %v11551_v53 = vpop.f32.mrb[25].mxu0  ;;  %v19137_v7 = vpop.f32.mrb[26].mxu1 }
 0x74c   : >> { %v12000_v18 = vmul.f32 %v11896_v3, %v11896_v3  ;;  %v20351_v37 = vadd.f32 %v11551_v53, %v10319_v27  ;;  %v19329_v23 = vpop.f32.mrb[26].mxu0  ;;  %v10322_v39 = vpop.f32.mrb[27].mxu1  ;;  %v11837_v58 = vsel %vm25495_vm7, %v11710_v19, %v11774_v10  ;;  %vm25512_vm10 = vcmp.gt.s32.totalorder %v11711_v12, %v11775_v4 }
 0x74d   : >> { %v12030_v54 = vadd.f32 %v12029_v8, %v11999_v63  ;;  %v11899_v21 = vsel %vm11867_vm4, %v20350_v49, 0.0  ;;  %v11961_v62 = vadd.f32 %v11960_v41, %v11896_v3  ;;  %v20352_v52 = vadd.f32 %v19329_v23, %v19137_v7  ;;  %v11554_v29 = vpop.f32.mrb[27].mxu0 }
 0x74e   : >> { %16463 = vst [vmem:[%s25188_s6 + $0x158] sm:$0xff] %v11899_v21  ;;  %v11897_v15 = vsel %vm11865_vm5, %v20351_v37, 0.0  ;;  %v20353_v19 = vadd.f32 %v11554_v29, %v10322_v39  ;;  %v11833_v10 = vsel %vm25503_vm14, %v11708_v11, %v11772_v33  ;;  %vm11834_vm12 = vcmp.gt.s32.totalorder %v11709_v22, %v11773_v1 }
 0x74f   : >> { %16461 = vst [vmem:[%s25188_s6 + $0x148] sm:$0xff] %v11897_v15  ;;  %v11962_v26 = vadd.f32 %v11961_v62, %v11897_v15  ;;  %v12001_v55 = vmul.f32 %v11897_v15, %v11897_v15  ;;  %v12031_v36 = vadd.f32 %v12030_v54, %v12000_v18  ;;  %v11900_v9 = vsel %vm11868_vm6, %v20352_v52, 0.0  ;;  %v26960_v54 = vld [vmem:[#allocation21_spill] sm:$0xff]  ;;  %v26961_v52 = vld [vmem:[#allocation20_spill] sm:$0xff] }
 0x750   : >> { %16464 = vst [vmem:[%s25188_s6 + $0x160] sm:$0xff] %v11900_v9  ;;  %v11898_v43 = vsel %vm11866_vm8, %v20353_v19, 0.0  ;;  %v11839_v59 = vsel %vm25512_vm10, %v11711_v12, %v11775_v4  ;;  %v11835_v6 = vsel %vm11834_vm12, %v11709_v22, %v11773_v1  ;;  %vm11871_vm11 = vcmp.lt.s32.totalorder %v11837_v58, %v24930_v57 }
 0x751   : >> { %v12032_v40 = vadd.f32 %v12031_v36, %v12001_v55  ;;  %16462 = vst [vmem:[%s25188_s6 + $0x150] sm:$0xff] %v11898_v43  ;;  %v11963_v11 = vadd.f32 %v11962_v26, %v11898_v43  ;;  %v12002_v35 = vmul.f32 %v11898_v43, %v11898_v43  ;;  %v19140_v42 = vpop.f32.mrb[28].mxu1  ;;  %vm11869_vm13 = vcmp.lt.s32.totalorder %v11833_v10, %v24930_v57 }
 0x752   : >> { %v19332_v47 = vpop.f32.mrb[28].mxu0  ;;  %v10335_v28 = vpop.f32.mrb[29].mxu1  ;;  %v12003_v5 = vmul.f32 %v11899_v21, %v11899_v21  ;;  %v12004_v24 = vmul.f32 %v11900_v9, %v11900_v9  ;;  %vm11872_vm9 = vcmp.lt.s32.totalorder %v11839_v59, %v24930_v57  ;;  %vm11870_vm15 = vcmp.lt.s32.totalorder %v11835_v6, %v24930_v57 }
 0x753   : >> { %v11964_v20 = vadd.f32 %v11963_v11, %v11899_v21  ;;  %v12033_v32 = vadd.f32 %v12032_v40, %v12002_v35  ;;  %v20354_v30 = vadd.f32 %v19332_v47, %v19140_v42  ;;  %v11567_v50 = vpop.f32.mrb[29].mxu0  ;;  %v19141_v61 = vpop.f32.mrb[30].mxu1 }
 0x754   : >> { %v20355_v45 = vadd.f32 %v11567_v50, %v10335_v28  ;;  %v19333_v34 = vpop.f32.mrb[30].mxu0  ;;  %v10338_v38 = vpop.f32.mrb[31].mxu1 }
 0x755   : >> { %v12034_v48 = vadd.f32 %v12033_v32, %v12003_v5  ;;  %v11903_v33 = vsel %vm11871_vm11, %v20354_v30, 0.0  ;;  %v11965_v17 = vadd.f32 %v11964_v20, %v11900_v9  ;;  %v20356_v25 = vadd.f32 %v19333_v34, %v19141_v61  ;;  %v11570_v14 = vpop.f32.mrb[31].mxu0 }
 0x756   : >> { %16467 = vst [vmem:[%s25188_s6 + $0x178] sm:$0xff] %v11903_v33  ;;  %v11901_v56 = vsel %vm11869_vm13, %v20355_v45, 0.0  ;;  %v20357_v3 = vadd.f32 %v11570_v14, %v10338_v38  ;;  %v12007_v16 = vmul.f32 %v11903_v33, %v11903_v33 }
 0x757   : >> { %16465 = vst [vmem:[%s25188_s6 + $0x168] sm:$0xff] %v11901_v56  ;;  %v11966_v31 = vadd.f32 %v11965_v17, %v11901_v56  ;;  %v12005_v12 = vmul.f32 %v11901_v56, %v11901_v56  ;;  %v12035_v4 = vadd.f32 %v12034_v48, %v12004_v24  ;;  %v11904_v0 = vsel %vm11872_vm9, %v20356_v25, 0.0 }
 0x758   : >> { %16468 = vst [vmem:[%s25188_s6 + $0x180] sm:$0xff] %v11904_v0  ;;  %v11902_v46 = vsel %vm11870_vm15, %v20357_v3, 0.0  ;;  %v12008_v22 = vmul.f32 %v11904_v0, %v11904_v0 }
 0x759   : >> { %v12036_v60 = vadd.f32 %v12035_v4, %v12005_v12  ;;  %16466 = vst [vmem:[%s25188_s6 + $0x170] sm:$0xff] %v11902_v46  ;;  %v11967_v13 = vadd.f32 %v11966_v31, %v11902_v46  ;;  %v12006_v51 = vmul.f32 %v11902_v46, %v11902_v46 }
 0x75b   : >> { %v11968_v27 = vadd.f32 %v11967_v13, %v11903_v33  ;;  %v12037_v44 = vadd.f32 %v12036_v60, %v12006_v51 }
 0x75d   : >> { %v11969_v1 = vadd.f32 %v11968_v27, %v11904_v0  ;;  %v12038_v63 = vadd.f32 %v12037_v44, %v12007_v16 }
 0x75f   : >> { %v11970_v57 = vrot.slane %v11969_v1, 4  ;;  %v12039_v41 = vadd.f32 %v12038_v63, %v12008_v22 }
 0x761   : >> { %v11971_v8 = vadd.f32 %v11970_v57, %v11969_v1  ;;  %v12040_v49 = vrot.slane %v12039_v41, 4 }
 0x763   : >> { %v11972_v53 = vrot.slane %v11971_v8, 2  ;;  %v12041_v7 = vadd.f32 %v12040_v49, %v12039_v41 }
 0x765   : >> { %v11973_v18 = vadd.f32 %v11972_v53, %v11971_v8  ;;  %v12042_v37 = vrot.slane %v12041_v7, 2 }
 0x767   : >> { %v11974_v23 = vrot.slane %v11973_v18, 1  ;;  %v12043_v39 = vadd.f32 %v12042_v37, %v12041_v7 }
 0x769   : >> { %v11975_v58 = vadd.f32 %v11974_v23, %v11973_v18  ;;  %v12044_v2 = vrot.slane %v12043_v39, 1  ;;  %8902 = sbr.rel (!%p8900_p11) target bundleno = 1349 (0x545), region = 218 }
 0x76b   : >> { %v11976_v21 = vadd.f32 %v26960_v54, %v11975_v58   ;;  %v12045_v62 = vadd.f32 %v12044_v2, %v12043_v39 }
 0x76d   : >> { %v12046_v29 = vadd.f32 %v26961_v52, %v12045_v62   ;;  %v26963_v63 = vmov %v11976_v21  ;;  %12047 = vst [vmem:[#allocation3] sm:$0x1] (%p8900_p11), %v11976_v21 }
 0x76f   : >> { %v26962_v55 = vmov %v12046_v29  ;;  %12048 = vst [vmem:[#allocation3 + $0x1] sm:$0x1] (%p8900_p11), %v12046_v29 }
 0x770 PF: > { %p16469_p1 = scmp.ne.s32.totalorder %s22432_s16, 2 }
 0x771   : > { %v25560_v15 = vmov (!%p16469_p1), 0.0   ;;  %v25562_v19 = vmov (!%p16469_p1), 0.0   ;;  %s25564_s29 = smov (!%p16469_p1), 0  }
 0x772   : > { %12052 = sbr.rel (%p16469_p1) target bundleno = 2308 (0x904), region = 70 }
 0x779 LB: >> { %v21114_v10 = vld [vmem:[%s21574_s9 + $0x40] sm:$0xff]   ;;  %v21116_v55 = vld [vmem:[%s21574_s9 + $0x48] sm:$0xff]   ;;  %v21118_v9 = vld [vmem:[%s21574_s9 + $0x50] sm:$0xff]   ;;  %s25582_s16 = sshll.u32 %s21402_s29, 8  ;;  %s14461_s15 = smul.u32 2320, %s22443_s10  ;;  %s21402_s29 = sphi %s25564_s29, %s12058_s29   ;;  %v21398_v19 = vphi %v25562_v19, %v27017_v19   ;;  %v21394_v15 = vphi %v25560_v15, %v27016_v15  }
 0x77a   : >> { %v21115_v26 = vld [vmem:[%s21574_s9 + $0x140] sm:$0xff]   ;;  %19334 = vmatprep.subr.bf16.mxu1 %v21114_v10  ;;  %v21117_v36 = vld [vmem:[%s21574_s9 + $0x148] sm:$0xff]   ;;  %v21119_v43 = vld [vmem:[%s21574_s9 + $0x150] sm:$0xff]   ;;  %s12062_s13 = sadd.s32 %s25582_s16, %s22445_s28  ;;  %s12058_s29 = sadd.s32 1, %s21402_s29  }
 0x77b   : >> { %19430 = vmatprep.subr.bf16.mxu0 %v21115_v26  ;;  %19335 = vmatpush3.bf16.msra.mxu1 %v21114_v10  ;;  %v21120_v59 = vld [vmem:[%s21574_s9 + $0x58] sm:$0xff]   ;;  %v21122_v11 = vld [vmem:[%s21574_s9 + $0x60] sm:$0xff]   ;;  %v21124_v42 = vld [vmem:[%s21574_s9 + $0x68] sm:$0xff]   ;;  %s25591_s14 = scalar_lea.vmem [#allocation2], %s12062_s13  ;;  %s25959_s17 = sadd.s32 %s25582_s16, %s14461_s15 }
 0x77c   : >> { %19431 = vmatpush3.bf16.msra.mxu0 %v21115_v26  ;;  %19336 = vmatprep.subr.bf16.mxu1 %v21116_v55  ;;  %v21121_v40 = vld [vmem:[%s21574_s9 + $0x158] sm:$0xff]   ;;  %v21123_v35 = vld [vmem:[%s21574_s9 + $0x160] sm:$0xff]   ;;  %v21125_v5 = vld [vmem:[%s21574_s9 + $0x168] sm:$0xff]   ;;  %s26030_s19 = scalar_lea.vmem [#allocation2], %s25959_s17  ;;  %p12055_p3 = scmp.ge.s32.totalorder %s12058_s29, 8  }
 0x77d   : >> { %19432 = vmatprep.subr.bf16.mxu0 %v21117_v36  ;;  %v16472_v6 = vld [vmem:[%s25591_s14 + $0x1] sm:$0xff]  ;;  %v16473_v47 = vld [vmem:[%s25591_s14 + $0x9] sm:$0xff]  ;;  %v21126_v50 = vld [vmem:[%s21574_s9 + $0x70] sm:$0xff]  }
 0x77e   : >> { %v16537_v28 = vld [vmem:[%s25591_s14 + $0x20] sm:$0xff]  ;;  %v12162_v20 = vpack.c.bf16 %v16473_v47, %v16472_v6  ;;  %v16538_v32 = vld [vmem:[%s25591_s14 + $0x28] sm:$0xff]  ;;  %v21127_v61 = vld [vmem:[%s21574_s9 + $0x170] sm:$0xff]  }
 0x77f   : >> { %19337 = vmatpush3.bf16.msra.mxu1 %v21116_v55  ;;  %v25598_v30 = vpack.c.bf16 %v16538_v32, %v16537_v28  ;;  %v21128_v24 = vld [vmem:[%s21574_s9 + $0x78] sm:$0xff]   ;;  %v16474_v34 = vld [vmem:[%s25591_s14 + $0x11] sm:$0xff]  ;;  %v21130_v48 = vld [vmem:[%s21574_s9] sm:$0xff]  }
 0x780   : >> { %19433 = vmatpush3.bf16.msra.mxu0 %v21117_v36  ;;  %19338 = vmatprep.subr.bf16.mxu1 %v21118_v9  ;;  %v21129_v45 = vld [vmem:[%s21574_s9 + $0x178] sm:$0xff]   ;;  %v16539_v33 = vld [vmem:[%s25591_s14 + $0x30] sm:$0xff]  ;;  %v16540_v17 = vld [vmem:[%s25591_s14 + $0x38] sm:$0xff] }
 0x781   : >> { %19434 = vmatprep.subr.bf16.mxu0 %v21119_v43  ;;  %19350 = vmatprep.mubr.bf16.mxu1 %v12162_v20  ;;  %v16475_v38 = vld [vmem:[%s25591_s14 + $0x19] sm:$0xff]  ;;  %v21131_v25 = vld [vmem:[%s21574_s9 + $0x180] sm:$0xff]   ;;  %v25615_v4 = vpack.c.bf16 %v16540_v17, %v16539_v33  ;;  %v16478_v60 = vld [vmem:[%s25591_s14 + $0x31] sm:$0xff] }
 0x782   : >> { %19446 = vmatprep.mubr.bf16.mxu0 %v25598_v30  ;;  %v16476_v14 = vld [vmem:[%s25591_s14 + $0x21] sm:$0xff]  ;;  %v16477_v56 = vld [vmem:[%s25591_s14 + $0x29] sm:$0xff]  ;;  %v12163_v3 = vpack.c.bf16 %v16475_v38, %v16474_v34  ;;  %v16479_v13 = vld [vmem:[%s25591_s14 + $0x39] sm:$0xff] }
 0x783   : >> { %19339 = vmatpush3.bf16.msra.mxu1 %v21118_v9  ;;  %v16541_v31 = vld [vmem:[%s25591_s14 + $0x40] sm:$0xff]  ;;  %v16542_v12 = vld [vmem:[%s25591_s14 + $0x48] sm:$0xff]  ;;  %v25617_v0 = vpack.c.bf16 %v16477_v56, %v16476_v14  ;;  %v21132_v51 = vld [vmem:[%s21574_s9 + $0x8] sm:$0xff]   ;;  %v25636_v49 = vpack.c.bf16 %v16479_v13, %v16478_v60 }
 0x784   : >> { %19435 = vmatpush3.bf16.msra.mxu0 %v21119_v43  ;;  %19340 = vmatprep.subr.bf16.mxu1 %v21120_v59  ;;  %v25619_v46 = vpack.c.bf16 %v16542_v12, %v16541_v31  ;;  %v16543_v16 = vld [vmem:[%s25591_s14 + $0x50] sm:$0xff]  ;;  %v16544_v44 = vld [vmem:[%s25591_s14 + $0x58] sm:$0xff]  ;;  %v16480_v22 = vld [vmem:[%s25591_s14 + $0x41] sm:$0xff] }
 0x785   : >> { %19436 = vmatprep.subr.bf16.mxu0 %v21121_v40  ;;  %v21133_v27 = vld [vmem:[%s21574_s9 + $0x188] sm:$0xff]   ;;  %v16545_v63 = vld [vmem:[%s25591_s14 + $0x60] sm:$0xff]  ;;  %v21134_v57 = vld [vmem:[%s21574_s9 + $0x10] sm:$0xff]   ;;  %v25638_v53 = vpack.c.bf16 %v16544_v44, %v16543_v16 }
 0x786   : >> { %v16481_v1 = vld [vmem:[%s25591_s14 + $0x49] sm:$0xff]  ;;  %v21135_v8 = vld [vmem:[%s21574_s9 + $0x190] sm:$0xff]   ;;  %v21136_v37 = vld [vmem:[%s21574_s9 + $0x18] sm:$0xff]  }
 0x787   : >> { %19341 = vmatpush3.bf16.msra.mxu1 %v21120_v59  ;;  %v16546_v41 = vld [vmem:[%s25591_s14 + $0x68] sm:$0xff]  ;;  %v25640_v7 = vpack.c.bf16 %v16481_v1, %v16480_v22  ;;  %v16482_v23 = vld [vmem:[%s25591_s14 + $0x51] sm:$0xff]  ;;  %v16483_v39 = vld [vmem:[%s25591_s14 + $0x59] sm:$0xff] }
 0x788   : >> { %19437 = vmatpush3.bf16.msra.mxu0 %v21121_v40  ;;  %19342 = vmatprep.subr.bf16.mxu1 %v21122_v11  ;;  %v25642_v18 = vpack.c.bf16 %v16546_v41, %v16545_v63  ;;  %v21137_v58 = vld [vmem:[%s21574_s9 + $0x198] sm:$0xff]   ;;  %v16547_v2 = vld [vmem:[%s25591_s14 + $0x70] sm:$0xff]  ;;  %v16548_v54 = vld [vmem:[%s25591_s14 + $0x78] sm:$0xff]  ;;  %v25659_v26 = vpack.c.bf16 %v16483_v39, %v16482_v23 }
 0x789   : >> { %19438 = vmatprep.subr.bf16.mxu0 %v21123_v35  ;;  %v16484_v21 = vld [vmem:[%s25591_s14 + $0x61] sm:$0xff]  ;;  %v16485_v62 = vld [vmem:[%s25591_s14 + $0x69] sm:$0xff]  ;;  %v25662_v36 = vpack.c.bf16 %v16548_v54, %v16547_v2  ;;  %v16486_v59 = vld [vmem:[%s25591_s14 + $0x71] sm:$0xff] }
 0x78a   : >> { %v16549_v52 = vld [vmem:[%s25591_s14 + $0x80] sm:$0xff]  ;;  %v16550_v29 = vld [vmem:[%s25591_s14 + $0x88] sm:$0xff]  ;;  %v25664_v9 = vpack.c.bf16 %v16485_v62, %v16484_v21  ;;  %v16552_v6 = vld [vmem:[%s25591_s14 + $0x98] sm:$0xff] }
 0x78b   : >> { %19343 = vmatpush3.bf16.msra.mxu1 %v21122_v11  ;;  %v21138_v10 = vld [vmem:[%s21574_s9 + $0x20] sm:$0xff]   ;;  %v25666_v43 = vpack.c.bf16 %v16550_v29, %v16549_v52  ;;  %v16487_v40 = vld [vmem:[%s25591_s14 + $0x79] sm:$0xff]  ;;  %v21140_v11 = vld [vmem:[%s21574_s9 + $0x28] sm:$0xff]  }
 0x78c   : >> { %19439 = vmatpush3.bf16.msra.mxu0 %v21123_v35  ;;  %19344 = vmatprep.subr.bf16.mxu1 %v21124_v42  ;;  %v21139_v55 = vld [vmem:[%s21574_s9 + $0x1a0] sm:$0xff]   ;;  %v16551_v35 = vld [vmem:[%s25591_s14 + $0x90] sm:$0xff]  ;;  %v21142_v32 = vld [vmem:[%s21574_s9 + $0x30] sm:$0xff]  }
 0x78d   : >> { %19440 = vmatprep.subr.bf16.mxu0 %v21125_v5  ;;  %v16488_v47 = vld [vmem:[%s25591_s14 + $0x81] sm:$0xff]  ;;  %v16489_v28 = vld [vmem:[%s25591_s14 + $0x89] sm:$0xff]  ;;  %v16490_v33 = vld [vmem:[%s25591_s14 + $0x91] sm:$0xff] }
 0x78e   : >> { %v16554_v20 = vld [vmem:[%s25591_s14 + $0xa8] sm:$0xff]  ;;  %v21144_v38 = vld [vmem:[%s21574_s9 + $0x38] sm:$0xff]   ;;  %v16556_v14 = vld [vmem:[%s25591_s14 + $0xb8] sm:$0xff] }
 0x78f   : >> { %19345 = vmatpush3.bf16.msra.mxu1 %v21124_v42  ;;  %v21141_v42 = vld [vmem:[%s21574_s9 + $0x1a8] sm:$0xff]   ;;  %v16491_v17 = vld [vmem:[%s25591_s14 + $0x99] sm:$0xff]  ;;  %v16492_v56 = vld [vmem:[%s25591_s14 + $0xa1] sm:$0xff] }
 0x790   : >> { %19441 = vmatpush3.bf16.msra.mxu0 %v21125_v5  ;;  %19346 = vmatprep.subr.bf16.mxu1 %v21126_v50  ;;  %v16553_v5 = vld [vmem:[%s25591_s14 + $0xa0] sm:$0xff]  ;;  %v16558_v12 = vld [vmem:[%s25591_s14 + $0xc8] sm:$0xff]  ;;  %v25706_v60 = vpack.c.bf16 %v16491_v17, %v16490_v33  ;;  %v16559_v22 = vld [vmem:[%s25591_s14 + $0xd0] sm:$0xff] }
 0x791   : >> { %19442 = vmatprep.subr.bf16.mxu0 %v21127_v61  ;;  %v25690_v34 = vpack.c.bf16 %v16554_v20, %v16553_v5  ;;  %v16557_v31 = vld [vmem:[%s25591_s14 + $0xc0] sm:$0xff]  ;;  %v16560_v1 = vld [vmem:[%s25591_s14 + $0xd8] sm:$0xff]  ;;  %v16563_v21 = vld [vmem:[%s25591_s14 + $0xf0] sm:$0xff] }
 0x792   : >> { %v25712_v16 = vpack.c.bf16 %v16558_v12, %v16557_v31  ;;  %v16495_v44 = vld [vmem:[%s25591_s14 + $0xb9] sm:$0xff]  ;;  %v16496_v63 = vld [vmem:[%s25591_s14 + $0xc1] sm:$0xff]  ;;  %v25726_v23 = vpack.c.bf16 %v16560_v1, %v16559_v22  ;;  %v16498_v2 = vld [vmem:[%s25591_s14 + $0xd1] sm:$0xff] }
 0x793   : >> { %19347 = vmatpush3.bf16.msra.mxu1 %v21126_v50  ;;  %v25683_v50 = vpack.c.bf16 %v16487_v40, %v16486_v59  ;;  %v16561_v41 = vld [vmem:[%s25591_s14 + $0xe0] sm:$0xff]  ;;  %v16564_v62 = vld [vmem:[%s25591_s14 + $0xf8] sm:$0xff]  ;;  %v16501_v29 = vld [vmem:[%s25591_s14 + $0xe9] sm:$0xff] }
 0x794   : >> { %19443 = vmatpush3.bf16.msra.mxu0 %v21127_v61  ;;  %19348 = vmatprep.subr.bf16.mxu1 %v21128_v24  ;;  %v21143_v61 = vld [vmem:[%s21574_s9 + $0x1b0] sm:$0xff]   ;;  %v16500_v52 = vld [vmem:[%s25591_s14 + $0xe1] sm:$0xff]  ;;  %v12660_v40 = vpack.c.bf16 %v16564_v62, %v16563_v21 }
 0x795   : >> { %19444 = vmatprep.subr.bf16.mxu0 %v21129_v45  ;;  %v16499_v54 = vld [vmem:[%s25591_s14 + $0xd9] sm:$0xff]  ;;  %v12065_v20 = vld [vmem:[%s25591_s14 + $0x8] sm:$0xff] }
 0x796   : >> { %v12175_v59 = vpack.c.bf16 %v16499_v54, %v16498_v2  ;;  %v12064_v5 = vld [vmem:[%s25591_s14] sm:$0xff]  ;;  %v12067_v33 = vld [vmem:[%s25591_s14 + $0x18] sm:$0xff] }
 0x797   : >> { %19349 = vmatpush3.bf16.msra.mxu1 %v21128_v24  ;;  %v25686_v24 = vpack.c.bf16 %v16552_v6, %v16551_v35  ;;  %v16503_v6 = vld [vmem:[%s25591_s14 + $0xf9] sm:$0xff] }
 0x798   : >> { %19445 = vmatpush3.bf16.msra.mxu0 %v21129_v45  ;;  %19382 = vmatprep.subr.bf16.mxu1 %v21130_v48  ;;  %v25688_v45 = vpack.c.bf16 %v16489_v28, %v16488_v47  ;;  %v16567_v47 = vld [vmem:[%s25591_s14 + $0x110] sm:$0xff]  ;;  %v16568_v28 = vld [vmem:[%s25591_s14 + $0x118] sm:$0xff] }
 0x799   : >> { %19478 = vmatprep.subr.bf16.mxu0 %v21131_v25 }
 0x79a   : >> { %19351 = vmatmul.mubr.bf16.vlgmr.msra.gmra.mrb[0].mxu1 %v12163_v3  ;;  %v16493_v3 = vld [vmem:[%s25591_s14 + $0xa9] sm:$0xff] }
 0x79b   : >> { %19447 = vmatmul.mubr.bf16.vlgmr.msra.gmra.mrb[0].mxu0 %v25615_v4  ;;  %19383 = vmatpush3.bf16.msra.mxu1 %v21130_v48  ;;  %v21145_v48 = vld [vmem:[%s21574_s9 + $0x1b8] sm:$0xff]  }
 0x79c   : >> { %19479 = vmatpush3.bf16.msra.mxu0 %v21131_v25  ;;  %19354 = vmatprep.mubr.bf16.mxu1 %v25617_v0  ;;  %v16555_v25 = vld [vmem:[%s25591_s14 + $0xb0] sm:$0xff] }
 0x79d   : >> { %19450 = vmatprep.mubr.bf16.mxu0 %v25619_v46  ;;  %19384 = vmatprep.subr.bf16.mxu1 %v21132_v51  ;;  %v25708_v13 = vpack.c.bf16 %v16556_v14, %v16555_v25 }
 0x79e   : >> { %19480 = vmatprep.subr.bf16.mxu0 %v21133_v27 }
 0x79f   : >> { %19385 = vmatpush3.bf16.msra.mxu1 %v21132_v51  ;;  %v25710_v51 = vpack.c.bf16 %v16493_v3, %v16492_v56 }
 0x7a0   : >> { %19481 = vmatpush3.bf16.msra.mxu0 %v21133_v27  ;;  %19386 = vmatprep.subr.bf16.mxu1 %v21134_v57  ;;  %v16494_v27 = vld [vmem:[%s25591_s14 + $0xb1] sm:$0xff] }
 0x7a1   : >> { %19482 = vmatprep.subr.bf16.mxu0 %v21135_v8 }
 0x7a2   : >> { %19355 = vmatmul.mubr.bf16.gmra.mrb[4].mxu1 %v25636_v49 }
 0x7a3   : >> { %19451 = vmatmul.mubr.bf16.gmra.mrb[4].mxu0 %v25638_v53  ;;  %19358 = vmatprep.mubr.bf16.mxu1 %v25640_v7 }
 0x7a4   : >> { %19454 = vmatprep.mubr.bf16.mxu0 %v25642_v18  ;;  %19387 = vmatpush3.bf16.msra.mxu1 %v21134_v57  ;;  %v16497_v57 = vld [vmem:[%s25591_s14 + $0xc9] sm:$0xff] }
 0x7a5   : >> { %19483 = vmatpush3.bf16.msra.mxu0 %v21135_v8  ;;  %19388 = vmatprep.subr.bf16.mxu1 %v21136_v37  ;;  %v16562_v8 = vld [vmem:[%s25591_s14 + $0xe8] sm:$0xff]  ;;  %v12174_v39 = vpack.c.bf16 %v16497_v57, %v16496_v63 }
 0x7a6   : >> { %19484 = vmatprep.subr.bf16.mxu0 %v21137_v58 }
 0x7a8   : >> { %19389 = vmatpush3.bf16.msra.mxu1 %v21136_v37  ;;  %v12173_v37 = vpack.c.bf16 %v16495_v44, %v16494_v27 }
 0x7a9   : >> { %19485 = vmatpush3.bf16.msra.mxu0 %v21137_v58  ;;  %19390 = vmatprep.subr.bf16.mxu1 %v21138_v10  ;;  %v25728_v58 = vpack.c.bf16 %v16562_v8, %v16561_v41 }
 0x7aa   : >> { %19359 = vmatmul.mubr.bf16.gmra.mrb[8].mxu1 %v25659_v26  ;;  %19486 = vmatprep.subr.bf16.mxu0 %v21139_v55 }
 0x7ab   : >> { %19455 = vmatmul.mubr.bf16.gmra.mrb[8].mxu0 %v25662_v36  ;;  %19362 = vmatprep.mubr.bf16.mxu1 %v25664_v9 }
 0x7ac   : >> { %19458 = vmatprep.mubr.bf16.mxu0 %v25666_v43  ;;  %19391 = vmatpush3.bf16.msra.mxu1 %v21138_v10  ;;  %v16565_v10 = vld [vmem:[%s25591_s14 + $0x100] sm:$0xff] }
 0x7ad   : >> { %19487 = vmatpush3.bf16.msra.mxu0 %v21139_v55  ;;  %19392 = vmatprep.subr.bf16.mxu1 %v21140_v11  ;;  %v16566_v55 = vld [vmem:[%s25591_s14 + $0x108] sm:$0xff] }
 0x7ae   : >> { %19488 = vmatprep.subr.bf16.mxu0 %v21141_v42  ;;  %v12661_v35 = vpack.c.bf16 %v16566_v55, %v16565_v10 }
 0x7b0   : >> { %19393 = vmatpush3.bf16.msra.mxu1 %v21140_v11  ;;  %v12176_v11 = vpack.c.bf16 %v16501_v29, %v16500_v52  ;;  %v25802_v52 = vstv %s22435_s18 }
 0x7b1   : >> { %19489 = vmatpush3.bf16.msra.mxu0 %v21141_v42  ;;  %19394 = vmatprep.subr.bf16.mxu1 %v21142_v32  ;;  %v16502_v42 = vld [vmem:[%s25591_s14 + $0xf1] sm:$0xff] }
 0x7b2   : >> { %19363 = vmatmul.mubr.bf16.gmra.mrb[12].mxu1 %v25683_v50  ;;  %19490 = vmatprep.subr.bf16.mxu0 %v21143_v61 }
 0x7b3   : >> { %19459 = vmatmul.mubr.bf16.gmra.mrb[12].mxu0 %v25686_v24  ;;  %19366 = vmatprep.mubr.bf16.mxu1 %v25688_v45 }
 0x7b4   : >> { %19462 = vmatprep.mubr.bf16.mxu0 %v25690_v34  ;;  %19395 = vmatpush3.bf16.msra.mxu1 %v21142_v32  ;;  %v12177_v32 = vpack.c.bf16 %v16503_v6, %v16502_v42 }
 0x7b5   : >> { %19491 = vmatpush3.bf16.msra.mxu0 %v21143_v61  ;;  %19396 = vmatprep.subr.bf16.mxu1 %v21144_v38  ;;  %v12662_v61 = vpack.c.bf16 %v16568_v28, %v16567_v47 }
 0x7b6   : >> { %19492 = vmatprep.subr.bf16.mxu0 %v21145_v48 }
 0x7b8   : >> { %19397 = vmatpush3.bf16.msra.mxu1 %v21144_v38  ;;  %v12096_v38 = vpack.c.bf16 %v12065_v20, %v12064_v5 }
 0x7b9   : >> { %19493 = vmatpush3.bf16.msra.mxu0 %v21145_v48  ;;  %v12066_v48 = vld [vmem:[%s25591_s14 + $0x10] sm:$0xff] }
 0x7ba   : >> { %19367 = vmatmul.mubr.bf16.gmra.mrb[16].mxu1 %v25706_v60  ;;  %v12097_v17 = vpack.c.bf16 %v12067_v33, %v12066_v48 }
 0x7bb   : >> { %19463 = vmatmul.mubr.bf16.gmra.mrb[16].mxu0 %v25708_v13  ;;  %19370 = vmatprep.mubr.bf16.mxu1 %v25710_v51 }
 0x7bc   : >> { %19466 = vmatprep.mubr.bf16.mxu0 %v25712_v16 }
 0x7c2   : >> { %19371 = vmatmul.mubr.bf16.gmra.mrb[20].mxu1 %v12173_v37 }
 0x7c3   : >> { %19467 = vmatmul.mubr.bf16.gmra.mrb[20].mxu0 %v25726_v23  ;;  %19374 = vmatprep.mubr.bf16.mxu1 %v12174_v39 }
 0x7c4   : >> { %19470 = vmatprep.mubr.bf16.mxu0 %v25728_v58 }
 0x7ca   : >> { %19375 = vmatmul.mubr.bf16.gmra.mrb[24].mxu1 %v12175_v59 }
 0x7cb   : >> { %19471 = vmatmul.mubr.bf16.gmra.mrb[24].mxu0 %v12660_v40  ;;  %19378 = vmatprep.mubr.bf16.mxu1 %v12176_v11 }
 0x7cc   : >> { %19474 = vmatprep.mubr.bf16.mxu0 %v12661_v35 }
 0x7d2   : >> { %19379 = vmatmul.mubr.bf16.gmra.mrb[28].mxu1 %v12177_v32 }
 0x7d3   : >> { %19475 = vmatmul.mubr.bf16.gmra.mrb[28].mxu0 %v12662_v61  ;;  %19398 = vmatprep.mubr.bf16.mxu1 %v12096_v38 }
 0x7d4   : >> { %19494 = vmatprep.mubr.bf16.mxu0 %v25617_v0 }
 0x7da   : >> { %19399 = vmatmul.mubr.bf16.vlgmr.msra.gmra.mrb[0].mxu1 %v12097_v17 }
 0x7db   : >> { %19495 = vmatmul.mubr.bf16.vlgmr.msra.gmra.mrb[0].mxu0 %v25636_v49  ;;  %19402 = vmatprep.mubr.bf16.mxu1 %v25598_v30  ;;  %v16622_v30 = vld [vmem:[%s25591_s14 + $0x101] sm:$0xff]  ;;  %v16625_v49 = vld [vmem:[%s25591_s14 + $0x119] sm:$0xff] }
 0x7dc   : >> { %19498 = vmatprep.mubr.bf16.mxu0 %v25640_v7  ;;  %v13229_v7 = vlaneseq }
 0x7e2   : >> { %19403 = vmatmul.mubr.bf16.gmra.mrb[4].mxu1 %v25615_v4  ;;  %v16623_v4 = vld [vmem:[%s25591_s14 + $0x109] sm:$0xff] }
 0x7e3   : >> { %19499 = vmatmul.mubr.bf16.gmra.mrb[4].mxu0 %v25659_v26  ;;  %19406 = vmatprep.mubr.bf16.mxu1 %v25619_v46  ;;  %v12969_v0 = vpack.c.bf16 %v16623_v4, %v16622_v30  ;;  %v16624_v46 = vld [vmem:[%s25591_s14 + $0x111] sm:$0xff] }
 0x7e4   : >> { %19502 = vmatprep.mubr.bf16.mxu0 %v25664_v9 }
 0x7ea   : >> { %19407 = vmatmul.mubr.bf16.gmra.mrb[8].mxu1 %v25638_v53  ;;  %v12970_v53 = vpack.c.bf16 %v16625_v49, %v16624_v46 }
 0x7eb   : >> { %19503 = vmatmul.mubr.bf16.gmra.mrb[8].mxu0 %v25683_v50  ;;  %19410 = vmatprep.mubr.bf16.mxu1 %v25642_v18  ;;  %v25774_v18 = vshrl.u32 %v13229_v7, 7 }
 0x7ec   : >> { %19506 = vmatprep.mubr.bf16.mxu0 %v25688_v45 }
 0x7ed   : >> { %v13232_v26 = vadd.s32 16, %v25774_v18  ;;  %v13234_v3 = vadd.s32 32, %v25774_v18  ;;  %v13237_v31 = vadd.s32 56, %v25774_v18  ;;  %v13240_v41 = vadd.s32 80, %v25774_v18 }
 0x7ee   : >> { %v13238_v62 = vadd.s32 64, %v25774_v18  ;;  %v13241_v35 = vadd.s32 88, %v25774_v18  ;;  %v13239_v28 = vadd.s32 72, %v25774_v18  ;;  %v13244_v61 = vadd.s32 112, %v25774_v18 }
 0x7ef   : >> { %v13242_v48 = vadd.s32 96, %v25774_v18  ;;  %v13245_v33 = vadd.s32 120, %v25774_v18 }
 0x7f2   : >> { %19411 = vmatmul.mubr.bf16.gmra.mrb[12].mxu1 %v25662_v36  ;;  %v25778_v36 = vstv %s25582_s16 }
 0x7f3   : >> { %19507 = vmatmul.mubr.bf16.gmra.mrb[12].mxu0 %v25706_v60  ;;  %19414 = vmatprep.mubr.bf16.mxu1 %v25666_v43  ;;  %v13265_v9 = vadd.s32 %v25778_v36, %v13232_v26  ;;  %v13233_v43 = vadd.s32 24, %v25774_v18  ;;  %v13263_v50 = vadd.s32 %v25778_v36, %v25774_v18  ;;  %v13267_v1 = vadd.s32 %v25778_v36, %v13234_v3 }
 0x7f4   : >> { %19510 = vmatprep.mubr.bf16.mxu0 %v25710_v51  ;;  %v13270_v63 = vadd.s32 %v25778_v36, %v13237_v31  ;;  %v25805_v55 = vadd.s32 %v25778_v36, %v13240_v41  ;;  %v25829_v4 = vadd.s32 %v25778_v36, %v13241_v35  ;;  %v13248_v31 = vadd.s32 144, %v25774_v18 }
 0x7f5   : >> { %v13329_v45 = vshra.s32 %v13265_v9, 5  ;;  %v13266_v25 = vadd.s32 %v25778_v36, %v13233_v43  ;;  %v13327_v14 = vshra.s32 %v13263_v50, 5  ;;  %v13297_v12 = vand.u32 31, %v13265_v9 }
 0x7f6   : >> { %v13295_v27 = vand.u32 31, %v13263_v50  ;;  %v13331_v2 = vshra.s32 %v13267_v1, 5  ;;  %v13334_v21 = vshra.s32 %v13270_v63, 5  ;;  %v13299_v6 = vand.u32 31, %v13267_v1 }
 0x7f7   : >> { %v13361_v60 = vand.u32 31, %v13329_v45  ;;  %v13330_v51 = vshra.s32 %v13266_v25, 5  ;;  %v13359_v44 = vand.u32 31, %v13327_v14  ;;  %v13298_v8 = vand.u32 31, %v13266_v25 }
 0x7f8   : >> { %v13363_v47 = vand.u32 31, %v13331_v2  ;;  %v13302_v5 = vand.u32 31, %v13270_v63  ;;  %v13366_v20 = vand.u32 31, %v13334_v21  ;;  %v13337_v38 = vshra.s32 %v25805_v55, 5 }
 0x7f9   : >> { %vm13395_vm0 = vcmp.gt.s32.totalorder %v13297_v12, %v13361_v60  ;;  %vm13391_vm1 = vcmp.gt.s32.totalorder %v13295_v27, %v13359_v44  ;;  %v25847_v9 = vadd.s32 %v25778_v36, %v13244_v61  ;;  %v13305_v43 = vand.u32 31, %v25805_v55 }
 0x7fa   : >> { %19415 = vmatmul.mubr.bf16.gmra.mrb[16].mxu1 %v25686_v24  ;;  %v13231_v24 = vadd.s32 8, %v25774_v18  ;;  %v25798_v54 = vsel %vm13395_vm0, %v13297_v12, %v13361_v60  ;;  %vm13399_vm5 = vcmp.gt.s32.totalorder %v13299_v6, %v13363_v47  ;;  %vm13405_vm6 = vcmp.gt.s32.totalorder %v13302_v5, %v13366_v20 }
 0x7fb   : >> { %19511 = vmatmul.mubr.bf16.gmra.mrb[16].mxu0 %v12173_v37  ;;  %19418 = vmatprep.mubr.bf16.mxu1 %v25690_v34  ;;  %v13236_v34 = vadd.s32 48, %v25774_v18  ;;  %v13362_v37 = vand.u32 31, %v13330_v51  ;;  %v13369_v50 = vand.u32 31, %v13337_v38  ;;  %v25854_v45 = vadd.s32 %v25778_v36, %v13245_v33 }
 0x7fc   : >> { %19514 = vmatprep.mubr.bf16.mxu0 %v12174_v39  ;;  %v13264_v56 = vadd.s32 %v25778_v36, %v13231_v24  ;;  %v25851_v24 = vadd.s32 %v25778_v36, %v13242_v48  ;;  %v13338_v14 = vshra.s32 %v25829_v4, 5  ;;  %v13246_v12 = vadd.s32 128, %v25774_v18 }
 0x7fd   : >> { %vm25809_vm2 = vcmp.gt.s32.totalorder %v13298_v8, %v13362_v37  ;;  %v13249_v60 = vadd.s32 152, %v25774_v18  ;;  %vm25875_vm8 = vcmp.gt.s32.totalorder %v13305_v43, %v13369_v50  ;;  %v13342_v63 = vshra.s32 %v25854_v45, 5 }
 0x7fe   : >> { %v13328_v22 = vshra.s32 %v13264_v56, 5  ;;  %v13296_v39 = vand.u32 31, %v13264_v56  ;;  %v25834_v46 = vsel %vm25809_vm2, %v13298_v8, %v13362_v37  ;;  %v13339_v1 = vshra.s32 %v25851_v24, 5 }
 0x7ff   : >> { %v13370_v41 = vand.u32 31, %v13338_v14  ;;  %v25891_v2 = vadd.s32 %v25778_v36, %v13249_v60  ;;  %v13309_v21 = vand.u32 31, %v25847_v9  ;;  %v13252_v35 = vadd.s32 176, %v25774_v18 }
 0x800   : >> { %v13371_v55 = vand.u32 31, %v13339_v1  ;;  %vm13458_vm14 = vcmp.lt.s32.totalorder %v25798_v54, %v25802_v52  ;;  %vm13459_vm11 = vcmp.lt.s32.totalorder %v25834_v46, %v25802_v52  ;;  %v13256_v38 = vadd.s32 208, %v25774_v18 }
 0x801   : >> { %v13346_v61 = vshra.s32 %v25891_v2, 5  ;;  %v13314_v25 = vand.u32 31, %v25891_v2 }
 0x802   : >> { %19419 = vmatmul.mubr.bf16.gmra.mrb[20].mxu1 %v25708_v13  ;;  %v13269_v13 = vadd.s32 %v25778_v36, %v13236_v34  ;;  %v25856_v34 = vsel %vm13399_vm5, %v13299_v6, %v13363_v47  ;;  %v25908_v6 = vsel %vm25875_vm8, %v13305_v43, %v13369_v50  ;;  %v13253_v50 = vadd.s32 184, %v25774_v18 }
 0x803   : >> { %19515 = vmatmul.mubr.bf16.gmra.mrb[20].mxu0 %v12175_v59  ;;  %19422 = vmatprep.mubr.bf16.mxu1 %v25712_v16  ;;  %v13235_v16 = vadd.s32 40, %v25774_v18  ;;  %v25807_v59 = vsel %vm13391_vm1, %v13295_v27, %v13359_v44  ;;  %v13247_v27 = vadd.s32 136, %v25774_v18  ;;  %v13378_v14 = vand.u32 31, %v13346_v61 }
 0x804   : >> { %19518 = vmatprep.mubr.bf16.mxu0 %v12176_v11  ;;  %v13333_v57 = vshra.s32 %v13269_v13, 5  ;;  %v13301_v29 = vand.u32 31, %v13269_v13  ;;  %v25870_v13 = vsel %vm13405_vm6, %v13302_v5, %v13366_v20  ;;  %vm13456_vm10 = vcmp.lt.s32.totalorder %v25807_v59, %v25802_v52 }
 0x805   : >> { %vm13460_vm5 = vcmp.lt.s32.totalorder %v25856_v34, %v25802_v52  ;;  %vm26009_vm8 = vcmp.gt.s32.totalorder %v13314_v25, %v13378_v14 }
 0x806   : >> { %v13365_v10 = vand.u32 31, %v13333_v57  ;;  %v13306_v57 = vand.u32 31, %v25829_v4  ;;  %v26052_v59 = vsel %vm26009_vm8, %v13314_v25, %v13378_v14 }
 0x808   : >> { %vm13403_vm4 = vcmp.gt.s32.totalorder %v13301_v29, %v13365_v10  ;;  %vm25923_vm13 = vcmp.gt.s32.totalorder %v13306_v57, %v13370_v41 }
 0x809   : >> { %v25843_v7 = vsel %vm13403_vm4, %v13301_v29, %v13365_v10  ;;  %v13307_v29 = vand.u32 31, %v25851_v24  ;;  %v25896_v10 = vadd.s32 %v25778_v36, %v13247_v27 }
 0x80a   : >> { %19423 = vmatmul.mubr.bf16.gmra.mrb[24].mxu1 %v25726_v23  ;;  %v25796_v23 = vadd.s32 %v25778_v36, %v13235_v16  ;;  %v13341_v16 = vshra.s32 %v25847_v9, 5  ;;  %vm13462_vm4 = vcmp.lt.s32.totalorder %v25843_v7, %v25802_v52 }
 0x80b   : >> { %19519 = vmatmul.mubr.bf16.gmra.mrb[24].mxu0 %v12177_v32  ;;  %19426 = vmatprep.mubr.bf16.mxu1 %v25728_v58  ;;  %v13360_v58 = vand.u32 31, %v13328_v22  ;;  %v25821_v32 = vadd.s32 %v25778_v36, %v13238_v62  ;;  %v13344_v33 = vshra.s32 %v25896_v10, 5  ;;  %vm25939_vm1 = vcmp.gt.s32.totalorder %v13307_v29, %v13371_v55 }
 0x80c   : >> { %19522 = vmatprep.mubr.bf16.mxu0 %v12969_v0  ;;  %v13332_v11 = vshra.s32 %v25796_v23, 5  ;;  %v13300_v17 = vand.u32 31, %v25796_v23  ;;  %v13243_v0 = vadd.s32 104, %v25774_v18  ;;  %v13373_v62 = vand.u32 31, %v13341_v16 }
 0x80d   : >> { %vm25815_vm3 = vcmp.gt.s32.totalorder %v13296_v39, %v13360_v58  ;;  %v13335_v26 = vshra.s32 %v25821_v32, 5  ;;  %v13303_v51 = vand.u32 31, %v25821_v32  ;;  %v25971_v16 = vsel %vm25923_vm13, %v13306_v57, %v13370_v41 }
 0x80e   : >> { %v13364_v30 = vand.u32 31, %v13332_v11  ;;  %v25838_v49 = vsel %vm25815_vm3, %v13296_v39, %v13360_v58  ;;  %v25864_v56 = vadd.s32 %v25778_v36, %v13243_v0  ;;  %v25885_v39 = vadd.s32 %v25778_v36, %v13248_v31 }
 0x80f   : >> { %v13367_v22 = vand.u32 31, %v13335_v26  ;;  %v25888_v58 = vadd.s32 %v25778_v36, %v13246_v12  ;;  %v13374_v11 = vand.u32 31, %v13342_v63  ;;  %vm13457_vm15 = vcmp.lt.s32.totalorder %v25838_v49, %v25802_v52 }
 0x810   : >> { %vm25858_vm7 = vcmp.gt.s32.totalorder %v13300_v17, %v13364_v30  ;;  %v13340_v37 = vshra.s32 %v25864_v56, 5  ;;  %v13308_v47 = vand.u32 31, %v25864_v56  ;;  %v13345_v20 = vshra.s32 %v25885_v39, 5 }
 0x811   : >> { %v25904_v42 = vsel %vm25858_vm7, %v13300_v17, %v13364_v30  ;;  %vm25913_vm12 = vcmp.gt.s32.totalorder %v13303_v51, %v13367_v22  ;;  %v13343_v32 = vshra.s32 %v25888_v58, 5  ;;  %v13250_v17 = vadd.s32 160, %v25774_v18 }
 0x812   : >> { %19427 = vmatmul.mubr.bf16.gmra.mrb[28].mxu1 %v12660_v40  ;;  %v13310_v40 = vand.u32 31, %v25854_v45  ;;  %vm25935_vm0 = vcmp.gt.s32.totalorder %v13309_v21, %v13373_v62  ;;  %v13313_v9 = vand.u32 31, %v25885_v39  ;;  %v13311_v43 = vand.u32 31, %v25888_v58 }
 0x813   : >> { %19523 = vmatmul.mubr.bf16.gmra.mrb[28].mxu0 %v12970_v53  ;;  %v25841_v53 = vadd.s32 %v25778_v36, %v13239_v28  ;;  %v13372_v28 = vand.u32 31, %v13340_v37  ;;  %v13377_v24 = vand.u32 31, %v13345_v20  ;;  %v13375_v45 = vand.u32 31, %v13343_v32 }
 0x814   : >> { %vm25943_vm2 = vcmp.gt.s32.totalorder %v13310_v40, %v13374_v11  ;;  %v25963_v56 = vsel %vm25913_vm12, %v13303_v51, %v13367_v22  ;;  %v13376_v31 = vand.u32 31, %v13344_v33  ;;  %v25967_v12 = vadd.s32 %v25778_v36, %v13250_v17 }
 0x815   : >> { %v13336_v3 = vshra.s32 %v25841_v53, 5  ;;  %v13304_v8 = vand.u32 31, %v25841_v53  ;;  %v25948_v53 = vadd.s32 %v25778_v36, %v13252_v35  ;;  %vm25950_vm3 = vcmp.gt.s32.totalorder %v13308_v47, %v13372_v28 }
 0x816   : >> { %v25979_v44 = vsel %vm25935_vm0, %v13309_v21, %v13373_v62  ;;  %v25986_v63 = vsel %vm25939_vm1, %v13307_v29, %v13371_v55  ;;  %v25990_v57 = vsel %vm25943_vm2, %v13310_v40, %v13374_v11  ;;  %v25994_v41 = vsel %vm25950_vm3, %v13308_v47, %v13372_v28 }
 0x817   : >> { %v13368_v23 = vand.u32 31, %v13336_v3  ;;  %v13312_v3 = vand.u32 31, %v25896_v10  ;;  %v13349_v51 = vshra.s32 %v25948_v53, 5  ;;  %vm26001_vm6 = vcmp.gt.s32.totalorder %v13313_v9, %v13377_v24 }
 0x818   : >> { %vm26005_vm7 = vcmp.gt.s32.totalorder %v13311_v43, %v13375_v45  ;;  %vm13463_vm12 = vcmp.lt.s32.totalorder %v25870_v13, %v25802_v52  ;;  %v13317_v40 = vand.u32 31, %v25948_v53  ;;  %v13347_v11 = vshra.s32 %v25967_v12, 5 }
 0x819   : >> { %vm25927_vm9 = vcmp.gt.s32.totalorder %v13304_v8, %v13368_v23  ;;  %vm26015_vm13 = vcmp.gt.s32.totalorder %v13312_v3, %v13376_v31  ;;  %v26026_v5 = vand.u32 31, %v13349_v51  ;;  %v13251_v20 = vadd.s32 168, %v25774_v18 }
 0x81a   : >> { %v25975_v27 = vsel %vm25927_vm9, %v13304_v8, %v13368_v23  ;;  %v25997_v8 = vadd.s32 %v25778_v36, %v13253_v50  ;;  %vm13461_vm9 = vcmp.lt.s32.totalorder %v25904_v42, %v25802_v52  ;;  %v26044_v33 = vsel %vm26001_vm6, %v13313_v9, %v13377_v24 }
 0x81b   : >> { %v26048_v17 = vsel %vm26005_vm7, %v13311_v43, %v13375_v45  ;;  %v26060_v46 = vsel %vm26015_vm13, %v13312_v3, %v13376_v31  ;;  %v13315_v4 = vand.u32 31, %v25967_v12  ;;  %v13379_v0 = vand.u32 31, %v13347_v11 }
 0x81c   : >> { %v13350_v61 = vshra.s32 %v25997_v8, 5  ;;  %v13318_v24 = vand.u32 31, %v25997_v8  ;;  %v26075_v3 = vadd.s32 %v25778_v36, %v13251_v20  ;;  %v26078_v31 = vadd.s32 %v25778_v36, %v13256_v38 }
 0x81d   : >> { %vm26084_vm0 = vcmp.gt.s32.totalorder %v13315_v4, %v13379_v0  ;;  %v13254_v21 = vadd.s32 192, %v25774_v18  ;;  %vm13465_vm1 = vcmp.lt.s32.totalorder %v25975_v27, %v25802_v52  ;;  %vm13470_vm3 = vcmp.lt.s32.totalorder %v25979_v44, %v25802_v52 }
 0x81e   : >> { %v13382_v14 = vand.u32 31, %v13350_v61  ;;  %v13348_v7 = vshra.s32 %v26075_v3, 5  ;;  %v13316_v42 = vand.u32 31, %v26075_v3  ;;  %vm13469_vm6 = vcmp.lt.s32.totalorder %v25994_v41, %v25802_v52 }
 0x81f   : >> { %vm13474_vm8 = vcmp.lt.s32.totalorder %v26044_v33, %v25802_v52  ;;  %vm13472_vm13 = vcmp.lt.s32.totalorder %v26048_v17, %v25802_v52  ;;  %v13259_v33 = vadd.s32 232, %v25774_v18 }
 0x820   : >> { %vm26098_vm2 = vcmp.gt.s32.totalorder %v13318_v24, %v13382_v14 }
 0x821   : >> { %v26129_v53 = vsel %vm26098_vm2, %v13318_v24, %v13382_v14 }
 0x8ad   : >> { %v19400_v60 = vpop.f32.mrb[0].mxu1 }
 0x8ae   : >> { %v19496_v22 = vpop.f32.mrb[0].mxu0  ;;  %v12486_v1 = vpop.f32.mrb[1].mxu1 }
 0x8af   : >> { %v20582_v37 = vadd.f32 %v19496_v22, %v19400_v60  ;;  %v13070_v23 = vpop.f32.mrb[1].mxu0  ;;  %v19401_v39 = vpop.f32.mrb[2].mxu1 }
 0x8b0   : >> { %v20583_v62 = vadd.f32 %v13070_v23, %v12486_v1  ;;  %v19497_v29 = vpop.f32.mrb[2].mxu0  ;;  %v12489_v10 = vpop.f32.mrb[3].mxu1 }
 0x8b1   : >> { %v13490_v35 = vsel %vm13458_vm14, %v20582_v37, 0.0  ;;  %v20584_v47 = vadd.f32 %v19497_v29, %v19401_v39  ;;  %v13073_v28 = vpop.f32.mrb[3].mxu0  ;;  %vm13466_vm14 = vcmp.lt.s32.totalorder %v25908_v6, %v25802_v52 }
 0x8b2   : >> { %16653 = vst [vmem:[%s26030_s19 + $0x98] sm:$0xff] %v13490_v35  ;;  %v13488_v54 = vsel %vm13456_vm10, %v20583_v62, 0.0  ;;  %v20585_v32 = vadd.f32 %v13073_v28, %v12489_v10  ;;  %vm26070_vm10 = vcmp.gt.s32.totalorder %v13317_v40, %v26026_v5  ;;  %v13594_v12 = vmul.f32 %v13490_v35, %v13490_v35 }
 0x8b3   : >> { %16651 = vst [vmem:[%s26030_s19 + $0x88] sm:$0xff] %v13488_v54  ;;  %v13491_v48 = vsel %vm13459_vm11, %v20584_v47, 0.0  ;;  %v13592_v26 = vmul.f32 %v13488_v54, %v13488_v54  ;;  %vm13464_vm11 = vcmp.lt.s32.totalorder %v25963_v56, %v25802_v52  ;;  %v26116_v38 = vsel %vm26070_vm10, %v13317_v40, %v26026_v5 }
 0x8b4   : >> { %16654 = vst [vmem:[%s26030_s19 + $0xa0] sm:$0xff] %v13491_v48  ;;  %v13489_v30 = vsel %vm13457_vm15, %v20585_v32, 0.0  ;;  %v13595_v37 = vmul.f32 %v13491_v48, %v13491_v48  ;;  %vm13467_vm15 = vcmp.lt.s32.totalorder %v25971_v16, %v25802_v52  ;;  %v26131_v40 = vand.u32 31, %v13348_v7 }
 0x8b5   : >> { %16652 = vst [vmem:[%s26030_s19 + $0x90] sm:$0xff] %v13489_v30  ;;  %v13554_v9 = vadd.f32 %v13489_v30, %v13488_v54  ;;  %v13593_v43 = vmul.f32 %v13489_v30, %v13489_v30  ;;  %v19404_v50 = vpop.f32.mrb[4].mxu1  ;;  %v13257_v30 = vadd.s32 216, %v25774_v18  ;;  %v13353_v5 = vshra.s32 %v26078_v31, 5 }
 0x8b6   : >> { %v19500_v45 = vpop.f32.mrb[4].mxu0  ;;  %v12502_v25 = vpop.f32.mrb[5].mxu1  ;;  %vm26170_vm7 = vcmp.gt.s32.totalorder %v13316_v42, %v26131_v40 }
 0x8b7   : >> { %v13555_v60 = vadd.f32 %v13554_v9, %v13490_v35  ;;  %v13624_v51 = vadd.f32 %v13593_v43, %v13592_v26  ;;  %v20586_v22 = vadd.f32 %v19500_v45, %v19404_v50  ;;  %v13086_v1 = vpop.f32.mrb[5].mxu0  ;;  %v19405_v8 = vpop.f32.mrb[6].mxu1 }
 0x8b8   : >> { %v20587_v23 = vadd.f32 %v13086_v1, %v12502_v25  ;;  %v19501_v39 = vpop.f32.mrb[6].mxu0  ;;  %v12505_v58 = vpop.f32.mrb[7].mxu1 }
 0x8b9   : >> { %v13625_v62 = vadd.f32 %v13624_v51, %v13594_v12  ;;  %v13494_v29 = vsel %vm13462_vm4, %v20586_v22, 0.0  ;;  %v13556_v10 = vadd.f32 %v13555_v60, %v13491_v48  ;;  %v20588_v55 = vadd.f32 %v19501_v39, %v19405_v8  ;;  %v13089_v11 = vpop.f32.mrb[7].mxu0 }
 0x8ba   : >> { %16657 = vst [vmem:[%s26030_s19 + $0xb8] sm:$0xff] %v13494_v29  ;;  %v13492_v35 = vsel %vm13460_vm5, %v20587_v23, 0.0  ;;  %v20589_v47 = vadd.f32 %v13089_v11, %v12505_v58  ;;  %v26120_v48 = vsel %vm26084_vm0, %v13315_v4, %v13379_v0  ;;  %v26135_v4 = vadd.s32 %v25778_v36, %v13254_v21 }
 0x8bb   : >> { %16655 = vst [vmem:[%s26030_s19 + $0xa8] sm:$0xff] %v13492_v35  ;;  %v13557_v20 = vadd.f32 %v13556_v10, %v13492_v35  ;;  %v13596_v54 = vmul.f32 %v13492_v35, %v13492_v35  ;;  %v13626_v32 = vadd.f32 %v13625_v62, %v13595_v37  ;;  %v13495_v61 = vsel %vm13463_vm12, %v20588_v55, 0.0 }
 0x8bc   : >> { %16658 = vst [vmem:[%s26030_s19 + $0xc0] sm:$0xff] %v13495_v61  ;;  %v13493_v34 = vsel %vm13461_vm9, %v20589_v47, 0.0  ;;  %v13598_v0 = vmul.f32 %v13494_v29, %v13494_v29  ;;  %vm13468_vm4 = vcmp.lt.s32.totalorder %v25986_v63, %v25802_v52  ;;  %v13599_v22 = vmul.f32 %v13495_v61, %v13495_v61 }
 0x8bd   : >> { %v13627_v13 = vadd.f32 %v13626_v32, %v13596_v54  ;;  %16656 = vst [vmem:[%s26030_s19 + $0xb0] sm:$0xff] %v13493_v34  ;;  %v13558_v26 = vadd.f32 %v13557_v20, %v13493_v34  ;;  %v13597_v9 = vmul.f32 %v13493_v34, %v13493_v34  ;;  %v19408_v43 = vpop.f32.mrb[8].mxu1  ;;  %vm13471_vm5 = vcmp.lt.s32.totalorder %v25990_v57, %v25802_v52 }
 0x8be   : >> { %v19504_v50 = vpop.f32.mrb[8].mxu0  ;;  %v12518_v45 = vpop.f32.mrb[9].mxu1  ;;  %v13321_v8 = vand.u32 31, %v26078_v31  ;;  %v26143_v37 = vadd.s32 %v25778_v36, %v13257_v30  ;;  %v13385_v10 = vand.u32 31, %v13353_v5  ;;  %v13351_v55 = vshra.s32 %v26135_v4, 5 }
 0x8bf   : >> { %v13559_v25 = vadd.f32 %v13558_v26, %v13494_v29  ;;  %v13628_v49 = vadd.f32 %v13627_v13, %v13597_v9  ;;  %v20590_v12 = vadd.f32 %v19504_v50, %v19408_v43  ;;  %v13102_v60 = vpop.f32.mrb[9].mxu0  ;;  %v19409_v51 = vpop.f32.mrb[10].mxu1  ;;  %v13319_v56 = vand.u32 31, %v26135_v4 }
 0x8c0   : >> { %v20591_v24 = vadd.f32 %v13102_v60, %v12518_v45  ;;  %v19505_v14 = vpop.f32.mrb[10].mxu0  ;;  %v12521_v1 = vpop.f32.mrb[11].mxu1  ;;  %v13354_v7 = vshra.s32 %v26143_v37, 5  ;;  %v13255_v20 = vadd.s32 200, %v25774_v18  ;;  %vm26178_vm12 = vcmp.gt.s32.totalorder %v13321_v8, %v13385_v10 }
 0x8c1   : >> { %v13629_v23 = vadd.f32 %v13628_v49, %v13598_v0  ;;  %v13498_v39 = vsel %vm13466_vm14, %v20590_v12, 0.0  ;;  %v13560_v58 = vadd.f32 %v13559_v25, %v13495_v61  ;;  %v20592_v2 = vadd.f32 %v19505_v14, %v19409_v51  ;;  %v13105_v21 = vpop.f32.mrb[11].mxu0 }
 0x8c2   : >> { %16661 = vst [vmem:[%s26030_s19 + $0xd8] sm:$0xff] %v13498_v39  ;;  %v13496_v62 = vsel %vm13464_vm11, %v20591_v24, 0.0  ;;  %v20593_v29 = vadd.f32 %v13105_v21, %v12521_v1  ;;  %v13383_v26 = vand.u32 31, %v13351_v55  ;;  %v13322_v9 = vand.u32 31, %v26143_v37 }
 0x8c3   : >> { %16659 = vst [vmem:[%s26030_s19 + $0xc8] sm:$0xff] %v13496_v62  ;;  %v13561_v6 = vadd.f32 %v13560_v58, %v13496_v62  ;;  %v13600_v11 = vmul.f32 %v13496_v62, %v13496_v62  ;;  %v13630_v35 = vadd.f32 %v13629_v23, %v13599_v22  ;;  %v13499_v47 = vsel %vm13467_vm15, %v20592_v2, 0.0 }
 0x8c4   : >> { %16662 = vst [vmem:[%s26030_s19 + $0xe0] sm:$0xff] %v13499_v47  ;;  %v13497_v28 = vsel %vm13465_vm1, %v20593_v29, 0.0  ;;  %v13260_v43 = vadd.s32 240, %v25774_v18  ;;  %v13602_v50 = vmul.f32 %v13498_v39, %v13498_v39  ;;  %v13603_v49 = vmul.f32 %v13499_v47, %v13499_v47 }
 0x8c5   : >> { %v13631_v54 = vadd.f32 %v13630_v35, %v13600_v11  ;;  %16660 = vst [vmem:[%s26030_s19 + $0xd0] sm:$0xff] %v13497_v28  ;;  %v13562_v32 = vadd.f32 %v13561_v6, %v13497_v28  ;;  %v13601_v61 = vmul.f32 %v13497_v28, %v13497_v28  ;;  %v19412_v34 = vpop.f32.mrb[12].mxu1  ;;  %vm13475_vm9 = vcmp.lt.s32.totalorder %v26052_v59, %v25802_v52 }
 0x8c6   : >> { %v19508_v27 = vpop.f32.mrb[12].mxu0  ;;  %v12534_v30 = vpop.f32.mrb[13].mxu1  ;;  %v26188_v22 = vand.u32 31, %v13354_v7  ;;  %v26191_v24 = vadd.s32 %v25778_v36, %v13255_v20  ;;  %vm13473_vm14 = vcmp.lt.s32.totalorder %v26060_v46, %v25802_v52  ;;  %vm26202_vm10 = vcmp.gt.s32.totalorder %v13319_v56, %v13383_v26 }
 0x8c7   : >> { %v13563_v45 = vadd.f32 %v13562_v32, %v13498_v39  ;;  %v13632_v5 = vadd.f32 %v13631_v54, %v13601_v61  ;;  %v20594_v4 = vadd.f32 %v19508_v27, %v19412_v34  ;;  %v13118_v0 = vpop.f32.mrb[13].mxu0  ;;  %v19413_v25 = vpop.f32.mrb[14].mxu1  ;;  %v26207_v44 = vadd.s32 %v25778_v36, %v13260_v43 }
 0x8c8   : >> { %v20595_v12 = vadd.f32 %v13118_v0, %v12534_v30  ;;  %v19509_v60 = vpop.f32.mrb[14].mxu0  ;;  %v12537_v51 = vpop.f32.mrb[15].mxu1  ;;  %v26222_v35 = vsel %vm26170_vm7, %v13316_v42, %v26131_v40  ;;  %v13352_v57 = vshra.s32 %v26191_v24, 5  ;;  %v13258_v54 = vadd.s32 224, %v25774_v18 }
 0x8c9   : >> { %v13633_v14 = vadd.f32 %v13632_v5, %v13602_v50  ;;  %v13502_v1 = vsel %vm13470_vm3, %v20594_v4, 0.0  ;;  %v13564_v23 = vadd.f32 %v13563_v45, %v13499_v47  ;;  %v20596_v39 = vadd.f32 %v19509_v60, %v19413_v25  ;;  %v13121_v58 = vpop.f32.mrb[15].mxu0 }
 0x8ca   : >> { %16665 = vst [vmem:[%s26030_s19 + $0xf8] sm:$0xff] %v13502_v1  ;;  %v13500_v2 = vsel %vm13468_vm4, %v20595_v12, 0.0  ;;  %v20597_v21 = vadd.f32 %v13121_v58, %v12537_v51  ;;  %v26228_v47 = vsel %vm26178_vm12, %v13321_v8, %v13385_v10  ;;  %vm13478_vm11 = vcmp.lt.s32.totalorder %v26116_v38, %v25802_v52 }
 0x8cb   : >> { %16663 = vst [vmem:[%s26030_s19 + $0xe8] sm:$0xff] %v13500_v2  ;;  %v13565_v29 = vadd.f32 %v13564_v23, %v13500_v2  ;;  %v13604_v55 = vmul.f32 %v13500_v2, %v13500_v2  ;;  %v13634_v6 = vadd.f32 %v13633_v14, %v13603_v49  ;;  %v13503_v11 = vsel %vm13471_vm5, %v20596_v39, 0.0 }
 0x8cc   : >> { %16666 = vst [vmem:[%s26030_s19 + $0x100] sm:$0xff] %v13503_v11  ;;  %v13501_v63 = vsel %vm13469_vm6, %v20597_v21, 0.0  ;;  %v26237_v31 = vsel %vm26202_vm10, %v13319_v56, %v13383_v26  ;;  %vm26242_vm15 = vcmp.gt.s32.totalorder %v13322_v9, %v26188_v22  ;;  %v13320_v40 = vand.u32 31, %v26191_v24 }
 0x8cd   : >> { %v13635_v28 = vadd.f32 %v13634_v6, %v13604_v55  ;;  %16664 = vst [vmem:[%s26030_s19 + $0xf0] sm:$0xff] %v13501_v63  ;;  %v13566_v7 = vadd.f32 %v13565_v29, %v13501_v63  ;;  %v13605_v41 = vmul.f32 %v13501_v63, %v13501_v63  ;;  %v19416_v20 = vpop.f32.mrb[16].mxu1  ;;  %v13357_v8 = vshra.s32 %v26207_v44, 5 }
 0x8ce   : >> { %v19512_v3 = vpop.f32.mrb[16].mxu0  ;;  %v12550_v32 = vpop.f32.mrb[17].mxu1  ;;  %v13606_v10 = vmul.f32 %v13502_v1, %v13502_v1  ;;  %vm13476_vm0 = vcmp.lt.s32.totalorder %v26120_v48, %v25802_v52  ;;  %v13607_v56 = vmul.f32 %v13503_v11, %v13503_v11  ;;  %vm13479_vm1 = vcmp.lt.s32.totalorder %v26129_v53, %v25802_v52 }
 0x8cf   : >> { %v13567_v61 = vadd.f32 %v13566_v7, %v13502_v1  ;;  %v13636_v34 = vadd.f32 %v13635_v28, %v13605_v41  ;;  %v20598_v16 = vadd.f32 %v19512_v3, %v19416_v20  ;;  %v13134_v27 = vpop.f32.mrb[17].mxu0  ;;  %v19417_v30 = vpop.f32.mrb[18].mxu1  ;;  %v13384_v50 = vand.u32 31, %v13352_v57 }
 0x8d0   : >> { %v20599_v13 = vadd.f32 %v13134_v27, %v12550_v32  ;;  %v19513_v26 = vpop.f32.mrb[18].mxu0  ;;  %v12553_v43 = vpop.f32.mrb[19].mxu1  ;;  %v13261_v45 = vadd.s32 248, %v25774_v18  ;;  %vm13477_vm2 = vcmp.lt.s32.totalorder %v26222_v35, %v25802_v52  ;;  %v26263_v51 = vadd.s32 %v25778_v36, %v13258_v54 }
 0x8d1   : >> { %v13637_v5 = vadd.f32 %v13636_v34, %v13606_v10  ;;  %v13506_v4 = vsel %vm13474_vm8, %v20598_v16, 0.0  ;;  %v13568_v0 = vadd.f32 %v13567_v61, %v13503_v11  ;;  %v20600_v25 = vadd.f32 %v19513_v26, %v19417_v30  ;;  %v13137_v49 = vpop.f32.mrb[19].mxu0 }
 0x8d2   : >> { %16669 = vst [vmem:[%s26030_s19 + $0x118] sm:$0xff] %v13506_v4  ;;  %v13504_v12 = vsel %vm13472_vm13, %v20599_v13, 0.0  ;;  %v20601_v60 = vadd.f32 %v13137_v49, %v12553_v43  ;;  %v26279_v39 = vsel %vm26242_vm15, %v13322_v9, %v26188_v22  ;;  %v13325_v18 = vand.u32 31, %v26207_v44 }
 0x8d3   : >> { %16667 = vst [vmem:[%s26030_s19 + $0x108] sm:$0xff] %v13504_v12  ;;  %v13569_v24 = vadd.f32 %v13568_v0, %v13504_v12  ;;  %v13608_v14 = vmul.f32 %v13504_v12, %v13504_v12  ;;  %v13638_v1 = vadd.f32 %v13637_v5, %v13607_v56  ;;  %v13507_v23 = vsel %vm13475_vm9, %v20600_v25, 0.0 }
 0x8d4   : >> { %16670 = vst [vmem:[%s26030_s19 + $0x120] sm:$0xff] %v13507_v23  ;;  %v13505_v17 = vsel %vm13473_vm14, %v20601_v60, 0.0  ;;  %v26283_v58 = vadd.s32 %v25778_v36, %v13261_v45  ;;  %vm26286_vm3 = vcmp.gt.s32.totalorder %v13320_v40, %v13384_v50  ;;  %vm13482_vm4 = vcmp.lt.s32.totalorder %v26228_v47, %v25802_v52 }
 0x8d5   : >> { %v13639_v2 = vadd.f32 %v13638_v1, %v13608_v14  ;;  %16668 = vst [vmem:[%s26030_s19 + $0x110] sm:$0xff] %v13505_v17  ;;  %v13570_v59 = vadd.f32 %v13569_v24, %v13505_v17  ;;  %v13609_v21 = vmul.f32 %v13505_v17, %v13505_v17  ;;  %v19420_v62 = vpop.f32.mrb[20].mxu1  ;;  %v13389_v9 = vand.u32 31, %v13357_v8 }
 0x8d6   : >> { %v19516_v29 = vpop.f32.mrb[20].mxu0  ;;  %v12566_v37 = vpop.f32.mrb[21].mxu1  ;;  %v13323_v22 = vand.u32 31, %v26263_v51  ;;  %v13355_v55 = vshra.s32 %v26263_v51, 5  ;;  %v26295_v6 = vadd.s32 %v25778_v36, %v13259_v33  ;;  %v13610_v11 = vmul.f32 %v13506_v4, %v13506_v4 }
 0x8d7   : >> { %v13571_v63 = vadd.f32 %v13570_v59, %v13506_v4  ;;  %v13640_v57 = vadd.f32 %v13639_v2, %v13609_v21  ;;  %v20602_v28 = vadd.f32 %v19516_v29, %v19420_v62  ;;  %v13150_v7 = vpop.f32.mrb[21].mxu0  ;;  %v19421_v41 = vpop.f32.mrb[22].mxu1  ;;  %vm13480_vm5 = vcmp.lt.s32.totalorder %v26237_v31, %v25802_v52 }
 0x8d8   : >> { %v13611_v20 = vmul.f32 %v13507_v23, %v13507_v23  ;;  %v20603_v54 = vadd.f32 %v13150_v7, %v12566_v37  ;;  %v19517_v3 = vpop.f32.mrb[22].mxu0  ;;  %v12569_v32 = vpop.f32.mrb[23].mxu1  ;;  %v26301_v42 = vsel %vm26286_vm3, %v13320_v40, %v13384_v50  ;;  %v13358_v36 = vshra.s32 %v26283_v58, 5 }
 0x8d9   : >> { %v13641_v8 = vadd.f32 %v13640_v57, %v13610_v11  ;;  %v13510_v10 = vsel %vm13478_vm11, %v20602_v28, 0.0  ;;  %v13572_v61 = vadd.f32 %v13571_v63, %v13507_v23  ;;  %v20604_v34 = vadd.f32 %v19517_v3, %v19421_v41  ;;  %v13153_v16 = vpop.f32.mrb[23].mxu0 }
 0x8da   : >> { %16673 = vst [vmem:[%s26030_s19 + $0x138] sm:$0xff] %v13510_v10  ;;  %v13508_v27 = vsel %vm13476_vm0, %v20603_v54, 0.0  ;;  %v20605_v30 = vadd.f32 %v13153_v16, %v12569_v32  ;;  %v13387_v40 = vand.u32 31, %v13355_v55  ;;  %v13356_v56 = vshra.s32 %v26295_v6, 5 }
 0x8db   : >> { %16671 = vst [vmem:[%s26030_s19 + $0x128] sm:$0xff] %v13508_v27  ;;  %v13573_v13 = vadd.f32 %v13572_v61, %v13508_v27  ;;  %v13612_v26 = vmul.f32 %v13508_v27, %v13508_v27  ;;  %v13642_v43 = vadd.f32 %v13641_v8, %v13611_v20  ;;  %v13511_v38 = vsel %vm13479_vm1, %v20604_v34, 0.0 }
 0x8dc   : >> { %16674 = vst [vmem:[%s26030_s19 + $0x140] sm:$0xff] %v13511_v38  ;;  %v13509_v50 = vsel %vm13477_vm2, %v20605_v30, 0.0  ;;  %vm13483_vm6 = vcmp.lt.s32.totalorder %v26279_v39, %v25802_v52  ;;  %v13326_v48 = vand.u32 31, %v26283_v58  ;;  %v13390_v45 = vand.u32 31, %v13358_v36 }
 0x8dd   : >> { %v13643_v5 = vadd.f32 %v13642_v43, %v13612_v26  ;;  %16672 = vst [vmem:[%s26030_s19 + $0x130] sm:$0xff] %v13509_v50  ;;  %v13574_v4 = vadd.f32 %v13573_v13, %v13509_v50  ;;  %v13613_v0 = vmul.f32 %v13509_v50, %v13509_v50  ;;  %v19424_v25 = vpop.f32.mrb[24].mxu1  ;;  %vm26326_vm7 = vcmp.gt.s32.totalorder %v13325_v18, %v13389_v9 }
 0x8de   : >> { %v19520_v49 = vpop.f32.mrb[24].mxu0  ;;  %v12582_v35 = vpop.f32.mrb[25].mxu1  ;;  %vm13481_vm8 = vcmp.lt.s32.totalorder %v26301_v42, %v25802_v52  ;;  %vm26334_vm12 = vcmp.gt.s32.totalorder %v13323_v22, %v13387_v40  ;;  %v13324_v60 = vand.u32 31, %v26295_v6  ;;  %v13388_v33 = vand.u32 31, %v13356_v56 }
 0x8df   : >> { %v13614_v24 = vmul.f32 %v13510_v10, %v13510_v10  ;;  %v13575_v14 = vadd.f32 %v13574_v4, %v13510_v10  ;;  %v13644_v1 = vadd.f32 %v13643_v5, %v13613_v0  ;;  %v20606_v23 = vadd.f32 %v19520_v49, %v19424_v25  ;;  %v13166_v17 = vpop.f32.mrb[25].mxu0  ;;  %v19425_v58 = vpop.f32.mrb[26].mxu1 }
 0x8e0   : >> { %v13615_v2 = vmul.f32 %v13511_v38, %v13511_v38  ;;  %v20607_v59 = vadd.f32 %v13166_v17, %v12582_v35  ;;  %v19521_v21 = vpop.f32.mrb[26].mxu0  ;;  %v12585_v62 = vpop.f32.mrb[27].mxu1  ;;  %v13452_v46 = vsel %vm26326_vm7, %v13325_v18, %v13389_v9  ;;  %vm26343_vm13 = vcmp.gt.s32.totalorder %v13326_v48, %v13390_v45 }
 0x8e1   : >> { %v13645_v37 = vadd.f32 %v13644_v1, %v13614_v24  ;;  %v13514_v55 = vsel %vm13482_vm4, %v20606_v23, 0.0  ;;  %v13576_v6 = vadd.f32 %v13575_v14, %v13511_v38  ;;  %v20608_v11 = vadd.f32 %v19521_v21, %v19425_v58  ;;  %v13169_v63 = vpop.f32.mrb[27].mxu0 }
 0x8e2   : >> { %16677 = vst [vmem:[%s26030_s19 + $0x158] sm:$0xff] %v13514_v55  ;;  %v13512_v44 = vsel %vm13480_vm5, %v20607_v59, 0.0  ;;  %v20609_v18 = vadd.f32 %v13169_v63, %v12585_v62  ;;  %v13448_v9 = vsel %vm26334_vm12, %v13323_v22, %v13387_v40  ;;  %vm13449_vm9 = vcmp.gt.s32.totalorder %v13324_v60, %v13388_v33 }
 0x8e3   : >> { %16675 = vst [vmem:[%s26030_s19 + $0x148] sm:$0xff] %v13512_v44  ;;  %v13577_v57 = vadd.f32 %v13576_v6, %v13512_v44  ;;  %v13616_v47 = vmul.f32 %v13512_v44, %v13512_v44  ;;  %v13646_v28 = vadd.f32 %v13645_v37, %v13615_v2  ;;  %v13515_v7 = vsel %vm13483_vm6, %v20608_v11, 0.0 }
 0x8e4   : >> { %16678 = vst [vmem:[%s26030_s19 + $0x160] sm:$0xff] %v13515_v7  ;;  %v13513_v31 = vsel %vm13481_vm8, %v20609_v18, 0.0  ;;  %v13454_v51 = vsel %vm26343_vm13, %v13326_v48, %v13390_v45  ;;  %v13450_v3 = vsel %vm13449_vm9, %v13324_v60, %v13388_v33  ;;  %vm13486_vm14 = vcmp.lt.s32.totalorder %v13452_v46, %v25802_v52 }
 0x8e5   : >> { %v13647_v41 = vadd.f32 %v13646_v28, %v13616_v47  ;;  %16676 = vst [vmem:[%s26030_s19 + $0x150] sm:$0xff] %v13513_v31  ;;  %v13578_v22 = vadd.f32 %v13577_v57, %v13513_v31  ;;  %v13617_v20 = vmul.f32 %v13513_v31, %v13513_v31  ;;  %v19428_v54 = vpop.f32.mrb[28].mxu1  ;;  %vm13484_vm10 = vcmp.lt.s32.totalorder %v13448_v9, %v25802_v52 }
 0x8e6   : >> { %v19524_v32 = vpop.f32.mrb[28].mxu0  ;;  %v12598_v36 = vpop.f32.mrb[29].mxu1  ;;  %v13618_v39 = vmul.f32 %v13514_v55, %v13514_v55  ;;  %v13619_v16 = vmul.f32 %v13515_v7, %v13515_v7  ;;  %vm13487_vm11 = vcmp.lt.s32.totalorder %v13454_v51, %v25802_v52  ;;  %vm13485_vm15 = vcmp.lt.s32.totalorder %v13450_v3, %v25802_v52 }
 0x8e7   : >> { %v13579_v8 = vadd.f32 %v13578_v22, %v13514_v55  ;;  %v13648_v42 = vadd.f32 %v13647_v41, %v13617_v20  ;;  %v20610_v10 = vadd.f32 %v19524_v32, %v19428_v54  ;;  %v13182_v61 = vpop.f32.mrb[29].mxu0  ;;  %v19429_v34 = vpop.f32.mrb[30].mxu1 }
 0x8e8   : >> { %v20611_v27 = vadd.f32 %v13182_v61, %v12598_v36  ;;  %v19525_v30 = vpop.f32.mrb[30].mxu0  ;;  %v12601_v40 = vpop.f32.mrb[31].mxu1 }
 0x8e9   : >> { %v13649_v56 = vadd.f32 %v13648_v42, %v13618_v39  ;;  %v13518_v13 = vsel %vm13486_vm14, %v20610_v10, 0.0  ;;  %v13580_v26 = vadd.f32 %v13579_v8, %v13515_v7  ;;  %v20612_v43 = vadd.f32 %v19525_v30, %v19429_v34  ;;  %v13185_v38 = vpop.f32.mrb[31].mxu0 }
 0x8ea   : >> { %16681 = vst [vmem:[%s26030_s19 + $0x178] sm:$0xff] %v13518_v13  ;;  %v13516_v50 = vsel %vm13484_vm10, %v20611_v27, 0.0  ;;  %v20613_v48 = vadd.f32 %v13185_v38, %v12601_v40  ;;  %v13622_v12 = vmul.f32 %v13518_v13, %v13518_v13 }
 0x8eb   : >> { %16679 = vst [vmem:[%s26030_s19 + $0x168] sm:$0xff] %v13516_v50  ;;  %v13581_v45 = vadd.f32 %v13580_v26, %v13516_v50  ;;  %v13620_v5 = vmul.f32 %v13516_v50, %v13516_v50  ;;  %v13650_v4 = vadd.f32 %v13649_v56, %v13619_v16  ;;  %v13519_v0 = vsel %vm13487_vm11, %v20612_v43, 0.0 }
 0x8ec   : >> { %16682 = vst [vmem:[%s26030_s19 + $0x180] sm:$0xff] %v13519_v0  ;;  %v13517_v25 = vsel %vm13485_vm15, %v20613_v48, 0.0  ;;  %v13623_v24 = vmul.f32 %v13519_v0, %v13519_v0 }
 0x8ed   : >> { %v13651_v53 = vadd.f32 %v13650_v4, %v13620_v5  ;;  %16680 = vst [vmem:[%s26030_s19 + $0x170] sm:$0xff] %v13517_v25  ;;  %v13582_v49 = vadd.f32 %v13581_v45, %v13517_v25  ;;  %v13621_v35 = vmul.f32 %v13517_v25, %v13517_v25 }
 0x8ef   : >> { %v13583_v60 = vadd.f32 %v13582_v49, %v13518_v13  ;;  %v13652_v33 = vadd.f32 %v13651_v53, %v13621_v35 }
 0x8f1   : >> { %v13584_v14 = vadd.f32 %v13583_v60, %v13519_v0  ;;  %v13653_v1 = vadd.f32 %v13652_v33, %v13622_v12 }
 0x8f3   : >> { %v13585_v52 = vrot.slane %v13584_v14, 4  ;;  %v13654_v23 = vadd.f32 %v13653_v1, %v13623_v24 }
 0x8f5   : >> { %v13586_v17 = vadd.f32 %v13585_v52, %v13584_v14  ;;  %v13655_v58 = vrot.slane %v13654_v23, 4 }
 0x8f7   : >> { %v13587_v2 = vrot.slane %v13586_v17, 2  ;;  %v13656_v59 = vadd.f32 %v13655_v58, %v13654_v23 }
 0x8f9   : >> { %v13588_v21 = vadd.f32 %v13587_v2, %v13586_v17  ;;  %v13657_v62 = vrot.slane %v13656_v59, 2 }
 0x8fb   : >> { %v13589_v46 = vrot.slane %v13588_v21, 1  ;;  %v13658_v29 = vadd.f32 %v13657_v62, %v13656_v59 }
 0x8fd   : >> { %v13590_v37 = vadd.f32 %v13589_v46, %v13588_v21  ;;  %v13659_v55 = vrot.slane %v13658_v29, 1  ;;  %12057 = sbr.rel (!%p12055_p3) target bundleno = 1913 (0x779), region = 229 }
 0x8ff   : >> { %v13591_v6 = vadd.f32 %v21398_v19, %v13590_v37   ;;  %v13660_v11 = vadd.f32 %v13659_v55, %v13658_v29 }
 0x901   : >> { %v13661_v63 = vadd.f32 %v21394_v15, %v13660_v11   ;;  %v27017_v19 = vmov %v13591_v6  ;;  %13662 = vst [vmem:[#allocation3] sm:$0x1] (%p12055_p3), %v13591_v6 }
 0x903   : >> { %v27016_v15 = vmov %v13661_v63  ;;  %13663 = vst [vmem:[#allocation3 + $0x1] sm:$0x1] (%p12055_p3), %v13661_v63 }
 0x904 PF: > { %s13667_s21 = scvt.s32.f32 %s22439_s22  ;;  %p13687_p5 = scmp.gt.s32.totalorder %s22437_s20, 0 }
 0x905   : > { %s16683_s9 = sshll.u32 %s21476_s0, 3  ;;  %s26413_s20 = smov 0  }
 0x906   : > { %v13668_v19 = vstv %s13667_s21  ;;  %s26394_s24 = scalar_select %p13687_p5, 0.0, -inf }
 0x907   : > { %21146 = vrcp.f32 %v13668_v19  ;;  %s13688_s22 = scalar_select %p13687_p5, 1, 0 }
 0x908   : > { %v13671_v18 = vld [vmem:[#allocation3] sm:$0x1]  ;;  %s13665_s28 = scalar_lea.vmem [#allocation8], %s16683_s9 }
 0x909   : > { %v13689_v41 = vstv %s13688_s22  ;;  %v13666_v22 = vld [vmem:[%s13665_s28] sm:$0xff] }
 0x90a   : > { %v13674_v15 = vld [vmem:[#allocation3 + $0x1] sm:$0x1]  ;;  %vm26399_vm0 = vcmp.eq.s32.totalorder %v13689_v41, 1  ;;  %v13693_v8 = vrot.slane %v13666_v22, 1 }
 0x911   : > { %v21147_v44 = vpop.eup %21146 }
 0x912   : > { %20680 = vpush %v21147_v44 }
 0x943   : > { %s20681_s25 = spop %20680 }
 0x944   : > { %v13672_v9 = vstv %s20681_s25 }
 0x945   : > { %v13673_v57 = vmul.f32 %v13672_v9, %v13671_v18  ;;  %v13675_v47 = vmul.f32 %v13674_v15, %v13672_v9 }
 0x947   : > { %v13676_v28 = vmul.f32 %v13673_v57, %v13673_v57 }
 0x949   : > { %v13677_v7 = vsub.f32 %v13675_v47, %v13676_v28 }
 0x94b   : > { %v13678_v31 = vmax.f32 %v13677_v7, 0.0 }
 0x94d   : > { %v13679_v51 = vadd.f32 1e-05, %v13678_v31 }
 0x94f   : > { %21148 = vrsqrt.f32 %v13679_v51 }
 0x959   : > { %v21149_v20 = vpop.eup %21148 }
 0x95a   : > { %v26403_v3 = vmul.f32 %v21149_v20, %v13666_v22 }
 0x95c   : > { %v13682_v32 = vmul.f32 %v26403_v3, %v13673_v57  ;;  %v13691_v36 = vsel %vm26399_vm0, %v26403_v3, 1.0 }
 0x95e   : > { %v13684_v39 = vrot.slane %v13682_v32, 7 }
 0x960   : > { %v13686_v42 = vsub.f32 %v13666_v22, %v13684_v39 }
 0x962   : > { %v26411_v10 = vsel %vm26399_vm0, %v13686_v42, %v13693_v8 }
 0x963 LB: >> { %s14468_s5 = smul.u32 2320, %s22443_s10  ;;  %v13738_v61 = vlaneseq  ;;  %s16684_s12 = sshll.u32 %s21406_s20, 8  ;;  %v26425_v16 = vstv %s26394_s24  ;;  %v26438_v43 = vstv %s22435_s18  ;;  %s21406_s20 = sphi %s26413_s20, %s13702_s20  }
 0x964   : >> { %v26427_v27 = vstv %s16684_s12  ;;  %s13702_s20 = sadd.s32 1, %s21406_s20  }
 0x965   : >> { %v26420_v34 = vshrl.u32 %v13738_v61, 7  ;;  %s14470_s7 = sadd.s32 %s16684_s12, %s14468_s5  ;;  %p13699_p0 = scmp.ge.s32.totalorder %s13702_s20, 8  }
 0x966   : >> { %s26434_s30 = scalar_lea.vmem [#allocation2], %s14470_s7  ;;  %p16750_p2 = scmp.ne.s32.totalorder (%p13699_p0), %s21476_s0, 21 }
 0x967   : >> { %v13740_v30 = vsub.s32 0, %v26420_v34  ;;  %v13776_v40 = vsub.s32 1, %v26420_v34  ;;  %v13877_v56 = vadd.s32 %v26427_v27, %v26420_v34  ;;  %v13845_v13 = vadd.s32 8, %v26420_v34  ;;  %v16686_v26 = vld [vmem:[%s26434_s30 + $0x88] sm:$0xff]  ;;  %v16687_v38 = vld [vmem:[%s26434_s30 + $0x90] sm:$0xff]  ;;  %v16688_v50 = vld [vmem:[%s26434_s30 + $0x98] sm:$0xff] }
 0x968   : >> { %v13846_v48 = vadd.s32 16, %v26420_v34  ;;  %v13847_v45 = vadd.s32 24, %v26420_v34  ;;  %v13848_v5 = vadd.s32 32, %v26420_v34  ;;  %v16689_v52 = vld [vmem:[%s26434_s30 + $0xa0] sm:$0xff]  ;;  %v16690_v19 = vld [vmem:[%s26434_s30 + $0xa8] sm:$0xff]  ;;  %v16691_v28 = vld [vmem:[%s26434_s30 + $0xb0] sm:$0xff] }
 0x969   : >> { %v26449_v4 = vrot.slane %v13691_v36, %v13740_v30  ;;  %v26452_v0 = vrot.slane %v26411_v10, %v13776_v40  ;;  %v13909_v25 = vand.u32 31, %v13877_v56  ;;  %v13941_v53 = vshra.s32 %v13877_v56, 5  ;;  %v16692_v51 = vld [vmem:[%s26434_s30 + $0xb8] sm:$0xff]  ;;  %v16693_v41 = vld [vmem:[%s26434_s30 + $0xc0] sm:$0xff] }
 0x96a   : >> { %v13878_v49 = vadd.s32 %v26427_v27, %v13845_v13  ;;  %v13879_v35 = vadd.s32 %v26427_v27, %v13846_v48  ;;  %v13880_v12 = vadd.s32 %v26427_v27, %v13847_v45  ;;  %v26458_v60 = vadd.s32 %v26427_v27, %v13848_v5 }
 0x96b   : >> { %v13742_v33 = vmul.f32 %v16686_v26, %v26449_v4  ;;  %v13973_v24 = vand.u32 31, %v13941_v53  ;;  %v13743_v14 = vmul.f32 %v16687_v38, %v26449_v4  ;;  %v13744_v1 = vmul.f32 %v16688_v50, %v26449_v4 }
 0x96c   : >> { %v13910_v23 = vand.u32 31, %v13878_v49  ;;  %v13942_v17 = vshra.s32 %v13878_v49, 5  ;;  %v13911_v58 = vand.u32 31, %v13879_v35  ;;  %v13943_v2 = vshra.s32 %v13879_v35, 5 }
 0x96d   : >> { %v13778_v59 = vadd.f32 %v26452_v0, %v13742_v33  ;;  %vm14005_vm1 = vcmp.gt.s32.totalorder %v13909_v25, %v13973_v24  ;;  %v13779_v21 = vadd.f32 %v26452_v0, %v13743_v14  ;;  %v13780_v62 = vadd.f32 %v26452_v0, %v13744_v1  ;;  %v16695_v1 = vld [vmem:[%s26434_s30 + $0xd0] sm:$0xff] }
 0x96e   : >> { %v14006_v46 = vsel %vm14005_vm1, %v13909_v25, %v13973_v24  ;;  %v13974_v29 = vand.u32 31, %v13942_v17  ;;  %v13975_v37 = vand.u32 31, %v13943_v2  ;;  %v13745_v55 = vmul.f32 %v16689_v52, %v26449_v4 }
 0x96f   : >> { %v13811_v6 = vmax.f32 %v13778_v59, %v26425_v16  ;;  %vm14070_vm2 = vcmp.lt.s32.totalorder %v14006_v46, %v26438_v43  ;;  %v13812_v11 = vmax.f32 %v13779_v21, %v26425_v16  ;;  %v13813_v63 = vmax.f32 %v13780_v62, %v26425_v16 }
 0x970   : >> { %vm14007_vm3 = vcmp.gt.s32.totalorder %v13910_v23, %v13974_v29  ;;  %vm14009_vm4 = vcmp.gt.s32.totalorder %v13911_v58, %v13975_v37  ;;  %v13781_v44 = vadd.f32 %v26452_v0, %v13745_v55  ;;  %v13912_v18 = vand.u32 31, %v13880_v12 }
 0x971   : >> { %v14102_v9 = vsel %vm14070_vm2, %v13811_v6, 0.0  ;;  %v14008_v15 = vsel %vm14007_vm3, %v13910_v23, %v13974_v29  ;;  %v14010_v57 = vsel %vm14009_vm4, %v13911_v58, %v13975_v37  ;;  %v13944_v47 = vshra.s32 %v13880_v12, 5  ;;  %v16694_v12 = vld [vmem:[%s26434_s30 + $0xc8] sm:$0xff]  ;;  %v16696_v58 = vld [vmem:[%s26434_s30 + $0xd8] sm:$0xff] }
 0x972   : >> { %16718 = vst [vmem:[%s26434_s30 + $0x88] sm:$0xff] %v14102_v9  ;;  %vm14071_vm5 = vcmp.lt.s32.totalorder %v14008_v15, %v26438_v43  ;;  %vm14072_vm6 = vcmp.lt.s32.totalorder %v14010_v57, %v26438_v43  ;;  %v13814_v7 = vmax.f32 %v13781_v44, %v26425_v16  ;;  %v13746_v31 = vmul.f32 %v16690_v19, %v26449_v4 }
 0x973   : >> { %v14103_v22 = vsel %vm14071_vm5, %v13812_v11, 0.0  ;;  %v14104_v20 = vsel %vm14072_vm6, %v13813_v63, 0.0  ;;  %v13976_v32 = vand.u32 31, %v13944_v47  ;;  %v13913_v39 = vand.u32 31, %v26458_v60  ;;  %v16697_v47 = vld [vmem:[%s26434_s30 + $0xe0] sm:$0xff] }
 0x974   : >> { %16719 = vst [vmem:[%s26434_s30 + $0x90] sm:$0xff] %v14103_v22  ;;  %16720 = vst [vmem:[%s26434_s30 + $0x98] sm:$0xff] %v14104_v20  ;;  %v13782_v8 = vadd.f32 %v26452_v0, %v13746_v31  ;;  %v13945_v42 = vshra.s32 %v26458_v60, 5  ;;  %v13747_v61 = vmul.f32 %v16691_v28, %v26449_v4  ;;  %v13849_v30 = vadd.s32 40, %v26420_v34 }
 0x975   : >> { %vm14011_vm7 = vcmp.gt.s32.totalorder %v13912_v18, %v13976_v32  ;;  %v13748_v40 = vmul.f32 %v16692_v51, %v26449_v4  ;;  %v13850_v56 = vadd.s32 48, %v26420_v34  ;;  %v13749_v13 = vmul.f32 %v16693_v41, %v26449_v4  ;;  %v16698_v51 = vld [vmem:[%s26434_s30 + $0xe8] sm:$0xff] }
 0x976   : >> { %v14012_v26 = vsel %vm14011_vm7, %v13912_v18, %v13976_v32  ;;  %v13815_v38 = vmax.f32 %v13782_v8, %v26425_v16  ;;  %v13977_v50 = vand.u32 31, %v13945_v42  ;;  %v13783_v48 = vadd.f32 %v26452_v0, %v13747_v61 }
 0x977   : >> { %vm14073_vm8 = vcmp.lt.s32.totalorder %v14012_v26, %v26438_v43  ;;  %v13882_v45 = vadd.s32 %v26427_v27, %v13849_v30  ;;  %v13784_v5 = vadd.f32 %v26452_v0, %v13748_v40  ;;  %v13883_v25 = vadd.s32 %v26427_v27, %v13850_v56 }
 0x978   : >> { %v14105_v53 = vsel %vm14073_vm8, %v13814_v7, 0.0  ;;  %vm14013_vm12 = vcmp.gt.s32.totalorder %v13913_v39, %v13977_v50  ;;  %v13816_v49 = vmax.f32 %v13783_v48, %v26425_v16  ;;  %v26500_v35 = vadd.f32 %v26452_v0, %v13749_v13 }
 0x979   : >> { %16721 = vst [vmem:[%s26434_s30 + $0xa0] sm:$0xff] %v14105_v53  ;;  %v14014_v60 = vsel %vm14013_vm12, %v13913_v39, %v13977_v50  ;;  %v13914_v33 = vand.u32 31, %v13882_v45  ;;  %v13946_v24 = vshra.s32 %v13882_v45, 5  ;;  %v13817_v14 = vmax.f32 %v13784_v5, %v26425_v16 }
 0x97a   : >> { %vm14074_vm13 = vcmp.lt.s32.totalorder %v14014_v60, %v26438_v43  ;;  %v13915_v52 = vand.u32 31, %v13883_v25  ;;  %v13947_v23 = vshra.s32 %v13883_v25, 5  ;;  %v13818_v17 = vmax.f32 %v26500_v35, %v26425_v16 }
 0x97b   : >> { %v14106_v2 = vsel %vm14074_vm13, %v13815_v38, 0.0  ;;  %v13978_v59 = vand.u32 31, %v13946_v24  ;;  %v13851_v21 = vadd.s32 56, %v26420_v34  ;;  %v13750_v62 = vmul.f32 %v16694_v12, %v26449_v4 }
 0x97c   : >> { %16722 = vst [vmem:[%s26434_s30 + $0xa8] sm:$0xff] %v14106_v2  ;;  %v13979_v46 = vand.u32 31, %v13947_v23  ;;  %v13852_v29 = vadd.s32 64, %v26420_v34  ;;  %v13751_v37 = vmul.f32 %v16695_v1, %v26449_v4  ;;  %v13853_v55 = vadd.s32 72, %v26420_v34 }
 0x97d   : >> { %vm14015_vm9 = vcmp.gt.s32.totalorder %v13914_v33, %v13978_v59  ;;  %v13884_v6 = vadd.s32 %v26427_v27, %v13851_v21  ;;  %v13786_v11 = vadd.f32 %v26452_v0, %v13750_v62  ;;  %v13752_v63 = vmul.f32 %v16696_v58, %v26449_v4 }
 0x97e   : >> { %v14016_v19 = vsel %vm14015_vm9, %v13914_v33, %v13978_v59  ;;  %vm14017_vm14 = vcmp.gt.s32.totalorder %v13915_v52, %v13979_v46  ;;  %v13885_v44 = vadd.s32 %v26427_v27, %v13852_v29  ;;  %v13787_v18 = vadd.f32 %v26452_v0, %v13751_v37  ;;  %v16699_v33 = vld [vmem:[%s26434_s30 + $0xf0] sm:$0xff] }
 0x97f   : >> { %vm14075_vm10 = vcmp.lt.s32.totalorder %v14016_v19, %v26438_v43  ;;  %v14018_v9 = vsel %vm14017_vm14, %v13915_v52, %v13979_v46  ;;  %v13916_v15 = vand.u32 31, %v13884_v6  ;;  %v13948_v57 = vshra.s32 %v13884_v6, 5 }
 0x980   : >> { %v14107_v28 = vsel %vm14075_vm10, %v13816_v49, 0.0  ;;  %vm14076_vm11 = vcmp.lt.s32.totalorder %v14018_v9, %v26438_v43  ;;  %v13819_v7 = vmax.f32 %v13786_v11, %v26425_v16  ;;  %v13917_v31 = vand.u32 31, %v13885_v44  ;;  %v16700_v11 = vld [vmem:[%s26434_s30 + $0xf8] sm:$0xff]  ;;  %v16702_v9 = vld [vmem:[%s26434_s30 + $0x108] sm:$0xff] }
 0x981   : >> { %16723 = vst [vmem:[%s26434_s30 + $0xb0] sm:$0xff] %v14107_v28  ;;  %v14108_v41 = vsel %vm14076_vm11, %v13817_v14, 0.0  ;;  %v13980_v22 = vand.u32 31, %v13948_v57  ;;  %v13949_v20 = vshra.s32 %v13885_v44, 5  ;;  %v13820_v32 = vmax.f32 %v13787_v18, %v26425_v16  ;;  %v16701_v18 = vld [vmem:[%s26434_s30 + $0x100] sm:$0xff] }
 0x982   : >> { %16724 = vst [vmem:[%s26434_s30 + $0xb8] sm:$0xff] %v14108_v41  ;;  %v13886_v39 = vadd.s32 %v26427_v27, %v13853_v55  ;;  %v13788_v8 = vadd.f32 %v26452_v0, %v13752_v63  ;;  %v13854_v42 = vadd.s32 80, %v26420_v34  ;;  %v13753_v61 = vmul.f32 %v16697_v47, %v26449_v4 }
 0x983   : >> { %vm14019_vm15 = vcmp.gt.s32.totalorder %v13916_v15, %v13980_v22  ;;  %v13981_v30 = vand.u32 31, %v13949_v20  ;;  %v13855_v40 = vadd.s32 88, %v26420_v34  ;;  %v13754_v56 = vmul.f32 %v16698_v51, %v26449_v4 }
 0x984   : >> { %v14020_v13 = vsel %vm14019_vm15, %v13916_v15, %v13980_v22  ;;  %v13918_v26 = vand.u32 31, %v13886_v39  ;;  %v13950_v38 = vshra.s32 %v13886_v39, 5  ;;  %v13821_v50 = vmax.f32 %v13788_v8, %v26425_v16 }
 0x985   : >> { %vm14077_vm1 = vcmp.lt.s32.totalorder %v14020_v13, %v26438_v43  ;;  %vm14021_vm2 = vcmp.gt.s32.totalorder %v13917_v31, %v13981_v30  ;;  %v13887_v48 = vadd.s32 %v26427_v27, %v13854_v42  ;;  %v13789_v45 = vadd.f32 %v26452_v0, %v13753_v61 }
 0x986   : >> { %v14109_v5 = vsel %vm14077_vm1, %v13818_v17, 0.0  ;;  %v14022_v25 = vsel %vm14021_vm2, %v13917_v31, %v13981_v30  ;;  %v13982_v53 = vand.u32 31, %v13950_v38  ;;  %v13888_v49 = vadd.s32 %v26427_v27, %v13855_v40 }
 0x987   : >> { %16725 = vst [vmem:[%s26434_s30 + $0xc0] sm:$0xff] %v14109_v5  ;;  %vm14078_vm3 = vcmp.lt.s32.totalorder %v14022_v25, %v26438_v43  ;;  %v13919_v35 = vand.u32 31, %v13887_v48  ;;  %v13951_v12 = vshra.s32 %v13887_v48, 5  ;;  %v13822_v60 = vmax.f32 %v13789_v45, %v26425_v16  ;;  %v16703_v45 = vld [vmem:[%s26434_s30 + $0x110] sm:$0xff]  ;;  %v16704_v5 = vld [vmem:[%s26434_s30 + $0x118] sm:$0xff] }
 0x988   : >> { %v14110_v24 = vsel %vm14078_vm3, %v13819_v7, 0.0  ;;  %vm14023_vm4 = vcmp.gt.s32.totalorder %v13918_v26, %v13982_v53  ;;  %v13920_v14 = vand.u32 31, %v13888_v49  ;;  %v13952_v1 = vshra.s32 %v13888_v49, 5 }
 0x989   : >> { %16726 = vst [vmem:[%s26434_s30 + $0xc8] sm:$0xff] %v14110_v24  ;;  %v14024_v52 = vsel %vm14023_vm4, %v13918_v26, %v13982_v53  ;;  %v13983_v23 = vand.u32 31, %v13951_v12  ;;  %v13790_v17 = vadd.f32 %v26452_v0, %v13754_v56  ;;  %v13856_v58 = vadd.s32 96, %v26420_v34 }
 0x98a   : >> { %vm14079_vm5 = vcmp.lt.s32.totalorder %v14024_v52, %v26438_v43  ;;  %v13984_v2 = vand.u32 31, %v13952_v1  ;;  %v13755_v59 = vmul.f32 %v16699_v33, %v26449_v4  ;;  %v13857_v21 = vadd.s32 104, %v26420_v34 }
 0x98b   : >> { %v14111_v62 = vsel %vm14079_vm5, %v13820_v32, 0.0  ;;  %vm14025_vm6 = vcmp.gt.s32.totalorder %v13919_v35, %v13983_v23  ;;  %v13823_v46 = vmax.f32 %v13790_v17, %v26425_v16  ;;  %v13889_v29 = vadd.s32 %v26427_v27, %v13856_v58 }
 0x98c   : >> { %16727 = vst [vmem:[%s26434_s30 + $0xd0] sm:$0xff] %v14111_v62  ;;  %v14026_v37 = vsel %vm14025_vm6, %v13919_v35, %v13983_v23  ;;  %vm14027_vm7 = vcmp.gt.s32.totalorder %v13920_v14, %v13984_v2  ;;  %v13791_v55 = vadd.f32 %v26452_v0, %v13755_v59  ;;  %v13890_v6 = vadd.s32 %v26427_v27, %v13857_v21 }
 0x98d   : >> { %vm14080_vm8 = vcmp.lt.s32.totalorder %v14026_v37, %v26438_v43  ;;  %v14028_v63 = vsel %vm14027_vm7, %v13920_v14, %v13984_v2  ;;  %v13921_v19 = vand.u32 31, %v13889_v29  ;;  %v13953_v44 = vshra.s32 %v13889_v29, 5  ;;  %v16705_v37 = vld [vmem:[%s26434_s30 + $0x120] sm:$0xff] }
 0x98e   : >> { %v14112_v15 = vsel %vm14080_vm8, %v13821_v50, 0.0  ;;  %vm14081_vm12 = vcmp.lt.s32.totalorder %v14028_v63, %v26438_v43  ;;  %v13824_v57 = vmax.f32 %v13791_v55, %v26425_v16  ;;  %v13922_v47 = vand.u32 31, %v13890_v6  ;;  %v16706_v63 = vld [vmem:[%s26434_s30 + $0x128] sm:$0xff] }
 0x98f   : >> { %16728 = vst [vmem:[%s26434_s30 + $0xd8] sm:$0xff] %v14112_v15  ;;  %v14113_v28 = vsel %vm14081_vm12, %v13822_v60, 0.0  ;;  %v13985_v7 = vand.u32 31, %v13953_v44  ;;  %v13954_v31 = vshra.s32 %v13890_v6, 5  ;;  %v13756_v51 = vmul.f32 %v16700_v11, %v26449_v4 }
 0x990   : >> { %16729 = vst [vmem:[%s26434_s30 + $0xe0] sm:$0xff] %v14113_v28  ;;  %v13858_v41 = vadd.s32 112, %v26420_v34  ;;  %v13757_v22 = vmul.f32 %v16701_v18, %v26449_v4  ;;  %v13859_v20 = vadd.s32 120, %v26420_v34  ;;  %v13758_v32 = vmul.f32 %v16702_v9, %v26449_v4 }
 0x991   : >> { %vm14029_vm13 = vcmp.gt.s32.totalorder %v13921_v19, %v13985_v7  ;;  %v13986_v39 = vand.u32 31, %v13954_v31  ;;  %v13792_v8 = vadd.f32 %v26452_v0, %v13756_v51  ;;  %v13860_v42 = vadd.s32 128, %v26420_v34  ;;  %v16707_v51 = vld [vmem:[%s26434_s30 + $0x130] sm:$0xff] }
 0x992   : >> { %v14030_v61 = vsel %vm14029_vm13, %v13921_v19, %v13985_v7  ;;  %v13891_v30 = vadd.s32 %v26427_v27, %v13858_v41  ;;  %v13793_v40 = vadd.f32 %v26452_v0, %v13757_v22  ;;  %v13892_v56 = vadd.s32 %v26427_v27, %v13859_v20 }
 0x993   : >> { %vm14082_vm9 = vcmp.lt.s32.totalorder %v14030_v61, %v26438_v43  ;;  %vm14031_vm14 = vcmp.gt.s32.totalorder %v13922_v47, %v13986_v39  ;;  %v13825_v13 = vmax.f32 %v13792_v8, %v26425_v16  ;;  %v13794_v49 = vadd.f32 %v26452_v0, %v13758_v32 }
 0x994   : >> { %v14114_v26 = vsel %vm14082_vm9, %v13823_v46, 0.0  ;;  %v14032_v38 = vsel %vm14031_vm14, %v13922_v47, %v13986_v39  ;;  %v13923_v50 = vand.u32 31, %v13891_v30  ;;  %v13955_v48 = vshra.s32 %v13891_v30, 5 }
 0x995   : >> { %16730 = vst [vmem:[%s26434_s30 + $0xe8] sm:$0xff] %v14114_v26  ;;  %vm14083_vm10 = vcmp.lt.s32.totalorder %v14032_v38, %v26438_v43  ;;  %v13924_v25 = vand.u32 31, %v13892_v56  ;;  %v13956_v53 = vshra.s32 %v13892_v56, 5  ;;  %v13826_v60 = vmax.f32 %v13793_v40, %v26425_v16 }
 0x996   : >> { %v14115_v35 = vsel %vm14083_vm10, %v13824_v57, 0.0  ;;  %v13987_v12 = vand.u32 31, %v13955_v48  ;;  %v13893_v33 = vadd.s32 %v26427_v27, %v13860_v42  ;;  %v13759_v14 = vmul.f32 %v16703_v45, %v26449_v4 }
 0x997   : >> { %16731 = vst [vmem:[%s26434_s30 + $0xf0] sm:$0xff] %v14115_v35  ;;  %v13988_v24 = vand.u32 31, %v13956_v53  ;;  %v13861_v1 = vadd.s32 136, %v26420_v34  ;;  %v13760_v52 = vmul.f32 %v16704_v5, %v26449_v4  ;;  %v13862_v58 = vadd.s32 144, %v26420_v34 }
 0x998   : >> { %vm14033_vm11 = vcmp.gt.s32.totalorder %v13923_v50, %v13987_v12  ;;  %v13925_v23 = vand.u32 31, %v13893_v33  ;;  %v13957_v17 = vshra.s32 %v13893_v33, 5  ;;  %v13795_v59 = vadd.f32 %v26452_v0, %v13759_v14 }
 0x999   : >> { %v14034_v2 = vsel %vm14033_vm11, %v13923_v50, %v13987_v12  ;;  %vm14035_vm15 = vcmp.gt.s32.totalorder %v13924_v25, %v13988_v24  ;;  %v13894_v21 = vadd.s32 %v26427_v27, %v13861_v1  ;;  %v13827_v46 = vmax.f32 %v13794_v49, %v26425_v16  ;;  %v16708_v50 = vld [vmem:[%s26434_s30 + $0x138] sm:$0xff] }
 0x99a   : >> { %vm14084_vm1 = vcmp.lt.s32.totalorder %v14034_v2, %v26438_v43  ;;  %v14036_v62 = vsel %vm14035_vm15, %v13924_v25, %v13988_v24  ;;  %v13989_v29 = vand.u32 31, %v13957_v17  ;;  %v13828_v6 = vmax.f32 %v13795_v59, %v26425_v16 }
 0x99b   : >> { %v14116_v55 = vsel %vm14084_vm1, %v13825_v13, 0.0  ;;  %vm14085_vm2 = vcmp.lt.s32.totalorder %v14036_v62, %v26438_v43  ;;  %v13796_v11 = vadd.f32 %v26452_v0, %v13760_v52  ;;  %v13926_v44 = vand.u32 31, %v13894_v21  ;;  %v16710_v62 = vld [vmem:[%s26434_s30 + $0x148] sm:$0xff] }
 0x99c   : >> { %16732 = vst [vmem:[%s26434_s30 + $0xf8] sm:$0xff] %v14116_v55  ;;  %v14117_v19 = vsel %vm14085_vm2, %v13826_v60, 0.0  ;;  %vm14037_vm3 = vcmp.gt.s32.totalorder %v13925_v23, %v13989_v29  ;;  %v13958_v18 = vshra.s32 %v13894_v21, 5  ;;  %v13895_v15 = vadd.s32 %v26427_v27, %v13862_v58  ;;  %v16709_v58 = vld [vmem:[%s26434_s30 + $0x140] sm:$0xff]  ;;  %v16711_v55 = vld [vmem:[%s26434_s30 + $0x150] sm:$0xff] }
 0x99d   : >> { %16733 = vst [vmem:[%s26434_s30 + $0x100] sm:$0xff] %v14117_v19  ;;  %v14038_v9 = vsel %vm14037_vm3, %v13925_v23, %v13989_v29  ;;  %v13761_v57 = vmul.f32 %v16705_v37, %v26449_v4  ;;  %v13863_v47 = vadd.s32 152, %v26420_v34  ;;  %v13762_v7 = vmul.f32 %v16706_v63, %v26449_v4 }
 0x99e   : >> { %vm14086_vm4 = vcmp.lt.s32.totalorder %v14038_v9, %v26438_v43  ;;  %v13990_v28 = vand.u32 31, %v13958_v18  ;;  %v13864_v31 = vadd.s32 160, %v26420_v34  ;;  %v13927_v22 = vand.u32 31, %v13895_v15 }
 0x99f   : >> { %v14118_v41 = vsel %vm14086_vm4, %v13827_v46, 0.0  ;;  %v13959_v20 = vshra.s32 %v13895_v15, 5  ;;  %v13797_v32 = vadd.f32 %v26452_v0, %v13761_v57  ;;  %v13829_v39 = vmax.f32 %v13796_v11, %v26425_v16 }
 0x9a0   : >> { %16734 = vst [vmem:[%s26434_s30 + $0x108] sm:$0xff] %v14118_v41  ;;  %vm14039_vm5 = vcmp.gt.s32.totalorder %v13926_v44, %v13990_v28  ;;  %v13896_v8 = vadd.s32 %v26427_v27, %v13863_v47  ;;  %v13897_v42 = vadd.s32 %v26427_v27, %v13864_v31  ;;  %v13798_v40 = vadd.f32 %v26452_v0, %v13762_v7 }
 0x9a1   : >> { %v14040_v61 = vsel %vm14039_vm5, %v13926_v44, %v13990_v28  ;;  %v13991_v30 = vand.u32 31, %v13959_v20  ;;  %v13763_v56 = vmul.f32 %v16707_v51, %v26449_v4  ;;  %v13830_v13 = vmax.f32 %v13797_v32, %v26425_v16 }
 0x9a2   : >> { %vm14087_vm6 = vcmp.lt.s32.totalorder %v14040_v61, %v26438_v43  ;;  %v13928_v26 = vand.u32 31, %v13896_v8  ;;  %v13960_v38 = vshra.s32 %v13896_v8, 5  ;;  %v13929_v45 = vand.u32 31, %v13897_v42  ;;  %v16713_v61 = vld [vmem:[%s26434_s30 + $0x160] sm:$0xff] }
 0x9a3   : >> { %v14119_v48 = vsel %vm14087_vm6, %v13828_v6, 0.0  ;;  %vm14041_vm7 = vcmp.gt.s32.totalorder %v13927_v22, %v13991_v30  ;;  %v13961_v5 = vshra.s32 %v13897_v42, 5  ;;  %v13799_v49 = vadd.f32 %v26452_v0, %v13763_v56  ;;  %v16712_v42 = vld [vmem:[%s26434_s30 + $0x158] sm:$0xff] }
 0x9a4   : >> { %16735 = vst [vmem:[%s26434_s30 + $0x110] sm:$0xff] %v14119_v48  ;;  %v14042_v25 = vsel %vm14041_vm7, %v13927_v22, %v13991_v30  ;;  %v13992_v53 = vand.u32 31, %v13960_v38  ;;  %v13865_v35 = vadd.s32 168, %v26420_v34  ;;  %v13764_v60 = vmul.f32 %v16708_v50, %v26449_v4 }
 0x9a5   : >> { %vm14088_vm8 = vcmp.lt.s32.totalorder %v14042_v25, %v26438_v43  ;;  %v13993_v12 = vand.u32 31, %v13961_v5  ;;  %v13866_v33 = vadd.s32 176, %v26420_v34  ;;  %v13831_v14 = vmax.f32 %v13798_v40, %v26425_v16 }
 0x9a6   : >> { %v14120_v24 = vsel %vm14088_vm8, %v13829_v39, 0.0  ;;  %vm14043_vm12 = vcmp.gt.s32.totalorder %v13928_v26, %v13992_v53  ;;  %v13898_v1 = vadd.s32 %v26427_v27, %v13865_v35  ;;  %v13800_v23 = vadd.f32 %v26452_v0, %v13764_v60 }
 0x9a7   : >> { %16736 = vst [vmem:[%s26434_s30 + $0x118] sm:$0xff] %v14120_v24  ;;  %v14044_v52 = vsel %vm14043_vm12, %v13928_v26, %v13992_v53  ;;  %vm14045_vm13 = vcmp.gt.s32.totalorder %v13929_v45, %v13993_v12  ;;  %v13899_v17 = vadd.s32 %v26427_v27, %v13866_v33  ;;  %v13832_v29 = vmax.f32 %v13799_v49, %v26425_v16 }
 0x9a8   : >> { %vm14089_vm9 = vcmp.lt.s32.totalorder %v14044_v52, %v26438_v43  ;;  %v14046_v2 = vsel %vm14045_vm13, %v13929_v45, %v13993_v12  ;;  %v13930_v59 = vand.u32 31, %v13898_v1  ;;  %v13962_v21 = vshra.s32 %v13898_v1, 5  ;;  %v16714_v52 = vld [vmem:[%s26434_s30 + $0x168] sm:$0xff] }
 0x9a9   : >> { %v14121_v46 = vsel %vm14089_vm9, %v13830_v13, 0.0  ;;  %vm14090_vm14 = vcmp.lt.s32.totalorder %v14046_v2, %v26438_v43  ;;  %v13931_v37 = vand.u32 31, %v13899_v17  ;;  %v13963_v63 = vshra.s32 %v13899_v17, 5  ;;  %v16715_v2 = vld [vmem:[%s26434_s30 + $0x170] sm:$0xff] }
 0x9aa   : >> { %16737 = vst [vmem:[%s26434_s30 + $0x120] sm:$0xff] %v14121_v46  ;;  %v14122_v6 = vsel %vm14090_vm14, %v13831_v14, 0.0  ;;  %v13994_v11 = vand.u32 31, %v13962_v21  ;;  %v13765_v19 = vmul.f32 %v16709_v58, %v26449_v4  ;;  %v13833_v44 = vmax.f32 %v13800_v23, %v26425_v16 }
 0x9ab   : >> { %16738 = vst [vmem:[%s26434_s30 + $0x128] sm:$0xff] %v14122_v6  ;;  %v13867_v18 = vadd.s32 184, %v26420_v34  ;;  %v13766_v9 = vmul.f32 %v16710_v62, %v26449_v4  ;;  %v13868_v15 = vadd.s32 192, %v26420_v34  ;;  %v13995_v57 = vand.u32 31, %v13963_v63 }
 0x9ac   : >> { %vm14047_vm10 = vcmp.gt.s32.totalorder %v13930_v59, %v13994_v11  ;;  %v13801_v47 = vadd.f32 %v26452_v0, %v13765_v19  ;;  %v13767_v28 = vmul.f32 %v16711_v55, %v26449_v4  ;;  %v13869_v41 = vadd.s32 200, %v26420_v34 }
 0x9ad   : >> { %v14048_v7 = vsel %vm14047_vm10, %v13930_v59, %v13994_v11  ;;  %v13900_v31 = vadd.s32 %v26427_v27, %v13867_v18  ;;  %v13901_v51 = vadd.s32 %v26427_v27, %v13868_v15  ;;  %vm14049_vm15 = vcmp.gt.s32.totalorder %v13931_v37, %v13995_v57  ;;  %v16716_v15 = vld [vmem:[%s26434_s30 + $0x178] sm:$0xff] }
 0x9ae   : >> { %vm14091_vm11 = vcmp.lt.s32.totalorder %v14048_v7, %v26438_v43  ;;  %v13802_v22 = vadd.f32 %v26452_v0, %v13766_v9  ;;  %v14050_v32 = vsel %vm14049_vm15, %v13931_v37, %v13995_v57  ;;  %v13834_v30 = vmax.f32 %v13801_v47, %v26425_v16 }
 0x9af   : >> { %v14123_v20 = vsel %vm14091_vm11, %v13832_v29, 0.0  ;;  %v13932_v39 = vand.u32 31, %v13900_v31  ;;  %v13964_v8 = vshra.s32 %v13900_v31, 5  ;;  %vm14092_vm1 = vcmp.lt.s32.totalorder %v14050_v32, %v26438_v43 }
 0x9b0   : >> { %16739 = vst [vmem:[%s26434_s30 + $0x130] sm:$0xff] %v14123_v20  ;;  %v13933_v40 = vand.u32 31, %v13901_v51  ;;  %v13965_v56 = vshra.s32 %v13901_v51, 5  ;;  %v14124_v13 = vsel %vm14092_vm1, %v13833_v44, 0.0  ;;  %v13803_v38 = vadd.f32 %v26452_v0, %v13767_v28 }
 0x9b1   : >> { %v13996_v26 = vand.u32 31, %v13964_v8  ;;  %v13902_v50 = vadd.s32 %v26427_v27, %v13869_v41  ;;  %16740 = vst [vmem:[%s26434_s30 + $0x138] sm:$0xff] %v14124_v13  ;;  %v13768_v45 = vmul.f32 %v16712_v42, %v26449_v4  ;;  %v13870_v5 = vadd.s32 208, %v26420_v34 }
 0x9b2   : >> { %v13997_v48 = vand.u32 31, %v13965_v56  ;;  %v13769_v25 = vmul.f32 %v16713_v61, %v26449_v4  ;;  %v13835_v53 = vmax.f32 %v13802_v22, %v26425_v16  ;;  %v13871_v33 = vadd.s32 216, %v26420_v34 }
 0x9b3   : >> { %vm14051_vm2 = vcmp.gt.s32.totalorder %v13932_v39, %v13996_v26  ;;  %v13934_v49 = vand.u32 31, %v13902_v50  ;;  %v13966_v35 = vshra.s32 %v13902_v50, 5  ;;  %v13903_v60 = vadd.s32 %v26427_v27, %v13870_v5 }
 0x9b4   : >> { %v14052_v12 = vsel %vm14051_vm2, %v13932_v39, %v13996_v26  ;;  %vm14053_vm3 = vcmp.gt.s32.totalorder %v13933_v40, %v13997_v48  ;;  %v13836_v14 = vmax.f32 %v13803_v38, %v26425_v16  ;;  %v13804_v17 = vadd.f32 %v26452_v0, %v13768_v45  ;;  %v16717_v39 = vld [vmem:[%s26434_s30 + $0x180] sm:$0xff] }
 0x9b5   : >> { %vm14093_vm4 = vcmp.lt.s32.totalorder %v14052_v12, %v26438_v43  ;;  %v14054_v24 = vsel %vm14053_vm3, %v13933_v40, %v13997_v48  ;;  %v13998_v1 = vand.u32 31, %v13966_v35  ;;  %v13805_v58 = vadd.f32 %v26452_v0, %v13769_v25 }
 0x9b6   : >> { %v14125_v23 = vsel %vm14093_vm4, %v13834_v30, 0.0  ;;  %vm14094_vm5 = vcmp.lt.s32.totalorder %v14054_v24, %v26438_v43  ;;  %v13935_v21 = vand.u32 31, %v13903_v60  ;;  %v13967_v62 = vshra.s32 %v13903_v60, 5 }
 0x9b7   : >> { %16741 = vst [vmem:[%s26434_s30 + $0x140] sm:$0xff] %v14125_v23  ;;  %v14126_v59 = vsel %vm14094_vm5, %v13835_v53, 0.0  ;;  %vm14055_vm6 = vcmp.gt.s32.totalorder %v13934_v49, %v13998_v1  ;;  %v13904_v29 = vadd.s32 %v26427_v27, %v13871_v33  ;;  %v13770_v37 = vmul.f32 %v16714_v52, %v26449_v4 }
 0x9b8   : >> { %16742 = vst [vmem:[%s26434_s30 + $0x148] sm:$0xff] %v14126_v59  ;;  %v14056_v46 = vsel %vm14055_vm6, %v13934_v49, %v13998_v1  ;;  %v13872_v55 = vadd.s32 224, %v26420_v34  ;;  %v13999_v6 = vand.u32 31, %v13967_v62  ;;  %v13771_v11 = vmul.f32 %v16715_v2, %v26449_v4 }
 0x9b9   : >> { %vm14095_vm7 = vcmp.lt.s32.totalorder %v14056_v46, %v26438_v43  ;;  %v13873_v63 = vadd.s32 232, %v26420_v34  ;;  %v13837_v44 = vmax.f32 %v13804_v17, %v26425_v16  ;;  %v13936_v18 = vand.u32 31, %v13904_v29 }
 0x9ba   : >> { %v14127_v19 = vsel %vm14095_vm7, %v13836_v14, 0.0  ;;  %v13968_v9 = vshra.s32 %v13904_v29, 5  ;;  %vm14057_vm8 = vcmp.gt.s32.totalorder %v13935_v21, %v13999_v6  ;;  %v13806_v57 = vadd.f32 %v26452_v0, %v13770_v37 }
 0x9bb   : >> { %16743 = vst [vmem:[%s26434_s30 + $0x150] sm:$0xff] %v14127_v19  ;;  %v13905_v47 = vadd.s32 %v26427_v27, %v13872_v55  ;;  %v13906_v28 = vadd.s32 %v26427_v27, %v13873_v63  ;;  %v14058_v7 = vsel %vm14057_vm8, %v13935_v21, %v13999_v6  ;;  %v13838_v31 = vmax.f32 %v13805_v58, %v26425_v16 }
 0x9bc   : >> { %v14000_v51 = vand.u32 31, %v13968_v9  ;;  %v13807_v41 = vadd.f32 %v26452_v0, %v13771_v11  ;;  %vm14096_vm12 = vcmp.lt.s32.totalorder %v14058_v7, %v26438_v43  ;;  %v13772_v32 = vmul.f32 %v16716_v15, %v26449_v4 }
 0x9bd   : >> { %v13937_v22 = vand.u32 31, %v13905_v47  ;;  %v13969_v20 = vshra.s32 %v13905_v47, 5  ;;  %v14128_v8 = vsel %vm14096_vm12, %v13837_v44, 0.0  ;;  %v13938_v42 = vand.u32 31, %v13906_v28 }
 0x9be   : >> { %vm14059_vm13 = vcmp.gt.s32.totalorder %v13936_v18, %v14000_v51  ;;  %v13970_v61 = vshra.s32 %v13906_v28, 5  ;;  %16744 = vst [vmem:[%s26434_s30 + $0x158] sm:$0xff] %v14128_v8  ;;  %v13839_v40 = vmax.f32 %v13806_v57, %v26425_v16  ;;  %v13874_v13 = vadd.s32 240, %v26420_v34 }
 0x9bf   : >> { %v14060_v30 = vsel %vm14059_vm13, %v13936_v18, %v14000_v51  ;;  %v14001_v56 = vand.u32 31, %v13969_v20  ;;  %v13773_v38 = vmul.f32 %v16717_v39, %v26449_v4  ;;  %v13875_v50 = vadd.s32 248, %v26420_v34 }
 0x9c0   : >> { %vm14097_vm9 = vcmp.lt.s32.totalorder %v14060_v30, %v26438_v43  ;;  %v14002_v26 = vand.u32 31, %v13970_v61  ;;  %v13840_v45 = vmax.f32 %v13807_v41, %v26425_v16  ;;  %v13907_v5 = vadd.s32 %v26427_v27, %v13874_v13 }
 0x9c1   : >> { %v14129_v48 = vsel %vm14097_vm9, %v13838_v31, 0.0  ;;  %vm14061_vm14 = vcmp.gt.s32.totalorder %v13937_v22, %v14001_v56  ;;  %v13808_v53 = vadd.f32 %v26452_v0, %v13772_v32  ;;  %v13908_v49 = vadd.s32 %v26427_v27, %v13875_v50 }
 0x9c2   : >> { %16745 = vst [vmem:[%s26434_s30 + $0x160] sm:$0xff] %v14129_v48  ;;  %v14062_v25 = vsel %vm14061_vm14, %v13937_v22, %v14001_v56  ;;  %vm14063_vm10 = vcmp.gt.s32.totalorder %v13938_v42, %v14002_v26  ;;  %v13939_v35 = vand.u32 31, %v13907_v5  ;;  %v13971_v34 = vshra.s32 %v13907_v5, 5 }
 0x9c3   : >> { %vm14098_vm11 = vcmp.lt.s32.totalorder %v14062_v25, %v26438_v43  ;;  %v14064_v4 = vsel %vm14063_vm10, %v13938_v42, %v14002_v26  ;;  %v13809_v60 = vadd.f32 %v26452_v0, %v13773_v38  ;;  %v13940_v14 = vand.u32 31, %v13908_v49 }
 0x9c4   : >> { %v14130_v12 = vsel %vm14098_vm11, %v13839_v40, 0.0  ;;  %vm14099_vm15 = vcmp.lt.s32.totalorder %v14064_v4, %v26438_v43  ;;  %v14003_v24 = vand.u32 31, %v13971_v34  ;;  %v13972_v1 = vshra.s32 %v13908_v49, 5 }
 0x9c5   : >> { %16746 = vst [vmem:[%s26434_s30 + $0x168] sm:$0xff] %v14130_v12  ;;  %v14131_v33 = vsel %vm14099_vm15, %v13840_v45, 0.0  ;;  %v13841_v27 = vmax.f32 %v13808_v53, %v26425_v16  ;;  %v13842_v17 = vmax.f32 %v13809_v60, %v26425_v16 }
 0x9c6   : >> { %16747 = vst [vmem:[%s26434_s30 + $0x170] sm:$0xff] %v14131_v33  ;;  %vm14065_vm1 = vcmp.gt.s32.totalorder %v13939_v35, %v14003_v24  ;;  %v14004_v52 = vand.u32 31, %v13972_v1  ;;  %13701 = sbr.rel (!%p13699_p0) target bundleno = 2403 (0x963), region = 240 }
 0x9c7   : >> { %v14066_v23 = vsel %vm14065_vm1, %v13939_v35, %v14003_v24 }
 0x9c8   : >> { %vm14100_vm2 = vcmp.lt.s32.totalorder %v14066_v23, %v26438_v43  ;;  %vm14067_vm3 = vcmp.gt.s32.totalorder %v13940_v14, %v14004_v52 }
 0x9c9   : >> { %v14132_v58 = vsel %vm14100_vm2, %v13841_v27, 0.0  ;;  %v14068_v0 = vsel %vm14067_vm3, %v13940_v14, %v14004_v52 }
 0x9ca   : >> { %16748 = vst [vmem:[%s26434_s30 + $0x178] sm:$0xff] %v14132_v58  ;;  %vm14101_vm4 = vcmp.lt.s32.totalorder %v14068_v0, %v26438_v43 }
 0x9cb   : >> { %v14133_v2 = vsel %vm14101_vm4, %v13842_v17, 0.0 }
 0x9cc   : >> { %16749 = vst [vmem:[%s26434_s30 + $0x180] sm:$0xff] %v14133_v2 }
 0x9cd   : > { %14169 = sbr.rel (%p16750_p2) target bundleno = 2563 (0xa03), region = 88  ;;  %s26712_s11 = smov (!%p16750_p2), 0  }
 0x9d4 LB: >> { %s16751_s6 = sshll.u32 %s21410_s11, 8  ;;  %s14175_s11 = sadd.s32 1, %s21410_s11   ;;  %s21410_s11 = sphi %s26712_s11, %s14175_s11  }
 0x9d5   : >> { %s14475_s29 = sadd.s32 %s16751_s6, %s14468_s5  ;;  %s26736_s13 = scalar_lea.vmem %s26811_s4, %s16751_s6 }
 0x9d6   : >> { %s26720_s16 = scalar_lea.vmem [#allocation2], %s14475_s29  ;;  %p14172_p6 = scmp.ge.s32.totalorder %s14175_s11, 8  }
 0x9d7   : >> { %v16753_v54 = vld [vmem:[%s26720_s16 + $0x88] sm:$0xff]  ;;  %v16754_v3 = vld [vmem:[%s26720_s16 + $0x90] sm:$0xff]  ;;  %v16755_v36 = vld [vmem:[%s26720_s16 + $0x98] sm:$0xff] }
 0x9d8   : >> { %21150 = vtanh.f32 %v16753_v54  ;;  %v16756_v10 = vld [vmem:[%s26720_s16 + $0xa0] sm:$0xff]  ;;  %v16757_v16 = vld [vmem:[%s26720_s16 + $0xa8] sm:$0xff]  ;;  %v16758_v43 = vld [vmem:[%s26720_s16 + $0xb0] sm:$0xff] }
 0x9d9   : >> { %21152 = vtanh.f32 %v16754_v3  ;;  %v16759_v59 = vld [vmem:[%s26720_s16 + $0xb8] sm:$0xff]  ;;  %v16760_v21 = vld [vmem:[%s26720_s16 + $0xc0] sm:$0xff]  ;;  %v16761_v62 = vld [vmem:[%s26720_s16 + $0xc8] sm:$0xff] }
 0x9da   : >> { %21154 = vtanh.f32 %v16755_v36  ;;  %v16762_v46 = vld [vmem:[%s26720_s16 + $0xd0] sm:$0xff]  ;;  %v16763_v29 = vld [vmem:[%s26720_s16 + $0xd8] sm:$0xff]  ;;  %v16764_v37 = vld [vmem:[%s26720_s16 + $0xe0] sm:$0xff] }
 0x9db   : >> { %21156 = vtanh.f32 %v16756_v10  ;;  %v16765_v55 = vld [vmem:[%s26720_s16 + $0xe8] sm:$0xff]  ;;  %v16766_v11 = vld [vmem:[%s26720_s16 + $0xf0] sm:$0xff]  ;;  %v16767_v19 = vld [vmem:[%s26720_s16 + $0xf8] sm:$0xff] }
 0x9dc   : >> { %21158 = vtanh.f32 %v16757_v16  ;;  %v16768_v18 = vld [vmem:[%s26720_s16 + $0x100] sm:$0xff]  ;;  %v16769_v15 = vld [vmem:[%s26720_s16 + $0x108] sm:$0xff]  ;;  %v16770_v47 = vld [vmem:[%s26720_s16 + $0x110] sm:$0xff] }
 0x9dd   : >> { %21160 = vtanh.f32 %v16758_v43  ;;  %v16771_v7 = vld [vmem:[%s26720_s16 + $0x118] sm:$0xff]  ;;  %v16772_v51 = vld [vmem:[%s26720_s16 + $0x120] sm:$0xff]  ;;  %v16773_v22 = vld [vmem:[%s26720_s16 + $0x128] sm:$0xff] }
 0x9de   : >> { %21162 = vtanh.f32 %v16759_v59  ;;  %v16774_v32 = vld [vmem:[%s26720_s16 + $0x130] sm:$0xff]  ;;  %v16775_v8 = vld [vmem:[%s26720_s16 + $0x138] sm:$0xff]  ;;  %v16776_v61 = vld [vmem:[%s26720_s16 + $0x140] sm:$0xff] }
 0x9df   : >> { %21164 = vtanh.f32 %v16760_v21  ;;  %v16777_v40 = vld [vmem:[%s26720_s16 + $0x148] sm:$0xff]  ;;  %v16778_v13 = vld [vmem:[%s26720_s16 + $0x150] sm:$0xff]  ;;  %v16779_v38 = vld [vmem:[%s26720_s16 + $0x158] sm:$0xff] }
 0x9e0   : >> { %21166 = vtanh.f32 %v16761_v62  ;;  %v16780_v48 = vld [vmem:[%s26720_s16 + $0x160] sm:$0xff]  ;;  %v16781_v5 = vld [vmem:[%s26720_s16 + $0x168] sm:$0xff]  ;;  %v16782_v53 = vld [vmem:[%s26720_s16 + $0x170] sm:$0xff] }
 0x9e1   : >> { %21168 = vtanh.f32 %v16762_v46  ;;  %v16783_v4 = vld [vmem:[%s26720_s16 + $0x178] sm:$0xff]  ;;  %v16784_v34 = vld [vmem:[%s26720_s16 + $0x180] sm:$0xff] }
 0x9e2   : >> { %v21151_v6 = vpop.eup %21150  ;;  %21170 = vtanh.f32 %v16763_v29 }
 0x9e3   : >> { %v21153_v63 = vpop.eup %21152  ;;  %14244 = vst [vmem:[%s26736_s13] sm:$0xff] %v21151_v6  ;;  %21172 = vtanh.f32 %v16764_v37 }
 0x9e4   : >> { %v21155_v44 = vpop.eup %21154  ;;  %14245 = vst [vmem:[%s26736_s13 + $0x8] sm:$0xff] %v21153_v63  ;;  %21174 = vtanh.f32 %v16765_v55 }
 0x9e5   : >> { %v21157_v9 = vpop.eup %21156  ;;  %14246 = vst [vmem:[%s26736_s13 + $0x10] sm:$0xff] %v21155_v44  ;;  %21176 = vtanh.f32 %v16766_v11 }
 0x9e6   : >> { %v21159_v57 = vpop.eup %21158  ;;  %14247 = vst [vmem:[%s26736_s13 + $0x18] sm:$0xff] %v21157_v9  ;;  %21178 = vtanh.f32 %v16767_v19 }
 0x9e7   : >> { %v21161_v28 = vpop.eup %21160  ;;  %14248 = vst [vmem:[%s26736_s13 + $0x20] sm:$0xff] %v21159_v57  ;;  %21180 = vtanh.f32 %v16768_v18 }
 0x9e8   : >> { %v21163_v31 = vpop.eup %21162  ;;  %14249 = vst [vmem:[%s26736_s13 + $0x28] sm:$0xff] %v21161_v28  ;;  %21182 = vtanh.f32 %v16769_v15 }
 0x9e9   : >> { %v21165_v41 = vpop.eup %21164  ;;  %14250 = vst [vmem:[%s26736_s13 + $0x30] sm:$0xff] %v21163_v31  ;;  %21184 = vtanh.f32 %v16770_v47 }
 0x9ea   : >> { %v21167_v20 = vpop.eup %21166  ;;  %14251 = vst [vmem:[%s26736_s13 + $0x38] sm:$0xff] %v21165_v41  ;;  %21186 = vtanh.f32 %v16771_v7 }
 0x9eb   : >> { %v21169_v39 = vpop.eup %21168  ;;  %14252 = vst [vmem:[%s26736_s13 + $0x40] sm:$0xff] %v21167_v20  ;;  %21188 = vtanh.f32 %v16772_v51 }
 0x9ec   : >> { %v21171_v42 = vpop.eup %21170  ;;  %14253 = vst [vmem:[%s26736_s13 + $0x48] sm:$0xff] %v21169_v39  ;;  %21190 = vtanh.f32 %v16773_v22 }
 0x9ed   : >> { %v21173_v30 = vpop.eup %21172  ;;  %14254 = vst [vmem:[%s26736_s13 + $0x50] sm:$0xff] %v21171_v42  ;;  %21192 = vtanh.f32 %v16774_v32 }
 0x9ee   : >> { %v21175_v56 = vpop.eup %21174  ;;  %14255 = vst [vmem:[%s26736_s13 + $0x58] sm:$0xff] %v21173_v30  ;;  %21194 = vtanh.f32 %v16775_v8 }
 0x9ef   : >> { %v21177_v26 = vpop.eup %21176  ;;  %14256 = vst [vmem:[%s26736_s13 + $0x60] sm:$0xff] %v21175_v56  ;;  %21196 = vtanh.f32 %v16776_v61 }
 0x9f0   : >> { %v21179_v50 = vpop.eup %21178  ;;  %14257 = vst [vmem:[%s26736_s13 + $0x68] sm:$0xff] %v21177_v26  ;;  %21198 = vtanh.f32 %v16777_v40 }
 0x9f1   : >> { %v21181_v45 = vpop.eup %21180  ;;  %14258 = vst [vmem:[%s26736_s13 + $0x70] sm:$0xff] %v21179_v50  ;;  %21200 = vtanh.f32 %v16778_v13 }
 0x9f2   : >> { %v21183_v25 = vpop.eup %21182  ;;  %14259 = vst [vmem:[%s26736_s13 + $0x78] sm:$0xff] %v21181_v45  ;;  %21202 = vtanh.f32 %v16779_v38 }
 0x9f3   : >> { %v21185_v49 = vpop.eup %21184  ;;  %14260 = vst [vmem:[%s26736_s13 + $0x80] sm:$0xff] %v21183_v25  ;;  %21204 = vtanh.f32 %v16780_v48 }
 0x9f4   : >> { %v21187_v35 = vpop.eup %21186  ;;  %14261 = vst [vmem:[%s26736_s13 + $0x88] sm:$0xff] %v21185_v49  ;;  %21206 = vtanh.f32 %v16781_v5 }
 0x9f5   : >> { %v21189_v12 = vpop.eup %21188  ;;  %14262 = vst [vmem:[%s26736_s13 + $0x90] sm:$0xff] %v21187_v35  ;;  %21208 = vtanh.f32 %v16782_v53 }
 0x9f6   : >> { %v21191_v60 = vpop.eup %21190  ;;  %14263 = vst [vmem:[%s26736_s13 + $0x98] sm:$0xff] %v21189_v12  ;;  %21210 = vtanh.f32 %v16783_v4 }
 0x9f7   : >> { %v21193_v33 = vpop.eup %21192  ;;  %14264 = vst [vmem:[%s26736_s13 + $0xa0] sm:$0xff] %v21191_v60  ;;  %21212 = vtanh.f32 %v16784_v34 }
 0x9f8   : >> { %v21195_v24 = vpop.eup %21194  ;;  %14265 = vst [vmem:[%s26736_s13 + $0xa8] sm:$0xff] %v21193_v33 }
 0x9f9   : >> { %v21197_v14 = vpop.eup %21196  ;;  %14266 = vst [vmem:[%s26736_s13 + $0xb0] sm:$0xff] %v21195_v24 }
 0x9fa   : >> { %v21199_v1 = vpop.eup %21198  ;;  %14267 = vst [vmem:[%s26736_s13 + $0xb8] sm:$0xff] %v21197_v14 }
 0x9fb   : >> { %v21201_v27 = vpop.eup %21200  ;;  %14268 = vst [vmem:[%s26736_s13 + $0xc0] sm:$0xff] %v21199_v1 }
 0x9fc   : >> { %v21203_v52 = vpop.eup %21202  ;;  %14269 = vst [vmem:[%s26736_s13 + $0xc8] sm:$0xff] %v21201_v27  ;;  %14174 = sbr.rel (!%p14172_p6) target bundleno = 2516 (0x9d4), region = 251 }
 0x9fd   : >> { %v21205_v23 = vpop.eup %21204  ;;  %14270 = vst [vmem:[%s26736_s13 + $0xd0] sm:$0xff] %v21203_v52 }
 0x9fe   : >> { %v21207_v17 = vpop.eup %21206  ;;  %14271 = vst [vmem:[%s26736_s13 + $0xd8] sm:$0xff] %v21205_v23 }
 0x9ff   : >> { %v21209_v58 = vpop.eup %21208  ;;  %14272 = vst [vmem:[%s26736_s13 + $0xe0] sm:$0xff] %v21207_v17 }
 0xa00   : >> { %v21211_v0 = vpop.eup %21210  ;;  %14273 = vst [vmem:[%s26736_s13 + $0xe8] sm:$0xff] %v21209_v58 }
 0xa01   : >> { %v21213_v2 = vpop.eup %21212  ;;  %14274 = vst [vmem:[%s26736_s13 + $0xf0] sm:$0xff] %v21211_v0 }
 0xa02   : >> { %14275 = vst [vmem:[%s26736_s13 + $0xf8] sm:$0xff] %v21213_v2 }
 0xa03 PF: > { %p19_p9 = scmp.ge.s32.totalorder %s21502_s8, 24   ;;  %s27020_s25 = smov %s21358_s26 }
 0xa04   : > { %s27021_s26 = smov %s21362_s27  ;;  %s27022_s27 = smov %s21528_s23 }
 0xa05   : > { %s27023_s28 = smov %s21502_s8  ;;  %21 = sbr.rel (!%p19_p9) target bundleno = 16 (0x10), region = 262 }
 0xa0c   :  { %14287 = vsyncpa [#allocation7], 1 }
 0xa0d   :  { %14289 = vsyncpa [#allocation7 + $0x1], 1 }
 0xa0e   :  { %14290 = vsyncpa [#allocation9], 1 }

</bundles_post_ra>
